<compile_context>
chip_gen: v7x
topology: tpu7x:2x2x1
jax: 0.10.0
libtpu: 0.0.40
codegen_flags: <defaults>
</compile_context>

<pallas_src>
import functools

import jax
import jax.numpy as jnp
from jax.experimental import pallas as pl
from jax.experimental.pallas import tpu as pltpu

_FILL = 1.0e30     # "removed / padded" sentinel for distance values
_BIGIDX = 1.0e9    # "no candidate" sentinel for (float-encoded) indices
_KPAD = 128        # lane-padded width of the running top-k scratch


def _round_up(n, m):
    return ((n + m - 1) // m) * m


def _pick_tile(npad, cap):
    """Largest tile <= cap that divides npad (npad is always a multiple of 128)."""
    for t in (cap, 4096, 2048, 1024, 512, 256, 128):
        if t <= cap and t <= npad and npad % t == 0:
            return t
    return 128


# ----------------------------------------------------------------------------
# Kernel 1: fused pairwise distances + streaming exact top-k (knnSearch).
#   grid = (B, N/tm, N/tn); column-tile axis is last and "arbitrary" so the
#   running (tm, KPAD) best-values / best-indices scratch is carried across it.
# ----------------------------------------------------------------------------
def _knn_topk_kernel(row_ref, col_ref, vals_ref, idx_ref,
                     d_ref, rv_ref, ri_ref, *, k, tn, n_valid):
    j = pl.program_id(2)

    @pl.when(j == 0)
    def _init():
        rv_ref[...] = jnp.full(rv_ref.shape, _FILL, jnp.float32)
        ri_ref[...] = jnp.full(ri_ref.shape, _BIGIDX, jnp.float32)

    # --- distance tile on the VPU: |x_j|^2 - 2<x_i, x_j>  (per-row |x_i|^2 dropped;
    #     per-row top-k ordering is invariant to it).  No MXU, no transpose. ---
    xr = row_ref[0]                                    # (tm, 3) row-point coords
    xc = col_ref[0]                                    # (3, tn) col-point coords
    c0, c1, c2 = xc[0:1, :], xc[1:2, :], xc[2:3, :]    # (1, tn) each
    sq_col = c0 * c0 + c1 * c1 + c2 * c2               # (1, tn)  |x_j|^2
    m2 = xr * (-2.0)                                   # (tm, 3)  tiny
    d = sq_col + m2[:, 0:1] * c0 + m2[:, 1:2] * c1 + m2[:, 2:3] * c2   # (tm, tn)

    col_ids = jax.lax.broadcasted_iota(jnp.int32, d.shape, 1) + j * tn
    tile_idx = col_ids.astype(jnp.float32)             # global col index, exact in f32
    d = jnp.where(col_ids < n_valid, d, _FILL)         # mask padded columns
    d_ref[...] = d                                     # keep the tile in VMEM scratch

    # --- streaming exact top-k: k rounds of min / arg-min extraction over
    #     (running candidates  U  this tile's columns), lowest-index tie-break. ---
    rv = rv_ref[...]                                   # (tm, KPAD) running values
    ri = ri_ref[...]                                   # (tm, KPAD) running indices (f32)
    lane = jax.lax.broadcasted_iota(jnp.int32, rv.shape, 1)
    new_v = jnp.full(rv.shape, _FILL, jnp.float32)
    new_i = jnp.full(ri.shape, _BIGIDX, jnp.float32)

    for r in range(k):                                 # k is small: static unroll
        dcur = d_ref[...]
        m = jnp.minimum(jnp.min(dcur, axis=1, keepdims=True),
                        jnp.min(rv, axis=1, keepdims=True))             # (tm, 1)
        a_t = jnp.min(jnp.where(dcur == m, tile_idx, _BIGIDX), axis=1, keepdims=True)
        a_r = jnp.min(jnp.where(rv == m, ri, _BIGIDX), axis=1, keepdims=True)
        am = jnp.minimum(a_t, a_r)                     # running indices are always older
        d_ref[...] = jnp.where(tile_idx == am, _FILL, dcur)   # consume selected element
        rv = jnp.where(ri == am, _FILL, rv)
        new_v = jnp.where(lane == r, m, new_v)
        new_i = jnp.where(lane == r, am, new_i)

    rv_ref[...] = new_v
    ri_ref[...] = new_i
    vals_ref[0] = new_v[:, :k]
    idx_ref[0] = new_i[:, :k].astype(jnp.int32)


def knn_search(xyz, k, *, tm=256, tn=512):
    """Exact kNN (self included, ascending). xyz: (B, N, 3) f32 -> ((B,N,k) d2, (B,N,k) idx)."""
    B, N, _ = xyz.shape
    if not (1 <= k <= N and k <= _KPAD):
        raise ValueError(f"need 1 <= k <= min(N, {_KPAD}); got k={k}, N={N}")
    npad = _round_up(N, 128)                            # no full-N BlockSpec fallback
    xyz_p = jnp.pad(xyz, ((0, 0), (0, npad - N), (0, 0))) if npad != N else xyz
    xyz_t = jnp.transpose(xyz_p, (0, 2, 1))             # (B, 3, npad)
    tm = _pick_tile(npad, tm)
    tn = _pick_tile(npad, tn)

    kernel = functools.partial(_knn_topk_kernel, k=k, tn=tn, n_valid=N)
    vals, idx = pl.pallas_call(
        kernel,
        out_shape=(jax.ShapeDtypeStruct((B, npad, k), jnp.float32),
                   jax.ShapeDtypeStruct((B, npad, k), jnp.int32)),
        grid=(B, npad // tm, npad // tn),
        in_specs=[
            pl.BlockSpec((1, tm, 3), lambda b, i, j: (b, i, 0)),   # row coords
            pl.BlockSpec((1, 3, tn), lambda b, i, j: (b, 0, j)),   # col coords
        ],
        out_specs=[
            pl.BlockSpec((1, tm, k), lambda b, i, j: (b, i, 0)),
            pl.BlockSpec((1, tm, k), lambda b, i, j: (b, i, 0)),
        ],
        scratch_shapes=[
            pltpu.VMEM((tm, tn), jnp.float32),      # distance tile (consumed in place)
            pltpu.VMEM((tm, _KPAD), jnp.float32),   # running best values
            pltpu.VMEM((tm, _KPAD), jnp.float32),   # running best indices (f32-encoded)
        ],
        compiler_params=pltpu.CompilerParams(
            dimension_semantics=("parallel", "parallel", "arbitrary"),
            vmem_limit_bytes=32 * 1024 * 1024,
        ),
    )(xyz_p, xyz_t)

    # add back the dropped per-row |x_i|^2 so the returned values are true squared dists
    d2 = vals[:, :N, :] + jnp.sum(xyz * xyz, axis=-1)[:, :, None]
    return d2, idx[:, :N, :]


# ----------------------------------------------------------------------------
# Kernel 2: planes conv (3->P, 1x1) -> /norm -> norm*p*|p| -> max over neighbors
#           -> shapes conv (P->S, BN folded) + ReLU.   One lane-dense pass.
# ----------------------------------------------------------------------------
def _local_shape_kernel(knn_ref, wp_ref, ws_ref, shift_ref, out_ref, *, n_planes):
    xj = knn_ref[0]                             # (3, Kp, TN) relative coords
    x0, x1, x2 = xj[0], xj[1], xj[2]            # (Kp, TN) each
    s = x0 * x0 + x1 * x1 + x2 * x2             # (Kp, TN) squared norms
    # 1/(|p| + eps): sqrt + approximate reciprocal both ride the EUP slot,
    # keeping the busy VALU slots free for the per-plane FMAs/abs/max.
    inv = pl.reciprocal(jnp.sqrt(s) + 1e-8, approx=True)
    ws = ws_ref[...]                            # (S, P), BN scale already folded
    conv = None
    for p in range(n_planes):                   # nPlanes is small (e.g. 8): static unroll
        # 1x1 conv over the 3 coords == 3 broadcast FMAs (scalar weights from SMEM).
        pr = wp_ref[p, 0] * x0 + wp_ref[p, 1] * x1 + wp_ref[p, 2] * x2   # (Kp, TN)
        # nrm * (pr/nrm) * |pr/nrm| == pr * |pr| / nrm
        val = pr * jnp.abs(pr) * inv                                      # (Kp, TN)
        best_p = jnp.max(val, axis=0, keepdims=True)                      # (1, TN) over nbrs
        term = ws[:, p:p + 1] * best_p                                    # (S, TN)
        conv = term if conv is None else conv + term
    out_ref[0] = jnp.maximum(conv + shift_ref[...], 0.0)


def local_shape_core(knn_rel, wp, ws_folded, shift, *, tile_cap=2048):
    """knn_rel: (B, 3, Kp, N); wp: (P, 3); ws_folded: (S, P); shift: (S, 1)."""
    B, C, Kp, N = knn_rel.shape
    P = wp.shape[0]
    S = ws_folded.shape[0]
    npad = _round_up(N, 128)
    if npad != N:
        knn_rel = jnp.pad(knn_rel, ((0, 0), (0, 0), (0, 0), (0, npad - N)))
    tn = _pick_tile(npad, tile_cap)             # independent, larger tile than kernel 1
    kernel = functools.partial(_local_shape_kernel, n_planes=P)
    out = pl.pallas_call(
        kernel,
        out_shape=jax.ShapeDtypeStruct((B, S, npad), jnp.float32),
        grid=(B, npad // tn),
        in_specs=[
            pl.BlockSpec((1, C, Kp, tn), lambda b, t: (b, 0, 0, t)),
            pl.BlockSpec(memory_space=pltpu.MemorySpace.SMEM),       # wp (P, 3) scalars
            pl.BlockSpec((S, P), lambda b, t: (0, 0)),               # folded conv weight
            pl.BlockSpec((S, 1), lambda b, t: (0, 0)),               # folded shift
        ],
        out_specs=pl.BlockSpec((1, S, tn), lambda b, t: (b, 0, t)),
        compiler_params=pltpu.CompilerParams(
            dimension_semantics=("parallel", "parallel"),
            vmem_limit_bytes=32 * 1024 * 1024,
        ),
    )(knn_rel, wp, ws_folded, shift)
    return out[:, :, :N] if npad != N else out


# ----------------------------------------------------------------------------
# Glue in plain JAX: channel-major neighbor gather, parameter prep, forward.
# ----------------------------------------------------------------------------
def build_knn_rel(xyz, idx_nb):
    """xyz: (B, N, 3); idx_nb: (B, N, Kp) -> (B, 3, Kp, N) relative coords,
    produced directly in channel-major order (no separate (0,3,2,1) transpose pass)."""
    B, N, _ = xyz.shape
    Kp = idx_nb.shape[-1]
    xyz_t = jnp.transpose(xyz, (0, 2, 1))                            # (B, 3, N)
    idx_t = jnp.transpose(idx_nb, (0, 2, 1))                         # (B, Kp, N)
    src = jnp.broadcast_to(xyz_t[:, :, None, :], (B, 3, Kp, N))
    ind = jnp.broadcast_to(idx_t[:, None, :, :], (B, 3, Kp, N))
    gathered = jnp.take_along_axis(src, ind, axis=3)                 # (B, 3, Kp, N)
    # TODO(synk): for very large B*N*Kp, move this gather+subtract into kernel 2
    # (full (3, N) coord slab resident in VMEM, per-tile indices via scalar prefetch).
    return gathered - xyz_t[:, :, None, :]


def local_shape_forward(xyz, params, k=16):
    """xyz: (B, N, 3) float32. npoints=None, so xyz_new == xyz."""
    # TODO(synk): fps (farthest point sampling) for npoints is not implemented;
    # this covers the module's npoints=None branch only.
    xyz = xyz.astype(jnp.float32)
    xyz_new = xyz

    _, idx = knn_search(xyz, k)                  # (B, N, k) neighbours incl. self, ascending
    # NOTE: like the PyTorch reference, assumes self lands at rank 0 (exactly
    # duplicated points could swap it via tie-breaking).
    idx_nb = idx[:, :, 1:]                       # drop self
    knn_rel = build_knn_rel(xyz, idx_nb)         # (B, 3, k-1, N) channel-major

    shapes = local_shape_core(
        knn_rel, params["wp"], params["ws_folded"], params["shift"]
    )                                            # (B, nShapes, N)
    return shapes, xyz_new, idx


def init_params(nPlanes, nShapes, key):
    k1, k2, k3 = jax.random.split(key, 3)
    # Conv2d(3, nPlanes, (1,1), bias=False).weight -> (nPlanes, 3).
    wp = 0.5 * jax.random.normal(k1, (nPlanes, 3), jnp.float32)
    # MLP = Conv1d(nPlanes, nShapes, 1) + BatchNorm1d (eval) + ReLU.
    ws = 0.3 * jax.random.normal(k2, (nShapes, nPlanes), jnp.float32)
    bias = 0.1 * jax.random.normal(k3, (nShapes,), jnp.float32)
    gamma = jnp.ones((nShapes,), jnp.float32)
    beta = jnp.zeros((nShapes,), jnp.float32)
    run_mean = jnp.zeros((nShapes,), jnp.float32)
    run_var = jnp.ones((nShapes,), jnp.float32)
    eps = 1e-5
    scale = gamma / jnp.sqrt(run_var + eps)
    # Fold BN (eval) scale into the conv weight; only a per-channel shift remains.
    ws_folded = ws * scale[:, None]
    shift = (bias - run_mean) * scale + beta
    return {"wp": wp, "ws_folded": ws_folded, "shift": shift.reshape(nShapes, 1)}


def _core_reference(knn_rel, wp, ws_folded, shift):
    """Plain-JAX reference of the shape kernel (module semantics) for validation."""
    nrm = jnp.sqrt(jnp.sum(knn_rel * knn_rel, axis=1, keepdims=True)) + 1e-8  # (B,1,Kp,N)
    pr = jnp.einsum("pc,bckn->bpkn", wp, knn_rel)
    planes = pr / nrm
    val = nrm * planes * jnp.abs(planes)
    best = jnp.max(val, axis=2)                                               # (B,P,N)
    conv = jnp.einsum("sp,bpn->bsn", ws_folded, best)
    return jnp.maximum(conv + shift[None, :, :], 0.0)


if __name__ == "__main__":
    B, N = 2, 64
    nPlanes, nShapes, k = 8, 16, 16

    key = jax.random.PRNGKey(0)
    kx, kparam = jax.random.split(key)
    xyz = jax.random.normal(kx, (B, N, 3), jnp.float32)
    params = init_params(nPlanes, nShapes, kparam)

    shapes, xyz_new, idx = local_shape_forward(xyz, params, k=k)
    jax.block_until_ready((shapes, xyz_new, idx))

    assert shapes.shape == (B, nShapes, N)
    assert xyz_new.shape == (B, N, 3)
    assert idx.shape == (B, N, k)

    # --- validate the fused kNN kernel against a direct pairwise reference ---
    d2, idx2 = knn_search(xyz, k)
    d2_ref_full = jnp.sum((xyz[:, :, None, :] - xyz[:, None, :, :]) ** 2, axis=-1)
    neg_ref_vals, _ = jax.lax.top_k(-d2_ref_full, k)
    ref_d = -neg_ref_vals                                             # ascending distances
    d_sel = jnp.take_along_axis(d2_ref_full, idx2, axis=-1)
    assert float(jnp.max(jnp.abs(d_sel - ref_d))) < 1e-3              # picked the k smallest
    assert float(jnp.max(jnp.abs(d2 - d_sel))) < 1e-3                 # returned dists match
    assert bool(jnp.all(idx2[:, :, 0] == jnp.arange(N)[None, :]))     # self at rank 0

    # --- validate the planes/shapes kernel against a plain-JAX reference ---
    knn_rel = build_knn_rel(xyz, idx[:, :, 1:])
    shapes_ref = _core_reference(
        knn_rel, params["wp"], params["ws_folded"], params["shift"]
    )
    assert float(jnp.max(jnp.abs(shapes - shapes_ref))) < 1e-2        # approx-rcp tolerance

    print("KERNEL_OK")
</pallas_src>

<mosaic_0001>
module attributes {stable_mosaic.version = 11 : i64} {
  func.func @_knn_topk_kernel(%arg0: i32, %arg1: i32, %arg2: i32, %arg3: memref<1x128x3xf32, #tpu.memory_space<vmem>>, %arg4: memref<1x3x128xf32, #tpu.memory_space<vmem>>, %arg5: memref<1x128x16xf32, #tpu.memory_space<vmem>>, %arg6: memref<1x128x16xi32, #tpu.memory_space<vmem>>, %arg7: memref<128x128xf32, #tpu.memory_space<vmem>>, %arg8: memref<128x128xf32, #tpu.memory_space<vmem>>, %arg9: memref<128x128xf32, #tpu.memory_space<vmem>>) attributes {dimension_semantics = [#tpu.dimension_semantics<parallel>, #tpu.dimension_semantics<parallel>, #tpu.dimension_semantics<arbitrary>], iteration_bounds = array<i64: 2, 1, 1>, scalar_prefetch = 0 : i64, scratch_operands = 3 : i64, tpu.core_type = #tpu.core_type<tc>, window_params = [{transform_indices = @transform_0, window_bounds = array<i64: 1, 128, 3>}, {transform_indices = @transform_1, window_bounds = array<i64: 1, 3, 128>}, {transform_indices = @transform_2, window_bounds = array<i64: 1, 128, 16>}, {transform_indices = @transform_3, window_bounds = array<i64: 1, 128, 16>}]} {
    %c0_i32 = arith.constant 0 : i32
    %0 = arith.cmpi eq, %arg2, %c0_i32 : i32
    %1 = arith.extui %0 : i1 to i32
    %c0_i32_0 = arith.constant 0 : i32
    %2 = arith.cmpi ne, %1, %c0_i32_0 : i32
    scf.if %2 {
      %cst_233 = arith.constant 1.000000e+30 : f32
      %663 = vector.broadcast %cst_233 : f32 to vector<128x128xf32>
      %c0_234 = arith.constant 0 : index
      %c0_235 = arith.constant 0 : index
      %664 = vector.load %arg8[%c0_234, %c0_235] : memref<128x128xf32, #tpu.memory_space<vmem>>, vector<128x128xf32>
      tpu.vector_store %arg8[%c0_234, %c0_235], %663 {strides = array<i32>} : memref<128x128xf32, #tpu.memory_space<vmem>>, vector<128x128xf32>,
      %cst_236 = arith.constant 1.000000e+09 : f32
      %665 = vector.broadcast %cst_236 : f32 to vector<128x128xf32>
      %c0_237 = arith.constant 0 : index
      %c0_238 = arith.constant 0 : index
      %666 = vector.load %arg9[%c0_237, %c0_238] : memref<128x128xf32, #tpu.memory_space<vmem>>, vector<128x128xf32>
      tpu.vector_store %arg9[%c0_237, %c0_238], %665 {strides = array<i32>} : memref<128x128xf32, #tpu.memory_space<vmem>>, vector<128x128xf32>,
    } else {
    }
    %c0 = arith.constant 0 : index
    %c0_1 = arith.constant 0 : index
    %c0_2 = arith.constant 0 : index
    %3 = vector.load %arg3[%c0, %c0_1, %c0_2] : memref<1x128x3xf32, #tpu.memory_space<vmem>>, vector<1x128x3xf32>
    %4 = vector.shape_cast %3 : vector<1x128x3xf32> to vector<128x3xf32>
    %c0_3 = arith.constant 0 : index
    %c0_4 = arith.constant 0 : index
    %c0_5 = arith.constant 0 : index
    %5 = vector.load %arg4[%c0_3, %c0_4, %c0_5] : memref<1x3x128xf32, #tpu.memory_space<vmem>>, vector<1x3x128xf32>
    %6 = vector.shape_cast %5 : vector<1x3x128xf32> to vector<3x128xf32>
    %7 = vector.extract_strided_slice %6 {offsets = [0, 0], sizes = [1, 128], strides = [1, 1]} : vector<3x128xf32> to vector<1x128xf32>
    %8 = vector.extract_strided_slice %6 {offsets = [1, 0], sizes = [1, 128], strides = [1, 1]} : vector<3x128xf32> to vector<1x128xf32>
    %9 = vector.extract_strided_slice %6 {offsets = [2, 0], sizes = [1, 128], strides = [1, 1]} : vector<3x128xf32> to vector<1x128xf32>
    %10 = arith.mulf %7, %7 : vector<1x128xf32>
    %11 = arith.mulf %8, %8 : vector<1x128xf32>
    %12 = arith.addf %10, %11 : vector<1x128xf32>
    %13 = arith.mulf %9, %9 : vector<1x128xf32>
    %14 = arith.addf %12, %13 : vector<1x128xf32>
    %cst = arith.constant -2.000000e+00 : f32
    %15 = vector.broadcast %cst : f32 to vector<128x3xf32>
    %16 = arith.mulf %4, %15 : vector<128x3xf32>
    %17 = vector.extract_strided_slice %16 {offsets = [0, 0], sizes = [128, 1], strides = [1, 1]} : vector<128x3xf32> to vector<128x1xf32>
    %18 = vector.broadcast %17 : vector<128x1xf32> to vector<128x128xf32>
    %19 = vector.broadcast %7 : vector<1x128xf32> to vector<128x128xf32>
    %20 = arith.mulf %18, %19 : vector<128x128xf32>
    %21 = vector.broadcast %14 : vector<1x128xf32> to vector<128x128xf32>
    %22 = arith.addf %21, %20 : vector<128x128xf32>
    %23 = vector.extract_strided_slice %16 {offsets = [0, 1], sizes = [128, 1], strides = [1, 1]} : vector<128x3xf32> to vector<128x1xf32>
    %24 = vector.broadcast %23 : vector<128x1xf32> to vector<128x128xf32>
    %25 = vector.broadcast %8 : vector<1x128xf32> to vector<128x128xf32>
    %26 = arith.mulf %24, %25 : vector<128x128xf32>
    %27 = arith.addf %22, %26 : vector<128x128xf32>
    %28 = vector.extract_strided_slice %16 {offsets = [0, 2], sizes = [128, 1], strides = [1, 1]} : vector<128x3xf32> to vector<128x1xf32>
    %29 = vector.broadcast %28 : vector<128x1xf32> to vector<128x128xf32>
    %30 = vector.broadcast %9 : vector<1x128xf32> to vector<128x128xf32>
    %31 = arith.mulf %29, %30 : vector<128x128xf32>
    %32 = arith.addf %27, %31 : vector<128x128xf32>
    %33 = tpu.iota {dimensions = array<i32: 1>} : vector<128x128xi32>
    %c128_i32 = arith.constant 128 : i32
    %34 = arith.muli %arg2, %c128_i32 : i32
    %35 = vector.broadcast %34 : i32 to vector<128x128xi32>
    %36 = arith.addi %33, %35 : vector<128x128xi32>
    %37 = arith.sitofp %36 : vector<128x128xi32> to vector<128x128xf32>
    %c64_i32 = arith.constant 64 : i32
    %38 = vector.broadcast %c64_i32 : i32 to vector<128x128xi32>
    %39 = arith.cmpi slt, %36, %38 : vector<128x128xi32>
    %cst_6 = arith.constant 1.000000e+30 : f32
    %40 = vector.broadcast %cst_6 : f32 to vector<128x128xf32>
    %41 = arith.select %39, %32, %40 : vector<128x128xi1>, vector<128x128xf32>
    %c0_7 = arith.constant 0 : index
    %c0_8 = arith.constant 0 : index
    %42 = vector.load %arg7[%c0_7, %c0_8] : memref<128x128xf32, #tpu.memory_space<vmem>>, vector<128x128xf32>
    tpu.vector_store %arg7[%c0_7, %c0_8], %41 {strides = array<i32>} : memref<128x128xf32, #tpu.memory_space<vmem>>, vector<128x128xf32>,
    %c0_9 = arith.constant 0 : index
    %c0_10 = arith.constant 0 : index
    %43 = vector.load %arg8[%c0_9, %c0_10] : memref<128x128xf32, #tpu.memory_space<vmem>>, vector<128x128xf32>
    %c0_11 = arith.constant 0 : index
    %c0_12 = arith.constant 0 : index
    %44 = vector.load %arg9[%c0_11, %c0_12] : memref<128x128xf32, #tpu.memory_space<vmem>>, vector<128x128xf32>
    %45 = tpu.iota {dimensions = array<i32: 1>} : vector<128x128xi32>
    %cst_13 = arith.constant 1.000000e+30 : f32
    %46 = vector.broadcast %cst_13 : f32 to vector<128x128xf32>
    %cst_14 = arith.constant 1.000000e+09 : f32
    %47 = vector.broadcast %cst_14 : f32 to vector<128x128xf32>
    %c0_15 = arith.constant 0 : index
    %c0_16 = arith.constant 0 : index
    %48 = vector.load %arg7[%c0_15, %c0_16] : memref<128x128xf32, #tpu.memory_space<vmem>>, vector<128x128xf32>
    %cst_17 = arith.constant dense<0x7F800000> : vector<128xf32>
    %49 = vector.multi_reduction <minimumf>, %48, %cst_17 [1] : vector<128x128xf32> to vector<128xf32>
    %50 = vector.shape_cast %49 : vector<128xf32> to vector<128x1xf32>
    %cst_18 = arith.constant dense<0x7F800000> : vector<128xf32>
    %51 = vector.multi_reduction <minimumf>, %43, %cst_18 [1] : vector<128x128xf32> to vector<128xf32>
    %52 = vector.shape_cast %51 : vector<128xf32> to vector<128x1xf32>
    %53 = arith.minimumf %50, %52 : vector<128x1xf32>
    %54 = vector.broadcast %53 : vector<128x1xf32> to vector<128x128xf32>
    %55 = arith.cmpf oeq, %48, %54 : vector<128x128xf32>
    %cst_19 = arith.constant 1.000000e+09 : f32
    %56 = vector.broadcast %cst_19 : f32 to vector<128x128xf32>
    %57 = arith.select %55, %37, %56 : vector<128x128xi1>, vector<128x128xf32>
    %cst_20 = arith.constant dense<0x7F800000> : vector<128xf32>
    %58 = vector.multi_reduction <minimumf>, %57, %cst_20 [1] : vector<128x128xf32> to vector<128xf32>
    %59 = vector.shape_cast %58 : vector<128xf32> to vector<128x1xf32>
    %60 = vector.broadcast %53 : vector<128x1xf32> to vector<128x128xf32>
    %61 = arith.cmpf oeq, %43, %60 : vector<128x128xf32>
    %cst_21 = arith.constant 1.000000e+09 : f32
    %62 = vector.broadcast %cst_21 : f32 to vector<128x128xf32>
    %63 = arith.select %61, %44, %62 : vector<128x128xi1>, vector<128x128xf32>
    %cst_22 = arith.constant dense<0x7F800000> : vector<128xf32>
    %64 = vector.multi_reduction <minimumf>, %63, %cst_22 [1] : vector<128x128xf32> to vector<128xf32>
    %65 = vector.shape_cast %64 : vector<128xf32> to vector<128x1xf32>
    %66 = arith.minimumf %59, %65 : vector<128x1xf32>
    %67 = vector.broadcast %66 : vector<128x1xf32> to vector<128x128xf32>
    %68 = arith.cmpf oeq, %37, %67 : vector<128x128xf32>
    %cst_23 = arith.constant 1.000000e+30 : f32
    %69 = vector.broadcast %cst_23 : f32 to vector<128x128xf32>
    %70 = arith.select %68, %69, %48 : vector<128x128xi1>, vector<128x128xf32>
    %c0_24 = arith.constant 0 : index
    %c0_25 = arith.constant 0 : index
    %71 = vector.load %arg7[%c0_24, %c0_25] : memref<128x128xf32, #tpu.memory_space<vmem>>, vector<128x128xf32>
    tpu.vector_store %arg7[%c0_24, %c0_25], %70 {strides = array<i32>} : memref<128x128xf32, #tpu.memory_space<vmem>>, vector<128x128xf32>,
    %72 = vector.broadcast %66 : vector<128x1xf32> to vector<128x128xf32>
    %73 = arith.cmpf oeq, %44, %72 : vector<128x128xf32>
    %cst_26 = arith.constant 1.000000e+30 : f32
    %74 = vector.broadcast %cst_26 : f32 to vector<128x128xf32>
    %75 = arith.select %73, %74, %43 : vector<128x128xi1>, vector<128x128xf32>
    %c0_i32_27 = arith.constant 0 : i32
    %76 = vector.broadcast %c0_i32_27 : i32 to vector<128x128xi32>
    %77 = arith.cmpi eq, %45, %76 : vector<128x128xi32>
    %78 = vector.shape_cast %53 : vector<128x1xf32> to vector<128x1xf32>
    %79 = vector.broadcast %78 : vector<128x1xf32> to vector<128x128xf32>
    %80 = arith.select %77, %79, %46 : vector<128x128xi1>, vector<128x128xf32>
    %c0_i32_28 = arith.constant 0 : i32
    %81 = vector.broadcast %c0_i32_28 : i32 to vector<128x128xi32>
    %82 = arith.cmpi eq, %45, %81 : vector<128x128xi32>
    %83 = vector.shape_cast %66 : vector<128x1xf32> to vector<128x1xf32>
    %84 = vector.broadcast %83 : vector<128x1xf32> to vector<128x128xf32>
    %85 = arith.select %82, %84, %47 : vector<128x128xi1>, vector<128x128xf32>
    %c0_29 = arith.constant 0 : index
    %c0_30 = arith.constant 0 : index
    %86 = vector.load %arg7[%c0_29, %c0_30] : memref<128x128xf32, #tpu.memory_space<vmem>>, vector<128x128xf32>
    %cst_31 = arith.constant dense<0x7F800000> : vector<128xf32>
    %87 = vector.multi_reduction <minimumf>, %86, %cst_31 [1] : vector<128x128xf32> to vector<128xf32>
    %88 = vector.shape_cast %87 : vector<128xf32> to vector<128x1xf32>
    %cst_32 = arith.constant dense<0x7F800000> : vector<128xf32>
    %89 = vector.multi_reduction <minimumf>, %75, %cst_32 [1] : vector<128x128xf32> to vector<128xf32>
    %90 = vector.shape_cast %89 : vector<128xf32> to vector<128x1xf32>
    %91 = arith.minimumf %88, %90 : vector<128x1xf32>
    %92 = vector.broadcast %91 : vector<128x1xf32> to vector<128x128xf32>
    %93 = arith.cmpf oeq, %86, %92 : vector<128x128xf32>
    %cst_33 = arith.constant 1.000000e+09 : f32
    %94 = vector.broadcast %cst_33 : f32 to vector<128x128xf32>
    %95 = arith.select %93, %37, %94 : vector<128x128xi1>, vector<128x128xf32>
    %cst_34 = arith.constant dense<0x7F800000> : vector<128xf32>
    %96 = vector.multi_reduction <minimumf>, %95, %cst_34 [1] : vector<128x128xf32> to vector<128xf32>
    %97 = vector.shape_cast %96 : vector<128xf32> to vector<128x1xf32>
    %98 = vector.broadcast %91 : vector<128x1xf32> to vector<128x128xf32>
    %99 = arith.cmpf oeq, %75, %98 : vector<128x128xf32>
    %cst_35 = arith.constant 1.000000e+09 : f32
    %100 = vector.broadcast %cst_35 : f32 to vector<128x128xf32>
    %101 = arith.select %99, %44, %100 : vector<128x128xi1>, vector<128x128xf32>
    %cst_36 = arith.constant dense<0x7F800000> : vector<128xf32>
    %102 = vector.multi_reduction <minimumf>, %101, %cst_36 [1] : vector<128x128xf32> to vector<128xf32>
    %103 = vector.shape_cast %102 : vector<128xf32> to vector<128x1xf32>
    %104 = arith.minimumf %97, %103 : vector<128x1xf32>
    %105 = vector.broadcast %104 : vector<128x1xf32> to vector<128x128xf32>
    %106 = arith.cmpf oeq, %37, %105 : vector<128x128xf32>
    %cst_37 = arith.constant 1.000000e+30 : f32
    %107 = vector.broadcast %cst_37 : f32 to vector<128x128xf32>
    %108 = arith.select %106, %107, %86 : vector<128x128xi1>, vector<128x128xf32>
    %c0_38 = arith.constant 0 : index
    %c0_39 = arith.constant 0 : index
    %109 = vector.load %arg7[%c0_38, %c0_39] : memref<128x128xf32, #tpu.memory_space<vmem>>, vector<128x128xf32>
    tpu.vector_store %arg7[%c0_38, %c0_39], %108 {strides = array<i32>} : memref<128x128xf32, #tpu.memory_space<vmem>>, vector<128x128xf32>,
    %110 = vector.broadcast %104 : vector<128x1xf32> to vector<128x128xf32>
    %111 = arith.cmpf oeq, %44, %110 : vector<128x128xf32>
    %cst_40 = arith.constant 1.000000e+30 : f32
    %112 = vector.broadcast %cst_40 : f32 to vector<128x128xf32>
    %113 = arith.select %111, %112, %75 : vector<128x128xi1>, vector<128x128xf32>
    %c1_i32 = arith.constant 1 : i32
    %114 = vector.broadcast %c1_i32 : i32 to vector<128x128xi32>
    %115 = arith.cmpi eq, %45, %114 : vector<128x128xi32>
    %116 = vector.shape_cast %91 : vector<128x1xf32> to vector<128x1xf32>
    %117 = vector.broadcast %116 : vector<128x1xf32> to vector<128x128xf32>
    %118 = arith.select %115, %117, %80 : vector<128x128xi1>, vector<128x128xf32>
    %c1_i32_41 = arith.constant 1 : i32
    %119 = vector.broadcast %c1_i32_41 : i32 to vector<128x128xi32>
    %120 = arith.cmpi eq, %45, %119 : vector<128x128xi32>
    %121 = vector.shape_cast %104 : vector<128x1xf32> to vector<128x1xf32>
    %122 = vector.broadcast %121 : vector<128x1xf32> to vector<128x128xf32>
    %123 = arith.select %120, %122, %85 : vector<128x128xi1>, vector<128x128xf32>
    %c0_42 = arith.constant 0 : index
    %c0_43 = arith.constant 0 : index
    %124 = vector.load %arg7[%c0_42, %c0_43] : memref<128x128xf32, #tpu.memory_space<vmem>>, vector<128x128xf32>
    %cst_44 = arith.constant dense<0x7F800000> : vector<128xf32>
    %125 = vector.multi_reduction <minimumf>, %124, %cst_44 [1] : vector<128x128xf32> to vector<128xf32>
    %126 = vector.shape_cast %125 : vector<128xf32> to vector<128x1xf32>
    %cst_45 = arith.constant dense<0x7F800000> : vector<128xf32>
    %127 = vector.multi_reduction <minimumf>, %113, %cst_45 [1] : vector<128x128xf32> to vector<128xf32>
    %128 = vector.shape_cast %127 : vector<128xf32> to vector<128x1xf32>
    %129 = arith.minimumf %126, %128 : vector<128x1xf32>
    %130 = vector.broadcast %129 : vector<128x1xf32> to vector<128x128xf32>
    %131 = arith.cmpf oeq, %124, %130 : vector<128x128xf32>
    %cst_46 = arith.constant 1.000000e+09 : f32
    %132 = vector.broadcast %cst_46 : f32 to vector<128x128xf32>
    %133 = arith.select %131, %37, %132 : vector<128x128xi1>, vector<128x128xf32>
    %cst_47 = arith.constant dense<0x7F800000> : vector<128xf32>
    %134 = vector.multi_reduction <minimumf>, %133, %cst_47 [1] : vector<128x128xf32> to vector<128xf32>
    %135 = vector.shape_cast %134 : vector<128xf32> to vector<128x1xf32>
    %136 = vector.broadcast %129 : vector<128x1xf32> to vector<128x128xf32>
    %137 = arith.cmpf oeq, %113, %136 : vector<128x128xf32>
    %cst_48 = arith.constant 1.000000e+09 : f32
    %138 = vector.broadcast %cst_48 : f32 to vector<128x128xf32>
    %139 = arith.select %137, %44, %138 : vector<128x128xi1>, vector<128x128xf32>
    %cst_49 = arith.constant dense<0x7F800000> : vector<128xf32>
    %140 = vector.multi_reduction <minimumf>, %139, %cst_49 [1] : vector<128x128xf32> to vector<128xf32>
    %141 = vector.shape_cast %140 : vector<128xf32> to vector<128x1xf32>
    %142 = arith.minimumf %135, %141 : vector<128x1xf32>
    %143 = vector.broadcast %142 : vector<128x1xf32> to vector<128x128xf32>
    %144 = arith.cmpf oeq, %37, %143 : vector<128x128xf32>
    %cst_50 = arith.constant 1.000000e+30 : f32
    %145 = vector.broadcast %cst_50 : f32 to vector<128x128xf32>
    %146 = arith.select %144, %145, %124 : vector<128x128xi1>, vector<128x128xf32>
    %c0_51 = arith.constant 0 : index
    %c0_52 = arith.constant 0 : index
    %147 = vector.load %arg7[%c0_51, %c0_52] : memref<128x128xf32, #tpu.memory_space<vmem>>, vector<128x128xf32>
    tpu.vector_store %arg7[%c0_51, %c0_52], %146 {strides = array<i32>} : memref<128x128xf32, #tpu.memory_space<vmem>>, vector<128x128xf32>,
    %148 = vector.broadcast %142 : vector<128x1xf32> to vector<128x128xf32>
    %149 = arith.cmpf oeq, %44, %148 : vector<128x128xf32>
    %cst_53 = arith.constant 1.000000e+30 : f32
    %150 = vector.broadcast %cst_53 : f32 to vector<128x128xf32>
    %151 = arith.select %149, %150, %113 : vector<128x128xi1>, vector<128x128xf32>
    %c2_i32 = arith.constant 2 : i32
    %152 = vector.broadcast %c2_i32 : i32 to vector<128x128xi32>
    %153 = arith.cmpi eq, %45, %152 : vector<128x128xi32>
    %154 = vector.shape_cast %129 : vector<128x1xf32> to vector<128x1xf32>
    %155 = vector.broadcast %154 : vector<128x1xf32> to vector<128x128xf32>
    %156 = arith.select %153, %155, %118 : vector<128x128xi1>, vector<128x128xf32>
    %c2_i32_54 = arith.constant 2 : i32
    %157 = vector.broadcast %c2_i32_54 : i32 to vector<128x128xi32>
    %158 = arith.cmpi eq, %45, %157 : vector<128x128xi32>
    %159 = vector.shape_cast %142 : vector<128x1xf32> to vector<128x1xf32>
    %160 = vector.broadcast %159 : vector<128x1xf32> to vector<128x128xf32>
    %161 = arith.select %158, %160, %123 : vector<128x128xi1>, vector<128x128xf32>
    %c0_55 = arith.constant 0 : index
    %c0_56 = arith.constant 0 : index
    %162 = vector.load %arg7[%c0_55, %c0_56] : memref<128x128xf32, #tpu.memory_space<vmem>>, vector<128x128xf32>
    %cst_57 = arith.constant dense<0x7F800000> : vector<128xf32>
    %163 = vector.multi_reduction <minimumf>, %162, %cst_57 [1] : vector<128x128xf32> to vector<128xf32>
    %164 = vector.shape_cast %163 : vector<128xf32> to vector<128x1xf32>
    %cst_58 = arith.constant dense<0x7F800000> : vector<128xf32>
    %165 = vector.multi_reduction <minimumf>, %151, %cst_58 [1] : vector<128x128xf32> to vector<128xf32>
    %166 = vector.shape_cast %165 : vector<128xf32> to vector<128x1xf32>
    %167 = arith.minimumf %164, %166 : vector<128x1xf32>
    %168 = vector.broadcast %167 : vector<128x1xf32> to vector<128x128xf32>
    %169 = arith.cmpf oeq, %162, %168 : vector<128x128xf32>
    %cst_59 = arith.constant 1.000000e+09 : f32
    %170 = vector.broadcast %cst_59 : f32 to vector<128x128xf32>
    %171 = arith.select %169, %37, %170 : vector<128x128xi1>, vector<128x128xf32>
    %cst_60 = arith.constant dense<0x7F800000> : vector<128xf32>
    %172 = vector.multi_reduction <minimumf>, %171, %cst_60 [1] : vector<128x128xf32> to vector<128xf32>
    %173 = vector.shape_cast %172 : vector<128xf32> to vector<128x1xf32>
    %174 = vector.broadcast %167 : vector<128x1xf32> to vector<128x128xf32>
    %175 = arith.cmpf oeq, %151, %174 : vector<128x128xf32>
    %cst_61 = arith.constant 1.000000e+09 : f32
    %176 = vector.broadcast %cst_61 : f32 to vector<128x128xf32>
    %177 = arith.select %175, %44, %176 : vector<128x128xi1>, vector<128x128xf32>
    %cst_62 = arith.constant dense<0x7F800000> : vector<128xf32>
    %178 = vector.multi_reduction <minimumf>, %177, %cst_62 [1] : vector<128x128xf32> to vector<128xf32>
    %179 = vector.shape_cast %178 : vector<128xf32> to vector<128x1xf32>
    %180 = arith.minimumf %173, %179 : vector<128x1xf32>
    %181 = vector.broadcast %180 : vector<128x1xf32> to vector<128x128xf32>
    %182 = arith.cmpf oeq, %37, %181 : vector<128x128xf32>
    %cst_63 = arith.constant 1.000000e+30 : f32
    %183 = vector.broadcast %cst_63 : f32 to vector<128x128xf32>
    %184 = arith.select %182, %183, %162 : vector<128x128xi1>, vector<128x128xf32>
    %c0_64 = arith.constant 0 : index
    %c0_65 = arith.constant 0 : index
    %185 = vector.load %arg7[%c0_64, %c0_65] : memref<128x128xf32, #tpu.memory_space<vmem>>, vector<128x128xf32>
    tpu.vector_store %arg7[%c0_64, %c0_65], %184 {strides = array<i32>} : memref<128x128xf32, #tpu.memory_space<vmem>>, vector<128x128xf32>,
    %186 = vector.broadcast %180 : vector<128x1xf32> to vector<128x128xf32>
    %187 = arith.cmpf oeq, %44, %186 : vector<128x128xf32>
    %cst_66 = arith.constant 1.000000e+30 : f32
    %188 = vector.broadcast %cst_66 : f32 to vector<128x128xf32>
    %189 = arith.select %187, %188, %151 : vector<128x128xi1>, vector<128x128xf32>
    %c3_i32 = arith.constant 3 : i32
    %190 = vector.broadcast %c3_i32 : i32 to vector<128x128xi32>
    %191 = arith.cmpi eq, %45, %190 : vector<128x128xi32>
    %192 = vector.shape_cast %167 : vector<128x1xf32> to vector<128x1xf32>
    %193 = vector.broadcast %192 : vector<128x1xf32> to vector<128x128xf32>
    %194 = arith.select %191, %193, %156 : vector<128x128xi1>, vector<128x128xf32>
    %c3_i32_67 = arith.constant 3 : i32
    %195 = vector.broadcast %c3_i32_67 : i32 to vector<128x128xi32>
    %196 = arith.cmpi eq, %45, %195 : vector<128x128xi32>
    %197 = vector.shape_cast %180 : vector<128x1xf32> to vector<128x1xf32>
    %198 = vector.broadcast %197 : vector<128x1xf32> to vector<128x128xf32>
    %199 = arith.select %196, %198, %161 : vector<128x128xi1>, vector<128x128xf32>
    %c0_68 = arith.constant 0 : index
    %c0_69 = arith.constant 0 : index
    %200 = vector.load %arg7[%c0_68, %c0_69] : memref<128x128xf32, #tpu.memory_space<vmem>>, vector<128x128xf32>
    %cst_70 = arith.constant dense<0x7F800000> : vector<128xf32>
    %201 = vector.multi_reduction <minimumf>, %200, %cst_70 [1] : vector<128x128xf32> to vector<128xf32>
    %202 = vector.shape_cast %201 : vector<128xf32> to vector<128x1xf32>
    %cst_71 = arith.constant dense<0x7F800000> : vector<128xf32>
    %203 = vector.multi_reduction <minimumf>, %189, %cst_71 [1] : vector<128x128xf32> to vector<128xf32>
    %204 = vector.shape_cast %203 : vector<128xf32> to vector<128x1xf32>
    %205 = arith.minimumf %202, %204 : vector<128x1xf32>
    %206 = vector.broadcast %205 : vector<128x1xf32> to vector<128x128xf32>
    %207 = arith.cmpf oeq, %200, %206 : vector<128x128xf32>
    %cst_72 = arith.constant 1.000000e+09 : f32
    %208 = vector.broadcast %cst_72 : f32 to vector<128x128xf32>
    %209 = arith.select %207, %37, %208 : vector<128x128xi1>, vector<128x128xf32>
    %cst_73 = arith.constant dense<0x7F800000> : vector<128xf32>
    %210 = vector.multi_reduction <minimumf>, %209, %cst_73 [1] : vector<128x128xf32> to vector<128xf32>
    %211 = vector.shape_cast %210 : vector<128xf32> to vector<128x1xf32>
    %212 = vector.broadcast %205 : vector<128x1xf32> to vector<128x128xf32>
    %213 = arith.cmpf oeq, %189, %212 : vector<128x128xf32>
    %cst_74 = arith.constant 1.000000e+09 : f32
    %214 = vector.broadcast %cst_74 : f32 to vector<128x128xf32>
    %215 = arith.select %213, %44, %214 : vector<128x128xi1>, vector<128x128xf32>
    %cst_75 = arith.constant dense<0x7F800000> : vector<128xf32>
    %216 = vector.multi_reduction <minimumf>, %215, %cst_75 [1] : vector<128x128xf32> to vector<128xf32>
    %217 = vector.shape_cast %216 : vector<128xf32> to vector<128x1xf32>
    %218 = arith.minimumf %211, %217 : vector<128x1xf32>
    %219 = vector.broadcast %218 : vector<128x1xf32> to vector<128x128xf32>
    %220 = arith.cmpf oeq, %37, %219 : vector<128x128xf32>
    %cst_76 = arith.constant 1.000000e+30 : f32
    %221 = vector.broadcast %cst_76 : f32 to vector<128x128xf32>
    %222 = arith.select %220, %221, %200 : vector<128x128xi1>, vector<128x128xf32>
    %c0_77 = arith.constant 0 : index
    %c0_78 = arith.constant 0 : index
    %223 = vector.load %arg7[%c0_77, %c0_78] : memref<128x128xf32, #tpu.memory_space<vmem>>, vector<128x128xf32>
    tpu.vector_store %arg7[%c0_77, %c0_78], %222 {strides = array<i32>} : memref<128x128xf32, #tpu.memory_space<vmem>>, vector<128x128xf32>,
    %224 = vector.broadcast %218 : vector<128x1xf32> to vector<128x128xf32>
    %225 = arith.cmpf oeq, %44, %224 : vector<128x128xf32>
    %cst_79 = arith.constant 1.000000e+30 : f32
    %226 = vector.broadcast %cst_79 : f32 to vector<128x128xf32>
    %227 = arith.select %225, %226, %189 : vector<128x128xi1>, vector<128x128xf32>
    %c4_i32 = arith.constant 4 : i32
    %228 = vector.broadcast %c4_i32 : i32 to vector<128x128xi32>
    %229 = arith.cmpi eq, %45, %228 : vector<128x128xi32>
    %230 = vector.shape_cast %205 : vector<128x1xf32> to vector<128x1xf32>
    %231 = vector.broadcast %230 : vector<128x1xf32> to vector<128x128xf32>
    %232 = arith.select %229, %231, %194 : vector<128x128xi1>, vector<128x128xf32>
    %c4_i32_80 = arith.constant 4 : i32
    %233 = vector.broadcast %c4_i32_80 : i32 to vector<128x128xi32>
    %234 = arith.cmpi eq, %45, %233 : vector<128x128xi32>
    %235 = vector.shape_cast %218 : vector<128x1xf32> to vector<128x1xf32>
    %236 = vector.broadcast %235 : vector<128x1xf32> to vector<128x128xf32>
    %237 = arith.select %234, %236, %199 : vector<128x128xi1>, vector<128x128xf32>
    %c0_81 = arith.constant 0 : index
    %c0_82 = arith.constant 0 : index
    %238 = vector.load %arg7[%c0_81, %c0_82] : memref<128x128xf32, #tpu.memory_space<vmem>>, vector<128x128xf32>
    %cst_83 = arith.constant dense<0x7F800000> : vector<128xf32>
    %239 = vector.multi_reduction <minimumf>, %238, %cst_83 [1] : vector<128x128xf32> to vector<128xf32>
    %240 = vector.shape_cast %239 : vector<128xf32> to vector<128x1xf32>
    %cst_84 = arith.constant dense<0x7F800000> : vector<128xf32>
    %241 = vector.multi_reduction <minimumf>, %227, %cst_84 [1] : vector<128x128xf32> to vector<128xf32>
    %242 = vector.shape_cast %241 : vector<128xf32> to vector<128x1xf32>
    %243 = arith.minimumf %240, %242 : vector<128x1xf32>
    %244 = vector.broadcast %243 : vector<128x1xf32> to vector<128x128xf32>
    %245 = arith.cmpf oeq, %238, %244 : vector<128x128xf32>
    %cst_85 = arith.constant 1.000000e+09 : f32
    %246 = vector.broadcast %cst_85 : f32 to vector<128x128xf32>
    %247 = arith.select %245, %37, %246 : vector<128x128xi1>, vector<128x128xf32>
    %cst_86 = arith.constant dense<0x7F800000> : vector<128xf32>
    %248 = vector.multi_reduction <minimumf>, %247, %cst_86 [1] : vector<128x128xf32> to vector<128xf32>
    %249 = vector.shape_cast %248 : vector<128xf32> to vector<128x1xf32>
    %250 = vector.broadcast %243 : vector<128x1xf32> to vector<128x128xf32>
    %251 = arith.cmpf oeq, %227, %250 : vector<128x128xf32>
    %cst_87 = arith.constant 1.000000e+09 : f32
    %252 = vector.broadcast %cst_87 : f32 to vector<128x128xf32>
    %253 = arith.select %251, %44, %252 : vector<128x128xi1>, vector<128x128xf32>
    %cst_88 = arith.constant dense<0x7F800000> : vector<128xf32>
    %254 = vector.multi_reduction <minimumf>, %253, %cst_88 [1] : vector<128x128xf32> to vector<128xf32>
    %255 = vector.shape_cast %254 : vector<128xf32> to vector<128x1xf32>
    %256 = arith.minimumf %249, %255 : vector<128x1xf32>
    %257 = vector.broadcast %256 : vector<128x1xf32> to vector<128x128xf32>
    %258 = arith.cmpf oeq, %37, %257 : vector<128x128xf32>
    %cst_89 = arith.constant 1.000000e+30 : f32
    %259 = vector.broadcast %cst_89 : f32 to vector<128x128xf32>
    %260 = arith.select %258, %259, %238 : vector<128x128xi1>, vector<128x128xf32>
    %c0_90 = arith.constant 0 : index
    %c0_91 = arith.constant 0 : index
    %261 = vector.load %arg7[%c0_90, %c0_91] : memref<128x128xf32, #tpu.memory_space<vmem>>, vector<128x128xf32>
    tpu.vector_store %arg7[%c0_90, %c0_91], %260 {strides = array<i32>} : memref<128x128xf32, #tpu.memory_space<vmem>>, vector<128x128xf32>,
    %262 = vector.broadcast %256 : vector<128x1xf32> to vector<128x128xf32>
    %263 = arith.cmpf oeq, %44, %262 : vector<128x128xf32>
    %cst_92 = arith.constant 1.000000e+30 : f32
    %264 = vector.broadcast %cst_92 : f32 to vector<128x128xf32>
    %265 = arith.select %263, %264, %227 : vector<128x128xi1>, vector<128x128xf32>
    %c5_i32 = arith.constant 5 : i32
    %266 = vector.broadcast %c5_i32 : i32 to vector<128x128xi32>
    %267 = arith.cmpi eq, %45, %266 : vector<128x128xi32>
    %268 = vector.shape_cast %243 : vector<128x1xf32> to vector<128x1xf32>
    %269 = vector.broadcast %268 : vector<128x1xf32> to vector<128x128xf32>
    %270 = arith.select %267, %269, %232 : vector<128x128xi1>, vector<128x128xf32>
    %c5_i32_93 = arith.constant 5 : i32
    %271 = vector.broadcast %c5_i32_93 : i32 to vector<128x128xi32>
    %272 = arith.cmpi eq, %45, %271 : vector<128x128xi32>
    %273 = vector.shape_cast %256 : vector<128x1xf32> to vector<128x1xf32>
    %274 = vector.broadcast %273 : vector<128x1xf32> to vector<128x128xf32>
    %275 = arith.select %272, %274, %237 : vector<128x128xi1>, vector<128x128xf32>
    %c0_94 = arith.constant 0 : index
    %c0_95 = arith.constant 0 : index
    %276 = vector.load %arg7[%c0_94, %c0_95] : memref<128x128xf32, #tpu.memory_space<vmem>>, vector<128x128xf32>
    %cst_96 = arith.constant dense<0x7F800000> : vector<128xf32>
    %277 = vector.multi_reduction <minimumf>, %276, %cst_96 [1] : vector<128x128xf32> to vector<128xf32>
    %278 = vector.shape_cast %277 : vector<128xf32> to vector<128x1xf32>
    %cst_97 = arith.constant dense<0x7F800000> : vector<128xf32>
    %279 = vector.multi_reduction <minimumf>, %265, %cst_97 [1] : vector<128x128xf32> to vector<128xf32>
    %280 = vector.shape_cast %279 : vector<128xf32> to vector<128x1xf32>
    %281 = arith.minimumf %278, %280 : vector<128x1xf32>
    %282 = vector.broadcast %281 : vector<128x1xf32> to vector<128x128xf32>
    %283 = arith.cmpf oeq, %276, %282 : vector<128x128xf32>
    %cst_98 = arith.constant 1.000000e+09 : f32
    %284 = vector.broadcast %cst_98 : f32 to vector<128x128xf32>
    %285 = arith.select %283, %37, %284 : vector<128x128xi1>, vector<128x128xf32>
    %cst_99 = arith.constant dense<0x7F800000> : vector<128xf32>
    %286 = vector.multi_reduction <minimumf>, %285, %cst_99 [1] : vector<128x128xf32> to vector<128xf32>
    %287 = vector.shape_cast %286 : vector<128xf32> to vector<128x1xf32>
    %288 = vector.broadcast %281 : vector<128x1xf32> to vector<128x128xf32>
    %289 = arith.cmpf oeq, %265, %288 : vector<128x128xf32>
    %cst_100 = arith.constant 1.000000e+09 : f32
    %290 = vector.broadcast %cst_100 : f32 to vector<128x128xf32>
    %291 = arith.select %289, %44, %290 : vector<128x128xi1>, vector<128x128xf32>
    %cst_101 = arith.constant dense<0x7F800000> : vector<128xf32>
    %292 = vector.multi_reduction <minimumf>, %291, %cst_101 [1] : vector<128x128xf32> to vector<128xf32>
    %293 = vector.shape_cast %292 : vector<128xf32> to vector<128x1xf32>
    %294 = arith.minimumf %287, %293 : vector<128x1xf32>
    %295 = vector.broadcast %294 : vector<128x1xf32> to vector<128x128xf32>
    %296 = arith.cmpf oeq, %37, %295 : vector<128x128xf32>
    %cst_102 = arith.constant 1.000000e+30 : f32
    %297 = vector.broadcast %cst_102 : f32 to vector<128x128xf32>
    %298 = arith.select %296, %297, %276 : vector<128x128xi1>, vector<128x128xf32>
    %c0_103 = arith.constant 0 : index
    %c0_104 = arith.constant 0 : index
    %299 = vector.load %arg7[%c0_103, %c0_104] : memref<128x128xf32, #tpu.memory_space<vmem>>, vector<128x128xf32>
    tpu.vector_store %arg7[%c0_103, %c0_104], %298 {strides = array<i32>} : memref<128x128xf32, #tpu.memory_space<vmem>>, vector<128x128xf32>,
    %300 = vector.broadcast %294 : vector<128x1xf32> to vector<128x128xf32>
    %301 = arith.cmpf oeq, %44, %300 : vector<128x128xf32>
    %cst_105 = arith.constant 1.000000e+30 : f32
    %302 = vector.broadcast %cst_105 : f32 to vector<128x128xf32>
    %303 = arith.select %301, %302, %265 : vector<128x128xi1>, vector<128x128xf32>
    %c6_i32 = arith.constant 6 : i32
    %304 = vector.broadcast %c6_i32 : i32 to vector<128x128xi32>
    %305 = arith.cmpi eq, %45, %304 : vector<128x128xi32>
    %306 = vector.shape_cast %281 : vector<128x1xf32> to vector<128x1xf32>
    %307 = vector.broadcast %306 : vector<128x1xf32> to vector<128x128xf32>
    %308 = arith.select %305, %307, %270 : vector<128x128xi1>, vector<128x128xf32>
    %c6_i32_106 = arith.constant 6 : i32
    %309 = vector.broadcast %c6_i32_106 : i32 to vector<128x128xi32>
    %310 = arith.cmpi eq, %45, %309 : vector<128x128xi32>
    %311 = vector.shape_cast %294 : vector<128x1xf32> to vector<128x1xf32>
    %312 = vector.broadcast %311 : vector<128x1xf32> to vector<128x128xf32>
    %313 = arith.select %310, %312, %275 : vector<128x128xi1>, vector<128x128xf32>
    %c0_107 = arith.constant 0 : index
    %c0_108 = arith.constant 0 : index
    %314 = vector.load %arg7[%c0_107, %c0_108] : memref<128x128xf32, #tpu.memory_space<vmem>>, vector<128x128xf32>
    %cst_109 = arith.constant dense<0x7F800000> : vector<128xf32>
    %315 = vector.multi_reduction <minimumf>, %314, %cst_109 [1] : vector<128x128xf32> to vector<128xf32>
    %316 = vector.shape_cast %315 : vector<128xf32> to vector<128x1xf32>
    %cst_110 = arith.constant dense<0x7F800000> : vector<128xf32>
    %317 = vector.multi_reduction <minimumf>, %303, %cst_110 [1] : vector<128x128xf32> to vector<128xf32>
    %318 = vector.shape_cast %317 : vector<128xf32> to vector<128x1xf32>
    %319 = arith.minimumf %316, %318 : vector<128x1xf32>
    %320 = vector.broadcast %319 : vector<128x1xf32> to vector<128x128xf32>
    %321 = arith.cmpf oeq, %314, %320 : vector<128x128xf32>
    %cst_111 = arith.constant 1.000000e+09 : f32
    %322 = vector.broadcast %cst_111 : f32 to vector<128x128xf32>
    %323 = arith.select %321, %37, %322 : vector<128x128xi1>, vector<128x128xf32>
    %cst_112 = arith.constant dense<0x7F800000> : vector<128xf32>
    %324 = vector.multi_reduction <minimumf>, %323, %cst_112 [1] : vector<128x128xf32> to vector<128xf32>
    %325 = vector.shape_cast %324 : vector<128xf32> to vector<128x1xf32>
    %326 = vector.broadcast %319 : vector<128x1xf32> to vector<128x128xf32>
    %327 = arith.cmpf oeq, %303, %326 : vector<128x128xf32>
    %cst_113 = arith.constant 1.000000e+09 : f32
    %328 = vector.broadcast %cst_113 : f32 to vector<128x128xf32>
    %329 = arith.select %327, %44, %328 : vector<128x128xi1>, vector<128x128xf32>
    %cst_114 = arith.constant dense<0x7F800000> : vector<128xf32>
    %330 = vector.multi_reduction <minimumf>, %329, %cst_114 [1] : vector<128x128xf32> to vector<128xf32>
    %331 = vector.shape_cast %330 : vector<128xf32> to vector<128x1xf32>
    %332 = arith.minimumf %325, %331 : vector<128x1xf32>
    %333 = vector.broadcast %332 : vector<128x1xf32> to vector<128x128xf32>
    %334 = arith.cmpf oeq, %37, %333 : vector<128x128xf32>
    %cst_115 = arith.constant 1.000000e+30 : f32
    %335 = vector.broadcast %cst_115 : f32 to vector<128x128xf32>
    %336 = arith.select %334, %335, %314 : vector<128x128xi1>, vector<128x128xf32>
    %c0_116 = arith.constant 0 : index
    %c0_117 = arith.constant 0 : index
    %337 = vector.load %arg7[%c0_116, %c0_117] : memref<128x128xf32, #tpu.memory_space<vmem>>, vector<128x128xf32>
    tpu.vector_store %arg7[%c0_116, %c0_117], %336 {strides = array<i32>} : memref<128x128xf32, #tpu.memory_space<vmem>>, vector<128x128xf32>,
    %338 = vector.broadcast %332 : vector<128x1xf32> to vector<128x128xf32>
    %339 = arith.cmpf oeq, %44, %338 : vector<128x128xf32>
    %cst_118 = arith.constant 1.000000e+30 : f32
    %340 = vector.broadcast %cst_118 : f32 to vector<128x128xf32>
    %341 = arith.select %339, %340, %303 : vector<128x128xi1>, vector<128x128xf32>
    %c7_i32 = arith.constant 7 : i32
    %342 = vector.broadcast %c7_i32 : i32 to vector<128x128xi32>
    %343 = arith.cmpi eq, %45, %342 : vector<128x128xi32>
    %344 = vector.shape_cast %319 : vector<128x1xf32> to vector<128x1xf32>
    %345 = vector.broadcast %344 : vector<128x1xf32> to vector<128x128xf32>
    %346 = arith.select %343, %345, %308 : vector<128x128xi1>, vector<128x128xf32>
    %c7_i32_119 = arith.constant 7 : i32
    %347 = vector.broadcast %c7_i32_119 : i32 to vector<128x128xi32>
    %348 = arith.cmpi eq, %45, %347 : vector<128x128xi32>
    %349 = vector.shape_cast %332 : vector<128x1xf32> to vector<128x1xf32>
    %350 = vector.broadcast %349 : vector<128x1xf32> to vector<128x128xf32>
    %351 = arith.select %348, %350, %313 : vector<128x128xi1>, vector<128x128xf32>
    %c0_120 = arith.constant 0 : index
    %c0_121 = arith.constant 0 : index
    %352 = vector.load %arg7[%c0_120, %c0_121] : memref<128x128xf32, #tpu.memory_space<vmem>>, vector<128x128xf32>
    %cst_122 = arith.constant dense<0x7F800000> : vector<128xf32>
    %353 = vector.multi_reduction <minimumf>, %352, %cst_122 [1] : vector<128x128xf32> to vector<128xf32>
    %354 = vector.shape_cast %353 : vector<128xf32> to vector<128x1xf32>
    %cst_123 = arith.constant dense<0x7F800000> : vector<128xf32>
    %355 = vector.multi_reduction <minimumf>, %341, %cst_123 [1] : vector<128x128xf32> to vector<128xf32>
    %356 = vector.shape_cast %355 : vector<128xf32> to vector<128x1xf32>
    %357 = arith.minimumf %354, %356 : vector<128x1xf32>
    %358 = vector.broadcast %357 : vector<128x1xf32> to vector<128x128xf32>
    %359 = arith.cmpf oeq, %352, %358 : vector<128x128xf32>
    %cst_124 = arith.constant 1.000000e+09 : f32
    %360 = vector.broadcast %cst_124 : f32 to vector<128x128xf32>
    %361 = arith.select %359, %37, %360 : vector<128x128xi1>, vector<128x128xf32>
    %cst_125 = arith.constant dense<0x7F800000> : vector<128xf32>
    %362 = vector.multi_reduction <minimumf>, %361, %cst_125 [1] : vector<128x128xf32> to vector<128xf32>
    %363 = vector.shape_cast %362 : vector<128xf32> to vector<128x1xf32>
    %364 = vector.broadcast %357 : vector<128x1xf32> to vector<128x128xf32>
    %365 = arith.cmpf oeq, %341, %364 : vector<128x128xf32>
    %cst_126 = arith.constant 1.000000e+09 : f32
    %366 = vector.broadcast %cst_126 : f32 to vector<128x128xf32>
    %367 = arith.select %365, %44, %366 : vector<128x128xi1>, vector<128x128xf32>
    %cst_127 = arith.constant dense<0x7F800000> : vector<128xf32>
    %368 = vector.multi_reduction <minimumf>, %367, %cst_127 [1] : vector<128x128xf32> to vector<128xf32>
    %369 = vector.shape_cast %368 : vector<128xf32> to vector<128x1xf32>
    %370 = arith.minimumf %363, %369 : vector<128x1xf32>
    %371 = vector.broadcast %370 : vector<128x1xf32> to vector<128x128xf32>
    %372 = arith.cmpf oeq, %37, %371 : vector<128x128xf32>
    %cst_128 = arith.constant 1.000000e+30 : f32
    %373 = vector.broadcast %cst_128 : f32 to vector<128x128xf32>
    %374 = arith.select %372, %373, %352 : vector<128x128xi1>, vector<128x128xf32>
    %c0_129 = arith.constant 0 : index
    %c0_130 = arith.constant 0 : index
    %375 = vector.load %arg7[%c0_129, %c0_130] : memref<128x128xf32, #tpu.memory_space<vmem>>, vector<128x128xf32>
    tpu.vector_store %arg7[%c0_129, %c0_130], %374 {strides = array<i32>} : memref<128x128xf32, #tpu.memory_space<vmem>>, vector<128x128xf32>,
    %376 = vector.broadcast %370 : vector<128x1xf32> to vector<128x128xf32>
    %377 = arith.cmpf oeq, %44, %376 : vector<128x128xf32>
    %cst_131 = arith.constant 1.000000e+30 : f32
    %378 = vector.broadcast %cst_131 : f32 to vector<128x128xf32>
    %379 = arith.select %377, %378, %341 : vector<128x128xi1>, vector<128x128xf32>
    %c8_i32 = arith.constant 8 : i32
    %380 = vector.broadcast %c8_i32 : i32 to vector<128x128xi32>
    %381 = arith.cmpi eq, %45, %380 : vector<128x128xi32>
    %382 = vector.shape_cast %357 : vector<128x1xf32> to vector<128x1xf32>
    %383 = vector.broadcast %382 : vector<128x1xf32> to vector<128x128xf32>
    %384 = arith.select %381, %383, %346 : vector<128x128xi1>, vector<128x128xf32>
    %c8_i32_132 = arith.constant 8 : i32
    %385 = vector.broadcast %c8_i32_132 : i32 to vector<128x128xi32>
    %386 = arith.cmpi eq, %45, %385 : vector<128x128xi32>
    %387 = vector.shape_cast %370 : vector<128x1xf32> to vector<128x1xf32>
    %388 = vector.broadcast %387 : vector<128x1xf32> to vector<128x128xf32>
    %389 = arith.select %386, %388, %351 : vector<128x128xi1>, vector<128x128xf32>
    %c0_133 = arith.constant 0 : index
    %c0_134 = arith.constant 0 : index
    %390 = vector.load %arg7[%c0_133, %c0_134] : memref<128x128xf32, #tpu.memory_space<vmem>>, vector<128x128xf32>
    %cst_135 = arith.constant dense<0x7F800000> : vector<128xf32>
    %391 = vector.multi_reduction <minimumf>, %390, %cst_135 [1] : vector<128x128xf32> to vector<128xf32>
    %392 = vector.shape_cast %391 : vector<128xf32> to vector<128x1xf32>
    %cst_136 = arith.constant dense<0x7F800000> : vector<128xf32>
    %393 = vector.multi_reduction <minimumf>, %379, %cst_136 [1] : vector<128x128xf32> to vector<128xf32>
    %394 = vector.shape_cast %393 : vector<128xf32> to vector<128x1xf32>
    %395 = arith.minimumf %392, %394 : vector<128x1xf32>
    %396 = vector.broadcast %395 : vector<128x1xf32> to vector<128x128xf32>
    %397 = arith.cmpf oeq, %390, %396 : vector<128x128xf32>
    %cst_137 = arith.constant 1.000000e+09 : f32
    %398 = vector.broadcast %cst_137 : f32 to vector<128x128xf32>
    %399 = arith.select %397, %37, %398 : vector<128x128xi1>, vector<128x128xf32>
    %cst_138 = arith.constant dense<0x7F800000> : vector<128xf32>
    %400 = vector.multi_reduction <minimumf>, %399, %cst_138 [1] : vector<128x128xf32> to vector<128xf32>
    %401 = vector.shape_cast %400 : vector<128xf32> to vector<128x1xf32>
    %402 = vector.broadcast %395 : vector<128x1xf32> to vector<128x128xf32>
    %403 = arith.cmpf oeq, %379, %402 : vector<128x128xf32>
    %cst_139 = arith.constant 1.000000e+09 : f32
    %404 = vector.broadcast %cst_139 : f32 to vector<128x128xf32>
    %405 = arith.select %403, %44, %404 : vector<128x128xi1>, vector<128x128xf32>
    %cst_140 = arith.constant dense<0x7F800000> : vector<128xf32>
    %406 = vector.multi_reduction <minimumf>, %405, %cst_140 [1] : vector<128x128xf32> to vector<128xf32>
    %407 = vector.shape_cast %406 : vector<128xf32> to vector<128x1xf32>
    %408 = arith.minimumf %401, %407 : vector<128x1xf32>
    %409 = vector.broadcast %408 : vector<128x1xf32> to vector<128x128xf32>
    %410 = arith.cmpf oeq, %37, %409 : vector<128x128xf32>
    %cst_141 = arith.constant 1.000000e+30 : f32
    %411 = vector.broadcast %cst_141 : f32 to vector<128x128xf32>
    %412 = arith.select %410, %411, %390 : vector<128x128xi1>, vector<128x128xf32>
    %c0_142 = arith.constant 0 : index
    %c0_143 = arith.constant 0 : index
    %413 = vector.load %arg7[%c0_142, %c0_143] : memref<128x128xf32, #tpu.memory_space<vmem>>, vector<128x128xf32>
    tpu.vector_store %arg7[%c0_142, %c0_143], %412 {strides = array<i32>} : memref<128x128xf32, #tpu.memory_space<vmem>>, vector<128x128xf32>,
    %414 = vector.broadcast %408 : vector<128x1xf32> to vector<128x128xf32>
    %415 = arith.cmpf oeq, %44, %414 : vector<128x128xf32>
    %cst_144 = arith.constant 1.000000e+30 : f32
    %416 = vector.broadcast %cst_144 : f32 to vector<128x128xf32>
    %417 = arith.select %415, %416, %379 : vector<128x128xi1>, vector<128x128xf32>
    %c9_i32 = arith.constant 9 : i32
    %418 = vector.broadcast %c9_i32 : i32 to vector<128x128xi32>
    %419 = arith.cmpi eq, %45, %418 : vector<128x128xi32>
    %420 = vector.shape_cast %395 : vector<128x1xf32> to vector<128x1xf32>
    %421 = vector.broadcast %420 : vector<128x1xf32> to vector<128x128xf32>
    %422 = arith.select %419, %421, %384 : vector<128x128xi1>, vector<128x128xf32>
    %c9_i32_145 = arith.constant 9 : i32
    %423 = vector.broadcast %c9_i32_145 : i32 to vector<128x128xi32>
    %424 = arith.cmpi eq, %45, %423 : vector<128x128xi32>
    %425 = vector.shape_cast %408 : vector<128x1xf32> to vector<128x1xf32>
    %426 = vector.broadcast %425 : vector<128x1xf32> to vector<128x128xf32>
    %427 = arith.select %424, %426, %389 : vector<128x128xi1>, vector<128x128xf32>
    %c0_146 = arith.constant 0 : index
    %c0_147 = arith.constant 0 : index
    %428 = vector.load %arg7[%c0_146, %c0_147] : memref<128x128xf32, #tpu.memory_space<vmem>>, vector<128x128xf32>
    %cst_148 = arith.constant dense<0x7F800000> : vector<128xf32>
    %429 = vector.multi_reduction <minimumf>, %428, %cst_148 [1] : vector<128x128xf32> to vector<128xf32>
    %430 = vector.shape_cast %429 : vector<128xf32> to vector<128x1xf32>
    %cst_149 = arith.constant dense<0x7F800000> : vector<128xf32>
    %431 = vector.multi_reduction <minimumf>, %417, %cst_149 [1] : vector<128x128xf32> to vector<128xf32>
    %432 = vector.shape_cast %431 : vector<128xf32> to vector<128x1xf32>
    %433 = arith.minimumf %430, %432 : vector<128x1xf32>
    %434 = vector.broadcast %433 : vector<128x1xf32> to vector<128x128xf32>
    %435 = arith.cmpf oeq, %428, %434 : vector<128x128xf32>
    %cst_150 = arith.constant 1.000000e+09 : f32
    %436 = vector.broadcast %cst_150 : f32 to vector<128x128xf32>
    %437 = arith.select %435, %37, %436 : vector<128x128xi1>, vector<128x128xf32>
    %cst_151 = arith.constant dense<0x7F800000> : vector<128xf32>
    %438 = vector.multi_reduction <minimumf>, %437, %cst_151 [1] : vector<128x128xf32> to vector<128xf32>
    %439 = vector.shape_cast %438 : vector<128xf32> to vector<128x1xf32>
    %440 = vector.broadcast %433 : vector<128x1xf32> to vector<128x128xf32>
    %441 = arith.cmpf oeq, %417, %440 : vector<128x128xf32>
    %cst_152 = arith.constant 1.000000e+09 : f32
    %442 = vector.broadcast %cst_152 : f32 to vector<128x128xf32>
    %443 = arith.select %441, %44, %442 : vector<128x128xi1>, vector<128x128xf32>
    %cst_153 = arith.constant dense<0x7F800000> : vector<128xf32>
    %444 = vector.multi_reduction <minimumf>, %443, %cst_153 [1] : vector<128x128xf32> to vector<128xf32>
    %445 = vector.shape_cast %444 : vector<128xf32> to vector<128x1xf32>
    %446 = arith.minimumf %439, %445 : vector<128x1xf32>
    %447 = vector.broadcast %446 : vector<128x1xf32> to vector<128x128xf32>
    %448 = arith.cmpf oeq, %37, %447 : vector<128x128xf32>
    %cst_154 = arith.constant 1.000000e+30 : f32
    %449 = vector.broadcast %cst_154 : f32 to vector<128x128xf32>
    %450 = arith.select %448, %449, %428 : vector<128x128xi1>, vector<128x128xf32>
    %c0_155 = arith.constant 0 : index
    %c0_156 = arith.constant 0 : index
    %451 = vector.load %arg7[%c0_155, %c0_156] : memref<128x128xf32, #tpu.memory_space<vmem>>, vector<128x128xf32>
    tpu.vector_store %arg7[%c0_155, %c0_156], %450 {strides = array<i32>} : memref<128x128xf32, #tpu.memory_space<vmem>>, vector<128x128xf32>,
    %452 = vector.broadcast %446 : vector<128x1xf32> to vector<128x128xf32>
    %453 = arith.cmpf oeq, %44, %452 : vector<128x128xf32>
    %cst_157 = arith.constant 1.000000e+30 : f32
    %454 = vector.broadcast %cst_157 : f32 to vector<128x128xf32>
    %455 = arith.select %453, %454, %417 : vector<128x128xi1>, vector<128x128xf32>
    %c10_i32 = arith.constant 10 : i32
    %456 = vector.broadcast %c10_i32 : i32 to vector<128x128xi32>
    %457 = arith.cmpi eq, %45, %456 : vector<128x128xi32>
    %458 = vector.shape_cast %433 : vector<128x1xf32> to vector<128x1xf32>
    %459 = vector.broadcast %458 : vector<128x1xf32> to vector<128x128xf32>
    %460 = arith.select %457, %459, %422 : vector<128x128xi1>, vector<128x128xf32>
    %c10_i32_158 = arith.constant 10 : i32
    %461 = vector.broadcast %c10_i32_158 : i32 to vector<128x128xi32>
    %462 = arith.cmpi eq, %45, %461 : vector<128x128xi32>
    %463 = vector.shape_cast %446 : vector<128x1xf32> to vector<128x1xf32>
    %464 = vector.broadcast %463 : vector<128x1xf32> to vector<128x128xf32>
    %465 = arith.select %462, %464, %427 : vector<128x128xi1>, vector<128x128xf32>
    %c0_159 = arith.constant 0 : index
    %c0_160 = arith.constant 0 : index
    %466 = vector.load %arg7[%c0_159, %c0_160] : memref<128x128xf32, #tpu.memory_space<vmem>>, vector<128x128xf32>
    %cst_161 = arith.constant dense<0x7F800000> : vector<128xf32>
    %467 = vector.multi_reduction <minimumf>, %466, %cst_161 [1] : vector<128x128xf32> to vector<128xf32>
    %468 = vector.shape_cast %467 : vector<128xf32> to vector<128x1xf32>
    %cst_162 = arith.constant dense<0x7F800000> : vector<128xf32>
    %469 = vector.multi_reduction <minimumf>, %455, %cst_162 [1] : vector<128x128xf32> to vector<128xf32>
    %470 = vector.shape_cast %469 : vector<128xf32> to vector<128x1xf32>
    %471 = arith.minimumf %468, %470 : vector<128x1xf32>
    %472 = vector.broadcast %471 : vector<128x1xf32> to vector<128x128xf32>
    %473 = arith.cmpf oeq, %466, %472 : vector<128x128xf32>
    %cst_163 = arith.constant 1.000000e+09 : f32
    %474 = vector.broadcast %cst_163 : f32 to vector<128x128xf32>
    %475 = arith.select %473, %37, %474 : vector<128x128xi1>, vector<128x128xf32>
    %cst_164 = arith.constant dense<0x7F800000> : vector<128xf32>
    %476 = vector.multi_reduction <minimumf>, %475, %cst_164 [1] : vector<128x128xf32> to vector<128xf32>
    %477 = vector.shape_cast %476 : vector<128xf32> to vector<128x1xf32>
    %478 = vector.broadcast %471 : vector<128x1xf32> to vector<128x128xf32>
    %479 = arith.cmpf oeq, %455, %478 : vector<128x128xf32>
    %cst_165 = arith.constant 1.000000e+09 : f32
    %480 = vector.broadcast %cst_165 : f32 to vector<128x128xf32>
    %481 = arith.select %479, %44, %480 : vector<128x128xi1>, vector<128x128xf32>
    %cst_166 = arith.constant dense<0x7F800000> : vector<128xf32>
    %482 = vector.multi_reduction <minimumf>, %481, %cst_166 [1] : vector<128x128xf32> to vector<128xf32>
    %483 = vector.shape_cast %482 : vector<128xf32> to vector<128x1xf32>
    %484 = arith.minimumf %477, %483 : vector<128x1xf32>
    %485 = vector.broadcast %484 : vector<128x1xf32> to vector<128x128xf32>
    %486 = arith.cmpf oeq, %37, %485 : vector<128x128xf32>
    %cst_167 = arith.constant 1.000000e+30 : f32
    %487 = vector.broadcast %cst_167 : f32 to vector<128x128xf32>
    %488 = arith.select %486, %487, %466 : vector<128x128xi1>, vector<128x128xf32>
    %c0_168 = arith.constant 0 : index
    %c0_169 = arith.constant 0 : index
    %489 = vector.load %arg7[%c0_168, %c0_169] : memref<128x128xf32, #tpu.memory_space<vmem>>, vector<128x128xf32>
    tpu.vector_store %arg7[%c0_168, %c0_169], %488 {strides = array<i32>} : memref<128x128xf32, #tpu.memory_space<vmem>>, vector<128x128xf32>,
    %490 = vector.broadcast %484 : vector<128x1xf32> to vector<128x128xf32>
    %491 = arith.cmpf oeq, %44, %490 : vector<128x128xf32>
    %cst_170 = arith.constant 1.000000e+30 : f32
    %492 = vector.broadcast %cst_170 : f32 to vector<128x128xf32>
    %493 = arith.select %491, %492, %455 : vector<128x128xi1>, vector<128x128xf32>
    %c11_i32 = arith.constant 11 : i32
    %494 = vector.broadcast %c11_i32 : i32 to vector<128x128xi32>
    %495 = arith.cmpi eq, %45, %494 : vector<128x128xi32>
    %496 = vector.shape_cast %471 : vector<128x1xf32> to vector<128x1xf32>
    %497 = vector.broadcast %496 : vector<128x1xf32> to vector<128x128xf32>
    %498 = arith.select %495, %497, %460 : vector<128x128xi1>, vector<128x128xf32>
    %c11_i32_171 = arith.constant 11 : i32
    %499 = vector.broadcast %c11_i32_171 : i32 to vector<128x128xi32>
    %500 = arith.cmpi eq, %45, %499 : vector<128x128xi32>
    %501 = vector.shape_cast %484 : vector<128x1xf32> to vector<128x1xf32>
    %502 = vector.broadcast %501 : vector<128x1xf32> to vector<128x128xf32>
    %503 = arith.select %500, %502, %465 : vector<128x128xi1>, vector<128x128xf32>
    %c0_172 = arith.constant 0 : index
    %c0_173 = arith.constant 0 : index
    %504 = vector.load %arg7[%c0_172, %c0_173] : memref<128x128xf32, #tpu.memory_space<vmem>>, vector<128x128xf32>
    %cst_174 = arith.constant dense<0x7F800000> : vector<128xf32>
    %505 = vector.multi_reduction <minimumf>, %504, %cst_174 [1] : vector<128x128xf32> to vector<128xf32>
    %506 = vector.shape_cast %505 : vector<128xf32> to vector<128x1xf32>
    %cst_175 = arith.constant dense<0x7F800000> : vector<128xf32>
    %507 = vector.multi_reduction <minimumf>, %493, %cst_175 [1] : vector<128x128xf32> to vector<128xf32>
    %508 = vector.shape_cast %507 : vector<128xf32> to vector<128x1xf32>
    %509 = arith.minimumf %506, %508 : vector<128x1xf32>
    %510 = vector.broadcast %509 : vector<128x1xf32> to vector<128x128xf32>
    %511 = arith.cmpf oeq, %504, %510 : vector<128x128xf32>
    %cst_176 = arith.constant 1.000000e+09 : f32
    %512 = vector.broadcast %cst_176 : f32 to vector<128x128xf32>
    %513 = arith.select %511, %37, %512 : vector<128x128xi1>, vector<128x128xf32>
    %cst_177 = arith.constant dense<0x7F800000> : vector<128xf32>
    %514 = vector.multi_reduction <minimumf>, %513, %cst_177 [1] : vector<128x128xf32> to vector<128xf32>
    %515 = vector.shape_cast %514 : vector<128xf32> to vector<128x1xf32>
    %516 = vector.broadcast %509 : vector<128x1xf32> to vector<128x128xf32>
    %517 = arith.cmpf oeq, %493, %516 : vector<128x128xf32>
    %cst_178 = arith.constant 1.000000e+09 : f32
    %518 = vector.broadcast %cst_178 : f32 to vector<128x128xf32>
    %519 = arith.select %517, %44, %518 : vector<128x128xi1>, vector<128x128xf32>
    %cst_179 = arith.constant dense<0x7F800000> : vector<128xf32>
    %520 = vector.multi_reduction <minimumf>, %519, %cst_179 [1] : vector<128x128xf32> to vector<128xf32>
    %521 = vector.shape_cast %520 : vector<128xf32> to vector<128x1xf32>
    %522 = arith.minimumf %515, %521 : vector<128x1xf32>
    %523 = vector.broadcast %522 : vector<128x1xf32> to vector<128x128xf32>
    %524 = arith.cmpf oeq, %37, %523 : vector<128x128xf32>
    %cst_180 = arith.constant 1.000000e+30 : f32
    %525 = vector.broadcast %cst_180 : f32 to vector<128x128xf32>
    %526 = arith.select %524, %525, %504 : vector<128x128xi1>, vector<128x128xf32>
    %c0_181 = arith.constant 0 : index
    %c0_182 = arith.constant 0 : index
    %527 = vector.load %arg7[%c0_181, %c0_182] : memref<128x128xf32, #tpu.memory_space<vmem>>, vector<128x128xf32>
    tpu.vector_store %arg7[%c0_181, %c0_182], %526 {strides = array<i32>} : memref<128x128xf32, #tpu.memory_space<vmem>>, vector<128x128xf32>,
    %528 = vector.broadcast %522 : vector<128x1xf32> to vector<128x128xf32>
    %529 = arith.cmpf oeq, %44, %528 : vector<128x128xf32>
    %cst_183 = arith.constant 1.000000e+30 : f32
    %530 = vector.broadcast %cst_183 : f32 to vector<128x128xf32>
    %531 = arith.select %529, %530, %493 : vector<128x128xi1>, vector<128x128xf32>
    %c12_i32 = arith.constant 12 : i32
    %532 = vector.broadcast %c12_i32 : i32 to vector<128x128xi32>
    %533 = arith.cmpi eq, %45, %532 : vector<128x128xi32>
    %534 = vector.shape_cast %509 : vector<128x1xf32> to vector<128x1xf32>
    %535 = vector.broadcast %534 : vector<128x1xf32> to vector<128x128xf32>
    %536 = arith.select %533, %535, %498 : vector<128x128xi1>, vector<128x128xf32>
    %c12_i32_184 = arith.constant 12 : i32
    %537 = vector.broadcast %c12_i32_184 : i32 to vector<128x128xi32>
    %538 = arith.cmpi eq, %45, %537 : vector<128x128xi32>
    %539 = vector.shape_cast %522 : vector<128x1xf32> to vector<128x1xf32>
    %540 = vector.broadcast %539 : vector<128x1xf32> to vector<128x128xf32>
    %541 = arith.select %538, %540, %503 : vector<128x128xi1>, vector<128x128xf32>
    %c0_185 = arith.constant 0 : index
    %c0_186 = arith.constant 0 : index
    %542 = vector.load %arg7[%c0_185, %c0_186] : memref<128x128xf32, #tpu.memory_space<vmem>>, vector<128x128xf32>
    %cst_187 = arith.constant dense<0x7F800000> : vector<128xf32>
    %543 = vector.multi_reduction <minimumf>, %542, %cst_187 [1] : vector<128x128xf32> to vector<128xf32>
    %544 = vector.shape_cast %543 : vector<128xf32> to vector<128x1xf32>
    %cst_188 = arith.constant dense<0x7F800000> : vector<128xf32>
    %545 = vector.multi_reduction <minimumf>, %531, %cst_188 [1] : vector<128x128xf32> to vector<128xf32>
    %546 = vector.shape_cast %545 : vector<128xf32> to vector<128x1xf32>
    %547 = arith.minimumf %544, %546 : vector<128x1xf32>
    %548 = vector.broadcast %547 : vector<128x1xf32> to vector<128x128xf32>
    %549 = arith.cmpf oeq, %542, %548 : vector<128x128xf32>
    %cst_189 = arith.constant 1.000000e+09 : f32
    %550 = vector.broadcast %cst_189 : f32 to vector<128x128xf32>
    %551 = arith.select %549, %37, %550 : vector<128x128xi1>, vector<128x128xf32>
    %cst_190 = arith.constant dense<0x7F800000> : vector<128xf32>
    %552 = vector.multi_reduction <minimumf>, %551, %cst_190 [1] : vector<128x128xf32> to vector<128xf32>
    %553 = vector.shape_cast %552 : vector<128xf32> to vector<128x1xf32>
    %554 = vector.broadcast %547 : vector<128x1xf32> to vector<128x128xf32>
    %555 = arith.cmpf oeq, %531, %554 : vector<128x128xf32>
    %cst_191 = arith.constant 1.000000e+09 : f32
    %556 = vector.broadcast %cst_191 : f32 to vector<128x128xf32>
    %557 = arith.select %555, %44, %556 : vector<128x128xi1>, vector<128x128xf32>
    %cst_192 = arith.constant dense<0x7F800000> : vector<128xf32>
    %558 = vector.multi_reduction <minimumf>, %557, %cst_192 [1] : vector<128x128xf32> to vector<128xf32>
    %559 = vector.shape_cast %558 : vector<128xf32> to vector<128x1xf32>
    %560 = arith.minimumf %553, %559 : vector<128x1xf32>
    %561 = vector.broadcast %560 : vector<128x1xf32> to vector<128x128xf32>
    %562 = arith.cmpf oeq, %37, %561 : vector<128x128xf32>
    %cst_193 = arith.constant 1.000000e+30 : f32
    %563 = vector.broadcast %cst_193 : f32 to vector<128x128xf32>
    %564 = arith.select %562, %563, %542 : vector<128x128xi1>, vector<128x128xf32>
    %c0_194 = arith.constant 0 : index
    %c0_195 = arith.constant 0 : index
    %565 = vector.load %arg7[%c0_194, %c0_195] : memref<128x128xf32, #tpu.memory_space<vmem>>, vector<128x128xf32>
    tpu.vector_store %arg7[%c0_194, %c0_195], %564 {strides = array<i32>} : memref<128x128xf32, #tpu.memory_space<vmem>>, vector<128x128xf32>,
    %566 = vector.broadcast %560 : vector<128x1xf32> to vector<128x128xf32>
    %567 = arith.cmpf oeq, %44, %566 : vector<128x128xf32>
    %cst_196 = arith.constant 1.000000e+30 : f32
    %568 = vector.broadcast %cst_196 : f32 to vector<128x128xf32>
    %569 = arith.select %567, %568, %531 : vector<128x128xi1>, vector<128x128xf32>
    %c13_i32 = arith.constant 13 : i32
    %570 = vector.broadcast %c13_i32 : i32 to vector<128x128xi32>
    %571 = arith.cmpi eq, %45, %570 : vector<128x128xi32>
    %572 = vector.shape_cast %547 : vector<128x1xf32> to vector<128x1xf32>
    %573 = vector.broadcast %572 : vector<128x1xf32> to vector<128x128xf32>
    %574 = arith.select %571, %573, %536 : vector<128x128xi1>, vector<128x128xf32>
    %c13_i32_197 = arith.constant 13 : i32
    %575 = vector.broadcast %c13_i32_197 : i32 to vector<128x128xi32>
    %576 = arith.cmpi eq, %45, %575 : vector<128x128xi32>
    %577 = vector.shape_cast %560 : vector<128x1xf32> to vector<128x1xf32>
    %578 = vector.broadcast %577 : vector<128x1xf32> to vector<128x128xf32>
    %579 = arith.select %576, %578, %541 : vector<128x128xi1>, vector<128x128xf32>
    %c0_198 = arith.constant 0 : index
    %c0_199 = arith.constant 0 : index
    %580 = vector.load %arg7[%c0_198, %c0_199] : memref<128x128xf32, #tpu.memory_space<vmem>>, vector<128x128xf32>
    %cst_200 = arith.constant dense<0x7F800000> : vector<128xf32>
    %581 = vector.multi_reduction <minimumf>, %580, %cst_200 [1] : vector<128x128xf32> to vector<128xf32>
    %582 = vector.shape_cast %581 : vector<128xf32> to vector<128x1xf32>
    %cst_201 = arith.constant dense<0x7F800000> : vector<128xf32>
    %583 = vector.multi_reduction <minimumf>, %569, %cst_201 [1] : vector<128x128xf32> to vector<128xf32>
    %584 = vector.shape_cast %583 : vector<128xf32> to vector<128x1xf32>
    %585 = arith.minimumf %582, %584 : vector<128x1xf32>
    %586 = vector.broadcast %585 : vector<128x1xf32> to vector<128x128xf32>
    %587 = arith.cmpf oeq, %580, %586 : vector<128x128xf32>
    %cst_202 = arith.constant 1.000000e+09 : f32
    %588 = vector.broadcast %cst_202 : f32 to vector<128x128xf32>
    %589 = arith.select %587, %37, %588 : vector<128x128xi1>, vector<128x128xf32>
    %cst_203 = arith.constant dense<0x7F800000> : vector<128xf32>
    %590 = vector.multi_reduction <minimumf>, %589, %cst_203 [1] : vector<128x128xf32> to vector<128xf32>
    %591 = vector.shape_cast %590 : vector<128xf32> to vector<128x1xf32>
    %592 = vector.broadcast %585 : vector<128x1xf32> to vector<128x128xf32>
    %593 = arith.cmpf oeq, %569, %592 : vector<128x128xf32>
    %cst_204 = arith.constant 1.000000e+09 : f32
    %594 = vector.broadcast %cst_204 : f32 to vector<128x128xf32>
    %595 = arith.select %593, %44, %594 : vector<128x128xi1>, vector<128x128xf32>
    %cst_205 = arith.constant dense<0x7F800000> : vector<128xf32>
    %596 = vector.multi_reduction <minimumf>, %595, %cst_205 [1] : vector<128x128xf32> to vector<128xf32>
    %597 = vector.shape_cast %596 : vector<128xf32> to vector<128x1xf32>
    %598 = arith.minimumf %591, %597 : vector<128x1xf32>
    %599 = vector.broadcast %598 : vector<128x1xf32> to vector<128x128xf32>
    %600 = arith.cmpf oeq, %37, %599 : vector<128x128xf32>
    %cst_206 = arith.constant 1.000000e+30 : f32
    %601 = vector.broadcast %cst_206 : f32 to vector<128x128xf32>
    %602 = arith.select %600, %601, %580 : vector<128x128xi1>, vector<128x128xf32>
    %c0_207 = arith.constant 0 : index
    %c0_208 = arith.constant 0 : index
    %603 = vector.load %arg7[%c0_207, %c0_208] : memref<128x128xf32, #tpu.memory_space<vmem>>, vector<128x128xf32>
    tpu.vector_store %arg7[%c0_207, %c0_208], %602 {strides = array<i32>} : memref<128x128xf32, #tpu.memory_space<vmem>>, vector<128x128xf32>,
    %604 = vector.broadcast %598 : vector<128x1xf32> to vector<128x128xf32>
    %605 = arith.cmpf oeq, %44, %604 : vector<128x128xf32>
    %cst_209 = arith.constant 1.000000e+30 : f32
    %606 = vector.broadcast %cst_209 : f32 to vector<128x128xf32>
    %607 = arith.select %605, %606, %569 : vector<128x128xi1>, vector<128x128xf32>
    %c14_i32 = arith.constant 14 : i32
    %608 = vector.broadcast %c14_i32 : i32 to vector<128x128xi32>
    %609 = arith.cmpi eq, %45, %608 : vector<128x128xi32>
    %610 = vector.shape_cast %585 : vector<128x1xf32> to vector<128x1xf32>
    %611 = vector.broadcast %610 : vector<128x1xf32> to vector<128x128xf32>
    %612 = arith.select %609, %611, %574 : vector<128x128xi1>, vector<128x128xf32>
    %c14_i32_210 = arith.constant 14 : i32
    %613 = vector.broadcast %c14_i32_210 : i32 to vector<128x128xi32>
    %614 = arith.cmpi eq, %45, %613 : vector<128x128xi32>
    %615 = vector.shape_cast %598 : vector<128x1xf32> to vector<128x1xf32>
    %616 = vector.broadcast %615 : vector<128x1xf32> to vector<128x128xf32>
    %617 = arith.select %614, %616, %579 : vector<128x128xi1>, vector<128x128xf32>
    %c0_211 = arith.constant 0 : index
    %c0_212 = arith.constant 0 : index
    %618 = vector.load %arg7[%c0_211, %c0_212] : memref<128x128xf32, #tpu.memory_space<vmem>>, vector<128x128xf32>
    %cst_213 = arith.constant dense<0x7F800000> : vector<128xf32>
    %619 = vector.multi_reduction <minimumf>, %618, %cst_213 [1] : vector<128x128xf32> to vector<128xf32>
    %620 = vector.shape_cast %619 : vector<128xf32> to vector<128x1xf32>
    %cst_214 = arith.constant dense<0x7F800000> : vector<128xf32>
    %621 = vector.multi_reduction <minimumf>, %607, %cst_214 [1] : vector<128x128xf32> to vector<128xf32>
    %622 = vector.shape_cast %621 : vector<128xf32> to vector<128x1xf32>
    %623 = arith.minimumf %620, %622 : vector<128x1xf32>
    %624 = vector.broadcast %623 : vector<128x1xf32> to vector<128x128xf32>
    %625 = arith.cmpf oeq, %618, %624 : vector<128x128xf32>
    %cst_215 = arith.constant 1.000000e+09 : f32
    %626 = vector.broadcast %cst_215 : f32 to vector<128x128xf32>
    %627 = arith.select %625, %37, %626 : vector<128x128xi1>, vector<128x128xf32>
    %cst_216 = arith.constant dense<0x7F800000> : vector<128xf32>
    %628 = vector.multi_reduction <minimumf>, %627, %cst_216 [1] : vector<128x128xf32> to vector<128xf32>
    %629 = vector.shape_cast %628 : vector<128xf32> to vector<128x1xf32>
    %630 = vector.broadcast %623 : vector<128x1xf32> to vector<128x128xf32>
    %631 = arith.cmpf oeq, %607, %630 : vector<128x128xf32>
    %cst_217 = arith.constant 1.000000e+09 : f32
    %632 = vector.broadcast %cst_217 : f32 to vector<128x128xf32>
    %633 = arith.select %631, %44, %632 : vector<128x128xi1>, vector<128x128xf32>
    %cst_218 = arith.constant dense<0x7F800000> : vector<128xf32>
    %634 = vector.multi_reduction <minimumf>, %633, %cst_218 [1] : vector<128x128xf32> to vector<128xf32>
    %635 = vector.shape_cast %634 : vector<128xf32> to vector<128x1xf32>
    %636 = arith.minimumf %629, %635 : vector<128x1xf32>
    %637 = vector.broadcast %636 : vector<128x1xf32> to vector<128x128xf32>
    %638 = arith.cmpf oeq, %37, %637 : vector<128x128xf32>
    %cst_219 = arith.constant 1.000000e+30 : f32
    %639 = vector.broadcast %cst_219 : f32 to vector<128x128xf32>
    %640 = arith.select %638, %639, %618 : vector<128x128xi1>, vector<128x128xf32>
    %c0_220 = arith.constant 0 : index
    %c0_221 = arith.constant 0 : index
    %641 = vector.load %arg7[%c0_220, %c0_221] : memref<128x128xf32, #tpu.memory_space<vmem>>, vector<128x128xf32>
    tpu.vector_store %arg7[%c0_220, %c0_221], %640 {strides = array<i32>} : memref<128x128xf32, #tpu.memory_space<vmem>>, vector<128x128xf32>,
    %c15_i32 = arith.constant 15 : i32
    %642 = vector.broadcast %c15_i32 : i32 to vector<128x128xi32>
    %643 = arith.cmpi eq, %45, %642 : vector<128x128xi32>
    %644 = vector.shape_cast %623 : vector<128x1xf32> to vector<128x1xf32>
    %645 = vector.broadcast %644 : vector<128x1xf32> to vector<128x128xf32>
    %646 = arith.select %643, %645, %612 : vector<128x128xi1>, vector<128x128xf32>
    %c15_i32_222 = arith.constant 15 : i32
    %647 = vector.broadcast %c15_i32_222 : i32 to vector<128x128xi32>
    %648 = arith.cmpi eq, %45, %647 : vector<128x128xi32>
    %649 = vector.shape_cast %636 : vector<128x1xf32> to vector<128x1xf32>
    %650 = vector.broadcast %649 : vector<128x1xf32> to vector<128x128xf32>
    %651 = arith.select %648, %650, %617 : vector<128x128xi1>, vector<128x128xf32>
    %c0_223 = arith.constant 0 : index
    %c0_224 = arith.constant 0 : index
    %652 = vector.load %arg8[%c0_223, %c0_224] : memref<128x128xf32, #tpu.memory_space<vmem>>, vector<128x128xf32>
    tpu.vector_store %arg8[%c0_223, %c0_224], %646 {strides = array<i32>} : memref<128x128xf32, #tpu.memory_space<vmem>>, vector<128x128xf32>,
    %c0_225 = arith.constant 0 : index
    %c0_226 = arith.constant 0 : index
    %653 = vector.load %arg9[%c0_225, %c0_226] : memref<128x128xf32, #tpu.memory_space<vmem>>, vector<128x128xf32>
    tpu.vector_store %arg9[%c0_225, %c0_226], %651 {strides = array<i32>} : memref<128x128xf32, #tpu.memory_space<vmem>>, vector<128x128xf32>,
    %654 = vector.extract_strided_slice %646 {offsets = [0, 0], sizes = [128, 16], strides = [1, 1]} : vector<128x128xf32> to vector<128x16xf32>
    %c0_227 = arith.constant 0 : index
    %c0_228 = arith.constant 0 : index
    %c0_229 = arith.constant 0 : index
    %655 = vector.load %arg5[%c0_227, %c0_228, %c0_229] : memref<1x128x16xf32, #tpu.memory_space<vmem>>, vector<1x128x16xf32>
    %656 = vector.shape_cast %655 : vector<1x128x16xf32> to vector<128x16xf32>
    %657 = vector.shape_cast %654 : vector<128x16xf32> to vector<1x128x16xf32>
    tpu.vector_store %arg5[%c0_227, %c0_228, %c0_229], %657 {strides = array<i32>} : memref<1x128x16xf32, #tpu.memory_space<vmem>>, vector<1x128x16xf32>,
    %658 = vector.extract_strided_slice %651 {offsets = [0, 0], sizes = [128, 16], strides = [1, 1]} : vector<128x128xf32> to vector<128x16xf32>
    %659 = arith.fptosi %658 : vector<128x16xf32> to vector<128x16xi32>
    %c0_230 = arith.constant 0 : index
    %c0_231 = arith.constant 0 : index
    %c0_232 = arith.constant 0 : index
    %660 = vector.load %arg6[%c0_230, %c0_231, %c0_232] : memref<1x128x16xi32, #tpu.memory_space<vmem>>, vector<1x128x16xi32>
    %661 = vector.shape_cast %660 : vector<1x128x16xi32> to vector<128x16xi32>
    %662 = vector.shape_cast %659 : vector<128x16xi32> to vector<1x128x16xi32>
    tpu.vector_store %arg6[%c0_230, %c0_231, %c0_232], %662 {strides = array<i32>} : memref<1x128x16xi32, #tpu.memory_space<vmem>>, vector<1x128x16xi32>,
    return
  }
  func.func @transform_0(%arg0: i32, %arg1: i32, %arg2: i32) -> (i32, i32, i32) {
    %c0_i32 = arith.constant 0 : i32
    %c0_i32_0 = arith.constant 0 : i32
    return %arg0, %arg1, %c0_i32 : i32, i32, i32
  }
  func.func @transform_1(%arg0: i32, %arg1: i32, %arg2: i32) -> (i32, i32, i32) {
    %c0_i32 = arith.constant 0 : i32
    %c0_i32_0 = arith.constant 0 : i32
    return %arg0, %c0_i32, %arg2 : i32, i32, i32
  }
  func.func @transform_2(%arg0: i32, %arg1: i32, %arg2: i32) -> (i32, i32, i32) {
    %c0_i32 = arith.constant 0 : i32
    %c0_i32_0 = arith.constant 0 : i32
    return %arg0, %arg1, %c0_i32 : i32, i32, i32
  }
  func.func @transform_3(%arg0: i32, %arg1: i32, %arg2: i32) -> (i32, i32, i32) {
    %c0_i32 = arith.constant 0 : i32
    %c0_i32_0 = arith.constant 0 : i32
    return %arg0, %arg1, %c0_i32 : i32, i32, i32
  }
}

</mosaic_0001>

<bundles_post_ra>
// kernel: tpu_custom_call.1
= control target key start
LH: loop header
LB: loop body
LE: loop exit
PB: predicated region body
PF: predicated region fallthrough
CT: control target
= control target key end

     0   :  { %s7218_s12 = smov 0   ;;  %s7220_s13 = smov 0   ;;  %s12737_s0 = inlined_call_operand.vmem [shape: f32[2,128,3], index: 0, kind: input, shape index: {}]   ;;  %s12738_s1 = inlined_call_operand.vmem [shape: f32[2,3,128], index: 1, kind: input, shape index: {}]   ;;  %s12739_s2 = inlined_call_operand.vmem [shape: f32[2,128,16], index: 2, kind: output, shape index: {0}]   ;;  %s12740_s3 = inlined_call_operand.vmem [shape: s32[2,128,16], index: 3, kind: output, shape index: {1}]  }
   0x1   :  { %s7222_s14 = smov 0  }
   0x2 LB: > { %s33_s15 = sadd.s32 1, %s7187_s13  ;;  %p6593_p0 = scmp.ge.s32.totalorder %s7191_s14, 1  ;;  %s7191_s14 = sphi %s7222_s14, %s14_s14   ;;  %s7187_s13 = sphi %s7220_s13, %s13064_s13   ;;  %s7183_s12 = sphi %s7218_s12, %s13063_s12  }
   0x3   : > { %p35_p1 = scmp.ge.s32.totalorder %s33_s15, 2  ;;  %p184_p2 = scmp.lt.s32.totalorder %s7191_s14, 3 }
   0x5   : > { %s13066_s15 = smov (%p35_p1, %s33_s15), 0  ;;  %p185_p3 = pnand %p6593_p0, %p184_p2 }
   0x7   : > { %188 = sbr.rel (%p185_p3) target bundleno = 5085 (0x13dd), region = 28 }
   0xe   : > { %p233_p4 = scmp.lt.s32.totalorder %s7183_s12, 1  ;;  %v7193_v0 = vmov 0   ;;  %v7194_v33 = vmov 1   ;;  %v7195_v34 = vmov 2   ;;  %v426_v61 = vlaneseq }
   0xf   : > { %7164 = vset.pattern.permute.xlu1 %v7193_v0  ;;  %7163 = vset.pattern.permute.xlu0 %v7193_v0 }
  0x10   : > { %s13068_s12 = smov (!%p233_p4, %s7183_s12), 1 }
  0x11   : > { %s7239_s16 = sshll.u32 %s13068_s12, 7  ;;  %s6596_s20 = sshll.u32 %s13068_s12, 2 }
  0x12   : > { %s7245_s19 = scalar_lea.vmem %s12737_s0, %s7239_s16  ;;  %s248_s23 = scalar_lea.vmem %s12738_s1, %s6596_s20 }
  0x13   : > { %v307_v1 = vld [vmem:[%s7245_s19 + $0x10] sm:$0xff]  ;;  %v305_v2 = vld [vmem:[%s7245_s19] sm:$0xff]  ;;  %v308_v5 = vld [vmem:[%s7245_s19 + $0x18] sm:$0xff]  ;;  %s12492_s26 = scalar_lea.vmem %s12739_s2, %s7239_s16  ;;  %s12645_s29 = scalar_lea.vmem %s12740_s3, %s7239_s16 }
  0x14   : > { %v7249_v3 = vmul.f32 -2.0, %v307_v1  ;;  %v7251_v4 = vmul.f32 -2.0, %v305_v2  ;;  %v306_v6 = vld [vmem:[%s7245_s19 + $0x8] sm:$0xff]  ;;  %v7257_v7 = vmul.f32 -2.0, %v308_v5  ;;  %v309_v10 = vld [vmem:[%s7245_s19 + $0x20] sm:$0xff]  ;;  %v312_v13 = vld [vmem:[%s7245_s19 + $0x38] sm:$0xff] }
  0x15   : > { %v331_v8 = vmul.f32 -2.0, %v306_v6  ;;  %v310_v9 = vld [vmem:[%s7245_s19 + $0x28] sm:$0xff]  ;;  %v334_v12 = vmul.f32 -2.0, %v309_v10  ;;  %v311_v14 = vld [vmem:[%s7245_s19 + $0x30] sm:$0xff]  ;;  %v337_v15 = vmul.f32 -2.0, %v312_v13  ;;  %v313_v18 = vld [vmem:[%s7245_s19 + $0x40] sm:$0xff] }
  0x16   : > { %358 = vperm.xlu1 %7164, %v7249_v3   ;;  %348 = vperm.xlu0 %7163, %v7251_v4   ;;  %v335_v11 = vmul.f32 -2.0, %v310_v9  ;;  %v336_v16 = vmul.f32 -2.0, %v311_v14  ;;  %v314_v17 = vld [vmem:[%s7245_s19 + $0x48] sm:$0xff]  ;;  %v338_v20 = vmul.f32 -2.0, %v313_v18  ;;  %v316_v21 = vld [vmem:[%s7245_s19 + $0x58] sm:$0xff]  ;;  %v315_v22 = vld [vmem:[%s7245_s19 + $0x50] sm:$0xff] }
  0x17   : > { %v339_v19 = vmul.f32 -2.0, %v314_v17  ;;  %v341_v23 = vmul.f32 -2.0, %v316_v21  ;;  %v340_v24 = vmul.f32 -2.0, %v315_v22  ;;  %v318_v25 = vld [vmem:[%s7245_s19 + $0x68] sm:$0xff]  ;;  %v317_v26 = vld [vmem:[%s7245_s19 + $0x60] sm:$0xff]  ;;  %v320_v29 = vld [vmem:[%s7245_s19 + $0x78] sm:$0xff] }
  0x18   : > { %v343_v27 = vmul.f32 -2.0, %v318_v25  ;;  %v342_v28 = vmul.f32 -2.0, %v317_v26  ;;  %v319_v30 = vld [vmem:[%s7245_s19 + $0x70] sm:$0xff]  ;;  %v345_v31 = vmul.f32 -2.0, %v320_v29  ;;  %v321_v57 = vld [vmem:[%s248_s23] sm:$0x7] }
  0x19   : > { %v344_v32 = vmul.f32 -2.0, %v319_v30  ;;  %v322_v60 = vmul.f32 %v321_v57, %v321_v57  ;;  %v427_v1 = vshrl.u32 %v426_v61, 7  ;;  %v7332_v18 = vand.u32 127, %v426_v61 }
  0x1a   : > { %363 = vperm.xlu1 %7164, %v7257_v7   ;;  %353 = vperm.xlu0 %7163, %v331_v8  }
  0x1b   : > { %v324_v0 = vrot.slane %v322_v60, 1  ;;  %v327_v5 = vrot.slane %v322_v60, 2  ;;  %v428_v6 = vsub.s32 0, %v427_v1  ;;  %v632_v13 = vsub.s32 2, %v427_v1 }
  0x1c   : > { %vm672_vm0 = vcmp.lt.s32.totalorder %v7332_v18, 64 }
  0x1d   : > { %v7338_v22 = vrot.slane %v321_v57, %v632_v13 }
  0x1e   : > { %373 = vperm.xlu1 %7164, %v335_v11   ;;  %368 = vperm.xlu0 %7163, %v334_v12  }
  0x22   : > { %383 = vperm.xlu1 %7164, %v337_v15   ;;  %378 = vperm.xlu0 %7163, %v336_v16  }
  0x26   : > { %393 = vperm.xlu1 %7164, %v339_v19   ;;  %388 = vperm.xlu0 %7163, %v338_v20  }
  0x2a   : > { %403 = vperm.xlu1 %7164, %v341_v23   ;;  %398 = vperm.xlu0 %7163, %v340_v24  }
  0x2e   : > { %413 = vperm.xlu1 %7164, %v343_v27   ;;  %408 = vperm.xlu0 %7163, %v342_v28  }
  0x32   : > { %423 = vperm.xlu1 %7164, %v345_v31   ;;  %418 = vperm.xlu0 %7163, %v344_v32  }
  0x36   : > { %7166 = vset.pattern.permute.xlu1 %v7194_v33  ;;  %7165 = vset.pattern.permute.xlu0 %v7194_v33 }
  0x37   : > { %471 = vperm.xlu1 %7166, %v331_v8   ;;  %467 = vperm.xlu0 %7165, %v7251_v4  }
  0x3b   : > { %475 = vperm.xlu1 %7166, %v7249_v3   ;;  %479 = vperm.xlu0 %7165, %v7257_v7  }
  0x3f   : > { %483 = vperm.xlu1 %7166, %v334_v12   ;;  %487 = vperm.xlu0 %7165, %v335_v11  }
  0x43   : > { %491 = vperm.xlu1 %7166, %v336_v16   ;;  %495 = vperm.xlu0 %7165, %v337_v15  }
  0x47   : > { %499 = vperm.xlu1 %7166, %v338_v20   ;;  %503 = vperm.xlu0 %7165, %v339_v19  }
  0x4b   : > { %507 = vperm.xlu1 %7166, %v340_v24   ;;  %511 = vperm.xlu0 %7165, %v341_v23  }
  0x4f   : > { %515 = vperm.xlu1 %7166, %v342_v28   ;;  %519 = vperm.xlu0 %7165, %v343_v27  }
  0x53   : > { %523 = vperm.xlu1 %7166, %v344_v32   ;;  %527 = vperm.xlu0 %7165, %v345_v31  }
  0x57   : > { %7167 = vset.pattern.permute.xlu1 %v7195_v34  ;;  %7168 = vset.pattern.permute.xlu0 %v7195_v34 }
  0x58   : > { %567 = vperm.xlu1 %7167, %v7251_v4   ;;  %571 = vperm.xlu0 %7168, %v331_v8   ;;  %v326_v4 = vadd.f32 %v324_v0, %v322_v60 }
  0x5a   : > { %v329_v10 = vadd.f32 %v327_v5, %v326_v4 }
  0x5c   : > { %575 = vperm.xlu1 %7167, %v7249_v3   ;;  %583 = vperm.xlu0 %7168, %v334_v12  }
  0x60   : > { %579 = vperm.xlu1 %7167, %v7257_v7   ;;  %591 = vperm.xlu0 %7168, %v336_v16   ;;  %v532_v7 = vsub.s32 1, %v427_v1 }
  0x62   : > { %v7324_v12 = vrot.slane %v321_v57, %v532_v7 }
  0x64   : > { %587 = vperm.xlu1 %7167, %v335_v11   ;;  %599 = vperm.xlu0 %7168, %v338_v20   ;;  %v7322_v11 = vrot.slane %v321_v57, %v428_v6 }
  0x68   : > { %595 = vperm.xlu1 %7167, %v337_v15   ;;  %607 = vperm.xlu0 %7168, %v340_v24  }
  0x6c   : > { %603 = vperm.xlu1 %7167, %v339_v19   ;;  %615 = vperm.xlu0 %7168, %v342_v28   ;;  %v7334_v19 = vrot.slane %v329_v10, %v428_v6 }
  0x70   : > { %611 = vperm.xlu1 %7167, %v341_v23   ;;  %623 = vperm.xlu0 %7168, %v344_v32  }
  0x74   : > { %619 = vperm.xlu1 %7167, %v343_v27  }
  0x78   : > { %627 = vperm.xlu1 %7167, %v345_v31  }
  0x95   : > { %v359_v35 = vpop.permute.xlu1 %358  ;;  %v349_v36 = vpop.permute.xlu0 %348 }
  0x96   : > { %v430_v14 = vmul.f32 %v7322_v11, %v349_v36  ;;  %v432_v23 = vmul.f32 %v7322_v11, %v359_v35 }
  0x98   : > { %v450_v25 = vadd.f32 %v7334_v19, %v430_v14  ;;  %v452_v35 = vadd.f32 %v7334_v19, %v432_v23 }
  0x99   : > { %v7278_v37 = vpop.permute.xlu1 %363  ;;  %v354_v38 = vpop.permute.xlu0 %353 }
  0x9a   : > { %v431_v15 = vmul.f32 %v7322_v11, %v354_v38  ;;  %v433_v36 = vmul.f32 %v7322_v11, %v7278_v37 }
  0x9c   : > { %v451_v26 = vadd.f32 %v7334_v19, %v431_v15  ;;  %v453_v5 = vadd.f32 %v7334_v19, %v433_v36 }
  0x9d   : > { %v7280_v39 = vpop.permute.xlu1 %373  ;;  %v369_v40 = vpop.permute.xlu0 %368 }
  0x9e   : > { %v434_v24 = vmul.f32 %v7322_v11, %v369_v40 }
  0xa0   : > { %v454_v38 = vadd.f32 %v7334_v19, %v434_v24 }
  0xa1   : > { %v7282_v41 = vpop.permute.xlu1 %383  ;;  %v7284_v42 = vpop.permute.xlu0 %378 }
  0xa2   : > { %v436_v40 = vmul.f32 %v7322_v11, %v7284_v42 }
  0xa5   : > { %v7286_v43 = vpop.permute.xlu1 %393  ;;  %v7288_v44 = vpop.permute.xlu0 %388 }
  0xa9   : > { %v7290_v45 = vpop.permute.xlu1 %403  ;;  %v7292_v46 = vpop.permute.xlu0 %398 }
  0xad   : > { %v7294_v47 = vpop.permute.xlu1 %413  ;;  %v7296_v48 = vpop.permute.xlu0 %408 }
  0xb1   : > { %v7298_v49 = vpop.permute.xlu1 %423  ;;  %v7300_v50 = vpop.permute.xlu0 %418 }
  0xb6   : > { %v472_v51 = vpop.permute.xlu1 %471  ;;  %v468_v52 = vpop.permute.xlu0 %467 }
  0xb7   : > { %v535_v20 = vmul.f32 %v7324_v12, %v472_v51  ;;  %v534_v21 = vmul.f32 %v7324_v12, %v468_v52  ;;  %v435_v51 = vmul.f32 %v7322_v11, %v7280_v39 }
  0xb9   : > { %v551_v31 = vadd.f32 %v535_v20, %v451_v26  ;;  %v550_v32 = vadd.f32 %v534_v21, %v450_v25  ;;  %v455_v6 = vadd.f32 %v7334_v19, %v435_v51 }
  0xba   : > { %v476_v53 = vpop.permute.xlu1 %475  ;;  %v480_v54 = vpop.permute.xlu0 %479 }
  0xbb   : > { %v536_v27 = vmul.f32 %v7324_v12, %v476_v53  ;;  %v537_v57 = vmul.f32 %v7324_v12, %v480_v54  ;;  %v456_v54 = vadd.f32 %v7334_v19, %v436_v40 }
  0xbd   : > { %v553_v13 = vadd.f32 %v537_v57, %v453_v5 }
  0xbe   : > { %v484_v55 = vpop.permute.xlu1 %483  ;;  %v7306_v56 = vpop.permute.xlu0 %487 }
  0xbf   : > { %v538_v28 = vmul.f32 %v7324_v12, %v484_v55  ;;  %v552_v55 = vadd.f32 %v536_v27, %v452_v35  ;;  %v539_v14 = vmul.f32 %v7324_v12, %v7306_v56  ;;  %v437_v56 = vmul.f32 %v7322_v11, %v7282_v41 }
  0xc1   : > { %v554_v60 = vadd.f32 %v538_v28, %v454_v38  ;;  %v439_v28 = vmul.f32 %v7322_v11, %v7286_v43 }
  0xc2   : > { %v492_v58 = vpop.permute.xlu1 %491  ;;  %v7308_v59 = vpop.permute.xlu0 %495 }
  0xc3   : > { %v540_v61 = vmul.f32 %v7324_v12, %v492_v58  ;;  %v438_v58 = vmul.f32 %v7322_v11, %v7288_v44  ;;  %v459_v51 = vadd.f32 %v7334_v19, %v439_v28 }
  0xc5   : > { %v556_v15 = vadd.f32 %v540_v61, %v456_v54  ;;  %v458_v27 = vadd.f32 %v7334_v19, %v438_v58 }
  0xc6   : > { %v7310_v62 = vpop.permute.xlu1 %499  ;;  %v7312_v63 = vpop.permute.xlu0 %503 }
  0xc7   : > { %v542_v20 = vmul.f32 %v7324_v12, %v7310_v62  ;;  %v440_v62 = vmul.f32 %v7322_v11, %v7292_v46  ;;  %v543_v57 = vmul.f32 %v7324_v12, %v7312_v63  ;;  %v441_v63 = vmul.f32 %v7322_v11, %v7290_v45 }
  0xc9   : > { %v460_v40 = vadd.f32 %v7334_v19, %v440_v62 }
  0xca   : > { %v7314_v2 = vpop.permute.xlu1 %507  ;;  %v7316_v3 = vpop.permute.xlu0 %511 }
  0xcb   : > { %v544_v41 = vmul.f32 %v7324_v12, %v7314_v2  ;;  %v442_v2 = vmul.f32 %v7322_v11, %v7296_v48 }
  0xcd   : > { %v462_v54 = vadd.f32 %v7334_v19, %v442_v2 }
  0xce   : > { %v7318_v8 = vpop.permute.xlu1 %515  ;;  %v7320_v9 = vpop.permute.xlu0 %519 }
  0xcf   : > { %v546_v61 = vmul.f32 %v7324_v12, %v7318_v8  ;;  %v444_v8 = vmul.f32 %v7322_v11, %v7300_v50  ;;  %v547_v62 = vmul.f32 %v7324_v12, %v7320_v9  ;;  %v445_v9 = vmul.f32 %v7322_v11, %v7298_v49 }
  0xd1   : > { %v465_v49 = vadd.f32 %v7334_v19, %v445_v9 }
  0xd2   : > { %v7328_v16 = vpop.permute.xlu1 %523  ;;  %v7330_v17 = vpop.permute.xlu0 %527 }
  0xd7   : > { %v568_v29 = vpop.permute.xlu1 %567  ;;  %v572_v30 = vpop.permute.xlu0 %571 }
  0xd8   : > { %v634_v33 = vmul.f32 %v7338_v22, %v568_v29  ;;  %v635_v34 = vmul.f32 %v7338_v22, %v572_v30 }
  0xda   : > { %v650_v52 = vadd.f32 %v634_v33, %v550_v32  ;;  %v651_v53 = vadd.f32 %v635_v34, %v551_v31  ;;  %v555_v31 = vadd.f32 %v539_v14, %v455_v6  ;;  %v541_v32 = vmul.f32 %v7324_v12, %v7308_v59 }
  0xdb   : > { %v576_v0 = vpop.permute.xlu1 %575  ;;  %v584_v1 = vpop.permute.xlu0 %583  ;;  %v558_v33 = vadd.f32 %v542_v20, %v458_v27  ;;  %v457_v59 = vadd.f32 %v7334_v19, %v437_v56  ;;  %v548_v14 = vmul.f32 %v7324_v12, %v7328_v16  ;;  %v464_v16 = vadd.f32 %v7334_v19, %v444_v8 }
  0xdc   : > { %v636_v37 = vmul.f32 %v7338_v22, %v576_v0  ;;  %v638_v4 = vmul.f32 %v7338_v22, %v584_v1  ;;  %v7363_v42 = vsel %vm672_vm0, %v650_v52, 1e+30  ;;  %v7367_v39 = vsel %vm672_vm0, %v651_v53, 1e+30 }
  0xdd   : > { %753 = vmin.xlane.f32.xlu0 %v7363_v42  ;;  %755 = vmin.xlane.f32.xlu1 %v7367_v39  ;;  %v564_v28 = vadd.f32 %v548_v14, %v464_v16 }
  0xde   : > { %v652_v7 = vadd.f32 %v636_v37, %v552_v55  ;;  %v654_v10 = vadd.f32 %v638_v4, %v554_v60  ;;  %v557_v55 = vadd.f32 %v541_v32, %v457_v59  ;;  %v560_v60 = vadd.f32 %v544_v41, %v460_v40 }
  0xdf   : > { %v580_v21 = vpop.permute.xlu1 %579  ;;  %v592_v23 = vpop.permute.xlu0 %591  ;;  %v549_v59 = vmul.f32 %v7324_v12, %v7330_v17 }
  0xe0   : > { %v637_v44 = vmul.f32 %v7338_v22, %v580_v21  ;;  %v640_v24 = vmul.f32 %v7338_v22, %v592_v23  ;;  %v7384_v25 = vsel %vm672_vm0, %v652_v7, 1e+30  ;;  %v7388_v26 = vsel %vm672_vm0, %v654_v10, 1e+30 }
  0xe1   : > { %757 = vmin.xlane.f32.xlu0 %v7384_v25  ;;  %761 = vmin.xlane.f32.xlu1 %v7388_v26  ;;  %v559_v7 = vadd.f32 %v543_v57, %v459_v51  ;;  %v545_v10 = vmul.f32 %v7324_v12, %v7316_v3  ;;  %v461_v3 = vadd.f32 %v7334_v19, %v441_v63 }
  0xe2   : > { %v653_v29 = vadd.f32 %v637_v44, %v553_v13  ;;  %v656_v30 = vadd.f32 %v640_v24, %v556_v15  ;;  %v562_v13 = vadd.f32 %v546_v61, %v462_v54  ;;  %v443_v44 = vmul.f32 %v7322_v11, %v7294_v47 }
  0xe3   : > { %v588_v34 = vpop.permute.xlu1 %587  ;;  %v600_v35 = vpop.permute.xlu0 %599  ;;  %v561_v27 = vadd.f32 %v545_v10, %v461_v3 }
  0xe4   : > { %v639_v46 = vmul.f32 %v7338_v22, %v588_v34  ;;  %v642_v36 = vmul.f32 %v7338_v22, %v600_v35  ;;  %v7407_v38 = vsel %vm672_vm0, %v653_v29, 1e+30  ;;  %v7411_v43 = vsel %vm672_vm0, %v656_v30, 1e+30 }
  0xe5   : > { %759 = vmin.xlane.f32.xlu0 %v7407_v38  ;;  %765 = vmin.xlane.f32.xlu1 %v7411_v43  ;;  %v463_v41 = vadd.f32 %v7334_v19, %v443_v44  ;;  %v12743_v19 = vmov 1e+09  }
  0xe6   : > { %v655_v52 = vadd.f32 %v639_v46, %v555_v31  ;;  %v658_v53 = vadd.f32 %v642_v36, %v558_v33 }
  0xe7   : > { %v596_v0 = vpop.permute.xlu1 %595  ;;  %v608_v1 = vpop.permute.xlu0 %607  ;;  %v563_v46 = vadd.f32 %v547_v62, %v463_v41 }
  0xe8   : > { %v641_v48 = vmul.f32 %v7338_v22, %v596_v0  ;;  %v644_v37 = vmul.f32 %v7338_v22, %v608_v1  ;;  %v7428_v4 = vsel %vm672_vm0, %v655_v52, 1e+30  ;;  %v7432_v5 = vsel %vm672_vm0, %v658_v53, 1e+30 }
  0xe9   : > { %763 = vmin.xlane.f32.xlu0 %v7428_v4  ;;  %769 = vmin.xlane.f32.xlu1 %v7432_v5  ;;  %v565_v53 = vadd.f32 %v549_v59, %v465_v49 }
  0xea   : > { %v657_v58 = vadd.f32 %v641_v48, %v557_v55  ;;  %v660_v6 = vadd.f32 %v644_v37, %v560_v60  ;;  %v12741_v55 = vmov 1e+30  }
  0xeb   : > { %v604_v45 = vpop.permute.xlu1 %603  ;;  %v616_v15 = vpop.permute.xlu0 %615 }
  0xec   : > { %v643_v20 = vmul.f32 %v7338_v22, %v604_v45  ;;  %v646_v50 = vmul.f32 %v7338_v22, %v616_v15  ;;  %v7449_v21 = vsel %vm672_vm0, %v657_v58, 1e+30  ;;  %v7453_v23 = vsel %vm672_vm0, %v660_v6, 1e+30 }
  0xed   : > { %767 = vmin.xlane.f32.xlu0 %v7449_v21  ;;  %773 = vmin.xlane.f32.xlu1 %v7453_v23  ;;  %v7540_v15 = vcvt.s32.f32 %v7332_v18 }
  0xee   : > { %v659_v24 = vadd.f32 %v643_v20, %v559_v7  ;;  %v662_v56 = vadd.f32 %v646_v50, %v562_v13 }
  0xef   : > { %v612_v29 = vpop.permute.xlu1 %611  ;;  %v624_v30 = vpop.permute.xlu0 %623 }
  0xf0   : > { %v645_v31 = vmul.f32 %v7338_v22, %v612_v29  ;;  %v648_v32 = vmul.f32 %v7338_v22, %v624_v30  ;;  %v7467_v47 = vsel %vm672_vm0, %v659_v24, 1e+30  ;;  %v7471_v33 = vsel %vm672_vm0, %v662_v56, 1e+30 }
  0xf1   : > { %771 = vmin.xlane.f32.xlu0 %v7467_v47  ;;  %777 = vmin.xlane.f32.xlu1 %v7471_v33 }
  0xf2   : > { %v661_v34 = vadd.f32 %v645_v31, %v561_v27  ;;  %v664_v35 = vadd.f32 %v648_v32, %v564_v28 }
  0xf3   : > { %v620_v36 = vpop.permute.xlu1 %619 }
  0xf4   : > { %v647_v40 = vmul.f32 %v7338_v22, %v620_v36  ;;  %v7483_v2 = vsel %vm672_vm0, %v661_v34, 1e+30  ;;  %v7487_v51 = vsel %vm672_vm0, %v664_v35, 1e+30 }
  0xf5   : > { %775 = vmin.xlane.f32.xlu0 %v7483_v2  ;;  %781 = vmin.xlane.f32.xlu1 %v7487_v51 }
  0xf6   : > { %v663_v11 = vadd.f32 %v647_v40, %v563_v46 }
  0xf7   : > { %v628_v52 = vpop.permute.xlu1 %627 }
  0xf8   : > { %v649_v12 = vmul.f32 %v7338_v22, %v628_v52  ;;  %v7495_v17 = vsel %vm672_vm0, %v663_v11, 1e+30 }
  0xf9   : > { %779 = vmin.xlane.f32.xlu0 %v7495_v17  ;;  %785 = vmin.xlane.f32.xlu1 %v12741_v55 }
  0xfa   : > { %v665_v57 = vadd.f32 %v649_v12, %v565_v53 }
  0xfc   : > { %v7501_v60 = vsel %vm672_vm0, %v665_v57, 1e+30 }
  0xfd   : > { %783 = vmin.xlane.f32.xlu0 %v7501_v60  ;;  %789 = vmin.xlane.f32.xlu1 %v12741_v55 }
 0x101   : > { %787 = vmin.xlane.f32.xlu0 %v12741_v55  ;;  %793 = vmin.xlane.f32.xlu1 %v12741_v55 }
 0x105   : > { %791 = vmin.xlane.f32.xlu0 %v12741_v55  ;;  %797 = vmin.xlane.f32.xlu1 %v12741_v55 }
 0x109   : > { %795 = vmin.xlane.f32.xlu0 %v12741_v55  ;;  %801 = vmin.xlane.f32.xlu1 %v12741_v55 }
 0x10d   : > { %799 = vmin.xlane.f32.xlu0 %v12741_v55  ;;  %805 = vmin.xlane.f32.xlu1 %v12741_v55 }
 0x111   : > { %803 = vmin.xlane.f32.xlu0 %v12741_v55  ;;  %809 = vmin.xlane.f32.xlu1 %v12741_v55 }
 0x115   : > { %807 = vmin.xlane.f32.xlu0 %v12741_v55  ;;  %813 = vmin.xlane.f32.xlu1 %v12741_v55 }
 0x119   : > { %811 = vmin.xlane.f32.xlu0 %v12741_v55  ;;  %929 = vmin.xlane.f32.xlu1 %v12743_v19 }
 0x11d   : > { %815 = vmin.xlane.f32.xlu0 %v12741_v55  ;;  %933 = vmin.xlane.f32.xlu1 %v12743_v19 }
 0x121   : > { %931 = vmin.xlane.f32.xlu0 %v12743_v19  ;;  %937 = vmin.xlane.f32.xlu1 %v12743_v19 }
 0x125   : > { %935 = vmin.xlane.f32.xlu0 %v12743_v19  ;;  %941 = vmin.xlane.f32.xlu1 %v12743_v19 }
 0x129   : > { %939 = vmin.xlane.f32.xlu0 %v12743_v19  ;;  %945 = vmin.xlane.f32.xlu1 %v12743_v19 }
 0x12d   : > { %943 = vmin.xlane.f32.xlu0 %v12743_v19  ;;  %949 = vmin.xlane.f32.xlu1 %v12743_v19 }
 0x131   : > { %947 = vmin.xlane.f32.xlu0 %v12743_v19  ;;  %953 = vmin.xlane.f32.xlu1 %v12743_v19 }
 0x135   : > { %951 = vmin.xlane.f32.xlu0 %v12743_v19 }
 0x139   : > { %955 = vmin.xlane.f32.xlu0 %v12743_v19 }
 0x16a   : > { %v756_v22 = vpop.xlane.xlu1 %755  ;;  %v754_v61 = vpop.xlane.xlu0 %753 }
 0x16e   : > { %v762_v0 = vpop.xlane.xlu1 %761  ;;  %v758_v1 = vpop.xlane.xlu0 %757 }
 0x172   : > { %v766_v48 = vpop.xlane.xlu1 %765  ;;  %v760_v37 = vpop.xlane.xlu0 %759 }
 0x176   : > { %v770_v63 = vpop.xlane.xlu1 %769  ;;  %v764_v54 = vpop.xlane.xlu0 %763 }
 0x17a   : > { %v774_v8 = vpop.xlane.xlu1 %773  ;;  %v768_v58 = vpop.xlane.xlu0 %767 }
 0x17e   : > { %v778_v6 = vpop.xlane.xlu1 %777  ;;  %v772_v7 = vpop.xlane.xlu0 %771 }
 0x182   : > { %v7533_v10 = vpop.xlane.xlu1 %781  ;;  %v7535_v13 = vpop.xlane.xlu0 %775 }
 0x186   : > { %v786_v14 = vpop.xlane.xlu1 %785  ;;  %v7537_v45 = vpop.xlane.xlu0 %779 }
 0x187   : > { %v7542_v20 = vmin.f32 %v754_v61, %v786_v14 }
 0x189   : > { %vm833_vm1 = vcmp.eq.f32.partialorder %v7363_v42, %v7542_v20 }
 0x18a   : > { %v790_v50 = vpop.xlane.xlu1 %789  ;;  %v7546_v3 = vpop.xlane.xlu0 %783  ;;  %v849_v44 = vsel %vm833_vm1, %v7540_v15, 1e+09 }
 0x18b   : > { %v7549_v16 = vmin.f32 %v758_v1, %v790_v50  ;;  %865 = vmin.xlane.f32.xlu1 %v849_v44 }
 0x18d   : > { %vm835_vm2 = vcmp.eq.f32.partialorder %v7384_v25, %v7549_v16 }
 0x18e   : > { %v794_v24 = vpop.xlane.xlu1 %793  ;;  %v788_v56 = vpop.xlane.xlu0 %787  ;;  %v851_v27 = vsel %vm835_vm2, %v7540_v15, 1e+09 }
 0x18f   : > { %v7554_v62 = vmin.f32 %v762_v0, %v794_v24  ;;  %v7556_v28 = vmin.f32 %v756_v22, %v788_v56  ;;  %869 = vmin.xlane.f32.xlu1 %v851_v27 }
 0x191   : > { %vm837_vm3 = vcmp.eq.f32.partialorder %v7388_v26, %v7554_v62  ;;  %vm834_vm4 = vcmp.eq.f32.partialorder %v7367_v39, %v7556_v28 }
 0x192   : > { %v798_v29 = vpop.xlane.xlu1 %797  ;;  %v792_v30 = vpop.xlane.xlu0 %791  ;;  %v853_v31 = vsel %vm837_vm3, %v7540_v15, 1e+09  ;;  %v850_v32 = vsel %vm834_vm4, %v7540_v15, 1e+09 }
 0x193   : > { %v7564_v41 = vmin.f32 %v766_v48, %v798_v29  ;;  %v7566_v9 = vmin.f32 %v760_v37, %v792_v30  ;;  %873 = vmin.xlane.f32.xlu1 %v853_v31  ;;  %867 = vmin.xlane.f32.xlu0 %v850_v32 }
 0x195   : > { %vm839_vm5 = vcmp.eq.f32.partialorder %v7411_v43, %v7564_v41  ;;  %vm836_vm6 = vcmp.eq.f32.partialorder %v7407_v38, %v7566_v9 }
 0x196   : > { %v802_v34 = vpop.xlane.xlu1 %801  ;;  %v796_v35 = vpop.xlane.xlu0 %795  ;;  %v855_v46 = vsel %vm839_vm5, %v7540_v15, 1e+09  ;;  %v852_v36 = vsel %vm836_vm6, %v7540_v15, 1e+09 }
 0x197   : > { %v7574_v59 = vmin.f32 %v770_v63, %v802_v34  ;;  %v7576_v40 = vmin.f32 %v764_v54, %v796_v35  ;;  %877 = vmin.xlane.f32.xlu1 %v855_v46  ;;  %871 = vmin.xlane.f32.xlu0 %v852_v36 }
 0x199   : > { %vm841_vm7 = vcmp.eq.f32.partialorder %v7432_v5, %v7574_v59  ;;  %vm838_vm8 = vcmp.eq.f32.partialorder %v7428_v4, %v7576_v40 }
 0x19a   : > { %v806_v49 = vpop.xlane.xlu1 %805  ;;  %v800_v11 = vpop.xlane.xlu0 %799  ;;  %v857_v52 = vsel %vm841_vm7, %v7540_v15, 1e+09  ;;  %v854_v53 = vsel %vm838_vm8, %v7540_v15, 1e+09 }
 0x19b   : > { %v7584_v12 = vmin.f32 %v774_v8, %v806_v49  ;;  %v7586_v57 = vmin.f32 %v768_v58, %v800_v11  ;;  %881 = vmin.xlane.f32.xlu1 %v857_v52  ;;  %875 = vmin.xlane.f32.xlu0 %v854_v53 }
 0x19d   : > { %vm843_vm9 = vcmp.eq.f32.partialorder %v7453_v23, %v7584_v12  ;;  %vm840_vm10 = vcmp.eq.f32.partialorder %v7449_v21, %v7586_v57 }
 0x19e   : > { %v810_v22 = vpop.xlane.xlu1 %809  ;;  %v804_v61 = vpop.xlane.xlu0 %803  ;;  %v859_v0 = vsel %vm843_vm9, %v7540_v15, 1e+09  ;;  %v856_v1 = vsel %vm840_vm10, %v7540_v15, 1e+09 }
 0x19f   : > { %v7594_v48 = vmin.f32 %v778_v6, %v810_v22  ;;  %v7596_v37 = vmin.f32 %v772_v7, %v804_v61  ;;  %885 = vmin.xlane.f32.xlu1 %v859_v0  ;;  %879 = vmin.xlane.f32.xlu0 %v856_v1 }
 0x1a1   : > { %vm845_vm11 = vcmp.eq.f32.partialorder %v7471_v33, %v7594_v48  ;;  %vm842_vm12 = vcmp.eq.f32.partialorder %v7467_v47, %v7596_v37 }
 0x1a2   : > { %v814_v63 = vpop.xlane.xlu1 %813  ;;  %v808_v54 = vpop.xlane.xlu0 %807  ;;  %v861_v8 = vsel %vm845_vm11, %v7540_v15, 1e+09  ;;  %v858_v58 = vsel %vm842_vm12, %v7540_v15, 1e+09 }
 0x1a3   : > { %v7605_v14 = vmin.f32 %v7533_v10, %v814_v63  ;;  %v7608_v6 = vmin.f32 %v7535_v13, %v808_v54  ;;  %889 = vmin.xlane.f32.xlu1 %v861_v8  ;;  %883 = vmin.xlane.f32.xlu0 %v858_v58 }
 0x1a5   : > { %vm847_vm13 = vcmp.eq.f32.partialorder %v7487_v51, %v7605_v14  ;;  %vm844_vm14 = vcmp.eq.f32.partialorder %v7483_v2, %v7608_v6 }
 0x1a6   : > { %v812_v7 = vpop.xlane.xlu0 %811  ;;  %v863_v50 = vsel %vm847_vm13, %v7540_v15, 1e+09  ;;  %v860_v44 = vsel %vm844_vm14, %v7540_v15, 1e+09 }
 0x1a7   : > { %v7617_v24 = vmin.f32 %v7537_v45, %v812_v7  ;;  %893 = vmin.xlane.f32.xlu1 %v863_v50  ;;  %887 = vmin.xlane.f32.xlu0 %v860_v44 }
 0x1a9   : > { %vm846_vm15 = vcmp.eq.f32.partialorder %v7495_v17, %v7617_v24 }
 0x1aa   : > { %v816_v10 = vpop.xlane.xlu0 %815  ;;  %v862_v13 = vsel %vm846_vm15, %v7540_v15, 1e+09 }
 0x1ab   : > { %v7623_v56 = vmin.f32 %v7546_v3, %v816_v10  ;;  %957 = vmin.xlane.f32.xlu1 %v12743_v19  ;;  %891 = vmin.xlane.f32.xlu0 %v862_v13  ;;  %v930_v3 = vpop.xlane.xlu1 %929 }
 0x1ad   : > { %vm848_vm0 = vcmp.eq.f32.partialorder %v7501_v60, %v7623_v56 }
 0x1ae   : > { %v864_v45 = vsel %vm848_vm0, %v7540_v15, 1e+09  ;;  %v932_v29 = vpop.xlane.xlu0 %931 }
 0x1af   : > { %895 = vmin.xlane.f32.xlu0 %v864_v45  ;;  %1138 = vmin.xlane.f32.xlu1 %v12741_v55  ;;  %v934_v27 = vpop.xlane.xlu1 %933 }
 0x1b2   : > { %v936_v31 = vpop.xlane.xlu0 %935 }
 0x1b3   : > { %959 = vmin.xlane.f32.xlu0 %v12743_v19  ;;  %1142 = vmin.xlane.f32.xlu1 %v12741_v55  ;;  %v938_v30 = vpop.xlane.xlu1 %937 }
 0x1b6   : > { %v940_v34 = vpop.xlane.xlu0 %939 }
 0x1b7   : > { %1146 = vmin.xlane.f32.xlu1 %v12741_v55  ;;  %1140 = vmin.xlane.f32.xlu0 %v12741_v55  ;;  %v942_v32 = vpop.xlane.xlu1 %941 }
 0x1ba   : > { %v944_v46 = vpop.xlane.xlu0 %943 }
 0x1bb   : > { %1150 = vmin.xlane.f32.xlu1 %v12741_v55  ;;  %1144 = vmin.xlane.f32.xlu0 %v12741_v55  ;;  %v946_v35 = vpop.xlane.xlu1 %945 }
 0x1be   : > { %v948_v49 = vpop.xlane.xlu0 %947 }
 0x1bf   : > { %1154 = vmin.xlane.f32.xlu1 %v12741_v55  ;;  %1148 = vmin.xlane.f32.xlu0 %v12741_v55  ;;  %v950_v36 = vpop.xlane.xlu1 %949 }
 0x1c2   : > { %v952_v52 = vpop.xlane.xlu0 %951 }
 0x1c3   : > { %1158 = vmin.xlane.f32.xlu1 %v12741_v55  ;;  %1152 = vmin.xlane.f32.xlu0 %v12741_v55  ;;  %v954_v11 = vpop.xlane.xlu1 %953 }
 0x1c6   : > { %v7646_v61 = vpop.xlane.xlu0 %955 }
 0x1c7   : > { %1162 = vmin.xlane.f32.xlu1 %v12741_v55  ;;  %1156 = vmin.xlane.f32.xlu0 %v12741_v55 }
 0x1cb   : > { %1160 = vmin.xlane.f32.xlu0 %v12741_v55 }
 0x1cf   : > { %1164 = vmin.xlane.f32.xlu0 %v12741_v55 }
 0x218   : > { %v866_v53 = vpop.xlane.xlu1 %865 }
 0x219   : > { %v7644_v22 = vmin.f32 %v866_v53, %v930_v3 }
 0x21b   : > { %vm977_vm1 = vcmp.eq.f32.partialorder %v7540_v15, %v7644_v22 }
 0x21c   : > { %v870_v0 = vpop.xlane.xlu1 %869  ;;  %v7651_v1 = vsel %vm977_vm1, 1e+30, %v7363_v42  ;;  %vm1057_vm1 = vcmp.eq.s32.totalorder %v7332_v18, 0 }
 0x21d   : > { %v7653_v63 = vmin.f32 %v870_v0, %v934_v27  ;;  %1106 = vmin.xlane.f32.xlu1 %v7651_v1 }
 0x21f   : > { %vm979_vm2 = vcmp.eq.f32.partialorder %v7540_v15, %v7653_v63 }
 0x220   : > { %v874_v54 = vpop.xlane.xlu1 %873  ;;  %v868_v8 = vpop.xlane.xlu0 %867  ;;  %v7659_v58 = vsel %vm979_vm2, 1e+30, %v7384_v25  ;;  %vm1410_vm2 = vcmp.eq.s32.totalorder %v7332_v18, 1 }
 0x221   : > { %v7661_v7 = vmin.f32 %v874_v54, %v938_v30  ;;  %v7663_v50 = vmin.f32 %v868_v8, %v932_v29  ;;  %1110 = vmin.xlane.f32.xlu1 %v7659_v58 }
 0x223   : > { %vm981_vm3 = vcmp.eq.f32.partialorder %v7540_v15, %v7661_v7  ;;  %vm978_vm4 = vcmp.eq.f32.partialorder %v7540_v15, %v7663_v50 }
 0x224   : > { %v878_v42 = vpop.xlane.xlu1 %877  ;;  %v872_v44 = vpop.xlane.xlu0 %871  ;;  %v7671_v10 = vsel %vm981_vm3, 1e+30, %v7388_v26  ;;  %v7674_v25 = vsel %vm978_vm4, 1e+30, %v7367_v39 }
 0x225   : > { %v7676_v13 = vmin.f32 %v878_v42, %v942_v32  ;;  %v7678_v45 = vmin.f32 %v872_v44, %v936_v31  ;;  %1114 = vmin.xlane.f32.xlu1 %v7671_v10  ;;  %1108 = vmin.xlane.f32.xlu0 %v7674_v25 }
 0x227   : > { %vm983_vm5 = vcmp.eq.f32.partialorder %v7540_v15, %v7676_v13  ;;  %vm980_vm6 = vcmp.eq.f32.partialorder %v7540_v15, %v7678_v45 }
 0x228   : > { %v882_v3 = vpop.xlane.xlu1 %881  ;;  %v876_v26 = vpop.xlane.xlu0 %875  ;;  %v7687_v27 = vsel %vm983_vm5, 1e+30, %v7411_v43  ;;  %v7690_v39 = vsel %vm980_vm6, 1e+30, %v7407_v38 }
 0x229   : > { %v7692_v29 = vmin.f32 %v882_v3, %v946_v35  ;;  %v7694_v30 = vmin.f32 %v876_v26, %v940_v34  ;;  %1118 = vmin.xlane.f32.xlu1 %v7687_v27  ;;  %1112 = vmin.xlane.f32.xlu0 %v7690_v39 }
 0x22b   : > { %vm985_vm7 = vcmp.eq.f32.partialorder %v7540_v15, %v7692_v29  ;;  %vm982_vm8 = vcmp.eq.f32.partialorder %v7540_v15, %v7694_v30 }
 0x22c   : > { %v886_v31 = vpop.xlane.xlu1 %885  ;;  %v880_v43 = vpop.xlane.xlu0 %879  ;;  %v7703_v32 = vsel %vm985_vm7, 1e+30, %v7432_v5  ;;  %v7706_v38 = vsel %vm982_vm8, 1e+30, %v7428_v4 }
 0x22d   : > { %v7708_v34 = vmin.f32 %v886_v31, %v950_v36  ;;  %v7710_v35 = vmin.f32 %v880_v43, %v944_v46  ;;  %1122 = vmin.xlane.f32.xlu1 %v7703_v32  ;;  %1116 = vmin.xlane.f32.xlu0 %v7706_v38 }
 0x22f   : > { %12753 = vst [vmem:[#allocation5_spill] sm:$0xff] %v7708_v34  ;;  %12754 = vst [vmem:[#allocation6_spill] sm:$0xff] %v7710_v35  ;;  %vm987_vm9 = vcmp.eq.f32.partialorder %v7540_v15, %v7708_v34  ;;  %vm984_vm10 = vcmp.eq.f32.partialorder %v7540_v15, %v7710_v35 }
 0x230   : > { %v890_v53 = vpop.xlane.xlu1 %889  ;;  %v884_v5 = vpop.xlane.xlu0 %883  ;;  %v7719_v0 = vsel %vm987_vm9, 1e+30, %v7453_v23  ;;  %v7722_v4 = vsel %vm984_vm10, 1e+30, %v7449_v21 }
 0x231   : > { %v7724_v46 = vmin.f32 %v890_v53, %v954_v11  ;;  %v7726_v36 = vmin.f32 %v884_v5, %v948_v49  ;;  %1126 = vmin.xlane.f32.xlu1 %v7719_v0  ;;  %1120 = vmin.xlane.f32.xlu0 %v7722_v4 }
 0x233   : > { %12755 = vst [vmem:[#allocation7_spill] sm:$0xff] %v7724_v46  ;;  %12756 = vst [vmem:[#allocation8_spill] sm:$0xff] %v7726_v36  ;;  %vm989_vm11 = vcmp.eq.f32.partialorder %v7540_v15, %v7724_v46  ;;  %vm986_vm12 = vcmp.eq.f32.partialorder %v7540_v15, %v7726_v36 }
 0x234   : > { %v894_v54 = vpop.xlane.xlu1 %893  ;;  %v888_v23 = vpop.xlane.xlu0 %887  ;;  %v7735_v8 = vsel %vm989_vm11, 1e+30, %v7471_v33  ;;  %v7738_v21 = vsel %vm986_vm12, 1e+30, %v7467_v47 }
 0x235   : > { %v7740_v49 = vmin.f32 %v888_v23, %v952_v52  ;;  %1130 = vmin.xlane.f32.xlu1 %v7735_v8  ;;  %1124 = vmin.xlane.f32.xlu0 %v7738_v21 }
 0x237   : > { %12757 = vst [vmem:[#allocation9_spill] sm:$0xff] %v7740_v49  ;;  %vm988_vm13 = vcmp.eq.f32.partialorder %v7540_v15, %v7740_v49 }
 0x238   : > { %v958_v11 = vpop.xlane.xlu1 %957  ;;  %v892_v42 = vpop.xlane.xlu0 %891  ;;  %v7747_v44 = vsel %vm988_vm13, 1e+30, %v7483_v2 }
 0x239   : > { %v7749_v3 = vmin.f32 %v894_v54, %v958_v11  ;;  %v7752_v33 = vmin.f32 %v892_v42, %v7646_v61  ;;  %1128 = vmin.xlane.f32.xlu0 %v7747_v44 }
 0x23b   : > { %12758 = vst [vmem:[#allocation10_spill] sm:$0xff] %v7749_v3  ;;  %12759 = vst [vmem:[#allocation11_spill] sm:$0xff] %v7752_v33  ;;  %vm991_vm14 = vcmp.eq.f32.partialorder %v7540_v15, %v7749_v3  ;;  %vm990_vm15 = vcmp.eq.f32.partialorder %v7540_v15, %v7752_v33  ;;  %v1058_v3 = vsel %vm1057_vm1, %v7542_v20, 1e+30 }
 0x23c   : > { %v896_v47 = vpop.xlane.xlu0 %895  ;;  %v7760_v52 = vsel %vm991_vm14, 1e+30, %v7487_v51  ;;  %v7763_v2 = vsel %vm990_vm15, 1e+30, %v7495_v17  ;;  %v1139_v51 = vpop.xlane.xlu1 %1138 }
 0x23d   : > { %1134 = vmin.xlane.f32.xlu1 %v7760_v52  ;;  %1132 = vmin.xlane.f32.xlu0 %v7763_v2 }
 0x240   : > { %v960_v61 = vpop.xlane.xlu0 %959  ;;  %v1143_v17 = vpop.xlane.xlu1 %1142 }
 0x241   : > { %v7767_v26 = vmin.f32 %v896_v47, %v960_v61  ;;  %1166 = vmin.xlane.f32.xlu1 %v12741_v55 }
 0x243   : > { %12760 = vst [vmem:[#allocation12_spill] sm:$0xff] %v7767_v26  ;;  %vm992_vm0 = vcmp.eq.f32.partialorder %v7540_v15, %v7767_v26 }
 0x244   : > { %v7773_v31 = vsel %vm992_vm0, 1e+30, %v7501_v60  ;;  %v1141_v60 = vpop.xlane.xlu0 %1140  ;;  %v1147_v43 = vpop.xlane.xlu1 %1146 }
 0x245   : > { %1136 = vmin.xlane.f32.xlu0 %v7773_v31  ;;  %1282 = vmin.xlane.f32.xlu1 %v12743_v19 }
 0x248   : > { %v1145_v53 = vpop.xlane.xlu0 %1144  ;;  %v1151_v5 = vpop.xlane.xlu1 %1150 }
 0x249   : > { %1168 = vmin.xlane.f32.xlu0 %v12741_v55  ;;  %1286 = vmin.xlane.f32.xlu1 %v12743_v19 }
 0x24c   : > { %v1149_v54 = vpop.xlane.xlu0 %1148  ;;  %v1155_v23 = vpop.xlane.xlu1 %1154 }
 0x24d   : > { %1290 = vmin.xlane.f32.xlu1 %v12743_v19  ;;  %1284 = vmin.xlane.f32.xlu0 %v12743_v19 }
 0x250   : > { %v7791_v11 = vpop.xlane.xlu0 %1152  ;;  %v7793_v42 = vpop.xlane.xlu1 %1158 }
 0x251   : > { %1294 = vmin.xlane.f32.xlu1 %v12743_v19  ;;  %1288 = vmin.xlane.f32.xlu0 %v12743_v19 }
 0x254   : > { %v7795_v47 = vpop.xlane.xlu0 %1156  ;;  %v7797_v61 = vpop.xlane.xlu1 %1162 }
 0x255   : > { %1298 = vmin.xlane.f32.xlu1 %v12743_v19  ;;  %1292 = vmin.xlane.f32.xlu0 %v12743_v19 }
 0x258   : > { %v7799_v55 = vpop.xlane.xlu0 %1160 }
 0x259   : > { %1302 = vmin.xlane.f32.xlu1 %v12743_v19  ;;  %1296 = vmin.xlane.f32.xlu0 %v12743_v19 }
 0x25c   : > { %v7806_v33 = vpop.xlane.xlu0 %1164 }
 0x25d   : > { %1306 = vmin.xlane.f32.xlu1 %v12743_v19  ;;  %1300 = vmin.xlane.f32.xlu0 %v12743_v19 }
 0x261   : > { %1304 = vmin.xlane.f32.xlu0 %v12743_v19 }
 0x265   : > { %1308 = vmin.xlane.f32.xlu0 %v12743_v19 }
 0x2aa   : > { %v1107_v19 = vpop.xlane.xlu1 %1106 }
 0x2ab   : > { %v1170_v26 = vmin.f32 %v1107_v19, %v1139_v51  ;;  %v1060_v19 = vsel %vm1057_vm1, %v7549_v16, 1e+30  ;;  %v1059_v16 = vsel %vm1057_vm1, %v7556_v28, 1e+30 }
 0x2ad   : > { %v7810_v49 = vsel %vm1410_vm2, %v1170_v26, %v1058_v3  ;;  %vm1186_vm3 = vcmp.eq.f32.partialorder %v7651_v1, %v1170_v26 }
 0x2ae   : > { %12761 = vst [vmem:[#allocation13_spill] sm:$0xff] %v7810_v49  ;;  %v1111_v36 = vpop.xlane.xlu1 %1110  ;;  %v1202_v46 = vsel %vm1186_vm3, %v7540_v15, 1e+09 }
 0x2af   : > { %v1172_v35 = vmin.f32 %v1111_v36, %v1143_v17  ;;  %1218 = vmin.xlane.f32.xlu1 %v1202_v46  ;;  %v1062_v46 = vsel %vm1057_vm1, %v7554_v62, 1e+30 }
 0x2b1   : > { %v7819_v20 = vsel %vm1410_vm2, %v1172_v35, %v1060_v19  ;;  %vm1188_vm4 = vcmp.eq.f32.partialorder %v7659_v58, %v1172_v35  ;;  %v1064_v19 = vsel %vm1057_vm1, %v7564_v41, 1e+30 }
 0x2b2   : > { %v1115_v51 = vpop.xlane.xlu1 %1114  ;;  %v1109_v3 = vpop.xlane.xlu0 %1108  ;;  %v1204_v49 = vsel %vm1188_vm4, %v7540_v15, 1e+09 }
 0x2b3   : > { %v1174_v26 = vmin.f32 %v1115_v51, %v1147_v43  ;;  %v1171_v34 = vmin.f32 %v1109_v3, %v1141_v60  ;;  %1222 = vmin.xlane.f32.xlu1 %v1204_v49  ;;  %v1061_v51 = vsel %vm1057_vm1, %v7566_v9, 1e+30 }
 0x2b5   : > { %v7831_v36 = vsel %vm1410_vm2, %v1174_v26, %v1062_v46  ;;  %v7835_v35 = vsel %vm1410_vm2, %v1171_v34, %v1059_v16  ;;  %vm1190_vm5 = vcmp.eq.f32.partialorder %v7671_v10, %v1174_v26  ;;  %vm1187_vm6 = vcmp.eq.f32.partialorder %v7674_v25, %v1171_v34 }
 0x2b6   : > { %v1119_v49 = vpop.xlane.xlu1 %1118  ;;  %v1113_v17 = vpop.xlane.xlu0 %1112  ;;  %v1206_v62 = vsel %vm1190_vm5, %v7540_v15, 1e+09  ;;  %v1203_v60 = vsel %vm1187_vm6, %v7540_v15, 1e+09  ;;  %v1066_v16 = vsel %vm1057_vm1, %v7574_v59, 1e+30 }
 0x2b7   : > { %v1176_v43 = vmin.f32 %v1119_v49, %v1151_v5  ;;  %v1173_v28 = vmin.f32 %v1113_v17, %v1145_v53  ;;  %1226 = vmin.xlane.f32.xlu1 %v1206_v62  ;;  %1220 = vmin.xlane.f32.xlu0 %v1203_v60  ;;  %v1063_v49 = vsel %vm1057_vm1, %v7576_v40, 1e+30 }
 0x2b9   : > { %v7849_v34 = vsel %vm1410_vm2, %v1176_v43, %v1064_v19  ;;  %v7853_v3 = vsel %vm1410_vm2, %v1173_v28, %v1061_v51  ;;  %vm1192_vm7 = vcmp.eq.f32.partialorder %v7687_v27, %v1176_v43  ;;  %vm1189_vm8 = vcmp.eq.f32.partialorder %v7690_v39, %v1173_v28 }
 0x2ba   : > { %v1123_v53 = vpop.xlane.xlu1 %1122  ;;  %v1117_v5 = vpop.xlane.xlu0 %1116  ;;  %v1208_v41 = vsel %vm1192_vm7, %v7540_v15, 1e+09  ;;  %v1205_v26 = vsel %vm1189_vm8, %v7540_v15, 1e+09  ;;  %v1068_v28 = vsel %vm1057_vm1, %v7584_v12, 1e+30 }
 0x2bb   : > { %v1178_v46 = vmin.f32 %v1123_v53, %v1155_v23  ;;  %v1175_v9 = vmin.f32 %v1117_v5, %v1149_v54  ;;  %1230 = vmin.xlane.f32.xlu1 %v1208_v41  ;;  %1224 = vmin.xlane.f32.xlu0 %v1205_v26  ;;  %v1065_v19 = vsel %vm1057_vm1, %v7586_v57, 1e+30  ;;  %v1070_v26 = vsel %vm1057_vm1, %v7594_v48, 1e+30 }
 0x2bd   : > { %v7867_v17 = vsel %vm1410_vm2, %v1178_v46, %v1066_v16  ;;  %v7871_v62 = vsel %vm1410_vm2, %v1175_v9, %v1063_v49  ;;  %vm1194_vm9 = vcmp.eq.f32.partialorder %v7703_v32, %v1178_v46  ;;  %vm1191_vm10 = vcmp.eq.f32.partialorder %v7706_v38, %v1175_v9 }
 0x2be   : > { %v1127_v54 = vpop.xlane.xlu1 %1126  ;;  %v1121_v23 = vpop.xlane.xlu0 %1120  ;;  %v1210_v59 = vsel %vm1194_vm9, %v7540_v15, 1e+09  ;;  %v1207_v60 = vsel %vm1191_vm10, %v7540_v15, 1e+09  ;;  %v1067_v46 = vsel %vm1057_vm1, %v7596_v37, 1e+30 }
 0x2bf   : > { %v1180_v40 = vmin.f32 %v1127_v54, %v7793_v42  ;;  %v1177_v43 = vmin.f32 %v1121_v23, %v7791_v11  ;;  %1234 = vmin.xlane.f32.xlu1 %v1210_v59  ;;  %1228 = vmin.xlane.f32.xlu0 %v1207_v60  ;;  %v1069_v37 = vsel %vm1057_vm1, %v7608_v6, 1e+30 }
 0x2c1   : > { %v7887_v51 = vsel %vm1410_vm2, %v1180_v40, %v1068_v28  ;;  %v7891_v53 = vsel %vm1410_vm2, %v1177_v43, %v1065_v19  ;;  %vm1196_vm11 = vcmp.eq.f32.partialorder %v7719_v0, %v1180_v40  ;;  %vm1193_vm12 = vcmp.eq.f32.partialorder %v7722_v4, %v1177_v43 }
 0x2c2   : > { %v1131_v11 = vpop.xlane.xlu1 %1130  ;;  %v1125_v42 = vpop.xlane.xlu0 %1124  ;;  %v1212_v12 = vsel %vm1196_vm11, %v7540_v15, 1e+09  ;;  %v1209_v5 = vsel %vm1193_vm12, %v7540_v15, 1e+09 }
 0x2c3   : > { %v1182_v57 = vmin.f32 %v1131_v11, %v7797_v61  ;;  %v1179_v41 = vmin.f32 %v1125_v42, %v7795_v47  ;;  %1238 = vmin.xlane.f32.xlu1 %v1212_v12  ;;  %1232 = vmin.xlane.f32.xlu0 %v1209_v5 }
 0x2c5   : > { %v7907_v9 = vsel %vm1410_vm2, %v1182_v57, %v1070_v26  ;;  %v7911_v16 = vsel %vm1410_vm2, %v1179_v41, %v1067_v46  ;;  %vm1198_vm13 = vcmp.eq.f32.partialorder %v7735_v8, %v1182_v57  ;;  %vm1195_vm14 = vcmp.eq.f32.partialorder %v7738_v21, %v1179_v41 }
 0x2c6   : > { %v1129_v47 = vpop.xlane.xlu0 %1128  ;;  %v1214_v61 = vsel %vm1198_vm13, %v7540_v15, 1e+09  ;;  %v1211_v48 = vsel %vm1195_vm14, %v7540_v15, 1e+09  ;;  %v12762_v57 = vmov 1e+09  }
 0x2c7   : > { %v1181_v49 = vmin.f32 %v1129_v47, %v7799_v55  ;;  %1242 = vmin.xlane.f32.xlu1 %v1214_v61  ;;  %1236 = vmin.xlane.f32.xlu0 %v1211_v48  ;;  %v1071_v55 = vsel %vm1057_vm1, %v7617_v24, 1e+30  ;;  %v1073_v41 = vsel %vm1057_vm1, %v7623_v56, 1e+30  ;;  %v12763_v46 = vmov 1e+30  }
 0x2c9   : > { %v7923_v54 = vsel %vm1410_vm2, %v1181_v49, %v1069_v37  ;;  %vm1197_vm15 = vcmp.eq.f32.partialorder %v7747_v44, %v1181_v49 }
 0x2ca   : > { %v1135_v23 = vpop.xlane.xlu1 %1134  ;;  %v1133_v59 = vpop.xlane.xlu0 %1132  ;;  %v1213_v60 = vsel %vm1197_vm15, %v7540_v15, 1e+09 }
 0x2cb   : > { %v1183_v40 = vmin.f32 %v1133_v59, %v7806_v33  ;;  %1240 = vmin.xlane.f32.xlu0 %v1213_v60  ;;  %v1072_v33 = vsel %vm1057_vm1, %v7605_v14, 1e+30 }
 0x2cd   : > { %v7933_v6 = vsel %vm1410_vm2, %v1183_v40, %v1071_v55  ;;  %vm1199_vm0 = vcmp.eq.f32.partialorder %v7763_v2, %v1183_v40 }
 0x2ce   : > { %v1167_v43 = vpop.xlane.xlu1 %1166  ;;  %v1215_v28 = vsel %vm1199_vm0, %v7540_v15, 1e+09 }
 0x2cf   : > { %v1184_v19 = vmin.f32 %v1135_v23, %v1167_v43  ;;  %1244 = vmin.xlane.f32.xlu0 %v1215_v28 }
 0x2d1   : > { %v7942_v11 = vsel %vm1410_vm2, %v1184_v19, %v1072_v33  ;;  %vm1200_vm3 = vcmp.eq.f32.partialorder %v7760_v52, %v1184_v19 }
 0x2d2   : > { %v1137_v24 = vpop.xlane.xlu0 %1136  ;;  %v1216_v42 = vsel %vm1200_vm3, %v7540_v15, 1e+09  ;;  %v1283_v56 = vpop.xlane.xlu1 %1282 }
 0x2d3   : > { %1246 = vmin.xlane.f32.xlu1 %v1216_v42 }
 0x2d6   : > { %v1169_v12 = vpop.xlane.xlu0 %1168  ;;  %v1287_v47 = vpop.xlane.xlu1 %1286 }
 0x2d7   : > { %v1185_v5 = vmin.f32 %v1137_v24, %v1169_v12  ;;  %1310 = vmin.xlane.f32.xlu1 %v12762_v57  ;;  %v1074_v24 = vsel %vm1057_vm1, %v7644_v22, 1e+09 }
 0x2d9   : > { %v7952_v14 = vsel %vm1410_vm2, %v1185_v5, %v1073_v41  ;;  %vm1201_vm4 = vcmp.eq.f32.partialorder %v7773_v31, %v1185_v5 }
 0x2da   : > { %v1217_v26 = vsel %vm1201_vm4, %v7540_v15, 1e+09  ;;  %v1285_v61 = vpop.xlane.xlu0 %1284  ;;  %v1291_v48 = vpop.xlane.xlu1 %1290 }
 0x2db   : > { %1248 = vmin.xlane.f32.xlu0 %v1217_v26  ;;  %1491 = vmin.xlane.f32.xlu1 %v12763_v46 }
 0x2de   : > { %v1289_v49 = vpop.xlane.xlu0 %1288  ;;  %v1295_v37 = vpop.xlane.xlu1 %1294 }
 0x2df   : > { %1312 = vmin.xlane.f32.xlu0 %v12762_v57  ;;  %1495 = vmin.xlane.f32.xlu1 %v12763_v46 }
 0x2e2   : > { %v1293_v23 = vpop.xlane.xlu0 %1292  ;;  %v1299_v59 = vpop.xlane.xlu1 %1298 }
 0x2e3   : > { %1499 = vmin.xlane.f32.xlu1 %v12763_v46  ;;  %1493 = vmin.xlane.f32.xlu0 %v12763_v46 }
 0x2e6   : > { %v7971_v60 = vpop.xlane.xlu0 %1296  ;;  %v1303_v40 = vpop.xlane.xlu1 %1302 }
 0x2e7   : > { %1503 = vmin.xlane.f32.xlu1 %v12763_v46  ;;  %1497 = vmin.xlane.f32.xlu0 %v12763_v46 }
 0x2ea   : > { %v7973_v55 = vpop.xlane.xlu0 %1300  ;;  %v7975_v43 = vpop.xlane.xlu1 %1306 }
 0x2eb   : > { %1507 = vmin.xlane.f32.xlu1 %v12763_v46  ;;  %1501 = vmin.xlane.f32.xlu0 %v12763_v46 }
 0x2ee   : > { %v7977_v28 = vpop.xlane.xlu0 %1304 }
 0x2ef   : > { %1511 = vmin.xlane.f32.xlu1 %v12763_v46  ;;  %1505 = vmin.xlane.f32.xlu0 %v12763_v46 }
 0x2f2   : > { %v7982_v42 = vpop.xlane.xlu0 %1308 }
 0x2f3   : > { %1515 = vmin.xlane.f32.xlu1 %v12763_v46  ;;  %1509 = vmin.xlane.f32.xlu0 %v12763_v46 }
 0x2f7   : > { %1513 = vmin.xlane.f32.xlu0 %v12763_v46 }
 0x2fb   : > { %1517 = vmin.xlane.f32.xlu0 %v12763_v46 }
 0x33c   : > { %v1219_v19 = vpop.xlane.xlu1 %1218 }
 0x33d   : > { %v1314_v33 = vmin.f32 %v1219_v19, %v1283_v56  ;;  %v1076_v56 = vsel %vm1057_vm1, %v7653_v63, 1e+09  ;;  %v1075_v63 = vsel %vm1057_vm1, %v7663_v50, 1e+09 }
 0x33f   : > { %v7986_v12 = vsel %vm1410_vm2, %v1314_v33, %v1074_v24  ;;  %vm1330_vm5 = vcmp.eq.f32.partialorder %v7540_v15, %v1314_v33 }
 0x340   : > { %12764 = vst [vmem:[#allocation14_spill] sm:$0xff] %v7986_v12  ;;  %v1223_v5 = vpop.xlane.xlu1 %1222  ;;  %v7990_v41 = vsel %vm1330_vm5, 1e+30, %v7651_v1 }
 0x341   : > { %v1316_v26 = vmin.f32 %v1223_v5, %v1287_v47  ;;  %1459 = vmin.xlane.f32.xlu1 %v7990_v41  ;;  %v1078_v47 = vsel %vm1057_vm1, %v7661_v7, 1e+09 }
 0x343   : > { %v7998_v22 = vsel %vm1410_vm2, %v1316_v26, %v1076_v56  ;;  %vm1332_vm6 = vcmp.eq.f32.partialorder %v7540_v15, %v1316_v26 }
 0x344   : > { %v1227_v19 = vpop.xlane.xlu1 %1226  ;;  %v1221_v24 = vpop.xlane.xlu0 %1220  ;;  %v8002_v33 = vsel %vm1332_vm6, 1e+30, %v7659_v58 }
 0x345   : > { %v1318_v1 = vmin.f32 %v1227_v19, %v1291_v48  ;;  %v1315_v12 = vmin.f32 %v1221_v24, %v1285_v61  ;;  %1463 = vmin.xlane.f32.xlu1 %v8002_v33  ;;  %v1080_v19 = vsel %vm1057_vm1, %v7676_v13, 1e+09 }
 0x347   : > { %v8013_v5 = vsel %vm1410_vm2, %v1318_v1, %v1078_v47  ;;  %v8017_v58 = vsel %vm1410_vm2, %v1315_v12, %v1075_v63  ;;  %vm1334_vm7 = vcmp.eq.f32.partialorder %v7540_v15, %v1318_v1  ;;  %vm1331_vm8 = vcmp.eq.f32.partialorder %v7540_v15, %v1315_v12 }
 0x348   : > { %v1231_v61 = vpop.xlane.xlu1 %1230  ;;  %v1225_v48 = vpop.xlane.xlu0 %1224  ;;  %v8022_v7 = vsel %vm1334_vm7, 1e+30, %v7671_v10  ;;  %v8025_v26 = vsel %vm1331_vm8, 1e+30, %v7674_v25  ;;  %v1077_v12 = vsel %vm1057_vm1, %v7678_v45, 1e+09 }
 0x349   : > { %v1320_v50 = vmin.f32 %v1231_v61, %v1295_v37  ;;  %v1317_v56 = vmin.f32 %v1225_v48, %v1289_v49  ;;  %1467 = vmin.xlane.f32.xlu1 %v8022_v7  ;;  %1461 = vmin.xlane.f32.xlu0 %v8025_v26  ;;  %v1082_v47 = vsel %vm1057_vm1, %v7692_v29, 1e+09  ;;  %v1079_v63 = vsel %vm1057_vm1, %v7694_v30, 1e+09 }
 0x34b   : > { %v8037_v10 = vsel %vm1410_vm2, %v1320_v50, %v1080_v19  ;;  %v8041_v25 = vsel %vm1410_vm2, %v1317_v56, %v1077_v12  ;;  %vm1336_vm9 = vcmp.eq.f32.partialorder %v7540_v15, %v1320_v50  ;;  %vm1333_vm10 = vcmp.eq.f32.partialorder %v7540_v15, %v1317_v56  ;;  %v12766_v50 = vld [vmem:[#allocation5_spill] sm:$0xff]  ;;  %v12767_v19 = vld [vmem:[#allocation6_spill] sm:$0xff] }
 0x34c   : > { %v1235_v49 = vpop.xlane.xlu1 %1234  ;;  %v1229_v37 = vpop.xlane.xlu0 %1228  ;;  %v8046_v13 = vsel %vm1336_vm9, 1e+30, %v7687_v27  ;;  %v8049_v24 = vsel %vm1333_vm10, 1e+30, %v7690_v39  ;;  %v1084_v56 = vsel %vm1057_vm1, %v12766_v50, 1e+09 }
 0x34d   : > { %v1322_v45 = vmin.f32 %v1235_v49, %v1299_v59  ;;  %v1319_v1 = vmin.f32 %v1229_v37, %v1293_v23  ;;  %1471 = vmin.xlane.f32.xlu1 %v8046_v13  ;;  %1465 = vmin.xlane.f32.xlu0 %v8049_v24  ;;  %v1081_v12 = vsel %vm1057_vm1, %v12767_v19, 1e+09  ;;  %v12774_v50 = vld [vmem:[#allocation9_spill] sm:$0xff] }
 0x34f   : > { %v8061_v27 = vsel %vm1410_vm2, %v1322_v45, %v1082_v47  ;;  %v8065_v39 = vsel %vm1410_vm2, %v1319_v1, %v1079_v63  ;;  %vm1338_vm11 = vcmp.eq.f32.partialorder %v7540_v15, %v1322_v45  ;;  %vm1335_vm12 = vcmp.eq.f32.partialorder %v7540_v15, %v1319_v1  ;;  %v12770_v47 = vld [vmem:[#allocation7_spill] sm:$0xff] }
 0x350   : > { %12765 = vst [vmem:[#allocation15_spill] sm:$0xff] %v8065_v39  ;;  %v1239_v23 = vpop.xlane.xlu1 %1238  ;;  %v1233_v59 = vpop.xlane.xlu0 %1232  ;;  %v8070_v29 = vsel %vm1338_vm11, 1e+30, %v7703_v32  ;;  %v8073_v61 = vsel %vm1335_vm12, 1e+30, %v7706_v38 }
 0x351   : > { %v1324_v30 = vmin.f32 %v1239_v23, %v1303_v40  ;;  %v1321_v48 = vmin.f32 %v1233_v59, %v7971_v60  ;;  %1475 = vmin.xlane.f32.xlu1 %v8070_v29  ;;  %1469 = vmin.xlane.f32.xlu0 %v8073_v61  ;;  %v1086_v63 = vsel %vm1057_vm1, %v12770_v47, 1e+09  ;;  %v12771_v23 = vld [vmem:[#allocation8_spill] sm:$0xff]  ;;  %v12778_v47 = vld [vmem:[#allocation10_spill] sm:$0xff] }
 0x353   : > { %v8086_v32 = vsel %vm1410_vm2, %v1324_v30, %v1084_v56  ;;  %v8090_v38 = vsel %vm1410_vm2, %v1321_v48, %v1081_v12  ;;  %vm1340_vm13 = vcmp.eq.f32.partialorder %v7540_v15, %v1324_v30  ;;  %vm1337_vm14 = vcmp.eq.f32.partialorder %v7540_v15, %v1321_v48  ;;  %v12776_v12 = vld [vmem:[#allocation11_spill] sm:$0xff] }
 0x354   : > { %12768 = vst [vmem:[#allocation5_spill] sm:$0xff] %v8086_v32  ;;  %12769 = vst [vmem:[#allocation6_spill] sm:$0xff] %v8090_v38  ;;  %v1243_v60 = vpop.xlane.xlu1 %1242  ;;  %v1237_v40 = vpop.xlane.xlu0 %1236  ;;  %v8095_v49 = vsel %vm1340_vm13, 1e+30, %v7719_v0  ;;  %v8098_v37 = vsel %vm1337_vm14, 1e+30, %v7722_v4 }
 0x355   : > { %v1326_v45 = vmin.f32 %v1243_v60, %v7975_v43  ;;  %v1323_v1 = vmin.f32 %v1237_v40, %v7973_v55  ;;  %1479 = vmin.xlane.f32.xlu1 %v8095_v49  ;;  %1473 = vmin.xlane.f32.xlu0 %v8098_v37  ;;  %v1083_v0 = vsel %vm1057_vm1, %v12771_v23, 1e+09  ;;  %v1085_v56 = vsel %vm1057_vm1, %v12774_v50, 1e+09  ;;  %v12780_v50 = vld [vmem:[#allocation12_spill] sm:$0xff] }
 0x356   : > { %v1087_v60 = vsel %vm1057_vm1, %v12776_v12, 1e+09 }
 0x357   : > { %v8112_v4 = vsel %vm1410_vm2, %v1326_v45, %v1086_v63  ;;  %v8116_v43 = vsel %vm1410_vm2, %v1323_v1, %v1083_v0  ;;  %vm1342_vm15 = vcmp.eq.f32.partialorder %v7540_v15, %v1326_v45  ;;  %vm1339_vm0 = vcmp.eq.f32.partialorder %v7540_v15, %v1323_v1 }
 0x358   : > { %12772 = vst [vmem:[#allocation7_spill] sm:$0xff] %v8112_v4  ;;  %12773 = vst [vmem:[#allocation8_spill] sm:$0xff] %v8116_v43  ;;  %v1241_v55 = vpop.xlane.xlu0 %1240  ;;  %v8121_v59 = vsel %vm1342_vm15, 1e+30, %v7735_v8  ;;  %v8124_v30 = vsel %vm1339_vm0, 1e+30, %v7738_v21 }
 0x359   : > { %v1325_v48 = vmin.f32 %v1241_v55, %v7977_v28  ;;  %1483 = vmin.xlane.f32.xlu1 %v8121_v59  ;;  %1477 = vmin.xlane.f32.xlu0 %v8124_v30  ;;  %v1088_v63 = vsel %vm1057_vm1, %v12778_v47, 1e+09 }
 0x35b   : > { %v8134_v19 = vsel %vm1410_vm2, %v1325_v48, %v1085_v56  ;;  %vm1341_vm3 = vcmp.eq.f32.partialorder %v7540_v15, %v1325_v48  ;;  %v1089_v56 = vsel %vm1057_vm1, %v12780_v50, 1e+09  ;;  %vm1763_vm1 = vcmp.eq.s32.totalorder %v7332_v18, 2 }
 0x35c   : > { %12775 = vst [vmem:[#allocation9_spill] sm:$0xff] %v8134_v19  ;;  %v1245_v8 = vpop.xlane.xlu0 %1244  ;;  %v8138_v21 = vsel %vm1341_vm3, 1e+30, %v7747_v44 }
 0x35d   : > { %v1327_v28 = vmin.f32 %v1245_v8, %v7982_v42  ;;  %1481 = vmin.xlane.f32.xlu0 %v8138_v21 }
 0x35f   : > { %v8147_v40 = vsel %vm1410_vm2, %v1327_v28, %v1087_v60  ;;  %vm1343_vm4 = vcmp.eq.f32.partialorder %v7540_v15, %v1327_v28 }
 0x360   : > { %12777 = vst [vmem:[#allocation11_spill] sm:$0xff] %v8147_v40  ;;  %v1247_v45 = vpop.xlane.xlu1 %1246  ;;  %v8151_v1 = vsel %vm1343_vm4, 1e+30, %v7763_v2  ;;  %v12782_v40 = vld [vmem:[#allocation13_spill] sm:$0xff] }
 0x361   : > { %1485 = vmin.xlane.f32.xlu0 %v8151_v1 }
 0x364   : > { %v1311_v44 = vpop.xlane.xlu1 %1310 }
 0x365   : > { %v1328_v42 = vmin.f32 %v1247_v45, %v1311_v44 }
 0x367   : > { %v8159_v23 = vsel %vm1410_vm2, %v1328_v42, %v1088_v63  ;;  %vm1344_vm5 = vcmp.eq.f32.partialorder %v7540_v15, %v1328_v42 }
 0x368   : > { %12779 = vst [vmem:[#allocation10_spill] sm:$0xff] %v8159_v23  ;;  %v1249_v0 = vpop.xlane.xlu0 %1248  ;;  %v8163_v55 = vsel %vm1344_vm5, 1e+30, %v7760_v52  ;;  %v1492_v52 = vpop.xlane.xlu1 %1491 }
 0x369   : > { %1487 = vmin.xlane.f32.xlu1 %v8163_v55 }
 0x36c   : > { %v1313_v2 = vpop.xlane.xlu0 %1312 }
 0x36d   : > { %v1329_v48 = vmin.f32 %v1249_v0, %v1313_v2  ;;  %1519 = vmin.xlane.f32.xlu1 %v12763_v46 }
 0x36f   : > { %v8172_v8 = vsel %vm1410_vm2, %v1329_v48, %v1089_v56  ;;  %vm1345_vm6 = vcmp.eq.f32.partialorder %v7540_v15, %v1329_v48 }
 0x370   : > { %12781 = vst [vmem:[#allocation12_spill] sm:$0xff] %v8172_v8  ;;  %v8176_v28 = vsel %vm1345_vm6, 1e+30, %v7773_v31  ;;  %v1496_v31 = vpop.xlane.xlu1 %1495  ;;  %v1494_v12 = vpop.xlane.xlu0 %1493 }
 0x371   : > { %1489 = vmin.xlane.f32.xlu0 %v8176_v28  ;;  %1635 = vmin.xlane.f32.xlu1 %v12762_v57 }
 0x374   : > { %v1500_v60 = vpop.xlane.xlu1 %1499  ;;  %v1498_v45 = vpop.xlane.xlu0 %1497 }
 0x375   : > { %1521 = vmin.xlane.f32.xlu0 %v12763_v46  ;;  %1639 = vmin.xlane.f32.xlu1 %v12762_v57 }
 0x378   : > { %v1504_v44 = vpop.xlane.xlu1 %1503  ;;  %v1502_v42 = vpop.xlane.xlu0 %1501 }
 0x379   : > { %1643 = vmin.xlane.f32.xlu1 %v12762_v57  ;;  %1637 = vmin.xlane.f32.xlu0 %v12762_v57 }
 0x37c   : > { %v1508_v47 = vpop.xlane.xlu1 %1507  ;;  %v1506_v63 = vpop.xlane.xlu0 %1505 }
 0x37d   : > { %1647 = vmin.xlane.f32.xlu1 %v12762_v57  ;;  %1641 = vmin.xlane.f32.xlu0 %v12762_v57 }
 0x380   : > { %v1512_v0 = vpop.xlane.xlu1 %1511  ;;  %v8194_v2 = vpop.xlane.xlu0 %1509 }
 0x381   : > { %1651 = vmin.xlane.f32.xlu1 %v12762_v57  ;;  %1645 = vmin.xlane.f32.xlu0 %v12762_v57 }
 0x384   : > { %v8196_v48 = vpop.xlane.xlu1 %1515  ;;  %v8198_v50 = vpop.xlane.xlu0 %1513 }
 0x385   : > { %1655 = vmin.xlane.f32.xlu1 %v12762_v57  ;;  %1649 = vmin.xlane.f32.xlu0 %v12762_v57 }
 0x388   : > { %v8201_v23 = vpop.xlane.xlu0 %1517 }
 0x389   : > { %1659 = vmin.xlane.f32.xlu1 %v12762_v57  ;;  %1653 = vmin.xlane.f32.xlu0 %v12762_v57 }
 0x38d   : > { %1657 = vmin.xlane.f32.xlu0 %v12762_v57 }
 0x391   : > { %1661 = vmin.xlane.f32.xlu0 %v12762_v57 }
 0x3ce   : > { %v1460_v56 = vpop.xlane.xlu1 %1459 }
 0x3cf   : > { %v1523_v8 = vmin.f32 %v1460_v56, %v1492_v52 }
 0x3d1   : > { %v8206_v19 = vsel %vm1763_vm1, %v1523_v8, %v12782_v40  ;;  %vm1539_vm2 = vcmp.eq.f32.partialorder %v7990_v41, %v1523_v8 }
 0x3d2   : > { %12783 = vst [vmem:[#allocation13_spill] sm:$0xff] %v8206_v19  ;;  %v1464_v43 = vpop.xlane.xlu1 %1463  ;;  %v1555_v4 = vsel %vm1539_vm2, %v7540_v15, 1e+09 }
 0x3d3   : > { %v1525_v38 = vmin.f32 %v1464_v43, %v1496_v31  ;;  %1571 = vmin.xlane.f32.xlu1 %v1555_v4 }
 0x3d5   : > { %v8213_v32 = vsel %vm1763_vm1, %v1525_v38, %v7819_v20  ;;  %vm1541_vm7 = vcmp.eq.f32.partialorder %v8002_v33, %v1525_v38 }
 0x3d6   : > { %v1468_v52 = vpop.xlane.xlu1 %1467  ;;  %v1462_v56 = vpop.xlane.xlu0 %1461  ;;  %v1557_v39 = vsel %vm1541_vm7, %v7540_v15, 1e+09 }
 0x3d7   : > { %v1527_v40 = vmin.f32 %v1468_v52, %v1500_v60  ;;  %v1524_v19 = vmin.f32 %v1462_v56, %v1494_v12  ;;  %1575 = vmin.xlane.f32.xlu1 %v1557_v39 }
 0x3d9   : > { %v8220_v8 = vsel %vm1763_vm1, %v1527_v40, %v7831_v36  ;;  %v8225_v4 = vsel %vm1763_vm1, %v1524_v19, %v7835_v35  ;;  %vm1543_vm8 = vcmp.eq.f32.partialorder %v8022_v7, %v1527_v40  ;;  %vm1540_vm9 = vcmp.eq.f32.partialorder %v8025_v26, %v1524_v19 }
 0x3da   : > { %v1472_v20 = vpop.xlane.xlu1 %1471  ;;  %v1466_v38 = vpop.xlane.xlu0 %1465  ;;  %v1559_v43 = vsel %vm1543_vm8, %v7540_v15, 1e+09  ;;  %v1556_v39 = vsel %vm1540_vm9, %v7540_v15, 1e+09 }
 0x3db   : > { %v1529_v31 = vmin.f32 %v1472_v20, %v1504_v44  ;;  %v1526_v12 = vmin.f32 %v1466_v38, %v1498_v45  ;;  %1579 = vmin.xlane.f32.xlu1 %v1559_v43  ;;  %1573 = vmin.xlane.f32.xlu0 %v1556_v39 }
 0x3dd   : > { %v8234_v36 = vsel %vm1763_vm1, %v1529_v31, %v7849_v34  ;;  %v8239_v35 = vsel %vm1763_vm1, %v1526_v12, %v7853_v3  ;;  %vm1545_vm10 = vcmp.eq.f32.partialorder %v8046_v13, %v1529_v31  ;;  %vm1542_vm11 = vcmp.eq.f32.partialorder %v8049_v24, %v1526_v12 }
 0x3de   : > { %v1476_v19 = vpop.xlane.xlu1 %1475  ;;  %v1470_v60 = vpop.xlane.xlu0 %1469  ;;  %v1561_v45 = vsel %vm1545_vm10, %v7540_v15, 1e+09  ;;  %v1558_v44 = vsel %vm1542_vm11, %v7540_v15, 1e+09 }
 0x3df   : > { %v1531_v52 = vmin.f32 %v1476_v19, %v1508_v47  ;;  %v1528_v56 = vmin.f32 %v1470_v60, %v1502_v42  ;;  %1583 = vmin.xlane.f32.xlu1 %v1561_v45  ;;  %1577 = vmin.xlane.f32.xlu0 %v1558_v44 }
 0x3e1   : > { %v8248_v34 = vsel %vm1763_vm1, %v1531_v52, %v7867_v17  ;;  %v8253_v3 = vsel %vm1763_vm1, %v1528_v56, %v7871_v62  ;;  %vm1547_vm12 = vcmp.eq.f32.partialorder %v8070_v29, %v1531_v52  ;;  %vm1544_vm13 = vcmp.eq.f32.partialorder %v8073_v61, %v1528_v56 }
 0x3e2   : > { %v1480_v40 = vpop.xlane.xlu1 %1479  ;;  %v1474_v20 = vpop.xlane.xlu0 %1473  ;;  %v1563_v42 = vsel %vm1547_vm12, %v7540_v15, 1e+09  ;;  %v1560_v47 = vsel %vm1544_vm13, %v7540_v15, 1e+09 }
 0x3e3   : > { %v1533_v38 = vmin.f32 %v1480_v40, %v1512_v0  ;;  %v1530_v43 = vmin.f32 %v1474_v20, %v1506_v63  ;;  %1587 = vmin.xlane.f32.xlu1 %v1563_v42  ;;  %1581 = vmin.xlane.f32.xlu0 %v1560_v47 }
 0x3e5   : > { %v8262_v17 = vsel %vm1763_vm1, %v1533_v38, %v7887_v51  ;;  %v8267_v62 = vsel %vm1763_vm1, %v1530_v43, %v7891_v53  ;;  %vm1549_vm14 = vcmp.eq.f32.partialorder %v8095_v49, %v1533_v38  ;;  %vm1546_vm15 = vcmp.eq.f32.partialorder %v8098_v37, %v1530_v43 }
 0x3e6   : > { %v1484_v39 = vpop.xlane.xlu1 %1483  ;;  %v1478_v31 = vpop.xlane.xlu0 %1477  ;;  %v1565_v63 = vsel %vm1549_vm14, %v7540_v15, 1e+09  ;;  %v1562_v0 = vsel %vm1546_vm15, %v7540_v15, 1e+09 }
 0x3e7   : > { %v1535_v12 = vmin.f32 %v1484_v39, %v8196_v48  ;;  %v1532_v51 = vmin.f32 %v1478_v31, %v8194_v2  ;;  %1591 = vmin.xlane.f32.xlu1 %v1565_v63  ;;  %1585 = vmin.xlane.f32.xlu0 %v1562_v0 }
 0x3e9   : > { %v8278_v53 = vsel %vm1763_vm1, %v1535_v12, %v7907_v9  ;;  %v8283_v19 = vsel %vm1763_vm1, %v1532_v51, %v7911_v16  ;;  %vm1551_vm0 = vcmp.eq.f32.partialorder %v8121_v59, %v1535_v12  ;;  %vm1548_vm3 = vcmp.eq.f32.partialorder %v8124_v30, %v1532_v51 }
 0x3ea   : > { %v1482_v60 = vpop.xlane.xlu0 %1481  ;;  %v1567_v48 = vsel %vm1551_vm0, %v7540_v15, 1e+09  ;;  %v1564_v2 = vsel %vm1548_vm3, %v7540_v15, 1e+09 }
 0x3eb   : > { %v1534_v45 = vmin.f32 %v1482_v60, %v8198_v50  ;;  %1595 = vmin.xlane.f32.xlu1 %v1567_v48  ;;  %1589 = vmin.xlane.f32.xlu0 %v1564_v2 }
 0x3ed   : > { %v8293_v9 = vsel %vm1763_vm1, %v1534_v45, %v7923_v54  ;;  %vm1550_vm4 = vcmp.eq.f32.partialorder %v8138_v21, %v1534_v45 }
 0x3ee   : > { %v1486_v16 = vpop.xlane.xlu0 %1485  ;;  %v1566_v44 = vsel %vm1550_vm4, %v7540_v15, 1e+09 }
 0x3ef   : > { %v1536_v52 = vmin.f32 %v1486_v16, %v8201_v23  ;;  %1593 = vmin.xlane.f32.xlu0 %v1566_v44 }
 0x3f1   : > { %v8301_v56 = vsel %vm1763_vm1, %v1536_v52, %v7933_v6  ;;  %vm1552_vm5 = vcmp.eq.f32.partialorder %v8151_v1, %v1536_v52 }
 0x3f2   : > { %v1568_v50 = vsel %vm1552_vm5, %v7540_v15, 1e+09 }
 0x3f3   : > { %1597 = vmin.xlane.f32.xlu0 %v1568_v50 }
 0x3f6   : > { %v1488_v54 = vpop.xlane.xlu1 %1487 }
 0x3fa   : > { %v1520_v40 = vpop.xlane.xlu1 %1519 }
 0x3fb   : > { %v1537_v20 = vmin.f32 %v1488_v54, %v1520_v40  ;;  %v12784_v40 = vld [vmem:[#allocation14_spill] sm:$0xff] }
 0x3fd   : > { %v8308_v42 = vsel %vm1763_vm1, %v1537_v20, %v7942_v11  ;;  %vm1553_vm6 = vcmp.eq.f32.partialorder %v8163_v55, %v1537_v20 }
 0x3fe   : > { %v1490_v23 = vpop.xlane.xlu0 %1489  ;;  %v1569_v47 = vsel %vm1553_vm6, %v7540_v15, 1e+09 }
 0x3ff   : > { %1599 = vmin.xlane.f32.xlu1 %v1569_v47 }
 0x402   : > { %v1522_v6 = vpop.xlane.xlu0 %1521 }
 0x403   : > { %v1538_v38 = vmin.f32 %v1490_v23, %v1522_v6  ;;  %1663 = vmin.xlane.f32.xlu1 %v12762_v57 }
 0x405   : > { %v8316_v43 = vsel %vm1763_vm1, %v1538_v38, %v7952_v14  ;;  %vm1554_vm2 = vcmp.eq.f32.partialorder %v8176_v28, %v1538_v38  ;;  %v1636_v14 = vpop.xlane.xlu1 %1635 }
 0x406   : > { %v1570_v11 = vsel %vm1554_vm2, %v7540_v15, 1e+09  ;;  %v1638_v31 = vpop.xlane.xlu0 %1637 }
 0x407   : > { %1601 = vmin.xlane.f32.xlu0 %v1570_v11  ;;  %1844 = vmin.xlane.f32.xlu1 %v12763_v46 }
 0x409   : > { %v1640_v39 = vpop.xlane.xlu1 %1639 }
 0x40a   : > { %v1642_v0 = vpop.xlane.xlu0 %1641 }
 0x40b   : > { %1665 = vmin.xlane.f32.xlu0 %v12762_v57  ;;  %1848 = vmin.xlane.f32.xlu1 %v12763_v46 }
 0x40d   : > { %v1644_v63 = vpop.xlane.xlu1 %1643 }
 0x40e   : > { %v1646_v51 = vpop.xlane.xlu0 %1645 }
 0x40f   : > { %1852 = vmin.xlane.f32.xlu1 %v12763_v46  ;;  %1846 = vmin.xlane.f32.xlu0 %v12763_v46 }
 0x411   : > { %v1648_v12 = vpop.xlane.xlu1 %1647 }
 0x412   : > { %v1650_v48 = vpop.xlane.xlu0 %1649 }
 0x413   : > { %1856 = vmin.xlane.f32.xlu1 %v12763_v46  ;;  %1850 = vmin.xlane.f32.xlu0 %v12763_v46 }
 0x415   : > { %v1652_v60 = vpop.xlane.xlu1 %1651 }
 0x416   : > { %v8335_v45 = vpop.xlane.xlu0 %1653 }
 0x417   : > { %1860 = vmin.xlane.f32.xlu1 %v12763_v46  ;;  %1854 = vmin.xlane.f32.xlu0 %v12763_v46 }
 0x419   : > { %v1656_v2 = vpop.xlane.xlu1 %1655 }
 0x41a   : > { %v8339_v44 = vpop.xlane.xlu0 %1657 }
 0x41b   : > { %1864 = vmin.xlane.f32.xlu1 %v12763_v46  ;;  %1858 = vmin.xlane.f32.xlu0 %v12763_v46 }
 0x41d   : > { %v8337_v16 = vpop.xlane.xlu1 %1659 }
 0x41e   : > { %v8341_v54 = vpop.xlane.xlu0 %1661 }
 0x41f   : > { %1868 = vmin.xlane.f32.xlu1 %v12763_v46  ;;  %1862 = vmin.xlane.f32.xlu0 %v12763_v46 }
 0x423   : > { %1866 = vmin.xlane.f32.xlu0 %v12763_v46 }
 0x427   : > { %1870 = vmin.xlane.f32.xlu0 %v12763_v46 }
 0x460   : > { %v1572_v52 = vpop.xlane.xlu1 %1571 }
 0x461   : > { %v1667_v50 = vmin.f32 %v1572_v52, %v1636_v14 }
 0x463   : > { %v8346_v20 = vsel %vm1763_vm1, %v1667_v50, %v12784_v40  ;;  %vm1683_vm7 = vcmp.eq.f32.partialorder %v7540_v15, %v1667_v50 }
 0x464   : > { %v1576_v23 = vpop.xlane.xlu1 %1575  ;;  %v8350_v47 = vsel %vm1683_vm7, 1e+30, %v7990_v41 }
 0x465   : > { %v1669_v6 = vmin.f32 %v1576_v23, %v1640_v39  ;;  %1812 = vmin.xlane.f32.xlu1 %v8350_v47 }
 0x467   : > { %v8356_v38 = vsel %vm1763_vm1, %v1669_v6, %v7998_v22  ;;  %vm1685_vm8 = vcmp.eq.f32.partialorder %v7540_v15, %v1669_v6 }
 0x468   : > { %v1580_v11 = vpop.xlane.xlu1 %1579  ;;  %v1574_v14 = vpop.xlane.xlu0 %1573  ;;  %v8360_v52 = vsel %vm1685_vm8, 1e+30, %v8002_v33 }
 0x469   : > { %v1671_v50 = vmin.f32 %v1580_v11, %v1644_v63  ;;  %v1668_v40 = vmin.f32 %v1574_v14, %v1638_v31  ;;  %1816 = vmin.xlane.f32.xlu1 %v8360_v52  ;;  %v12786_v14 = vld [vmem:[#allocation15_spill] sm:$0xff] }
 0x46b   : > { %v8366_v41 = vsel %vm1763_vm1, %v1671_v50, %v8013_v5  ;;  %v8371_v22 = vsel %vm1763_vm1, %v1668_v40, %v8017_v58  ;;  %vm1687_vm9 = vcmp.eq.f32.partialorder %v7540_v15, %v1671_v50  ;;  %vm1684_vm10 = vcmp.eq.f32.partialorder %v7540_v15, %v1668_v40 }
 0x46c   : > { %v1584_v33 = vpop.xlane.xlu1 %1583  ;;  %v1578_v39 = vpop.xlane.xlu0 %1577  ;;  %v8376_v31 = vsel %vm1687_vm9, 1e+30, %v8022_v7  ;;  %v8379_v63 = vsel %vm1684_vm10, 1e+30, %v8025_v26 }
 0x46d   : > { %v1673_v23 = vmin.f32 %v1584_v33, %v1648_v12  ;;  %v1670_v5 = vmin.f32 %v1578_v39, %v1642_v0  ;;  %1820 = vmin.xlane.f32.xlu1 %v8376_v31  ;;  %1814 = vmin.xlane.f32.xlu0 %v8379_v63  ;;  %v12788_v33 = vld [vmem:[#allocation5_spill] sm:$0xff] }
 0x46f   : > { %v8386_v58 = vsel %vm1763_vm1, %v1673_v23, %v8037_v10  ;;  %v8391_v6 = vsel %vm1763_vm1, %v1670_v5, %v8041_v25  ;;  %vm1689_vm11 = vcmp.eq.f32.partialorder %v7540_v15, %v1673_v23  ;;  %vm1686_vm12 = vcmp.eq.f32.partialorder %v7540_v15, %v1670_v5  ;;  %v12790_v23 = vld [vmem:[#allocation6_spill] sm:$0xff] }
 0x470   : > { %v1588_v7 = vpop.xlane.xlu1 %1587  ;;  %v1582_v26 = vpop.xlane.xlu0 %1581  ;;  %v8396_v0 = vsel %vm1689_vm11, 1e+30, %v8046_v13  ;;  %v8399_v12 = vsel %vm1686_vm12, 1e+30, %v8049_v24 }
 0x471   : > { %v1675_v11 = vmin.f32 %v1588_v7, %v1652_v60  ;;  %v1672_v10 = vmin.f32 %v1582_v26, %v1646_v51  ;;  %1824 = vmin.xlane.f32.xlu1 %v8396_v0  ;;  %1818 = vmin.xlane.f32.xlu0 %v8399_v12 }
 0x473   : > { %v8406_v25 = vsel %vm1763_vm1, %v1675_v11, %v8061_v27  ;;  %v8411_v50 = vsel %vm1763_vm1, %v1672_v10, %v12786_v14  ;;  %vm1691_vm13 = vcmp.eq.f32.partialorder %v7540_v15, %v1675_v11  ;;  %vm1688_vm14 = vcmp.eq.f32.partialorder %v7540_v15, %v1672_v10  ;;  %v12792_v11 = vld [vmem:[#allocation7_spill] sm:$0xff]  ;;  %v12794_v14 = vld [vmem:[#allocation8_spill] sm:$0xff] }
 0x474   : > { %12785 = vst [vmem:[#allocation14_spill] sm:$0xff] %v8406_v25  ;;  %12787 = vst [vmem:[#allocation15_spill] sm:$0xff] %v8411_v50  ;;  %v1592_v13 = vpop.xlane.xlu1 %1591  ;;  %v1586_v24 = vpop.xlane.xlu0 %1585  ;;  %v8416_v51 = vsel %vm1691_vm13, 1e+30, %v8070_v29  ;;  %v8419_v60 = vsel %vm1688_vm14, 1e+30, %v8073_v61 }
 0x475   : > { %v1677_v40 = vmin.f32 %v1592_v13, %v1656_v2  ;;  %v1674_v27 = vmin.f32 %v1586_v24, %v1650_v48  ;;  %1828 = vmin.xlane.f32.xlu1 %v8416_v51  ;;  %1822 = vmin.xlane.f32.xlu0 %v8419_v60  ;;  %v12796_v24 = vld [vmem:[#allocation9_spill] sm:$0xff] }
 0x477   : > { %v8426_v39 = vsel %vm1763_vm1, %v1677_v40, %v12788_v33  ;;  %v8431_v5 = vsel %vm1763_vm1, %v1674_v27, %v12790_v23  ;;  %vm1693_vm15 = vcmp.eq.f32.partialorder %v7540_v15, %v1677_v40  ;;  %vm1690_vm0 = vcmp.eq.f32.partialorder %v7540_v15, %v1674_v27 }
 0x478   : > { %12789 = vst [vmem:[#allocation5_spill] sm:$0xff] %v8426_v39  ;;  %12791 = vst [vmem:[#allocation6_spill] sm:$0xff] %v8431_v5  ;;  %v1596_v29 = vpop.xlane.xlu1 %1595  ;;  %v1590_v61 = vpop.xlane.xlu0 %1589  ;;  %v8436_v48 = vsel %vm1693_vm15, 1e+30, %v8095_v49  ;;  %v8439_v2 = vsel %vm1690_vm0, 1e+30, %v8098_v37 }
 0x479   : > { %v1679_v7 = vmin.f32 %v1596_v29, %v8337_v16  ;;  %v1676_v26 = vmin.f32 %v1590_v61, %v8335_v45  ;;  %1832 = vmin.xlane.f32.xlu1 %v8436_v48  ;;  %1826 = vmin.xlane.f32.xlu0 %v8439_v2 }
 0x47b   : > { %v8448_v10 = vsel %vm1763_vm1, %v1679_v7, %v12792_v11  ;;  %v8453_v49 = vsel %vm1763_vm1, %v1676_v26, %v12794_v14  ;;  %vm1695_vm3 = vcmp.eq.f32.partialorder %v7540_v15, %v1679_v7  ;;  %vm1692_vm4 = vcmp.eq.f32.partialorder %v7540_v15, %v1676_v26  ;;  %v12800_v7 = vld [vmem:[#allocation10_spill] sm:$0xff] }
 0x47c   : > { %12793 = vst [vmem:[#allocation7_spill] sm:$0xff] %v8448_v10  ;;  %12795 = vst [vmem:[#allocation8_spill] sm:$0xff] %v8453_v49  ;;  %v1594_v37 = vpop.xlane.xlu0 %1593  ;;  %v8458_v45 = vsel %vm1695_vm3, 1e+30, %v8121_v59  ;;  %v8461_v16 = vsel %vm1692_vm4, 1e+30, %v8124_v30 }
 0x47d   : > { %v1678_v13 = vmin.f32 %v1594_v37, %v8339_v44  ;;  %1836 = vmin.xlane.f32.xlu1 %v8458_v45  ;;  %1830 = vmin.xlane.f32.xlu0 %v8461_v16  ;;  %v12798_v44 = vld [vmem:[#allocation11_spill] sm:$0xff]  ;;  %v12802_v37 = vld [vmem:[#allocation12_spill] sm:$0xff] }
 0x47f   : > { %v8469_v40 = vsel %vm1763_vm1, %v1678_v13, %v12796_v24  ;;  %vm1694_vm5 = vcmp.eq.f32.partialorder %v7540_v15, %v1678_v13 }
 0x480   : > { %12797 = vst [vmem:[#allocation9_spill] sm:$0xff] %v8469_v40  ;;  %v1598_v27 = vpop.xlane.xlu0 %1597  ;;  %v8473_v59 = vsel %vm1694_vm5, 1e+30, %v8138_v21  ;;  %v12804_v40 = vld [vmem:[#allocation13_spill] sm:$0xff] }
 0x481   : > { %v1680_v30 = vmin.f32 %v1598_v27, %v8341_v54  ;;  %1834 = vmin.xlane.f32.xlu0 %v8473_v59 }
 0x483   : > { %v8480_v33 = vsel %vm1763_vm1, %v1680_v30, %v12798_v44  ;;  %vm1696_vm6 = vcmp.eq.f32.partialorder %v7540_v15, %v1680_v30 }
 0x484   : > { %12799 = vst [vmem:[#allocation11_spill] sm:$0xff] %v8480_v33  ;;  %v8484_v23 = vsel %vm1696_vm6, 1e+30, %v8151_v1 }
 0x485   : > { %1838 = vmin.xlane.f32.xlu0 %v8484_v23 }
 0x48c   : > { %v1600_v29 = vpop.xlane.xlu1 %1599 }
 0x490   : > { %v1664_v61 = vpop.xlane.xlu1 %1663 }
 0x491   : > { %v1681_v21 = vmin.f32 %v1600_v29, %v1664_v61 }
 0x493   : > { %v8490_v54 = vsel %vm1763_vm1, %v1681_v21, %v12800_v7  ;;  %vm1697_vm2 = vcmp.eq.f32.partialorder %v7540_v15, %v1681_v21 }
 0x494   : > { %12801 = vst [vmem:[#allocation10_spill] sm:$0xff] %v8490_v54  ;;  %v1602_v26 = vpop.xlane.xlu0 %1601  ;;  %v8494_v11 = vsel %vm1697_vm2, 1e+30, %v8163_v55  ;;  %v1845_v55 = vpop.xlane.xlu1 %1844 }
 0x495   : > { %1840 = vmin.xlane.f32.xlu1 %v8494_v11 }
 0x498   : > { %v1666_v1 = vpop.xlane.xlu0 %1665 }
 0x499   : > { %v1682_v14 = vmin.f32 %v1602_v26, %v1666_v1  ;;  %1872 = vmin.xlane.f32.xlu1 %v12763_v46 }
 0x49b   : > { %v8501_v13 = vsel %vm1763_vm1, %v1682_v14, %v12802_v37  ;;  %vm1698_vm7 = vcmp.eq.f32.partialorder %v7540_v15, %v1682_v14  ;;  %vm2116_vm1 = vcmp.eq.s32.totalorder %v7332_v18, 3 }
 0x49c   : > { %12803 = vst [vmem:[#allocation12_spill] sm:$0xff] %v8501_v13  ;;  %v8505_v24 = vsel %vm1698_vm7, 1e+30, %v8176_v28  ;;  %v1849_v28 = vpop.xlane.xlu1 %1848  ;;  %v1847_v27 = vpop.xlane.xlu0 %1846 }
 0x49d   : > { %1842 = vmin.xlane.f32.xlu0 %v8505_v24  ;;  %1988 = vmin.xlane.f32.xlu1 %v12762_v57 }
 0x4a0   : > { %v1853_v30 = vpop.xlane.xlu1 %1852  ;;  %v1851_v44 = vpop.xlane.xlu0 %1850 }
 0x4a1   : > { %1874 = vmin.xlane.f32.xlu0 %v12763_v46  ;;  %1992 = vmin.xlane.f32.xlu1 %v12762_v57 }
 0x4a4   : > { %v1857_v29 = vpop.xlane.xlu1 %1856  ;;  %v1855_v61 = vpop.xlane.xlu0 %1854 }
 0x4a5   : > { %1996 = vmin.xlane.f32.xlu1 %v12762_v57  ;;  %1990 = vmin.xlane.f32.xlu0 %v12762_v57 }
 0x4a8   : > { %v1861_v21 = vpop.xlane.xlu1 %1860  ;;  %v1859_v7 = vpop.xlane.xlu0 %1858 }
 0x4a9   : > { %2000 = vmin.xlane.f32.xlu1 %v12762_v57  ;;  %1994 = vmin.xlane.f32.xlu0 %v12762_v57 }
 0x4ac   : > { %v1865_v26 = vpop.xlane.xlu1 %1864  ;;  %v8523_v1 = vpop.xlane.xlu0 %1862 }
 0x4ad   : > { %2004 = vmin.xlane.f32.xlu1 %v12762_v57  ;;  %1998 = vmin.xlane.f32.xlu0 %v12762_v57 }
 0x4b0   : > { %v8525_v14 = vpop.xlane.xlu1 %1868  ;;  %v8527_v37 = vpop.xlane.xlu0 %1866 }
 0x4b1   : > { %2008 = vmin.xlane.f32.xlu1 %v12762_v57  ;;  %2002 = vmin.xlane.f32.xlu0 %v12762_v57 }
 0x4b4   : > { %v8530_v33 = vpop.xlane.xlu0 %1870 }
 0x4b5   : > { %2012 = vmin.xlane.f32.xlu1 %v12762_v57  ;;  %2006 = vmin.xlane.f32.xlu0 %v12762_v57 }
 0x4b9   : > { %2010 = vmin.xlane.f32.xlu0 %v12762_v57 }
 0x4bd   : > { %2014 = vmin.xlane.f32.xlu0 %v12762_v57 }
 0x4f2   : > { %v1813_v13 = vpop.xlane.xlu1 %1812 }
 0x4f3   : > { %v1876_v54 = vmin.f32 %v1813_v13, %v1845_v55 }
 0x4f5   : > { %v8535_v49 = vsel %vm2116_vm1, %v1876_v54, %v12804_v40  ;;  %vm1892_vm8 = vcmp.eq.f32.partialorder %v8350_v47, %v1876_v54 }
 0x4f6   : > { %12805 = vst [vmem:[#allocation13_spill] sm:$0xff] %v8535_v49  ;;  %v1817_v10 = vpop.xlane.xlu1 %1816  ;;  %v1908_v5 = vsel %vm1892_vm8, %v7540_v15, 1e+09 }
 0x4f7   : > { %v1878_v39 = vmin.f32 %v1817_v10, %v1849_v28  ;;  %1924 = vmin.xlane.f32.xlu1 %v1908_v5 }
 0x4f9   : > { %v8542_v50 = vsel %vm2116_vm1, %v1878_v39, %v8213_v32  ;;  %vm1894_vm9 = vcmp.eq.f32.partialorder %v8360_v52, %v1878_v39 }
 0x4fa   : > { %v1821_v13 = vpop.xlane.xlu1 %1820  ;;  %v1815_v55 = vpop.xlane.xlu0 %1814  ;;  %v1910_v25 = vsel %vm1894_vm9, %v7540_v15, 1e+09 }
 0x4fb   : > { %v1880_v40 = vmin.f32 %v1821_v13, %v1853_v30  ;;  %v1877_v49 = vmin.f32 %v1815_v55, %v1847_v27  ;;  %1928 = vmin.xlane.f32.xlu1 %v1910_v25 }
 0x4fd   : > { %v8549_v54 = vsel %vm2116_vm1, %v1880_v40, %v8220_v8  ;;  %v8554_v5 = vsel %vm2116_vm1, %v1877_v49, %v8225_v4  ;;  %vm1896_vm10 = vcmp.eq.f32.partialorder %v8376_v31, %v1880_v40  ;;  %vm1893_vm11 = vcmp.eq.f32.partialorder %v8379_v63, %v1877_v49 }
 0x4fe   : > { %v1825_v32 = vpop.xlane.xlu1 %1824  ;;  %v1819_v39 = vpop.xlane.xlu0 %1818  ;;  %v1912_v10 = vsel %vm1896_vm10, %v7540_v15, 1e+09  ;;  %v1909_v25 = vsel %vm1893_vm11, %v7540_v15, 1e+09 }
 0x4ff   : > { %v1882_v28 = vmin.f32 %v1825_v32, %v1857_v29  ;;  %v1879_v27 = vmin.f32 %v1819_v39, %v1851_v44  ;;  %1932 = vmin.xlane.f32.xlu1 %v1912_v10  ;;  %1926 = vmin.xlane.f32.xlu0 %v1909_v25 }
 0x501   : > { %v8563_v8 = vsel %vm2116_vm1, %v1882_v28, %v8234_v36  ;;  %v8568_v4 = vsel %vm2116_vm1, %v1879_v27, %v8239_v35  ;;  %vm1898_vm12 = vcmp.eq.f32.partialorder %v8396_v0, %v1882_v28  ;;  %vm1895_vm13 = vcmp.eq.f32.partialorder %v8399_v12, %v1879_v27 }
 0x502   : > { %v1829_v49 = vpop.xlane.xlu1 %1828  ;;  %v1823_v30 = vpop.xlane.xlu0 %1822  ;;  %v1914_v44 = vsel %vm1898_vm12, %v7540_v15, 1e+09  ;;  %v1911_v29 = vsel %vm1895_vm13, %v7540_v15, 1e+09 }
 0x503   : > { %v1884_v13 = vmin.f32 %v1829_v49, %v1861_v21  ;;  %v1881_v55 = vmin.f32 %v1823_v30, %v1855_v61  ;;  %1936 = vmin.xlane.f32.xlu1 %v1914_v44  ;;  %1930 = vmin.xlane.f32.xlu0 %v1911_v29 }
 0x505   : > { %v8577_v36 = vsel %vm2116_vm1, %v1884_v13, %v8248_v34  ;;  %v8582_v35 = vsel %vm2116_vm1, %v1881_v55, %v8253_v3  ;;  %vm1900_vm14 = vcmp.eq.f32.partialorder %v8416_v51, %v1884_v13  ;;  %vm1897_vm15 = vcmp.eq.f32.partialorder %v8419_v60, %v1881_v55 }
 0x506   : > { %v1833_v40 = vpop.xlane.xlu1 %1832  ;;  %v1827_v32 = vpop.xlane.xlu0 %1826  ;;  %v1916_v61 = vsel %vm1900_vm14, %v7540_v15, 1e+09  ;;  %v1913_v21 = vsel %vm1897_vm15, %v7540_v15, 1e+09 }
 0x507   : > { %v1886_v39 = vmin.f32 %v1833_v40, %v1865_v26  ;;  %v1883_v10 = vmin.f32 %v1827_v32, %v1859_v7  ;;  %1940 = vmin.xlane.f32.xlu1 %v1916_v61  ;;  %1934 = vmin.xlane.f32.xlu0 %v1913_v21 }
 0x509   : > { %v8591_v34 = vsel %vm2116_vm1, %v1886_v39, %v8262_v17  ;;  %v8596_v3 = vsel %vm2116_vm1, %v1883_v10, %v8267_v62  ;;  %vm1902_vm0 = vcmp.eq.f32.partialorder %v8436_v48, %v1886_v39  ;;  %vm1899_vm3 = vcmp.eq.f32.partialorder %v8439_v2, %v1883_v10 }
 0x50a   : > { %v1837_v25 = vpop.xlane.xlu1 %1836  ;;  %v1831_v28 = vpop.xlane.xlu0 %1830  ;;  %v1918_v7 = vsel %vm1902_vm0, %v7540_v15, 1e+09  ;;  %v1915_v26 = vsel %vm1899_vm3, %v7540_v15, 1e+09 }
 0x50b   : > { %v1888_v27 = vmin.f32 %v1837_v25, %v8525_v14  ;;  %v1885_v17 = vmin.f32 %v1831_v28, %v8523_v1  ;;  %1944 = vmin.xlane.f32.xlu1 %v1918_v7  ;;  %1938 = vmin.xlane.f32.xlu0 %v1915_v26 }
 0x50d   : > { %v8607_v62 = vsel %vm2116_vm1, %v1888_v27, %v8278_v53  ;;  %v8612_v49 = vsel %vm2116_vm1, %v1885_v17, %v8283_v19  ;;  %vm1904_vm4 = vcmp.eq.f32.partialorder %v8458_v45, %v1888_v27  ;;  %vm1901_vm5 = vcmp.eq.f32.partialorder %v8461_v16, %v1885_v17 }
 0x50e   : > { %v1835_v30 = vpop.xlane.xlu0 %1834  ;;  %v1920_v14 = vsel %vm1904_vm4, %v7540_v15, 1e+09  ;;  %v1917_v1 = vsel %vm1901_vm5, %v7540_v15, 1e+09 }
 0x50f   : > { %v1887_v44 = vmin.f32 %v1835_v30, %v8527_v37  ;;  %1948 = vmin.xlane.f32.xlu1 %v1920_v14  ;;  %1942 = vmin.xlane.f32.xlu0 %v1917_v1 }
 0x511   : > { %v8622_v53 = vsel %vm2116_vm1, %v1887_v44, %v8293_v9  ;;  %vm1903_vm6 = vcmp.eq.f32.partialorder %v8473_v59, %v1887_v44 }
 0x512   : > { %v1839_v19 = vpop.xlane.xlu0 %1838  ;;  %v1919_v29 = vsel %vm1903_vm6, %v7540_v15, 1e+09 }
 0x513   : > { %v1889_v13 = vmin.f32 %v1839_v19, %v8530_v33  ;;  %1946 = vmin.xlane.f32.xlu0 %v1919_v29 }
 0x515   : > { %v8630_v55 = vsel %vm2116_vm1, %v1889_v13, %v8301_v56  ;;  %vm1905_vm2 = vcmp.eq.f32.partialorder %v8484_v23, %v1889_v13 }
 0x516   : > { %v1921_v37 = vsel %vm1905_vm2, %v7540_v15, 1e+09 }
 0x517   : > { %1950 = vmin.xlane.f32.xlu0 %v1921_v37 }
 0x522   : > { %v1841_v9 = vpop.xlane.xlu1 %1840 }
 0x526   : > { %v1873_v40 = vpop.xlane.xlu1 %1872 }
 0x527   : > { %v1890_v32 = vmin.f32 %v1841_v9, %v1873_v40 }
 0x529   : > { %v8637_v61 = vsel %vm2116_vm1, %v1890_v32, %v8308_v42  ;;  %vm1906_vm7 = vcmp.eq.f32.partialorder %v8494_v11, %v1890_v32 }
 0x52a   : > { %v1843_v33 = vpop.xlane.xlu0 %1842  ;;  %v1922_v21 = vsel %vm1906_vm7, %v7540_v15, 1e+09 }
 0x52b   : > { %1952 = vmin.xlane.f32.xlu1 %v1922_v21 }
 0x52e   : > { %v1875_v56 = vpop.xlane.xlu0 %1874 }
 0x52f   : > { %v1891_v39 = vmin.f32 %v1843_v33, %v1875_v56  ;;  %2016 = vmin.xlane.f32.xlu1 %v12762_v57 }
 0x531   : > { %v8645_v10 = vsel %vm2116_vm1, %v1891_v39, %v8316_v43  ;;  %vm1907_vm8 = vcmp.eq.f32.partialorder %v8505_v24, %v1891_v39  ;;  %v1989_v43 = vpop.xlane.xlu1 %1988 }
 0x532   : > { %v1923_v42 = vsel %vm1907_vm8, %v7540_v15, 1e+09  ;;  %v1991_v28 = vpop.xlane.xlu0 %1990 }
 0x533   : > { %1954 = vmin.xlane.f32.xlu0 %v1923_v42  ;;  %2197 = vmin.xlane.f32.xlu1 %v12763_v46 }
 0x535   : > { %v1993_v25 = vpop.xlane.xlu1 %1992 }
 0x536   : > { %v1995_v26 = vpop.xlane.xlu0 %1994 }
 0x537   : > { %2018 = vmin.xlane.f32.xlu0 %v12762_v57  ;;  %2201 = vmin.xlane.f32.xlu1 %v12763_v46 }
 0x539   : > { %v1997_v7 = vpop.xlane.xlu1 %1996 }
 0x53a   : > { %v1999_v17 = vpop.xlane.xlu0 %1998 }
 0x53b   : > { %2205 = vmin.xlane.f32.xlu1 %v12763_v46  ;;  %2199 = vmin.xlane.f32.xlu0 %v12763_v46 }
 0x53d   : > { %v2001_v27 = vpop.xlane.xlu1 %2000 }
 0x53e   : > { %v2003_v14 = vpop.xlane.xlu0 %2002 }
 0x53f   : > { %2209 = vmin.xlane.f32.xlu1 %v12763_v46  ;;  %2203 = vmin.xlane.f32.xlu0 %v12763_v46 }
 0x541   : > { %v2005_v30 = vpop.xlane.xlu1 %2004 }
 0x542   : > { %v8664_v44 = vpop.xlane.xlu0 %2006 }
 0x543   : > { %2213 = vmin.xlane.f32.xlu1 %v12763_v46  ;;  %2207 = vmin.xlane.f32.xlu0 %v12763_v46 }
 0x545   : > { %v2009_v1 = vpop.xlane.xlu1 %2008 }
 0x546   : > { %v8668_v29 = vpop.xlane.xlu0 %2010 }
 0x547   : > { %2217 = vmin.xlane.f32.xlu1 %v12763_v46  ;;  %2211 = vmin.xlane.f32.xlu0 %v12763_v46 }
 0x549   : > { %v8666_v19 = vpop.xlane.xlu1 %2012 }
 0x54a   : > { %v8670_v9 = vpop.xlane.xlu0 %2014 }
 0x54b   : > { %2221 = vmin.xlane.f32.xlu1 %v12763_v46  ;;  %2215 = vmin.xlane.f32.xlu0 %v12763_v46 }
 0x54f   : > { %2219 = vmin.xlane.f32.xlu0 %v12763_v46 }
 0x553   : > { %2223 = vmin.xlane.f32.xlu0 %v12763_v46 }
 0x584   : > { %v1925_v13 = vpop.xlane.xlu1 %1924 }
 0x585   : > { %v2020_v37 = vmin.f32 %v1925_v13, %v1989_v43 }
 0x587   : > { %v8675_v40 = vsel %vm2116_vm1, %v2020_v37, %v8346_v20  ;;  %vm2036_vm9 = vcmp.eq.f32.partialorder %v7540_v15, %v2020_v37 }
 0x588   : > { %v1929_v32 = vpop.xlane.xlu1 %1928  ;;  %v8679_v33 = vsel %vm2036_vm9, 1e+30, %v8350_v47 }
 0x589   : > { %v2022_v21 = vmin.f32 %v1929_v32, %v1993_v25  ;;  %2165 = vmin.xlane.f32.xlu1 %v8679_v33 }
 0x58b   : > { %v8685_v56 = vsel %vm2116_vm1, %v2022_v21, %v8356_v38  ;;  %vm2038_vm10 = vcmp.eq.f32.partialorder %v7540_v15, %v2022_v21 }
 0x58c   : > { %v1933_v39 = vpop.xlane.xlu1 %1932  ;;  %v1927_v42 = vpop.xlane.xlu0 %1926  ;;  %v8689_v20 = vsel %vm2038_vm10, 1e+30, %v8360_v52 }
 0x58d   : > { %v2024_v43 = vmin.f32 %v1933_v39, %v1997_v7  ;;  %v2021_v13 = vmin.f32 %v1927_v42, %v1991_v28  ;;  %2169 = vmin.xlane.f32.xlu1 %v8689_v20  ;;  %v12808_v42 = vld [vmem:[#allocation15_spill] sm:$0xff] }
 0x58f   : > { %v8695_v47 = vsel %vm2116_vm1, %v2024_v43, %v8366_v41  ;;  %v8700_v38 = vsel %vm2116_vm1, %v2021_v13, %v8371_v22  ;;  %vm2040_vm11 = vcmp.eq.f32.partialorder %v7540_v15, %v2024_v43  ;;  %vm2037_vm12 = vcmp.eq.f32.partialorder %v7540_v15, %v2021_v13 }
 0x590   : > { %v1937_v52 = vpop.xlane.xlu1 %1936  ;;  %v1931_v25 = vpop.xlane.xlu0 %1930  ;;  %v8705_v28 = vsel %vm2040_vm11, 1e+30, %v8376_v31  ;;  %v8708_v7 = vsel %vm2037_vm12, 1e+30, %v8379_v63 }
 0x591   : > { %v2026_v37 = vmin.f32 %v1937_v52, %v2001_v27  ;;  %v2023_v41 = vmin.f32 %v1931_v25, %v1995_v26  ;;  %2173 = vmin.xlane.f32.xlu1 %v8705_v28  ;;  %2167 = vmin.xlane.f32.xlu0 %v8708_v7  ;;  %v12810_v25 = vld [vmem:[#allocation5_spill] sm:$0xff] }
 0x593   : > { %v8715_v22 = vsel %vm2116_vm1, %v2026_v37, %v8386_v58  ;;  %v8720_v32 = vsel %vm2116_vm1, %v2023_v41, %v8391_v6  ;;  %vm2042_vm13 = vcmp.eq.f32.partialorder %v7540_v15, %v2026_v37  ;;  %vm2039_vm14 = vcmp.eq.f32.partialorder %v7540_v15, %v2023_v41  ;;  %v12806_v6 = vld [vmem:[#allocation14_spill] sm:$0xff] }
 0x594   : > { %v1941_v31 = vpop.xlane.xlu1 %1940  ;;  %v1935_v63 = vpop.xlane.xlu0 %1934  ;;  %v8725_v26 = vsel %vm2042_vm13, 1e+30, %v8396_v0  ;;  %v8728_v27 = vsel %vm2039_vm14, 1e+30, %v8399_v12  ;;  %v12812_v41 = vld [vmem:[#allocation6_spill] sm:$0xff] }
 0x595   : > { %v2028_v21 = vmin.f32 %v1941_v31, %v2005_v30  ;;  %v2025_v58 = vmin.f32 %v1935_v63, %v1999_v17  ;;  %2177 = vmin.xlane.f32.xlu1 %v8725_v26  ;;  %2171 = vmin.xlane.f32.xlu0 %v8728_v27 }
 0x597   : > { %v8735_v39 = vsel %vm2116_vm1, %v2028_v21, %v12806_v6  ;;  %v8740_v43 = vsel %vm2116_vm1, %v2025_v58, %v12808_v42  ;;  %vm2044_vm15 = vcmp.eq.f32.partialorder %v7540_v15, %v2028_v21  ;;  %vm2041_vm0 = vcmp.eq.f32.partialorder %v7540_v15, %v2025_v58  ;;  %v12814_v58 = vld [vmem:[#allocation7_spill] sm:$0xff]  ;;  %v12816_v42 = vld [vmem:[#allocation8_spill] sm:$0xff] }
 0x598   : > { %12807 = vst [vmem:[#allocation14_spill] sm:$0xff] %v8735_v39  ;;  %12809 = vst [vmem:[#allocation15_spill] sm:$0xff] %v8740_v43  ;;  %v1945_v0 = vpop.xlane.xlu1 %1944  ;;  %v1939_v12 = vpop.xlane.xlu0 %1938  ;;  %v8745_v17 = vsel %vm2044_vm15, 1e+30, %v8416_v51  ;;  %v8748_v30 = vsel %vm2041_vm0, 1e+30, %v8419_v60 }
 0x599   : > { %v2030_v13 = vmin.f32 %v1945_v0, %v2009_v1  ;;  %v2027_v52 = vmin.f32 %v1939_v12, %v2003_v14  ;;  %2181 = vmin.xlane.f32.xlu1 %v8745_v17  ;;  %2175 = vmin.xlane.f32.xlu0 %v8748_v30  ;;  %v12818_v12 = vld [vmem:[#allocation9_spill] sm:$0xff] }
 0x59b   : > { %v8755_v37 = vsel %vm2116_vm1, %v2030_v13, %v12810_v25  ;;  %v8760_v31 = vsel %vm2116_vm1, %v2027_v52, %v12812_v41  ;;  %vm2046_vm3 = vcmp.eq.f32.partialorder %v7540_v15, %v2030_v13  ;;  %vm2043_vm4 = vcmp.eq.f32.partialorder %v7540_v15, %v2027_v52 }
 0x59c   : > { %12811 = vst [vmem:[#allocation5_spill] sm:$0xff] %v8755_v37  ;;  %12813 = vst [vmem:[#allocation6_spill] sm:$0xff] %v8760_v31  ;;  %v1949_v51 = vpop.xlane.xlu1 %1948  ;;  %v1943_v60 = vpop.xlane.xlu0 %1942  ;;  %v8765_v14 = vsel %vm2046_vm3, 1e+30, %v8436_v48  ;;  %v8768_v1 = vsel %vm2043_vm4, 1e+30, %v8439_v2 }
 0x59d   : > { %v2032_v63 = vmin.f32 %v1949_v51, %v8666_v19  ;;  %v2029_v21 = vmin.f32 %v1943_v60, %v8664_v44  ;;  %2185 = vmin.xlane.f32.xlu1 %v8765_v14  ;;  %2179 = vmin.xlane.f32.xlu0 %v8768_v1 }
 0x59f   : > { %v8777_v6 = vsel %vm2116_vm1, %v2032_v63, %v12814_v58  ;;  %v8782_v48 = vsel %vm2116_vm1, %v2029_v21, %v12816_v42  ;;  %vm2048_vm5 = vcmp.eq.f32.partialorder %v7540_v15, %v2032_v63  ;;  %vm2045_vm6 = vcmp.eq.f32.partialorder %v7540_v15, %v2029_v21  ;;  %v12822_v63 = vld [vmem:[#allocation10_spill] sm:$0xff] }
 0x5a0   : > { %12815 = vst [vmem:[#allocation7_spill] sm:$0xff] %v8777_v6  ;;  %12817 = vst [vmem:[#allocation8_spill] sm:$0xff] %v8782_v48  ;;  %v1947_v2 = vpop.xlane.xlu0 %1946  ;;  %v8787_v44 = vsel %vm2048_vm5, 1e+30, %v8458_v45  ;;  %v8790_v19 = vsel %vm2045_vm6, 1e+30, %v8461_v16 }
 0x5a1   : > { %v2031_v0 = vmin.f32 %v1947_v2, %v8668_v29  ;;  %2189 = vmin.xlane.f32.xlu1 %v8787_v44  ;;  %2183 = vmin.xlane.f32.xlu0 %v8790_v19  ;;  %v12820_v29 = vld [vmem:[#allocation11_spill] sm:$0xff]  ;;  %v12824_v2 = vld [vmem:[#allocation12_spill] sm:$0xff] }
 0x5a3   : > { %v8798_v13 = vsel %vm2116_vm1, %v2031_v0, %v12818_v12  ;;  %vm2047_vm2 = vcmp.eq.f32.partialorder %v7540_v15, %v2031_v0 }
 0x5a4   : > { %12819 = vst [vmem:[#allocation9_spill] sm:$0xff] %v8798_v13  ;;  %v1951_v52 = vpop.xlane.xlu0 %1950  ;;  %v8802_v45 = vsel %vm2047_vm2, 1e+30, %v8473_v59  ;;  %v12826_v13 = vld [vmem:[#allocation13_spill] sm:$0xff] }
 0x5a5   : > { %v2033_v16 = vmin.f32 %v1951_v52, %v8670_v9  ;;  %2187 = vmin.xlane.f32.xlu0 %v8802_v45 }
 0x5a7   : > { %v8809_v25 = vsel %vm2116_vm1, %v2033_v16, %v12820_v29  ;;  %vm2049_vm7 = vcmp.eq.f32.partialorder %v7540_v15, %v2033_v16 }
 0x5a8   : > { %12821 = vst [vmem:[#allocation11_spill] sm:$0xff] %v8809_v25  ;;  %v8813_v41 = vsel %vm2049_vm7, 1e+30, %v8484_v23 }
 0x5a9   : > { %2191 = vmin.xlane.f32.xlu0 %v8813_v41 }
 0x5b8   : > { %v1953_v51 = vpop.xlane.xlu1 %1952 }
 0x5bc   : > { %v2017_v60 = vpop.xlane.xlu1 %2016 }
 0x5bd   : > { %v2034_v59 = vmin.f32 %v1953_v51, %v2017_v60 }
 0x5bf   : > { %v8819_v9 = vsel %vm2116_vm1, %v2034_v59, %v12822_v63  ;;  %vm2050_vm8 = vcmp.eq.f32.partialorder %v7540_v15, %v2034_v59 }
 0x5c0   : > { %12823 = vst [vmem:[#allocation10_spill] sm:$0xff] %v8819_v9  ;;  %v1955_v21 = vpop.xlane.xlu0 %1954  ;;  %v8823_v58 = vsel %vm2050_vm8, 1e+30, %v8494_v11  ;;  %v2198_v11 = vpop.xlane.xlu1 %2197 }
 0x5c1   : > { %2193 = vmin.xlane.f32.xlu1 %v8823_v58 }
 0x5c4   : > { %v2019_v23 = vpop.xlane.xlu0 %2018 }
 0x5c5   : > { %v2035_v42 = vmin.f32 %v1955_v21, %v2019_v23  ;;  %2225 = vmin.xlane.f32.xlu1 %v12763_v46 }
 0x5c7   : > { %v8830_v0 = vsel %vm2116_vm1, %v2035_v42, %v12824_v2  ;;  %vm2051_vm9 = vcmp.eq.f32.partialorder %v7540_v15, %v2035_v42  ;;  %vm2469_vm1 = vcmp.eq.s32.totalorder %v7332_v18, 4 }
 0x5c8   : > { %12825 = vst [vmem:[#allocation12_spill] sm:$0xff] %v8830_v0  ;;  %v8834_v12 = vsel %vm2051_vm9, 1e+30, %v8505_v24  ;;  %v2202_v24 = vpop.xlane.xlu1 %2201  ;;  %v2200_v52 = vpop.xlane.xlu0 %2199 }
 0x5c9   : > { %2195 = vmin.xlane.f32.xlu0 %v8834_v12  ;;  %2341 = vmin.xlane.f32.xlu1 %v12762_v57 }
 0x5cc   : > { %v2206_v16 = vpop.xlane.xlu1 %2205  ;;  %v2204_v29 = vpop.xlane.xlu0 %2203 }
 0x5cd   : > { %2227 = vmin.xlane.f32.xlu0 %v12763_v46  ;;  %2345 = vmin.xlane.f32.xlu1 %v12762_v57 }
 0x5d0   : > { %v2210_v51 = vpop.xlane.xlu1 %2209  ;;  %v2208_v60 = vpop.xlane.xlu0 %2207 }
 0x5d1   : > { %2349 = vmin.xlane.f32.xlu1 %v12762_v57  ;;  %2343 = vmin.xlane.f32.xlu0 %v12762_v57 }
 0x5d4   : > { %v2214_v59 = vpop.xlane.xlu1 %2213  ;;  %v2212_v63 = vpop.xlane.xlu0 %2211 }
 0x5d5   : > { %2353 = vmin.xlane.f32.xlu1 %v12762_v57  ;;  %2347 = vmin.xlane.f32.xlu0 %v12762_v57 }
 0x5d8   : > { %v2218_v21 = vpop.xlane.xlu1 %2217  ;;  %v8852_v23 = vpop.xlane.xlu0 %2215 }
 0x5d9   : > { %2357 = vmin.xlane.f32.xlu1 %v12762_v57  ;;  %2351 = vmin.xlane.f32.xlu0 %v12762_v57 }
 0x5dc   : > { %v8854_v42 = vpop.xlane.xlu1 %2221  ;;  %v8856_v2 = vpop.xlane.xlu0 %2219 }
 0x5dd   : > { %2361 = vmin.xlane.f32.xlu1 %v12762_v57  ;;  %2355 = vmin.xlane.f32.xlu0 %v12762_v57 }
 0x5e0   : > { %v8859_v25 = vpop.xlane.xlu0 %2223 }
 0x5e1   : > { %2365 = vmin.xlane.f32.xlu1 %v12762_v57  ;;  %2359 = vmin.xlane.f32.xlu0 %v12762_v57 }
 0x5e5   : > { %2363 = vmin.xlane.f32.xlu0 %v12762_v57 }
 0x5e9   : > { %2367 = vmin.xlane.f32.xlu0 %v12762_v57 }
 0x616   : > { %v2166_v0 = vpop.xlane.xlu1 %2165 }
 0x617   : > { %v2229_v9 = vmin.f32 %v2166_v0, %v2198_v11 }
 0x619   : > { %v8864_v48 = vsel %vm2469_vm1, %v2229_v9, %v12826_v13  ;;  %vm2245_vm10 = vcmp.eq.f32.partialorder %v8679_v33, %v2229_v9 }
 0x61a   : > { %12827 = vst [vmem:[#allocation13_spill] sm:$0xff] %v8864_v48  ;;  %v2170_v6 = vpop.xlane.xlu1 %2169  ;;  %v2261_v31 = vsel %vm2245_vm10, %v7540_v15, 1e+09 }
 0x61b   : > { %v2231_v37 = vmin.f32 %v2170_v6, %v2202_v24  ;;  %2277 = vmin.xlane.f32.xlu1 %v2261_v31 }
 0x61d   : > { %v8871_v43 = vsel %vm2469_vm1, %v2231_v37, %v8542_v50  ;;  %vm2247_vm11 = vcmp.eq.f32.partialorder %v8689_v20, %v2231_v37 }
 0x61e   : > { %v2174_v0 = vpop.xlane.xlu1 %2173  ;;  %v2168_v11 = vpop.xlane.xlu0 %2167  ;;  %v2263_v39 = vsel %vm2247_vm11, %v7540_v15, 1e+09 }
 0x61f   : > { %v2233_v13 = vmin.f32 %v2174_v0, %v2206_v16  ;;  %v2230_v48 = vmin.f32 %v2168_v11, %v2200_v52  ;;  %2281 = vmin.xlane.f32.xlu1 %v2263_v39 }
 0x621   : > { %v8878_v9 = vsel %vm2469_vm1, %v2233_v13, %v8549_v54  ;;  %v8883_v31 = vsel %vm2469_vm1, %v2230_v48, %v8554_v5  ;;  %vm2249_vm12 = vcmp.eq.f32.partialorder %v8705_v28, %v2233_v13  ;;  %vm2246_vm13 = vcmp.eq.f32.partialorder %v8708_v7, %v2230_v48 }
 0x622   : > { %v2178_v50 = vpop.xlane.xlu1 %2177  ;;  %v2172_v37 = vpop.xlane.xlu0 %2171  ;;  %v2265_v6 = vsel %vm2249_vm12, %v7540_v15, 1e+09  ;;  %v2262_v39 = vsel %vm2246_vm13, %v7540_v15, 1e+09 }
 0x623   : > { %v2235_v24 = vmin.f32 %v2178_v50, %v2210_v51  ;;  %v2232_v52 = vmin.f32 %v2172_v37, %v2204_v29  ;;  %2285 = vmin.xlane.f32.xlu1 %v2265_v6  ;;  %2279 = vmin.xlane.f32.xlu0 %v2262_v39 }
 0x625   : > { %v8892_v54 = vsel %vm2469_vm1, %v2235_v24, %v8563_v8  ;;  %v8897_v5 = vsel %vm2469_vm1, %v2232_v52, %v8568_v4  ;;  %vm2251_vm14 = vcmp.eq.f32.partialorder %v8725_v26, %v2235_v24  ;;  %vm2248_vm15 = vcmp.eq.f32.partialorder %v8728_v27, %v2232_v52 }
 0x626   : > { %v2182_v48 = vpop.xlane.xlu1 %2181  ;;  %v2176_v16 = vpop.xlane.xlu0 %2175  ;;  %v2267_v29 = vsel %vm2251_vm14, %v7540_v15, 1e+09  ;;  %v2264_v51 = vsel %vm2248_vm15, %v7540_v15, 1e+09 }
 0x627   : > { %v2237_v0 = vmin.f32 %v2182_v48, %v2214_v59  ;;  %v2234_v11 = vmin.f32 %v2176_v16, %v2208_v60  ;;  %2289 = vmin.xlane.f32.xlu1 %v2267_v29  ;;  %2283 = vmin.xlane.f32.xlu0 %v2264_v51 }
 0x629   : > { %v8906_v8 = vsel %vm2469_vm1, %v2237_v0, %v8577_v36  ;;  %v8911_v4 = vsel %vm2469_vm1, %v2234_v11, %v8582_v35  ;;  %vm2253_vm0 = vcmp.eq.f32.partialorder %v8745_v17, %v2237_v0  ;;  %vm2250_vm3 = vcmp.eq.f32.partialorder %v8748_v30, %v2234_v11 }
 0x62a   : > { %v2186_v13 = vpop.xlane.xlu1 %2185  ;;  %v2180_v50 = vpop.xlane.xlu0 %2179  ;;  %v2269_v60 = vsel %vm2253_vm0, %v7540_v15, 1e+09  ;;  %v2266_v59 = vsel %vm2250_vm3, %v7540_v15, 1e+09 }
 0x62b   : > { %v2239_v37 = vmin.f32 %v2186_v13, %v2218_v21  ;;  %v2236_v6 = vmin.f32 %v2180_v50, %v2212_v63  ;;  %2293 = vmin.xlane.f32.xlu1 %v2269_v60  ;;  %2287 = vmin.xlane.f32.xlu0 %v2266_v59 }
 0x62d   : > { %v8920_v36 = vsel %vm2469_vm1, %v2239_v37, %v8591_v34  ;;  %v8925_v35 = vsel %vm2469_vm1, %v2236_v6, %v8596_v3  ;;  %vm2255_vm4 = vcmp.eq.f32.partialorder %v8765_v14, %v2239_v37  ;;  %vm2252_vm5 = vcmp.eq.f32.partialorder %v8768_v1, %v2236_v6 }
 0x62e   : > { %v2190_v39 = vpop.xlane.xlu1 %2189  ;;  %v2184_v24 = vpop.xlane.xlu0 %2183  ;;  %v2271_v63 = vsel %vm2255_vm4, %v7540_v15, 1e+09  ;;  %v2268_v21 = vsel %vm2252_vm5, %v7540_v15, 1e+09 }
 0x62f   : > { %v2241_v52 = vmin.f32 %v2190_v39, %v8854_v42  ;;  %v2238_v34 = vmin.f32 %v2184_v24, %v8852_v23  ;;  %2297 = vmin.xlane.f32.xlu1 %v2271_v63  ;;  %2291 = vmin.xlane.f32.xlu0 %v2268_v21 }
 0x631   : > { %v8936_v3 = vsel %vm2469_vm1, %v2241_v52, %v8607_v62  ;;  %v8941_v48 = vsel %vm2469_vm1, %v2238_v34, %v8612_v49  ;;  %vm2257_vm6 = vcmp.eq.f32.partialorder %v8787_v44, %v2241_v52  ;;  %vm2254_vm2 = vcmp.eq.f32.partialorder %v8790_v19, %v2238_v34 }
 0x632   : > { %v2188_v16 = vpop.xlane.xlu0 %2187  ;;  %v2273_v42 = vsel %vm2257_vm6, %v7540_v15, 1e+09  ;;  %v2270_v23 = vsel %vm2254_vm2, %v7540_v15, 1e+09 }
 0x633   : > { %v2240_v29 = vmin.f32 %v2188_v16, %v8856_v2  ;;  %2301 = vmin.xlane.f32.xlu1 %v2273_v42  ;;  %2295 = vmin.xlane.f32.xlu0 %v2270_v23 }
 0x635   : > { %v8951_v62 = vsel %vm2469_vm1, %v2240_v29, %v8622_v53  ;;  %vm2256_vm7 = vcmp.eq.f32.partialorder %v8802_v45, %v2240_v29 }
 0x636   : > { %v2192_v49 = vpop.xlane.xlu0 %2191  ;;  %v2272_v51 = vsel %vm2256_vm7, %v7540_v15, 1e+09 }
 0x637   : > { %v2242_v0 = vmin.f32 %v2192_v49, %v8859_v25  ;;  %2299 = vmin.xlane.f32.xlu0 %v2272_v51 }
 0x639   : > { %v8959_v11 = vsel %vm2469_vm1, %v2242_v0, %v8630_v55  ;;  %vm2258_vm8 = vcmp.eq.f32.partialorder %v8813_v41, %v2242_v0 }
 0x63a   : > { %v2274_v2 = vsel %vm2258_vm8, %v7540_v15, 1e+09 }
 0x63b   : > { %2303 = vmin.xlane.f32.xlu0 %v2274_v2 }
 0x64e   : > { %v2194_v53 = vpop.xlane.xlu1 %2193 }
 0x652   : > { %v2226_v13 = vpop.xlane.xlu1 %2225 }
 0x653   : > { %v2243_v50 = vmin.f32 %v2194_v53, %v2226_v13 }
 0x655   : > { %v8966_v60 = vsel %vm2469_vm1, %v2243_v50, %v8637_v61  ;;  %vm2259_vm9 = vcmp.eq.f32.partialorder %v8823_v58, %v2243_v50 }
 0x656   : > { %v2196_v25 = vpop.xlane.xlu0 %2195  ;;  %v2275_v59 = vsel %vm2259_vm9, %v7540_v15, 1e+09 }
 0x657   : > { %2305 = vmin.xlane.f32.xlu1 %v2275_v59 }
 0x65a   : > { %v2228_v55 = vpop.xlane.xlu0 %2227 }
 0x65b   : > { %v2244_v37 = vmin.f32 %v2196_v25, %v2228_v55  ;;  %2369 = vmin.xlane.f32.xlu1 %v12762_v57 }
 0x65d   : > { %v8974_v6 = vsel %vm2469_vm1, %v2244_v37, %v8645_v10  ;;  %vm2260_vm10 = vcmp.eq.f32.partialorder %v8834_v12, %v2244_v37  ;;  %v2342_v10 = vpop.xlane.xlu1 %2341 }
 0x65e   : > { %v2276_v61 = vsel %vm2260_vm10, %v7540_v15, 1e+09  ;;  %v2344_v24 = vpop.xlane.xlu0 %2343 }
 0x65f   : > { %2307 = vmin.xlane.f32.xlu0 %v2276_v61  ;;  %2550 = vmin.xlane.f32.xlu1 %v12763_v46 }
 0x661   : > { %v2346_v39 = vpop.xlane.xlu1 %2345 }
 0x662   : > { %v2348_v21 = vpop.xlane.xlu0 %2347 }
 0x663   : > { %2371 = vmin.xlane.f32.xlu0 %v12762_v57  ;;  %2554 = vmin.xlane.f32.xlu1 %v12763_v46 }
 0x665   : > { %v2350_v63 = vpop.xlane.xlu1 %2349 }
 0x666   : > { %v2352_v34 = vpop.xlane.xlu0 %2351 }
 0x667   : > { %2558 = vmin.xlane.f32.xlu1 %v12763_v46  ;;  %2552 = vmin.xlane.f32.xlu0 %v12763_v46 }
 0x669   : > { %v2354_v52 = vpop.xlane.xlu1 %2353 }
 0x66a   : > { %v2356_v42 = vpop.xlane.xlu0 %2355 }
 0x66b   : > { %2562 = vmin.xlane.f32.xlu1 %v12763_v46  ;;  %2556 = vmin.xlane.f32.xlu0 %v12763_v46 }
 0x66d   : > { %v2358_v16 = vpop.xlane.xlu1 %2357 }
 0x66e   : > { %v8993_v29 = vpop.xlane.xlu0 %2359 }
 0x66f   : > { %2566 = vmin.xlane.f32.xlu1 %v12763_v46  ;;  %2560 = vmin.xlane.f32.xlu0 %v12763_v46 }
 0x671   : > { %v2362_v23 = vpop.xlane.xlu1 %2361 }
 0x672   : > { %v8997_v51 = vpop.xlane.xlu0 %2363 }
 0x673   : > { %2570 = vmin.xlane.f32.xlu1 %v12763_v46  ;;  %2564 = vmin.xlane.f32.xlu0 %v12763_v46 }
 0x675   : > { %v8995_v49 = vpop.xlane.xlu1 %2365 }
 0x676   : > { %v8999_v53 = vpop.xlane.xlu0 %2367 }
 0x677   : > { %2574 = vmin.xlane.f32.xlu1 %v12763_v46  ;;  %2568 = vmin.xlane.f32.xlu0 %v12763_v46 }
 0x67b   : > { %2572 = vmin.xlane.f32.xlu0 %v12763_v46 }
 0x67f   : > { %2576 = vmin.xlane.f32.xlu0 %v12763_v46 }
 0x6a8   : > { %v2278_v0 = vpop.xlane.xlu1 %2277 }
 0x6a9   : > { %v2373_v2 = vmin.f32 %v2278_v0, %v2342_v10 }
 0x6ab   : > { %v9004_v13 = vsel %vm2469_vm1, %v2373_v2, %v8675_v40  ;;  %vm2389_vm11 = vcmp.eq.f32.partialorder %v7540_v15, %v2373_v2 }
 0x6ac   : > { %v2282_v50 = vpop.xlane.xlu1 %2281  ;;  %v9008_v25 = vsel %vm2389_vm11, 1e+30, %v8679_v33 }
 0x6ad   : > { %v2375_v59 = vmin.f32 %v2282_v50, %v2346_v39  ;;  %2518 = vmin.xlane.f32.xlu1 %v9008_v25 }
 0x6af   : > { %v9014_v55 = vsel %vm2469_vm1, %v2375_v59, %v8685_v56  ;;  %vm2391_vm12 = vcmp.eq.f32.partialorder %v7540_v15, %v2375_v59 }
 0x6b0   : > { %v2286_v37 = vpop.xlane.xlu1 %2285  ;;  %v2280_v61 = vpop.xlane.xlu0 %2279  ;;  %v9018_v40 = vsel %vm2391_vm12, 1e+30, %v8689_v20 }
 0x6b1   : > { %v2377_v10 = vmin.f32 %v2286_v37, %v2350_v63  ;;  %v2374_v0 = vmin.f32 %v2280_v61, %v2344_v24  ;;  %2522 = vmin.xlane.f32.xlu1 %v9018_v40  ;;  %v12830_v61 = vld [vmem:[#allocation15_spill] sm:$0xff] }
 0x6b3   : > { %v9024_v33 = vsel %vm2469_vm1, %v2377_v10, %v8695_v47  ;;  %v9029_v56 = vsel %vm2469_vm1, %v2374_v0, %v8700_v38  ;;  %vm2393_vm13 = vcmp.eq.f32.partialorder %v7540_v15, %v2377_v10  ;;  %vm2390_vm14 = vcmp.eq.f32.partialorder %v7540_v15, %v2374_v0 }
 0x6b4   : > { %v2290_v20 = vpop.xlane.xlu1 %2289  ;;  %v2284_v39 = vpop.xlane.xlu0 %2283  ;;  %v9034_v24 = vsel %vm2393_vm13, 1e+30, %v8705_v28  ;;  %v9037_v63 = vsel %vm2390_vm14, 1e+30, %v8708_v7 }
 0x6b5   : > { %v2379_v2 = vmin.f32 %v2290_v20, %v2354_v52  ;;  %v2376_v47 = vmin.f32 %v2284_v39, %v2348_v21  ;;  %2526 = vmin.xlane.f32.xlu1 %v9034_v24  ;;  %2520 = vmin.xlane.f32.xlu0 %v9037_v63  ;;  %v12832_v39 = vld [vmem:[#allocation5_spill] sm:$0xff] }
 0x6b7   : > { %v9044_v38 = vsel %vm2469_vm1, %v2379_v2, %v8715_v22  ;;  %v9049_v50 = vsel %vm2469_vm1, %v2376_v47, %v8720_v32  ;;  %vm2395_vm15 = vcmp.eq.f32.partialorder %v7540_v15, %v2379_v2  ;;  %vm2392_vm0 = vcmp.eq.f32.partialorder %v7540_v15, %v2376_v47  ;;  %v12828_v32 = vld [vmem:[#allocation14_spill] sm:$0xff] }
 0x6b8   : > { %v2294_v28 = vpop.xlane.xlu1 %2293  ;;  %v2288_v7 = vpop.xlane.xlu0 %2287  ;;  %v9054_v21 = vsel %vm2395_vm15, 1e+30, %v8725_v26  ;;  %v9057_v52 = vsel %vm2392_vm0, 1e+30, %v8728_v27  ;;  %v12834_v47 = vld [vmem:[#allocation6_spill] sm:$0xff] }
 0x6b9   : > { %v2381_v59 = vmin.f32 %v2294_v28, %v2358_v16  ;;  %v2378_v22 = vmin.f32 %v2288_v7, %v2352_v34  ;;  %2530 = vmin.xlane.f32.xlu1 %v9054_v21  ;;  %2524 = vmin.xlane.f32.xlu0 %v9057_v52 }
 0x6bb   : > { %v9064_v37 = vsel %vm2469_vm1, %v2381_v59, %v12828_v32  ;;  %v9069_v10 = vsel %vm2469_vm1, %v2378_v22, %v12830_v61  ;;  %vm2397_vm3 = vcmp.eq.f32.partialorder %v7540_v15, %v2381_v59  ;;  %vm2394_vm4 = vcmp.eq.f32.partialorder %v7540_v15, %v2378_v22  ;;  %v12836_v22 = vld [vmem:[#allocation7_spill] sm:$0xff]  ;;  %v12838_v61 = vld [vmem:[#allocation8_spill] sm:$0xff] }
 0x6bc   : > { %12829 = vst [vmem:[#allocation14_spill] sm:$0xff] %v9064_v37  ;;  %12831 = vst [vmem:[#allocation15_spill] sm:$0xff] %v9069_v10  ;;  %v2298_v26 = vpop.xlane.xlu1 %2297  ;;  %v2292_v27 = vpop.xlane.xlu0 %2291  ;;  %v9074_v34 = vsel %vm2397_vm3, 1e+30, %v8745_v17  ;;  %v9077_v16 = vsel %vm2394_vm4, 1e+30, %v8748_v30 }
 0x6bd   : > { %v2383_v0 = vmin.f32 %v2298_v26, %v2362_v23  ;;  %v2380_v20 = vmin.f32 %v2292_v27, %v2356_v42  ;;  %2534 = vmin.xlane.f32.xlu1 %v9074_v34  ;;  %2528 = vmin.xlane.f32.xlu0 %v9077_v16  ;;  %v12840_v27 = vld [vmem:[#allocation9_spill] sm:$0xff] }
 0x6bf   : > { %v9084_v2 = vsel %vm2469_vm1, %v2383_v0, %v12832_v39  ;;  %v9089_v28 = vsel %vm2469_vm1, %v2380_v20, %v12834_v47  ;;  %vm2399_vm5 = vcmp.eq.f32.partialorder %v7540_v15, %v2383_v0  ;;  %vm2396_vm6 = vcmp.eq.f32.partialorder %v7540_v15, %v2380_v20 }
 0x6c0   : > { %12833 = vst [vmem:[#allocation5_spill] sm:$0xff] %v9084_v2  ;;  %12835 = vst [vmem:[#allocation6_spill] sm:$0xff] %v9089_v28  ;;  %v2302_v17 = vpop.xlane.xlu1 %2301  ;;  %v2296_v30 = vpop.xlane.xlu0 %2295  ;;  %v9094_v42 = vsel %vm2399_vm5, 1e+30, %v8765_v14  ;;  %v9097_v23 = vsel %vm2396_vm6, 1e+30, %v8768_v1 }
 0x6c1   : > { %v2385_v7 = vmin.f32 %v2302_v17, %v8995_v49  ;;  %v2382_v59 = vmin.f32 %v2296_v30, %v8993_v29  ;;  %2538 = vmin.xlane.f32.xlu1 %v9094_v42  ;;  %2532 = vmin.xlane.f32.xlu0 %v9097_v23 }
 0x6c3   : > { %v9106_v32 = vsel %vm2469_vm1, %v2385_v7, %v12836_v22  ;;  %v9111_v14 = vsel %vm2469_vm1, %v2382_v59, %v12838_v61  ;;  %vm2401_vm2 = vcmp.eq.f32.partialorder %v7540_v15, %v2385_v7  ;;  %vm2398_vm7 = vcmp.eq.f32.partialorder %v7540_v15, %v2382_v59  ;;  %v12844_v7 = vld [vmem:[#allocation10_spill] sm:$0xff] }
 0x6c4   : > { %12837 = vst [vmem:[#allocation7_spill] sm:$0xff] %v9106_v32  ;;  %12839 = vst [vmem:[#allocation8_spill] sm:$0xff] %v9111_v14  ;;  %v2300_v1 = vpop.xlane.xlu0 %2299  ;;  %v9116_v29 = vsel %vm2401_vm2, 1e+30, %v8787_v44  ;;  %v9119_v49 = vsel %vm2398_vm7, 1e+30, %v8790_v19 }
 0x6c5   : > { %v2384_v26 = vmin.f32 %v2300_v1, %v8997_v51  ;;  %2542 = vmin.xlane.f32.xlu1 %v9116_v29  ;;  %2536 = vmin.xlane.f32.xlu0 %v9119_v49  ;;  %v12842_v51 = vld [vmem:[#allocation11_spill] sm:$0xff]  ;;  %v12846_v1 = vld [vmem:[#allocation12_spill] sm:$0xff] }
 0x6c7   : > { %v9127_v0 = vsel %vm2469_vm1, %v2384_v26, %v12840_v27  ;;  %vm2400_vm8 = vcmp.eq.f32.partialorder %v7540_v15, %v2384_v26 }
 0x6c8   : > { %12841 = vst [vmem:[#allocation9_spill] sm:$0xff] %v9127_v0  ;;  %v2304_v20 = vpop.xlane.xlu0 %2303  ;;  %v9131_v44 = vsel %vm2400_vm8, 1e+30, %v8802_v45  ;;  %v12848_v0 = vld [vmem:[#allocation13_spill] sm:$0xff] }
 0x6c9   : > { %v2386_v19 = vmin.f32 %v2304_v20, %v8999_v53  ;;  %2540 = vmin.xlane.f32.xlu0 %v9131_v44 }
 0x6cb   : > { %v9138_v39 = vsel %vm2469_vm1, %v2386_v19, %v12842_v51  ;;  %vm2402_vm9 = vcmp.eq.f32.partialorder %v7540_v15, %v2386_v19 }
 0x6cc   : > { %12843 = vst [vmem:[#allocation11_spill] sm:$0xff] %v9138_v39  ;;  %v9142_v47 = vsel %vm2402_vm9, 1e+30, %v8813_v41 }
 0x6cd   : > { %2544 = vmin.xlane.f32.xlu0 %v9142_v47 }
 0x6e4   : > { %v2306_v17 = vpop.xlane.xlu1 %2305 }
 0x6e8   : > { %v2370_v30 = vpop.xlane.xlu1 %2369 }
 0x6e9   : > { %v2387_v45 = vmin.f32 %v2306_v17, %v2370_v30 }
 0x6eb   : > { %v9148_v53 = vsel %vm2469_vm1, %v2387_v45, %v12844_v7  ;;  %vm2403_vm10 = vcmp.eq.f32.partialorder %v7540_v15, %v2387_v45 }
 0x6ec   : > { %12845 = vst [vmem:[#allocation10_spill] sm:$0xff] %v9148_v53  ;;  %v2308_v59 = vpop.xlane.xlu0 %2307  ;;  %v9152_v22 = vsel %vm2403_vm10, 1e+30, %v8823_v58  ;;  %v2551_v58 = vpop.xlane.xlu1 %2550 }
 0x6ed   : > { %2546 = vmin.xlane.f32.xlu1 %v9152_v22 }
 0x6f0   : > { %v2372_v41 = vpop.xlane.xlu0 %2371 }
 0x6f1   : > { %v2388_v61 = vmin.f32 %v2308_v59, %v2372_v41  ;;  %2578 = vmin.xlane.f32.xlu1 %v12763_v46 }
 0x6f3   : > { %v9159_v26 = vsel %vm2469_vm1, %v2388_v61, %v12846_v1  ;;  %vm2404_vm11 = vcmp.eq.f32.partialorder %v7540_v15, %v2388_v61  ;;  %vm2822_vm1 = vcmp.eq.s32.totalorder %v7332_v18, 5 }
 0x6f4   : > { %12847 = vst [vmem:[#allocation12_spill] sm:$0xff] %v9159_v26  ;;  %v9163_v27 = vsel %vm2404_vm11, 1e+30, %v8834_v12  ;;  %v2555_v12 = vpop.xlane.xlu1 %2554  ;;  %v2553_v20 = vpop.xlane.xlu0 %2552 }
 0x6f5   : > { %2548 = vmin.xlane.f32.xlu0 %v9163_v27  ;;  %2694 = vmin.xlane.f32.xlu1 %v12762_v57 }
 0x6f8   : > { %v2559_v19 = vpop.xlane.xlu1 %2558  ;;  %v2557_v51 = vpop.xlane.xlu0 %2556 }
 0x6f9   : > { %2580 = vmin.xlane.f32.xlu0 %v12763_v46  ;;  %2698 = vmin.xlane.f32.xlu1 %v12762_v57 }
 0x6fc   : > { %v2563_v17 = vpop.xlane.xlu1 %2562  ;;  %v2561_v30 = vpop.xlane.xlu0 %2560 }
 0x6fd   : > { %2702 = vmin.xlane.f32.xlu1 %v12762_v57  ;;  %2696 = vmin.xlane.f32.xlu0 %v12762_v57 }
 0x700   : > { %v2567_v45 = vpop.xlane.xlu1 %2566  ;;  %v2565_v7 = vpop.xlane.xlu0 %2564 }
 0x701   : > { %2706 = vmin.xlane.f32.xlu1 %v12762_v57  ;;  %2700 = vmin.xlane.f32.xlu0 %v12762_v57 }
 0x704   : > { %v2571_v59 = vpop.xlane.xlu1 %2570  ;;  %v9181_v41 = vpop.xlane.xlu0 %2568 }
 0x705   : > { %2710 = vmin.xlane.f32.xlu1 %v12762_v57  ;;  %2704 = vmin.xlane.f32.xlu0 %v12762_v57 }
 0x708   : > { %v9183_v61 = vpop.xlane.xlu1 %2574  ;;  %v9185_v1 = vpop.xlane.xlu0 %2572 }
 0x709   : > { %2714 = vmin.xlane.f32.xlu1 %v12762_v57  ;;  %2708 = vmin.xlane.f32.xlu0 %v12762_v57 }
 0x70c   : > { %v9188_v39 = vpop.xlane.xlu0 %2576 }
 0x70d   : > { %2718 = vmin.xlane.f32.xlu1 %v12762_v57  ;;  %2712 = vmin.xlane.f32.xlu0 %v12762_v57 }
 0x711   : > { %2716 = vmin.xlane.f32.xlu0 %v12762_v57 }
 0x715   : > { %2720 = vmin.xlane.f32.xlu0 %v12762_v57 }
 0x73a   : > { %v2519_v26 = vpop.xlane.xlu1 %2518 }
 0x73b   : > { %v2582_v53 = vmin.f32 %v2519_v26, %v2551_v58 }
 0x73d   : > { %v9193_v14 = vsel %vm2822_vm1, %v2582_v53, %v12848_v0  ;;  %vm2598_vm12 = vcmp.eq.f32.partialorder %v9008_v25, %v2582_v53 }
 0x73e   : > { %12849 = vst [vmem:[#allocation13_spill] sm:$0xff] %v9193_v14  ;;  %v2523_v32 = vpop.xlane.xlu1 %2522  ;;  %v2614_v28 = vsel %vm2598_vm12, %v7540_v15, 1e+09 }
 0x73f   : > { %v2584_v2 = vmin.f32 %v2523_v32, %v2555_v12  ;;  %2630 = vmin.xlane.f32.xlu1 %v2614_v28 }
 0x741   : > { %v9200_v10 = vsel %vm2822_vm1, %v2584_v2, %v8871_v43  ;;  %vm2600_vm13 = vcmp.eq.f32.partialorder %v9018_v40, %v2584_v2 }
 0x742   : > { %v2527_v26 = vpop.xlane.xlu1 %2526  ;;  %v2521_v58 = vpop.xlane.xlu0 %2520  ;;  %v2616_v37 = vsel %vm2600_vm13, %v7540_v15, 1e+09 }
 0x743   : > { %v2586_v0 = vmin.f32 %v2527_v26, %v2559_v19  ;;  %v2583_v14 = vmin.f32 %v2521_v58, %v2553_v20  ;;  %2634 = vmin.xlane.f32.xlu1 %v2616_v37 }
 0x745   : > { %v9207_v53 = vsel %vm2822_vm1, %v2586_v0, %v8878_v9  ;;  %v9212_v28 = vsel %vm2822_vm1, %v2583_v14, %v8883_v31  ;;  %vm2602_vm14 = vcmp.eq.f32.partialorder %v9034_v24, %v2586_v0  ;;  %vm2599_vm15 = vcmp.eq.f32.partialorder %v9037_v63, %v2583_v14 }
 0x746   : > { %v2531_v43 = vpop.xlane.xlu1 %2530  ;;  %v2525_v2 = vpop.xlane.xlu0 %2524  ;;  %v2618_v32 = vsel %vm2602_vm14, %v7540_v15, 1e+09  ;;  %v2615_v37 = vsel %vm2599_vm15, %v7540_v15, 1e+09 }
 0x747   : > { %v2588_v12 = vmin.f32 %v2531_v43, %v2563_v17  ;;  %v2585_v20 = vmin.f32 %v2525_v2, %v2557_v51  ;;  %2638 = vmin.xlane.f32.xlu1 %v2618_v32  ;;  %2632 = vmin.xlane.f32.xlu0 %v2615_v37 }
 0x749   : > { %v9221_v9 = vsel %vm2822_vm1, %v2588_v12, %v8892_v54  ;;  %v9226_v31 = vsel %vm2822_vm1, %v2585_v20, %v8897_v5  ;;  %vm2604_vm0 = vcmp.eq.f32.partialorder %v9054_v21, %v2588_v12  ;;  %vm2601_vm3 = vcmp.eq.f32.partialorder %v9057_v52, %v2585_v20 }
 0x74a   : > { %v2535_v14 = vpop.xlane.xlu1 %2534  ;;  %v2529_v19 = vpop.xlane.xlu0 %2528  ;;  %v2620_v51 = vsel %vm2604_vm0, %v7540_v15, 1e+09  ;;  %v2617_v17 = vsel %vm2601_vm3, %v7540_v15, 1e+09 }
 0x74b   : > { %v2590_v26 = vmin.f32 %v2535_v14, %v2567_v45  ;;  %v2587_v58 = vmin.f32 %v2529_v19, %v2561_v30  ;;  %2642 = vmin.xlane.f32.xlu1 %v2620_v51  ;;  %2636 = vmin.xlane.f32.xlu0 %v2617_v17 }
 0x74d   : > { %v9235_v54 = vsel %vm2822_vm1, %v2590_v26, %v8906_v8  ;;  %v9240_v5 = vsel %vm2822_vm1, %v2587_v58, %v8911_v4  ;;  %vm2606_vm4 = vcmp.eq.f32.partialorder %v9074_v34, %v2590_v26  ;;  %vm2603_vm5 = vcmp.eq.f32.partialorder %v9077_v16, %v2587_v58 }
 0x74e   : > { %v2539_v0 = vpop.xlane.xlu1 %2538  ;;  %v2533_v43 = vpop.xlane.xlu0 %2532  ;;  %v2622_v30 = vsel %vm2606_vm4, %v7540_v15, 1e+09  ;;  %v2619_v45 = vsel %vm2603_vm5, %v7540_v15, 1e+09 }
 0x74f   : > { %v2592_v2 = vmin.f32 %v2539_v0, %v2571_v59  ;;  %v2589_v32 = vmin.f32 %v2533_v43, %v2565_v7  ;;  %2646 = vmin.xlane.f32.xlu1 %v2622_v30  ;;  %2640 = vmin.xlane.f32.xlu0 %v2619_v45 }
 0x751   : > { %v9249_v8 = vsel %vm2822_vm1, %v2592_v2, %v8920_v36  ;;  %v9254_v4 = vsel %vm2822_vm1, %v2589_v32, %v8925_v35  ;;  %vm2608_vm6 = vcmp.eq.f32.partialorder %v9094_v42, %v2592_v2  ;;  %vm2605_vm2 = vcmp.eq.f32.partialorder %v9097_v23, %v2589_v32 }
 0x752   : > { %v2543_v37 = vpop.xlane.xlu1 %2542  ;;  %v2537_v12 = vpop.xlane.xlu0 %2536  ;;  %v2624_v7 = vsel %vm2608_vm6, %v7540_v15, 1e+09  ;;  %v2621_v59 = vsel %vm2605_vm2, %v7540_v15, 1e+09 }
 0x753   : > { %v2594_v20 = vmin.f32 %v2543_v37, %v9183_v61  ;;  %v2591_v36 = vmin.f32 %v2537_v12, %v9181_v41  ;;  %2650 = vmin.xlane.f32.xlu1 %v2624_v7  ;;  %2644 = vmin.xlane.f32.xlu0 %v2621_v59 }
 0x755   : > { %v9265_v35 = vsel %vm2822_vm1, %v2594_v20, %v8936_v3  ;;  %v9270_v14 = vsel %vm2822_vm1, %v2591_v36, %v8941_v48  ;;  %vm2610_vm7 = vcmp.eq.f32.partialorder %v9116_v29, %v2594_v20  ;;  %vm2607_vm8 = vcmp.eq.f32.partialorder %v9119_v49, %v2591_v36 }
 0x756   : > { %v2541_v19 = vpop.xlane.xlu0 %2540  ;;  %v2626_v61 = vsel %vm2610_vm7, %v7540_v15, 1e+09  ;;  %v2623_v41 = vsel %vm2607_vm8, %v7540_v15, 1e+09 }
 0x757   : > { %v2593_v51 = vmin.f32 %v2541_v19, %v9185_v1  ;;  %2654 = vmin.xlane.f32.xlu1 %v2626_v61  ;;  %2648 = vmin.xlane.f32.xlu0 %v2623_v41 }
 0x759   : > { %v9280_v3 = vsel %vm2822_vm1, %v2593_v51, %v8951_v62  ;;  %vm2609_vm9 = vcmp.eq.f32.partialorder %v9131_v44, %v2593_v51 }
 0x75a   : > { %v2545_v48 = vpop.xlane.xlu0 %2544  ;;  %v2625_v17 = vsel %vm2609_vm9, %v7540_v15, 1e+09 }
 0x75b   : > { %v2595_v26 = vmin.f32 %v2545_v48, %v9188_v39  ;;  %2652 = vmin.xlane.f32.xlu0 %v2625_v17 }
 0x75d   : > { %v9288_v58 = vsel %vm2822_vm1, %v2595_v26, %v8959_v11  ;;  %vm2611_vm10 = vcmp.eq.f32.partialorder %v9142_v47, %v2595_v26 }
 0x75e   : > { %v2627_v1 = vsel %vm2611_vm10, %v7540_v15, 1e+09 }
 0x75f   : > { %2656 = vmin.xlane.f32.xlu0 %v2627_v1 }
 0x77a   : > { %v2547_v62 = vpop.xlane.xlu1 %2546 }
 0x77e   : > { %v2579_v0 = vpop.xlane.xlu1 %2578 }
 0x77f   : > { %v2596_v43 = vmin.f32 %v2547_v62, %v2579_v0 }
 0x781   : > { %v9295_v30 = vsel %vm2822_vm1, %v2596_v43, %v8966_v60  ;;  %vm2612_vm11 = vcmp.eq.f32.partialorder %v9152_v22, %v2596_v43 }
 0x782   : > { %v2549_v39 = vpop.xlane.xlu0 %2548  ;;  %v2628_v45 = vsel %vm2612_vm11, %v7540_v15, 1e+09 }
 0x783   : > { %2658 = vmin.xlane.f32.xlu1 %v2628_v45 }
 0x786   : > { %v2581_v11 = vpop.xlane.xlu0 %2580 }
 0x787   : > { %v2597_v2 = vmin.f32 %v2549_v39, %v2581_v11  ;;  %2722 = vmin.xlane.f32.xlu1 %v12762_v57 }
 0x789   : > { %v9303_v32 = vsel %vm2822_vm1, %v2597_v2, %v8974_v6  ;;  %vm2613_vm12 = vcmp.eq.f32.partialorder %v9163_v27, %v2597_v2  ;;  %v2695_v6 = vpop.xlane.xlu1 %2694 }
 0x78a   : > { %v2629_v60 = vsel %vm2613_vm12, %v7540_v15, 1e+09  ;;  %v2697_v12 = vpop.xlane.xlu0 %2696 }
 0x78b   : > { %2660 = vmin.xlane.f32.xlu0 %v2629_v60  ;;  %2903 = vmin.xlane.f32.xlu1 %v12763_v46 }
 0x78d   : > { %v2699_v37 = vpop.xlane.xlu1 %2698 }
 0x78e   : > { %v2701_v59 = vpop.xlane.xlu0 %2700 }
 0x78f   : > { %2724 = vmin.xlane.f32.xlu0 %v12762_v57  ;;  %2907 = vmin.xlane.f32.xlu1 %v12763_v46 }
 0x791   : > { %v2703_v7 = vpop.xlane.xlu1 %2702 }
 0x792   : > { %v2705_v36 = vpop.xlane.xlu0 %2704 }
 0x793   : > { %2911 = vmin.xlane.f32.xlu1 %v12763_v46  ;;  %2905 = vmin.xlane.f32.xlu0 %v12763_v46 }
 0x795   : > { %v2707_v20 = vpop.xlane.xlu1 %2706 }
 0x796   : > { %v2709_v61 = vpop.xlane.xlu0 %2708 }
 0x797   : > { %2915 = vmin.xlane.f32.xlu1 %v12763_v46  ;;  %2909 = vmin.xlane.f32.xlu0 %v12763_v46 }
 0x799   : > { %v2711_v19 = vpop.xlane.xlu1 %2710 }
 0x79a   : > { %v9322_v51 = vpop.xlane.xlu0 %2712 }
 0x79b   : > { %2919 = vmin.xlane.f32.xlu1 %v12763_v46  ;;  %2913 = vmin.xlane.f32.xlu0 %v12763_v46 }
 0x79d   : > { %v2715_v41 = vpop.xlane.xlu1 %2714 }
 0x79e   : > { %v9326_v17 = vpop.xlane.xlu0 %2716 }
 0x79f   : > { %2923 = vmin.xlane.f32.xlu1 %v12763_v46  ;;  %2917 = vmin.xlane.f32.xlu0 %v12763_v46 }
 0x7a1   : > { %v9324_v48 = vpop.xlane.xlu1 %2718 }
 0x7a2   : > { %v9328_v62 = vpop.xlane.xlu0 %2720 }
 0x7a3   : > { %2927 = vmin.xlane.f32.xlu1 %v12763_v46  ;;  %2921 = vmin.xlane.f32.xlu0 %v12763_v46 }
 0x7a7   : > { %2925 = vmin.xlane.f32.xlu0 %v12763_v46 }
 0x7ab   : > { %2929 = vmin.xlane.f32.xlu0 %v12763_v46 }
 0x7cc   : > { %v2631_v26 = vpop.xlane.xlu1 %2630 }
 0x7cd   : > { %v2726_v1 = vmin.f32 %v2631_v26, %v2695_v6 }
 0x7cf   : > { %v9333_v0 = vsel %vm2822_vm1, %v2726_v1, %v9004_v13  ;;  %vm2742_vm13 = vcmp.eq.f32.partialorder %v7540_v15, %v2726_v1 }
 0x7d0   : > { %v2635_v43 = vpop.xlane.xlu1 %2634  ;;  %v9337_v39 = vsel %vm2742_vm13, 1e+30, %v9008_v25 }
 0x7d1   : > { %v2728_v45 = vmin.f32 %v2635_v43, %v2699_v37  ;;  %2871 = vmin.xlane.f32.xlu1 %v9337_v39 }
 0x7d3   : > { %v9343_v11 = vsel %vm2822_vm1, %v2728_v45, %v9014_v55  ;;  %vm2744_vm14 = vcmp.eq.f32.partialorder %v7540_v15, %v2728_v45 }
 0x7d4   : > { %v2639_v2 = vpop.xlane.xlu1 %2638  ;;  %v2633_v60 = vpop.xlane.xlu0 %2632  ;;  %v9347_v13 = vsel %vm2744_vm14, 1e+30, %v9018_v40 }
 0x7d5   : > { %v2730_v6 = vmin.f32 %v2639_v2, %v2703_v7  ;;  %v2727_v26 = vmin.f32 %v2633_v60, %v2697_v12  ;;  %2875 = vmin.xlane.f32.xlu1 %v9347_v13  ;;  %v12852_v60 = vld [vmem:[#allocation15_spill] sm:$0xff] }
 0x7d7   : > { %v9353_v25 = vsel %vm2822_vm1, %v2730_v6, %v9024_v33  ;;  %v9358_v55 = vsel %vm2822_vm1, %v2727_v26, %v9029_v56  ;;  %vm2746_vm15 = vcmp.eq.f32.partialorder %v7540_v15, %v2730_v6  ;;  %vm2743_vm0 = vcmp.eq.f32.partialorder %v7540_v15, %v2727_v26 }
 0x7d8   : > { %v2643_v40 = vpop.xlane.xlu1 %2642  ;;  %v2637_v37 = vpop.xlane.xlu0 %2636  ;;  %v9363_v12 = vsel %vm2746_vm15, 1e+30, %v9034_v24  ;;  %v9366_v7 = vsel %vm2743_vm0, 1e+30, %v9037_v63 }
 0x7d9   : > { %v2732_v1 = vmin.f32 %v2643_v40, %v2707_v20  ;;  %v2729_v33 = vmin.f32 %v2637_v37, %v2701_v59  ;;  %2879 = vmin.xlane.f32.xlu1 %v9363_v12  ;;  %2873 = vmin.xlane.f32.xlu0 %v9366_v7  ;;  %v12854_v37 = vld [vmem:[#allocation5_spill] sm:$0xff] }
 0x7db   : > { %v9373_v56 = vsel %vm2822_vm1, %v2732_v1, %v9044_v38  ;;  %v9378_v43 = vsel %vm2822_vm1, %v2729_v33, %v9049_v50  ;;  %vm2748_vm3 = vcmp.eq.f32.partialorder %v7540_v15, %v2732_v1  ;;  %vm2745_vm4 = vcmp.eq.f32.partialorder %v7540_v15, %v2729_v33  ;;  %v12850_v50 = vld [vmem:[#allocation14_spill] sm:$0xff] }
 0x7dc   : > { %v2647_v24 = vpop.xlane.xlu1 %2646  ;;  %v2641_v63 = vpop.xlane.xlu0 %2640  ;;  %v9383_v59 = vsel %vm2748_vm3, 1e+30, %v9054_v21  ;;  %v9386_v20 = vsel %vm2745_vm4, 1e+30, %v9057_v52  ;;  %v12856_v33 = vld [vmem:[#allocation6_spill] sm:$0xff] }
 0x7dd   : > { %v2734_v45 = vmin.f32 %v2647_v24, %v2711_v19  ;;  %v2731_v38 = vmin.f32 %v2641_v63, %v2705_v36  ;;  %2883 = vmin.xlane.f32.xlu1 %v9383_v59  ;;  %2877 = vmin.xlane.f32.xlu0 %v9386_v20 }
 0x7df   : > { %v9393_v2 = vsel %vm2822_vm1, %v2734_v45, %v12850_v50  ;;  %v9398_v6 = vsel %vm2822_vm1, %v2731_v38, %v12852_v60  ;;  %vm2750_vm5 = vcmp.eq.f32.partialorder %v7540_v15, %v2734_v45  ;;  %vm2747_vm6 = vcmp.eq.f32.partialorder %v7540_v15, %v2731_v38  ;;  %v12858_v38 = vld [vmem:[#allocation7_spill] sm:$0xff]  ;;  %v12860_v60 = vld [vmem:[#allocation8_spill] sm:$0xff] }
 0x7e0   : > { %12851 = vst [vmem:[#allocation14_spill] sm:$0xff] %v9393_v2  ;;  %12853 = vst [vmem:[#allocation15_spill] sm:$0xff] %v9398_v6  ;;  %v2651_v21 = vpop.xlane.xlu1 %2650  ;;  %v2645_v52 = vpop.xlane.xlu0 %2644  ;;  %v9403_v36 = vsel %vm2750_vm5, 1e+30, %v9074_v34  ;;  %v9406_v19 = vsel %vm2747_vm6, 1e+30, %v9077_v16 }
 0x7e1   : > { %v2736_v26 = vmin.f32 %v2651_v21, %v2715_v41  ;;  %v2733_v40 = vmin.f32 %v2645_v52, %v2709_v61  ;;  %2887 = vmin.xlane.f32.xlu1 %v9403_v36  ;;  %2881 = vmin.xlane.f32.xlu0 %v9406_v19  ;;  %v12862_v52 = vld [vmem:[#allocation9_spill] sm:$0xff] }
 0x7e3   : > { %v9413_v1 = vsel %vm2822_vm1, %v2736_v26, %v12854_v37  ;;  %v9418_v24 = vsel %vm2822_vm1, %v2733_v40, %v12856_v33  ;;  %vm2752_vm2 = vcmp.eq.f32.partialorder %v7540_v15, %v2736_v26  ;;  %vm2749_vm7 = vcmp.eq.f32.partialorder %v7540_v15, %v2733_v40 }
 0x7e4   : > { %12855 = vst [vmem:[#allocation5_spill] sm:$0xff] %v9413_v1  ;;  %12857 = vst [vmem:[#allocation6_spill] sm:$0xff] %v9418_v24  ;;  %v2655_v34 = vpop.xlane.xlu1 %2654  ;;  %v2649_v16 = vpop.xlane.xlu0 %2648  ;;  %v9423_v61 = vsel %vm2752_vm2, 1e+30, %v9094_v42  ;;  %v9426_v41 = vsel %vm2749_vm7, 1e+30, %v9097_v23 }
 0x7e5   : > { %v2738_v63 = vmin.f32 %v2655_v34, %v9324_v48  ;;  %v2735_v45 = vmin.f32 %v2649_v16, %v9322_v51  ;;  %2891 = vmin.xlane.f32.xlu1 %v9423_v61  ;;  %2885 = vmin.xlane.f32.xlu0 %v9426_v41 }
 0x7e7   : > { %v9435_v50 = vsel %vm2822_vm1, %v2738_v63, %v12858_v38  ;;  %v9440_v42 = vsel %vm2822_vm1, %v2735_v45, %v12860_v60  ;;  %vm2754_vm8 = vcmp.eq.f32.partialorder %v7540_v15, %v2738_v63  ;;  %vm2751_vm9 = vcmp.eq.f32.partialorder %v7540_v15, %v2735_v45  ;;  %v12866_v63 = vld [vmem:[#allocation10_spill] sm:$0xff] }
 0x7e8   : > { %12859 = vst [vmem:[#allocation7_spill] sm:$0xff] %v9435_v50  ;;  %12861 = vst [vmem:[#allocation8_spill] sm:$0xff] %v9440_v42  ;;  %v2653_v23 = vpop.xlane.xlu0 %2652  ;;  %v9445_v51 = vsel %vm2754_vm8, 1e+30, %v9116_v29  ;;  %v9448_v48 = vsel %vm2751_vm9, 1e+30, %v9119_v49 }
 0x7e9   : > { %v2737_v21 = vmin.f32 %v2653_v23, %v9326_v17  ;;  %2895 = vmin.xlane.f32.xlu1 %v9445_v51  ;;  %2889 = vmin.xlane.f32.xlu0 %v9448_v48  ;;  %v12864_v17 = vld [vmem:[#allocation11_spill] sm:$0xff]  ;;  %v12868_v23 = vld [vmem:[#allocation12_spill] sm:$0xff] }
 0x7eb   : > { %v9456_v26 = vsel %vm2822_vm1, %v2737_v21, %v12862_v52  ;;  %vm2753_vm10 = vcmp.eq.f32.partialorder %v7540_v15, %v2737_v21 }
 0x7ec   : > { %12863 = vst [vmem:[#allocation9_spill] sm:$0xff] %v9456_v26  ;;  %v2657_v40 = vpop.xlane.xlu0 %2656  ;;  %v9460_v29 = vsel %vm2753_vm10, 1e+30, %v9131_v44  ;;  %v12870_v26 = vld [vmem:[#allocation13_spill] sm:$0xff] }
 0x7ed   : > { %v2739_v49 = vmin.f32 %v2657_v40, %v9328_v62  ;;  %2893 = vmin.xlane.f32.xlu0 %v9460_v29 }
 0x7ef   : > { %v9467_v37 = vsel %vm2822_vm1, %v2739_v49, %v12864_v17  ;;  %vm2755_vm11 = vcmp.eq.f32.partialorder %v7540_v15, %v2739_v49 }
 0x7f0   : > { %12865 = vst [vmem:[#allocation11_spill] sm:$0xff] %v9467_v37  ;;  %v9471_v33 = vsel %vm2755_vm11, 1e+30, %v9142_v47 }
 0x7f1   : > { %2897 = vmin.xlane.f32.xlu0 %v9471_v33 }
 0x810   : > { %v2659_v34 = vpop.xlane.xlu1 %2658 }
 0x814   : > { %v2723_v16 = vpop.xlane.xlu1 %2722 }
 0x815   : > { %v2740_v44 = vmin.f32 %v2659_v34, %v2723_v16 }
 0x817   : > { %v9477_v62 = vsel %vm2822_vm1, %v2740_v44, %v12866_v63  ;;  %vm2756_vm12 = vcmp.eq.f32.partialorder %v7540_v15, %v2740_v44 }
 0x818   : > { %12867 = vst [vmem:[#allocation10_spill] sm:$0xff] %v9477_v62  ;;  %v2661_v45 = vpop.xlane.xlu0 %2660  ;;  %v9481_v38 = vsel %vm2756_vm12, 1e+30, %v9152_v22  ;;  %v2904_v22 = vpop.xlane.xlu1 %2903 }
 0x819   : > { %2899 = vmin.xlane.f32.xlu1 %v9481_v38 }
 0x81c   : > { %v2725_v47 = vpop.xlane.xlu0 %2724 }
 0x81d   : > { %v2741_v60 = vmin.f32 %v2661_v45, %v2725_v47  ;;  %2931 = vmin.xlane.f32.xlu1 %v12763_v46 }
 0x81f   : > { %v9488_v21 = vsel %vm2822_vm1, %v2741_v60, %v12868_v23  ;;  %vm2757_vm13 = vcmp.eq.f32.partialorder %v7540_v15, %v2741_v60  ;;  %vm3175_vm1 = vcmp.eq.s32.totalorder %v7332_v18, 6 }
 0x820   : > { %12869 = vst [vmem:[#allocation12_spill] sm:$0xff] %v9488_v21  ;;  %v9492_v52 = vsel %vm2757_vm13, 1e+30, %v9163_v27  ;;  %v2908_v27 = vpop.xlane.xlu1 %2907  ;;  %v2906_v40 = vpop.xlane.xlu0 %2905 }
 0x821   : > { %2901 = vmin.xlane.f32.xlu0 %v9492_v52  ;;  %3047 = vmin.xlane.f32.xlu1 %v12762_v57 }
 0x824   : > { %v2912_v49 = vpop.xlane.xlu1 %2911  ;;  %v2910_v17 = vpop.xlane.xlu0 %2909 }
 0x825   : > { %2933 = vmin.xlane.f32.xlu0 %v12763_v46  ;;  %3051 = vmin.xlane.f32.xlu1 %v12762_v57 }
 0x828   : > { %v2916_v34 = vpop.xlane.xlu1 %2915  ;;  %v2914_v16 = vpop.xlane.xlu0 %2913 }
 0x829   : > { %3055 = vmin.xlane.f32.xlu1 %v12762_v57  ;;  %3049 = vmin.xlane.f32.xlu0 %v12762_v57 }
 0x82c   : > { %v2920_v44 = vpop.xlane.xlu1 %2919  ;;  %v2918_v63 = vpop.xlane.xlu0 %2917 }
 0x82d   : > { %3059 = vmin.xlane.f32.xlu1 %v12762_v57  ;;  %3053 = vmin.xlane.f32.xlu0 %v12762_v57 }
 0x830   : > { %v2924_v45 = vpop.xlane.xlu1 %2923  ;;  %v9510_v47 = vpop.xlane.xlu0 %2921 }
 0x831   : > { %3063 = vmin.xlane.f32.xlu1 %v12762_v57  ;;  %3057 = vmin.xlane.f32.xlu0 %v12762_v57 }
 0x834   : > { %v9512_v60 = vpop.xlane.xlu1 %2927  ;;  %v9514_v23 = vpop.xlane.xlu0 %2925 }
 0x835   : > { %3067 = vmin.xlane.f32.xlu1 %v12762_v57  ;;  %3061 = vmin.xlane.f32.xlu0 %v12762_v57 }
 0x838   : > { %v9517_v37 = vpop.xlane.xlu0 %2929 }
 0x839   : > { %3071 = vmin.xlane.f32.xlu1 %v12762_v57  ;;  %3065 = vmin.xlane.f32.xlu0 %v12762_v57 }
 0x83d   : > { %3069 = vmin.xlane.f32.xlu0 %v12762_v57 }
 0x841   : > { %3073 = vmin.xlane.f32.xlu0 %v12762_v57 }
 0x85e   : > { %v2872_v21 = vpop.xlane.xlu1 %2871 }
 0x85f   : > { %v2935_v62 = vmin.f32 %v2872_v21, %v2904_v22 }
 0x861   : > { %v9522_v42 = vsel %vm3175_vm1, %v2935_v62, %v12870_v26  ;;  %vm2951_vm14 = vcmp.eq.f32.partialorder %v9337_v39, %v2935_v62 }
 0x862   : > { %12871 = vst [vmem:[#allocation13_spill] sm:$0xff] %v9522_v42  ;;  %v2876_v50 = vpop.xlane.xlu1 %2875  ;;  %v2967_v24 = vsel %vm2951_vm14, %v7540_v15, 1e+09 }
 0x863   : > { %v2937_v1 = vmin.f32 %v2876_v50, %v2908_v27  ;;  %2983 = vmin.xlane.f32.xlu1 %v2967_v24 }
 0x865   : > { %v9529_v6 = vsel %vm3175_vm1, %v2937_v1, %v9200_v10  ;;  %vm2953_vm15 = vcmp.eq.f32.partialorder %v9347_v13, %v2937_v1 }
 0x866   : > { %v2880_v21 = vpop.xlane.xlu1 %2879  ;;  %v2874_v22 = vpop.xlane.xlu0 %2873  ;;  %v2969_v2 = vsel %vm2953_vm15, %v7540_v15, 1e+09 }
 0x867   : > { %v2939_v26 = vmin.f32 %v2880_v21, %v2912_v49  ;;  %v2936_v42 = vmin.f32 %v2874_v22, %v2906_v40  ;;  %2987 = vmin.xlane.f32.xlu1 %v2969_v2 }
 0x869   : > { %v9536_v62 = vsel %vm3175_vm1, %v2939_v26, %v9207_v53  ;;  %v9541_v24 = vsel %vm3175_vm1, %v2936_v42, %v9212_v28  ;;  %vm2955_vm0 = vcmp.eq.f32.partialorder %v9363_v12, %v2939_v26  ;;  %vm2952_vm3 = vcmp.eq.f32.partialorder %v9366_v7, %v2936_v42 }
 0x86a   : > { %v2884_v10 = vpop.xlane.xlu1 %2883  ;;  %v2878_v1 = vpop.xlane.xlu0 %2877  ;;  %v2971_v50 = vsel %vm2955_vm0, %v7540_v15, 1e+09  ;;  %v2968_v2 = vsel %vm2952_vm3, %v7540_v15, 1e+09 }
 0x86b   : > { %v2941_v27 = vmin.f32 %v2884_v10, %v2916_v34  ;;  %v2938_v40 = vmin.f32 %v2878_v1, %v2910_v17  ;;  %2991 = vmin.xlane.f32.xlu1 %v2971_v50  ;;  %2985 = vmin.xlane.f32.xlu0 %v2968_v2 }
 0x86d   : > { %v9550_v53 = vsel %vm3175_vm1, %v2941_v27, %v9221_v9  ;;  %v9555_v28 = vsel %vm3175_vm1, %v2938_v40, %v9226_v31  ;;  %vm2957_vm4 = vcmp.eq.f32.partialorder %v9383_v59, %v2941_v27  ;;  %vm2954_vm5 = vcmp.eq.f32.partialorder %v9386_v20, %v2938_v40 }
 0x86e   : > { %v2888_v42 = vpop.xlane.xlu1 %2887  ;;  %v2882_v49 = vpop.xlane.xlu0 %2881  ;;  %v2973_v17 = vsel %vm2957_vm4, %v7540_v15, 1e+09  ;;  %v2970_v34 = vsel %vm2954_vm5, %v7540_v15, 1e+09 }
 0x86f   : > { %v2943_v21 = vmin.f32 %v2888_v42, %v2920_v44  ;;  %v2940_v22 = vmin.f32 %v2882_v49, %v2914_v16  ;;  %2995 = vmin.xlane.f32.xlu1 %v2973_v17  ;;  %2989 = vmin.xlane.f32.xlu0 %v2970_v34 }
 0x871   : > { %v9564_v9 = vsel %vm3175_vm1, %v2943_v21, %v9235_v54  ;;  %v9569_v31 = vsel %vm3175_vm1, %v2940_v22, %v9240_v5  ;;  %vm2959_vm6 = vcmp.eq.f32.partialorder %v9403_v36, %v2943_v21  ;;  %vm2956_vm2 = vcmp.eq.f32.partialorder %v9406_v19, %v2940_v22 }
 0x872   : > { %v2892_v26 = vpop.xlane.xlu1 %2891  ;;  %v2886_v10 = vpop.xlane.xlu0 %2885  ;;  %v2975_v16 = vsel %vm2959_vm6, %v7540_v15, 1e+09  ;;  %v2972_v44 = vsel %vm2956_vm2, %v7540_v15, 1e+09 }
 0x873   : > { %v2945_v1 = vmin.f32 %v2892_v26, %v2924_v45  ;;  %v2942_v50 = vmin.f32 %v2886_v10, %v2918_v63  ;;  %2999 = vmin.xlane.f32.xlu1 %v2975_v16  ;;  %2993 = vmin.xlane.f32.xlu0 %v2972_v44 }
 0x875   : > { %v9578_v54 = vsel %vm3175_vm1, %v2945_v1, %v9249_v8  ;;  %v9583_v5 = vsel %vm3175_vm1, %v2942_v50, %v9254_v4  ;;  %vm2961_vm7 = vcmp.eq.f32.partialorder %v9423_v61, %v2945_v1  ;;  %vm2958_vm8 = vcmp.eq.f32.partialorder %v9426_v41, %v2942_v50 }
 0x876   : > { %v2896_v2 = vpop.xlane.xlu1 %2895  ;;  %v2890_v27 = vpop.xlane.xlu0 %2889  ;;  %v2977_v63 = vsel %vm2961_vm7, %v7540_v15, 1e+09  ;;  %v2974_v45 = vsel %vm2958_vm8, %v7540_v15, 1e+09 }
 0x877   : > { %v2947_v40 = vmin.f32 %v2896_v2, %v9512_v60  ;;  %v2944_v8 = vmin.f32 %v2890_v27, %v9510_v47  ;;  %3003 = vmin.xlane.f32.xlu1 %v2977_v63  ;;  %2997 = vmin.xlane.f32.xlu0 %v2974_v45 }
 0x879   : > { %v9594_v4 = vsel %vm3175_vm1, %v2947_v40, %v9265_v35  ;;  %v9599_v42 = vsel %vm3175_vm1, %v2944_v8, %v9270_v14  ;;  %vm2963_vm9 = vcmp.eq.f32.partialorder %v9445_v51, %v2947_v40  ;;  %vm2960_vm10 = vcmp.eq.f32.partialorder %v9448_v48, %v2944_v8 }
 0x87a   : > { %v2894_v49 = vpop.xlane.xlu0 %2893  ;;  %v2979_v60 = vsel %vm2963_vm9, %v7540_v15, 1e+09  ;;  %v2976_v47 = vsel %vm2960_vm10, %v7540_v15, 1e+09 }
 0x87b   : > { %v2946_v17 = vmin.f32 %v2894_v49, %v9514_v23  ;;  %3007 = vmin.xlane.f32.xlu1 %v2979_v60  ;;  %3001 = vmin.xlane.f32.xlu0 %v2976_v47 }
 0x87d   : > { %v9609_v35 = vsel %vm3175_vm1, %v2946_v17, %v9280_v3  ;;  %vm2962_vm11 = vcmp.eq.f32.partialorder %v9460_v29, %v2946_v17 }
 0x87e   : > { %v2898_v14 = vpop.xlane.xlu0 %2897  ;;  %v2978_v34 = vsel %vm2962_vm11, %v7540_v15, 1e+09 }
 0x87f   : > { %v2948_v21 = vmin.f32 %v2898_v14, %v9517_v37  ;;  %3005 = vmin.xlane.f32.xlu0 %v2978_v34 }
 0x881   : > { %v9617_v22 = vsel %vm3175_vm1, %v2948_v21, %v9288_v58  ;;  %vm2964_vm12 = vcmp.eq.f32.partialorder %v9471_v33, %v2948_v21 }
 0x882   : > { %v2980_v23 = vsel %vm2964_vm12, %v7540_v15, 1e+09 }
 0x883   : > { %3009 = vmin.xlane.f32.xlu0 %v2980_v23 }
 0x8a6   : > { %v2900_v3 = vpop.xlane.xlu1 %2899 }
 0x8aa   : > { %v2932_v26 = vpop.xlane.xlu1 %2931 }
 0x8ab   : > { %v2949_v10 = vmin.f32 %v2900_v3, %v2932_v26 }
 0x8ad   : > { %v9624_v16 = vsel %vm3175_vm1, %v2949_v10, %v9295_v30  ;;  %vm2965_vm13 = vcmp.eq.f32.partialorder %v9481_v38, %v2949_v10 }
 0x8ae   : > { %v2902_v37 = vpop.xlane.xlu0 %2901  ;;  %v2981_v44 = vsel %vm2965_vm13, %v7540_v15, 1e+09 }
 0x8af   : > { %3011 = vmin.xlane.f32.xlu1 %v2981_v44 }
 0x8b2   : > { %v2934_v58 = vpop.xlane.xlu0 %2933 }
 0x8b3   : > { %v2950_v1 = vmin.f32 %v2902_v37, %v2934_v58  ;;  %3075 = vmin.xlane.f32.xlu1 %v12762_v57 }
 0x8b5   : > { %v9632_v50 = vsel %vm3175_vm1, %v2950_v1, %v9303_v32  ;;  %vm2966_vm14 = vcmp.eq.f32.partialorder %v9492_v52, %v2950_v1  ;;  %v3048_v32 = vpop.xlane.xlu1 %3047 }
 0x8b6   : > { %v2982_v30 = vsel %vm2966_vm14, %v7540_v15, 1e+09  ;;  %v3050_v27 = vpop.xlane.xlu0 %3049 }
 0x8b7   : > { %3013 = vmin.xlane.f32.xlu0 %v2982_v30  ;;  %3256 = vmin.xlane.f32.xlu1 %v12763_v46 }
 0x8b9   : > { %v3052_v2 = vpop.xlane.xlu1 %3051 }
 0x8ba   : > { %v3054_v45 = vpop.xlane.xlu0 %3053 }
 0x8bb   : > { %3077 = vmin.xlane.f32.xlu0 %v12762_v57  ;;  %3260 = vmin.xlane.f32.xlu1 %v12763_v46 }
 0x8bd   : > { %v3056_v63 = vpop.xlane.xlu1 %3055 }
 0x8be   : > { %v3058_v8 = vpop.xlane.xlu0 %3057 }
 0x8bf   : > { %3264 = vmin.xlane.f32.xlu1 %v12763_v46  ;;  %3258 = vmin.xlane.f32.xlu0 %v12763_v46 }
 0x8c1   : > { %v3060_v40 = vpop.xlane.xlu1 %3059 }
 0x8c2   : > { %v3062_v60 = vpop.xlane.xlu0 %3061 }
 0x8c3   : > { %3268 = vmin.xlane.f32.xlu1 %v12763_v46  ;;  %3262 = vmin.xlane.f32.xlu0 %v12763_v46 }
 0x8c5   : > { %v3064_v49 = vpop.xlane.xlu1 %3063 }
 0x8c6   : > { %v9651_v17 = vpop.xlane.xlu0 %3065 }
 0x8c7   : > { %3272 = vmin.xlane.f32.xlu1 %v12763_v46  ;;  %3266 = vmin.xlane.f32.xlu0 %v12763_v46 }
 0x8c9   : > { %v3068_v47 = vpop.xlane.xlu1 %3067 }
 0x8ca   : > { %v9655_v34 = vpop.xlane.xlu0 %3069 }
 0x8cb   : > { %3276 = vmin.xlane.f32.xlu1 %v12763_v46  ;;  %3270 = vmin.xlane.f32.xlu0 %v12763_v46 }
 0x8cd   : > { %v9653_v14 = vpop.xlane.xlu1 %3071 }
 0x8ce   : > { %v9657_v3 = vpop.xlane.xlu0 %3073 }
 0x8cf   : > { %3280 = vmin.xlane.f32.xlu1 %v12763_v46  ;;  %3274 = vmin.xlane.f32.xlu0 %v12763_v46 }
 0x8d3   : > { %3278 = vmin.xlane.f32.xlu0 %v12763_v46 }
 0x8d7   : > { %3282 = vmin.xlane.f32.xlu0 %v12763_v46 }
 0x8f0   : > { %v2984_v21 = vpop.xlane.xlu1 %2983 }
 0x8f1   : > { %v3079_v23 = vmin.f32 %v2984_v21, %v3048_v32 }
 0x8f3   : > { %v9662_v26 = vsel %vm3175_vm1, %v3079_v23, %v9333_v0  ;;  %vm3095_vm15 = vcmp.eq.f32.partialorder %v7540_v15, %v3079_v23 }
 0x8f4   : > { %v2988_v10 = vpop.xlane.xlu1 %2987  ;;  %v9666_v37 = vsel %vm3095_vm15, 1e+30, %v9337_v39 }
 0x8f5   : > { %v3081_v44 = vmin.f32 %v2988_v10, %v3052_v2  ;;  %3224 = vmin.xlane.f32.xlu1 %v9666_v37 }
 0x8f7   : > { %v9672_v58 = vsel %vm3175_vm1, %v3081_v44, %v9343_v11  ;;  %vm3097_vm0 = vcmp.eq.f32.partialorder %v7540_v15, %v3081_v44 }
 0x8f8   : > { %v2992_v1 = vpop.xlane.xlu1 %2991  ;;  %v2986_v30 = vpop.xlane.xlu0 %2985  ;;  %v9676_v0 = vsel %vm3097_vm0, 1e+30, %v9347_v13 }
 0x8f9   : > { %v3083_v32 = vmin.f32 %v2992_v1, %v3056_v63  ;;  %v3080_v21 = vmin.f32 %v2986_v30, %v3050_v27  ;;  %3228 = vmin.xlane.f32.xlu1 %v9676_v0  ;;  %v12874_v30 = vld [vmem:[#allocation15_spill] sm:$0xff] }
 0x8fb   : > { %v9682_v39 = vsel %vm3175_vm1, %v3083_v32, %v9353_v25  ;;  %v9687_v11 = vsel %vm3175_vm1, %v3080_v21, %v9358_v55  ;;  %vm3099_vm3 = vcmp.eq.f32.partialorder %v7540_v15, %v3083_v32  ;;  %vm3096_vm4 = vcmp.eq.f32.partialorder %v7540_v15, %v3080_v21 }
 0x8fc   : > { %v2996_v13 = vpop.xlane.xlu1 %2995  ;;  %v2990_v2 = vpop.xlane.xlu0 %2989  ;;  %v9692_v27 = vsel %vm3099_vm3, 1e+30, %v9363_v12  ;;  %v9695_v63 = vsel %vm3096_vm4, 1e+30, %v9366_v7 }
 0x8fd   : > { %v3085_v23 = vmin.f32 %v2996_v13, %v3060_v40  ;;  %v3082_v25 = vmin.f32 %v2990_v2, %v3054_v45  ;;  %3232 = vmin.xlane.f32.xlu1 %v9692_v27  ;;  %3226 = vmin.xlane.f32.xlu0 %v9695_v63  ;;  %v12876_v2 = vld [vmem:[#allocation5_spill] sm:$0xff] }
 0x8ff   : > { %v9702_v55 = vsel %vm3175_vm1, %v3085_v23, %v9373_v56  ;;  %v9707_v10 = vsel %vm3175_vm1, %v3082_v25, %v9378_v43  ;;  %vm3101_vm5 = vcmp.eq.f32.partialorder %v7540_v15, %v3085_v23  ;;  %vm3098_vm6 = vcmp.eq.f32.partialorder %v7540_v15, %v3082_v25  ;;  %v12872_v43 = vld [vmem:[#allocation14_spill] sm:$0xff] }
 0x900   : > { %v3000_v12 = vpop.xlane.xlu1 %2999  ;;  %v2994_v7 = vpop.xlane.xlu0 %2993  ;;  %v9712_v45 = vsel %vm3101_vm5, 1e+30, %v9383_v59  ;;  %v9715_v40 = vsel %vm3098_vm6, 1e+30, %v9386_v20  ;;  %v12878_v25 = vld [vmem:[#allocation6_spill] sm:$0xff] }
 0x901   : > { %v3087_v44 = vmin.f32 %v3000_v12, %v3064_v49  ;;  %v3084_v56 = vmin.f32 %v2994_v7, %v3058_v8  ;;  %3236 = vmin.xlane.f32.xlu1 %v9712_v45  ;;  %3230 = vmin.xlane.f32.xlu0 %v9715_v40 }
 0x903   : > { %v9722_v1 = vsel %vm3175_vm1, %v3087_v44, %v12872_v43  ;;  %v9727_v32 = vsel %vm3175_vm1, %v3084_v56, %v12874_v30  ;;  %vm3103_vm2 = vcmp.eq.f32.partialorder %v7540_v15, %v3087_v44  ;;  %vm3100_vm7 = vcmp.eq.f32.partialorder %v7540_v15, %v3084_v56  ;;  %v12880_v56 = vld [vmem:[#allocation7_spill] sm:$0xff]  ;;  %v12882_v30 = vld [vmem:[#allocation8_spill] sm:$0xff] }
 0x904   : > { %12873 = vst [vmem:[#allocation14_spill] sm:$0xff] %v9722_v1  ;;  %12875 = vst [vmem:[#allocation15_spill] sm:$0xff] %v9727_v32  ;;  %v3004_v59 = vpop.xlane.xlu1 %3003  ;;  %v2998_v20 = vpop.xlane.xlu0 %2997  ;;  %v9732_v8 = vsel %vm3103_vm2, 1e+30, %v9403_v36  ;;  %v9735_v49 = vsel %vm3100_vm7, 1e+30, %v9406_v19 }
 0x905   : > { %v3089_v21 = vmin.f32 %v3004_v59, %v3068_v47  ;;  %v3086_v13 = vmin.f32 %v2998_v20, %v3062_v60  ;;  %3240 = vmin.xlane.f32.xlu1 %v9732_v8  ;;  %3234 = vmin.xlane.f32.xlu0 %v9735_v49  ;;  %v12884_v20 = vld [vmem:[#allocation9_spill] sm:$0xff] }
 0x907   : > { %v9742_v23 = vsel %vm3175_vm1, %v3089_v21, %v12876_v2  ;;  %v9747_v12 = vsel %vm3175_vm1, %v3086_v13, %v12878_v25  ;;  %vm3105_vm8 = vcmp.eq.f32.partialorder %v7540_v15, %v3089_v21  ;;  %vm3102_vm9 = vcmp.eq.f32.partialorder %v7540_v15, %v3086_v13 }
 0x908   : > { %12877 = vst [vmem:[#allocation5_spill] sm:$0xff] %v9742_v23  ;;  %12879 = vst [vmem:[#allocation6_spill] sm:$0xff] %v9747_v12  ;;  %v3008_v36 = vpop.xlane.xlu1 %3007  ;;  %v3002_v19 = vpop.xlane.xlu0 %3001  ;;  %v9752_v60 = vsel %vm3105_vm8, 1e+30, %v9423_v61  ;;  %v9755_v47 = vsel %vm3102_vm9, 1e+30, %v9426_v41 }
 0x909   : > { %v3091_v7 = vmin.f32 %v3008_v36, %v9653_v14  ;;  %v3088_v44 = vmin.f32 %v3002_v19, %v9651_v17  ;;  %3244 = vmin.xlane.f32.xlu1 %v9752_v60  ;;  %3238 = vmin.xlane.f32.xlu0 %v9755_v47 }
 0x90b   : > { %v9764_v43 = vsel %vm3175_vm1, %v3091_v7, %v12880_v56  ;;  %v9769_v61 = vsel %vm3175_vm1, %v3088_v44, %v12882_v30  ;;  %vm3107_vm10 = vcmp.eq.f32.partialorder %v7540_v15, %v3091_v7  ;;  %vm3104_vm11 = vcmp.eq.f32.partialorder %v7540_v15, %v3088_v44  ;;  %v12888_v7 = vld [vmem:[#allocation10_spill] sm:$0xff] }
 0x90c   : > { %12881 = vst [vmem:[#allocation7_spill] sm:$0xff] %v9764_v43  ;;  %12883 = vst [vmem:[#allocation8_spill] sm:$0xff] %v9769_v61  ;;  %v3006_v41 = vpop.xlane.xlu0 %3005  ;;  %v9774_v17 = vsel %vm3107_vm10, 1e+30, %v9445_v51  ;;  %v9777_v14 = vsel %vm3104_vm11, 1e+30, %v9448_v48 }
 0x90d   : > { %v3090_v59 = vmin.f32 %v3006_v41, %v9655_v34  ;;  %3248 = vmin.xlane.f32.xlu1 %v9774_v17  ;;  %3242 = vmin.xlane.f32.xlu0 %v9777_v14  ;;  %v12886_v34 = vld [vmem:[#allocation11_spill] sm:$0xff]  ;;  %v12890_v41 = vld [vmem:[#allocation12_spill] sm:$0xff] }
 0x90f   : > { %v9785_v21 = vsel %vm3175_vm1, %v3090_v59, %v12884_v20  ;;  %vm3106_vm12 = vcmp.eq.f32.partialorder %v7540_v15, %v3090_v59 }
 0x910   : > { %12885 = vst [vmem:[#allocation9_spill] sm:$0xff] %v9785_v21  ;;  %v3010_v13 = vpop.xlane.xlu0 %3009  ;;  %v9789_v51 = vsel %vm3106_vm12, 1e+30, %v9460_v29  ;;  %v12892_v21 = vld [vmem:[#allocation13_spill] sm:$0xff] }
 0x911   : > { %v3092_v48 = vmin.f32 %v3010_v13, %v9657_v3  ;;  %3246 = vmin.xlane.f32.xlu0 %v9789_v51 }
 0x913   : > { %v9796_v2 = vsel %vm3175_vm1, %v3092_v48, %v12886_v34  ;;  %vm3108_vm13 = vcmp.eq.f32.partialorder %v7540_v15, %v3092_v48 }
 0x914   : > { %12887 = vst [vmem:[#allocation11_spill] sm:$0xff] %v9796_v2  ;;  %v9800_v25 = vsel %vm3108_vm13, 1e+30, %v9471_v33 }
 0x915   : > { %3250 = vmin.xlane.f32.xlu0 %v9800_v25 }
 0x93c   : > { %v3012_v36 = vpop.xlane.xlu1 %3011 }
 0x940   : > { %v3076_v19 = vpop.xlane.xlu1 %3075 }
 0x941   : > { %v3093_v29 = vmin.f32 %v3012_v36, %v3076_v19 }
 0x943   : > { %v9806_v3 = vsel %vm3175_vm1, %v3093_v29, %v12888_v7  ;;  %vm3109_vm14 = vcmp.eq.f32.partialorder %v7540_v15, %v3093_v29 }
 0x944   : > { %12889 = vst [vmem:[#allocation10_spill] sm:$0xff] %v9806_v3  ;;  %v3014_v44 = vpop.xlane.xlu0 %3013  ;;  %v9810_v56 = vsel %vm3109_vm14, 1e+30, %v9481_v38  ;;  %v3257_v38 = vpop.xlane.xlu1 %3256 }
 0x945   : > { %3252 = vmin.xlane.f32.xlu1 %v9810_v56 }
 0x948   : > { %v3078_v33 = vpop.xlane.xlu0 %3077 }
 0x949   : > { %v3094_v30 = vmin.f32 %v3014_v44, %v3078_v33  ;;  %3284 = vmin.xlane.f32.xlu1 %v12763_v46 }
 0x94b   : > { %v9817_v59 = vsel %vm3175_vm1, %v3094_v30, %v12890_v41  ;;  %vm3110_vm15 = vcmp.eq.f32.partialorder %v7540_v15, %v3094_v30  ;;  %vm3528_vm1 = vcmp.eq.s32.totalorder %v7332_v18, 7 }
 0x94c   : > { %12891 = vst [vmem:[#allocation12_spill] sm:$0xff] %v9817_v59  ;;  %v9821_v20 = vsel %vm3110_vm15, 1e+30, %v9492_v52  ;;  %v3261_v52 = vpop.xlane.xlu1 %3260  ;;  %v3259_v13 = vpop.xlane.xlu0 %3258 }
 0x94d   : > { %3254 = vmin.xlane.f32.xlu0 %v9821_v20  ;;  %3400 = vmin.xlane.f32.xlu1 %v12762_v57 }
 0x950   : > { %v3265_v48 = vpop.xlane.xlu1 %3264  ;;  %v3263_v34 = vpop.xlane.xlu0 %3262 }
 0x951   : > { %3286 = vmin.xlane.f32.xlu0 %v12763_v46  ;;  %3404 = vmin.xlane.f32.xlu1 %v12762_v57 }
 0x954   : > { %v3269_v36 = vpop.xlane.xlu1 %3268  ;;  %v3267_v19 = vpop.xlane.xlu0 %3266 }
 0x955   : > { %3408 = vmin.xlane.f32.xlu1 %v12762_v57  ;;  %3402 = vmin.xlane.f32.xlu0 %v12762_v57 }
 0x958   : > { %v3273_v29 = vpop.xlane.xlu1 %3272  ;;  %v3271_v7 = vpop.xlane.xlu0 %3270 }
 0x959   : > { %3412 = vmin.xlane.f32.xlu1 %v12762_v57  ;;  %3406 = vmin.xlane.f32.xlu0 %v12762_v57 }
 0x95c   : > { %v3277_v44 = vpop.xlane.xlu1 %3276  ;;  %v9839_v33 = vpop.xlane.xlu0 %3274 }
 0x95d   : > { %3416 = vmin.xlane.f32.xlu1 %v12762_v57  ;;  %3410 = vmin.xlane.f32.xlu0 %v12762_v57 }
 0x960   : > { %v9841_v30 = vpop.xlane.xlu1 %3280  ;;  %v9843_v41 = vpop.xlane.xlu0 %3278 }
 0x961   : > { %3420 = vmin.xlane.f32.xlu1 %v12762_v57  ;;  %3414 = vmin.xlane.f32.xlu0 %v12762_v57 }
 0x964   : > { %v9846_v2 = vpop.xlane.xlu0 %3282 }
 0x965   : > { %3424 = vmin.xlane.f32.xlu1 %v12762_v57  ;;  %3418 = vmin.xlane.f32.xlu0 %v12762_v57 }
 0x969   : > { %3422 = vmin.xlane.f32.xlu0 %v12762_v57 }
 0x96d   : > { %3426 = vmin.xlane.f32.xlu0 %v12762_v57 }
 0x982   : > { %v3225_v59 = vpop.xlane.xlu1 %3224 }
 0x983   : > { %v3288_v3 = vmin.f32 %v3225_v59, %v3257_v38 }
 0x985   : > { %v9851_v61 = vsel %vm3528_vm1, %v3288_v3, %v12892_v21  ;;  %vm3304_vm0 = vcmp.eq.f32.partialorder %v9666_v37, %v3288_v3 }
 0x986   : > { %12893 = vst [vmem:[#allocation13_spill] sm:$0xff] %v9851_v61  ;;  %v3229_v43 = vpop.xlane.xlu1 %3228  ;;  %v3320_v12 = vsel %vm3304_vm0, %v7540_v15, 1e+09 }
 0x987   : > { %v3290_v23 = vmin.f32 %v3229_v43, %v3261_v52  ;;  %3336 = vmin.xlane.f32.xlu1 %v3320_v12 }
 0x989   : > { %v9858_v32 = vsel %vm3528_vm1, %v3290_v23, %v9529_v6  ;;  %vm3306_vm3 = vcmp.eq.f32.partialorder %v9676_v0, %v3290_v23 }
 0x98a   : > { %v3233_v59 = vpop.xlane.xlu1 %3232  ;;  %v3227_v38 = vpop.xlane.xlu0 %3226  ;;  %v3322_v1 = vsel %vm3306_vm3, %v7540_v15, 1e+09 }
 0x98b   : > { %v3292_v21 = vmin.f32 %v3233_v59, %v3265_v48  ;;  %v3289_v61 = vmin.f32 %v3227_v38, %v3259_v13  ;;  %3340 = vmin.xlane.f32.xlu1 %v3322_v1 }
 0x98d   : > { %v9865_v3 = vsel %vm3528_vm1, %v3292_v21, %v9536_v62  ;;  %v9870_v12 = vsel %vm3528_vm1, %v3289_v61, %v9541_v24  ;;  %vm3308_vm4 = vcmp.eq.f32.partialorder %v9692_v27, %v3292_v21  ;;  %vm3305_vm5 = vcmp.eq.f32.partialorder %v9695_v63, %v3289_v61 }
 0x98e   : > { %v3237_v6 = vpop.xlane.xlu1 %3236  ;;  %v3231_v23 = vpop.xlane.xlu0 %3230  ;;  %v3324_v43 = vsel %vm3308_vm4, %v7540_v15, 1e+09  ;;  %v3321_v1 = vsel %vm3305_vm5, %v7540_v15, 1e+09 }
 0x98f   : > { %v3294_v52 = vmin.f32 %v3237_v6, %v3269_v36  ;;  %v3291_v13 = vmin.f32 %v3231_v23, %v3263_v34  ;;  %3344 = vmin.xlane.f32.xlu1 %v3324_v43  ;;  %3338 = vmin.xlane.f32.xlu0 %v3321_v1 }
 0x991   : > { %v9879_v62 = vsel %vm3528_vm1, %v3294_v52, %v9550_v53  ;;  %v9884_v24 = vsel %vm3528_vm1, %v3291_v13, %v9555_v28  ;;  %vm3310_vm6 = vcmp.eq.f32.partialorder %v9712_v45, %v3294_v52  ;;  %vm3307_vm2 = vcmp.eq.f32.partialorder %v9715_v40, %v3291_v13 }
 0x992   : > { %v3241_v61 = vpop.xlane.xlu1 %3240  ;;  %v3235_v48 = vpop.xlane.xlu0 %3234  ;;  %v3326_v34 = vsel %vm3310_vm6, %v7540_v15, 1e+09  ;;  %v3323_v36 = vsel %vm3307_vm2, %v7540_v15, 1e+09 }
 0x993   : > { %v3296_v59 = vmin.f32 %v3241_v61, %v3273_v29  ;;  %v3293_v38 = vmin.f32 %v3235_v48, %v3267_v19  ;;  %3348 = vmin.xlane.f32.xlu1 %v3326_v34  ;;  %3342 = vmin.xlane.f32.xlu0 %v3323_v36 }
 0x995   : > { %v9893_v53 = vsel %vm3528_vm1, %v3296_v59, %v9564_v9  ;;  %v9898_v28 = vsel %vm3528_vm1, %v3293_v38, %v9569_v31  ;;  %vm3312_vm7 = vcmp.eq.f32.partialorder %v9732_v8, %v3296_v59  ;;  %vm3309_vm8 = vcmp.eq.f32.partialorder %v9735_v49, %v3293_v38 }
 0x996   : > { %v3245_v21 = vpop.xlane.xlu1 %3244  ;;  %v3239_v6 = vpop.xlane.xlu0 %3238  ;;  %v3328_v19 = vsel %vm3312_vm7, %v7540_v15, 1e+09  ;;  %v3325_v29 = vsel %vm3309_vm8, %v7540_v15, 1e+09 }
 0x997   : > { %v3298_v23 = vmin.f32 %v3245_v21, %v3277_v44  ;;  %v3295_v43 = vmin.f32 %v3239_v6, %v3271_v7  ;;  %3352 = vmin.xlane.f32.xlu1 %v3328_v19  ;;  %3346 = vmin.xlane.f32.xlu0 %v3325_v29 }
 0x999   : > { %v9907_v9 = vsel %vm3528_vm1, %v3298_v23, %v9578_v54  ;;  %v9912_v31 = vsel %vm3528_vm1, %v3295_v43, %v9583_v5  ;;  %vm3314_vm9 = vcmp.eq.f32.partialorder %v9752_v60, %v3298_v23  ;;  %vm3311_vm10 = vcmp.eq.f32.partialorder %v9755_v47, %v3295_v43 }
 0x99a   : > { %v3249_v1 = vpop.xlane.xlu1 %3248  ;;  %v3243_v52 = vpop.xlane.xlu0 %3242  ;;  %v3330_v7 = vsel %vm3314_vm9, %v7540_v15, 1e+09  ;;  %v3327_v44 = vsel %vm3311_vm10, %v7540_v15, 1e+09 }
 0x99b   : > { %v3300_v13 = vmin.f32 %v3249_v1, %v9841_v30  ;;  %v3297_v54 = vmin.f32 %v3243_v52, %v9839_v33  ;;  %3356 = vmin.xlane.f32.xlu1 %v3330_v7  ;;  %3350 = vmin.xlane.f32.xlu0 %v3327_v44 }
 0x99d   : > { %v9923_v5 = vsel %vm3528_vm1, %v3300_v13, %v9594_v4  ;;  %v9928_v61 = vsel %vm3528_vm1, %v3297_v54, %v9599_v42  ;;  %vm3316_vm11 = vcmp.eq.f32.partialorder %v9774_v17, %v3300_v13  ;;  %vm3313_vm12 = vcmp.eq.f32.partialorder %v9777_v14, %v3297_v54 }
 0x99e   : > { %v3247_v48 = vpop.xlane.xlu0 %3246  ;;  %v3332_v30 = vsel %vm3316_vm11, %v7540_v15, 1e+09  ;;  %v3329_v33 = vsel %vm3313_vm12, %v7540_v15, 1e+09 }
 0x99f   : > { %v3299_v34 = vmin.f32 %v3247_v48, %v9843_v41  ;;  %3360 = vmin.xlane.f32.xlu1 %v3332_v30  ;;  %3354 = vmin.xlane.f32.xlu0 %v3329_v33 }
 0x9a1   : > { %v9938_v4 = vsel %vm3528_vm1, %v3299_v34, %v9609_v35  ;;  %vm3315_vm13 = vcmp.eq.f32.partialorder %v9789_v51, %v3299_v34 }
 0x9a2   : > { %v3251_v42 = vpop.xlane.xlu0 %3250  ;;  %v3331_v36 = vsel %vm3315_vm13, %v7540_v15, 1e+09 }
 0x9a3   : > { %v3301_v59 = vmin.f32 %v3251_v42, %v9846_v2  ;;  %3358 = vmin.xlane.f32.xlu0 %v3331_v36 }
 0x9a5   : > { %v9946_v38 = vsel %vm3528_vm1, %v3301_v59, %v9617_v22  ;;  %vm3317_vm14 = vcmp.eq.f32.partialorder %v9800_v25, %v3301_v59 }
 0x9a6   : > { %v3333_v41 = vsel %vm3317_vm14, %v7540_v15, 1e+09 }
 0x9a7   : > { %3362 = vmin.xlane.f32.xlu0 %v3333_v41 }
 0x9d2   : > { %v3253_v35 = vpop.xlane.xlu1 %3252 }
 0x9d6   : > { %v3285_v21 = vpop.xlane.xlu1 %3284 }
 0x9d7   : > { %v3302_v6 = vmin.f32 %v3253_v35, %v3285_v21 }
 0x9d9   : > { %v9953_v19 = vsel %vm3528_vm1, %v3302_v6, %v9624_v16  ;;  %vm3318_vm15 = vcmp.eq.f32.partialorder %v9810_v56, %v3302_v6 }
 0x9da   : > { %v3255_v2 = vpop.xlane.xlu0 %3254  ;;  %v3334_v29 = vsel %vm3318_vm15, %v7540_v15, 1e+09  ;;  %v3401_v1 = vpop.xlane.xlu1 %3400 }
 0x9db   : > { %3364 = vmin.xlane.f32.xlu1 %v3334_v29 }
 0x9de   : > { %v3287_v22 = vpop.xlane.xlu0 %3286 }
 0x9df   : > { %v3303_v23 = vmin.f32 %v3255_v2, %v3287_v22  ;;  %3428 = vmin.xlane.f32.xlu1 %v12762_v57 }
 0x9e1   : > { %v9961_v43 = vsel %vm3528_vm1, %v3303_v23, %v9632_v50  ;;  %vm3319_vm0 = vcmp.eq.f32.partialorder %v9821_v20, %v3303_v23  ;;  %v3405_v50 = vpop.xlane.xlu1 %3404 }
 0x9e2   : > { %v3335_v16 = vsel %vm3319_vm0, %v7540_v15, 1e+09  ;;  %v3403_v52 = vpop.xlane.xlu0 %3402 }
 0x9e3   : > { %3366 = vmin.xlane.f32.xlu0 %v3335_v16  ;;  %3609 = vmin.xlane.f32.xlu1 %v12763_v46 }
 0x9e5   : > { %v3409_v7 = vpop.xlane.xlu1 %3408 }
 0x9e6   : > { %v3407_v44 = vpop.xlane.xlu0 %3406 }
 0x9e7   : > { %3430 = vmin.xlane.f32.xlu0 %v12762_v57  ;;  %3613 = vmin.xlane.f32.xlu1 %v12763_v46 }
 0x9e9   : > { %v3413_v13 = vpop.xlane.xlu1 %3412 }
 0x9ea   : > { %v3411_v54 = vpop.xlane.xlu0 %3410 }
 0x9eb   : > { %3617 = vmin.xlane.f32.xlu1 %v12763_v46  ;;  %3611 = vmin.xlane.f32.xlu0 %v12763_v46 }
 0x9ed   : > { %v3417_v48 = vpop.xlane.xlu1 %3416 }
 0x9ee   : > { %v3415_v30 = vpop.xlane.xlu0 %3414 }
 0x9ef   : > { %3621 = vmin.xlane.f32.xlu1 %v12763_v46  ;;  %3615 = vmin.xlane.f32.xlu0 %v12763_v46 }
 0x9f1   : > { %v3421_v33 = vpop.xlane.xlu1 %3420 }
 0x9f2   : > { %v9980_v34 = vpop.xlane.xlu0 %3418 }
 0x9f3   : > { %3625 = vmin.xlane.f32.xlu1 %v12763_v46  ;;  %3619 = vmin.xlane.f32.xlu0 %v12763_v46 }
 0x9f5   : > { %v9982_v42 = vpop.xlane.xlu1 %3424 }
 0x9f6   : > { %v9984_v36 = vpop.xlane.xlu0 %3422 }
 0x9f7   : > { %3629 = vmin.xlane.f32.xlu1 %v12763_v46  ;;  %3623 = vmin.xlane.f32.xlu0 %v12763_v46 }
 0x9fa   : > { %v9986_v35 = vpop.xlane.xlu0 %3426 }
 0x9fb   : > { %3633 = vmin.xlane.f32.xlu1 %v12763_v46  ;;  %3627 = vmin.xlane.f32.xlu0 %v12763_v46 }
 0x9ff   : > { %3631 = vmin.xlane.f32.xlu0 %v12763_v46 }
 0xa03   : > { %3635 = vmin.xlane.f32.xlu0 %v12763_v46 }
 0xa14   : > { %v3337_v59 = vpop.xlane.xlu1 %3336 }
 0xa15   : > { %v3432_v41 = vmin.f32 %v3337_v59, %v3401_v1 }
 0xa17   : > { %v9991_v21 = vsel %vm3528_vm1, %v3432_v41, %v9662_v26  ;;  %vm3448_vm3 = vcmp.eq.f32.partialorder %v7540_v15, %v3432_v41 }
 0xa18   : > { %v3341_v6 = vpop.xlane.xlu1 %3340  ;;  %v9995_v2 = vsel %vm3448_vm3, 1e+30, %v9666_v37 }
 0xa19   : > { %v3434_v29 = vmin.f32 %v3341_v6, %v3405_v50  ;;  %3577 = vmin.xlane.f32.xlu1 %v9995_v2 }
 0xa1b   : > { %v10001_v22 = vsel %vm3528_vm1, %v3434_v29, %v9672_v58  ;;  %vm3450_vm4 = vcmp.eq.f32.partialorder %v7540_v15, %v3434_v29 }
 0xa1c   : > { %v3345_v23 = vpop.xlane.xlu1 %3344  ;;  %v3339_v16 = vpop.xlane.xlu0 %3338  ;;  %v10005_v26 = vsel %vm3450_vm4, 1e+30, %v9676_v0 }
 0xa1d   : > { %v3436_v1 = vmin.f32 %v3345_v23, %v3409_v7  ;;  %v3433_v59 = vmin.f32 %v3339_v16, %v3403_v52  ;;  %3581 = vmin.xlane.f32.xlu1 %v10005_v26  ;;  %v12896_v16 = vld [vmem:[#allocation15_spill] sm:$0xff] }
 0xa1f   : > { %v10011_v37 = vsel %vm3528_vm1, %v3436_v1, %v9682_v39  ;;  %v10016_v58 = vsel %vm3528_vm1, %v3433_v59, %v9687_v11  ;;  %vm3452_vm5 = vcmp.eq.f32.partialorder %v7540_v15, %v3436_v1  ;;  %vm3449_vm6 = vcmp.eq.f32.partialorder %v7540_v15, %v3433_v59 }
 0xa20   : > { %v3349_v0 = vpop.xlane.xlu1 %3348  ;;  %v3343_v50 = vpop.xlane.xlu0 %3342  ;;  %v10021_v52 = vsel %vm3452_vm5, 1e+30, %v9692_v27  ;;  %v10024_v7 = vsel %vm3449_vm6, 1e+30, %v9695_v63 }
 0xa21   : > { %v3438_v41 = vmin.f32 %v3349_v0, %v3413_v13  ;;  %v3435_v39 = vmin.f32 %v3343_v50, %v3407_v44  ;;  %3585 = vmin.xlane.f32.xlu1 %v10021_v52  ;;  %3579 = vmin.xlane.f32.xlu0 %v10024_v7  ;;  %v12898_v50 = vld [vmem:[#allocation5_spill] sm:$0xff] }
 0xa23   : > { %v10031_v11 = vsel %vm3528_vm1, %v3438_v41, %v9702_v55  ;;  %v10036_v6 = vsel %vm3528_vm1, %v3435_v39, %v9707_v10  ;;  %vm3454_vm2 = vcmp.eq.f32.partialorder %v7540_v15, %v3438_v41  ;;  %vm3451_vm7 = vcmp.eq.f32.partialorder %v7540_v15, %v3435_v39  ;;  %v12894_v10 = vld [vmem:[#allocation14_spill] sm:$0xff] }
 0xa24   : > { %v3353_v27 = vpop.xlane.xlu1 %3352  ;;  %v3347_v63 = vpop.xlane.xlu0 %3346  ;;  %v10041_v44 = vsel %vm3454_vm2, 1e+30, %v9712_v45  ;;  %v10044_v13 = vsel %vm3451_vm7, 1e+30, %v9715_v40  ;;  %v12900_v39 = vld [vmem:[#allocation6_spill] sm:$0xff] }
 0xa25   : > { %v3440_v29 = vmin.f32 %v3353_v27, %v3417_v48  ;;  %v3437_v55 = vmin.f32 %v3347_v63, %v3411_v54  ;;  %3589 = vmin.xlane.f32.xlu1 %v10041_v44  ;;  %3583 = vmin.xlane.f32.xlu0 %v10044_v13 }
 0xa27   : > { %v10051_v23 = vsel %vm3528_vm1, %v3440_v29, %v12894_v10  ;;  %v10056_v1 = vsel %vm3528_vm1, %v3437_v55, %v12896_v16  ;;  %vm3456_vm8 = vcmp.eq.f32.partialorder %v7540_v15, %v3440_v29  ;;  %vm3453_vm9 = vcmp.eq.f32.partialorder %v7540_v15, %v3437_v55  ;;  %v12902_v55 = vld [vmem:[#allocation7_spill] sm:$0xff]  ;;  %v12904_v16 = vld [vmem:[#allocation8_spill] sm:$0xff] }
 0xa28   : > { %12895 = vst [vmem:[#allocation14_spill] sm:$0xff] %v10051_v23  ;;  %12897 = vst [vmem:[#allocation15_spill] sm:$0xff] %v10056_v1  ;;  %v3357_v45 = vpop.xlane.xlu1 %3356  ;;  %v3351_v40 = vpop.xlane.xlu0 %3350  ;;  %v10061_v54 = vsel %vm3456_vm8, 1e+30, %v9732_v8  ;;  %v10064_v48 = vsel %vm3453_vm9, 1e+30, %v9735_v49 }
 0xa29   : > { %v3442_v59 = vmin.f32 %v3357_v45, %v3421_v33  ;;  %v3439_v0 = vmin.f32 %v3351_v40, %v3415_v30  ;;  %3593 = vmin.xlane.f32.xlu1 %v10061_v54  ;;  %3587 = vmin.xlane.f32.xlu0 %v10064_v48  ;;  %v12906_v40 = vld [vmem:[#allocation9_spill] sm:$0xff] }
 0xa2b   : > { %v10071_v41 = vsel %vm3528_vm1, %v3442_v59, %v12898_v50  ;;  %v10076_v27 = vsel %vm3528_vm1, %v3439_v0, %v12900_v39  ;;  %vm3458_vm10 = vcmp.eq.f32.partialorder %v7540_v15, %v3442_v59  ;;  %vm3455_vm11 = vcmp.eq.f32.partialorder %v7540_v15, %v3439_v0 }
 0xa2c   : > { %12899 = vst [vmem:[#allocation5_spill] sm:$0xff] %v10071_v41  ;;  %12901 = vst [vmem:[#allocation6_spill] sm:$0xff] %v10076_v27  ;;  %v3361_v8 = vpop.xlane.xlu1 %3360  ;;  %v3355_v49 = vpop.xlane.xlu0 %3354  ;;  %v10081_v30 = vsel %vm3458_vm10, 1e+30, %v9752_v60  ;;  %v10084_v33 = vsel %vm3455_vm11, 1e+30, %v9755_v47 }
 0xa2d   : > { %v3444_v63 = vmin.f32 %v3361_v8, %v9982_v42  ;;  %v3441_v29 = vmin.f32 %v3355_v49, %v9980_v34  ;;  %3597 = vmin.xlane.f32.xlu1 %v10081_v30  ;;  %3591 = vmin.xlane.f32.xlu0 %v10084_v33 }
 0xa2f   : > { %v10093_v10 = vsel %vm3528_vm1, %v3444_v63, %v12902_v55  ;;  %v10098_v60 = vsel %vm3528_vm1, %v3441_v29, %v12904_v16  ;;  %vm3460_vm12 = vcmp.eq.f32.partialorder %v7540_v15, %v3444_v63  ;;  %vm3457_vm13 = vcmp.eq.f32.partialorder %v7540_v15, %v3441_v29  ;;  %v12910_v63 = vld [vmem:[#allocation10_spill] sm:$0xff] }
 0xa30   : > { %12903 = vst [vmem:[#allocation7_spill] sm:$0xff] %v10093_v10  ;;  %12905 = vst [vmem:[#allocation8_spill] sm:$0xff] %v10098_v60  ;;  %v3359_v47 = vpop.xlane.xlu0 %3358  ;;  %v10103_v34 = vsel %vm3460_vm12, 1e+30, %v9774_v17  ;;  %v10106_v42 = vsel %vm3457_vm13, 1e+30, %v9777_v14 }
 0xa31   : > { %v3443_v45 = vmin.f32 %v3359_v47, %v9984_v36  ;;  %3601 = vmin.xlane.f32.xlu1 %v10103_v34  ;;  %3595 = vmin.xlane.f32.xlu0 %v10106_v42  ;;  %v12908_v36 = vld [vmem:[#allocation11_spill] sm:$0xff]  ;;  %v12912_v47 = vld [vmem:[#allocation12_spill] sm:$0xff] }
 0xa33   : > { %v10114_v59 = vsel %vm3528_vm1, %v3443_v45, %v12906_v40  ;;  %vm3459_vm14 = vcmp.eq.f32.partialorder %v7540_v15, %v3443_v45 }
 0xa34   : > { %12907 = vst [vmem:[#allocation9_spill] sm:$0xff] %v10114_v59  ;;  %v3363_v0 = vpop.xlane.xlu0 %3362  ;;  %v10118_v17 = vsel %vm3459_vm14, 1e+30, %v9789_v51  ;;  %v12914_v59 = vld [vmem:[#allocation13_spill] sm:$0xff] }
 0xa35   : > { %v3445_v14 = vmin.f32 %v3363_v0, %v9986_v35  ;;  %3599 = vmin.xlane.f32.xlu0 %v10118_v17 }
 0xa37   : > { %v10125_v50 = vsel %vm3528_vm1, %v3445_v14, %v12908_v36  ;;  %vm3461_vm15 = vcmp.eq.f32.partialorder %v7540_v15, %v3445_v14 }
 0xa38   : > { %12909 = vst [vmem:[#allocation11_spill] sm:$0xff] %v10125_v50  ;;  %v10129_v39 = vsel %vm3461_vm15, 1e+30, %v9800_v25 }
 0xa39   : > { %3603 = vmin.xlane.f32.xlu0 %v10129_v39 }
 0xa68   : > { %v3365_v8 = vpop.xlane.xlu1 %3364 }
 0xa6c   : > { %v3429_v49 = vpop.xlane.xlu1 %3428 }
 0xa6d   : > { %v3446_v51 = vmin.f32 %v3365_v8, %v3429_v49 }
 0xa6f   : > { %v10135_v35 = vsel %vm3528_vm1, %v3446_v51, %v12910_v63  ;;  %vm3462_vm0 = vcmp.eq.f32.partialorder %v7540_v15, %v3446_v51 }
 0xa70   : > { %12911 = vst [vmem:[#allocation10_spill] sm:$0xff] %v10135_v35  ;;  %v3367_v29 = vpop.xlane.xlu0 %3366  ;;  %v10139_v55 = vsel %vm3462_vm0, 1e+30, %v9810_v56  ;;  %v3610_v56 = vpop.xlane.xlu1 %3609 }
 0xa71   : > { %3605 = vmin.xlane.f32.xlu1 %v10139_v55 }
 0xa74   : > { %v3431_v25 = vpop.xlane.xlu0 %3430  ;;  %v3614_v0 = vpop.xlane.xlu1 %3613 }
 0xa75   : > { %v3447_v16 = vmin.f32 %v3367_v29, %v3431_v25  ;;  %3637 = vmin.xlane.f32.xlu1 %v12763_v46 }
 0xa77   : > { %v10146_v45 = vsel %vm3528_vm1, %v3447_v16, %v12912_v47  ;;  %vm3463_vm3 = vcmp.eq.f32.partialorder %v7540_v15, %v3447_v16  ;;  %vm3881_vm1 = vcmp.eq.s32.totalorder %v7332_v18, 8 }
 0xa78   : > { %12913 = vst [vmem:[#allocation12_spill] sm:$0xff] %v10146_v45  ;;  %v10150_v40 = vsel %vm3463_vm3, 1e+30, %v9821_v20  ;;  %v3612_v14 = vpop.xlane.xlu0 %3611  ;;  %v3618_v20 = vpop.xlane.xlu1 %3617 }
 0xa79   : > { %3607 = vmin.xlane.f32.xlu0 %v10150_v40  ;;  %3753 = vmin.xlane.f32.xlu1 %v12762_v57 }
 0xa7c   : > { %v3616_v36 = vpop.xlane.xlu0 %3615  ;;  %v3622_v8 = vpop.xlane.xlu1 %3621 }
 0xa7d   : > { %3639 = vmin.xlane.f32.xlu0 %v12763_v46  ;;  %3757 = vmin.xlane.f32.xlu1 %v12762_v57 }
 0xa80   : > { %v3620_v49 = vpop.xlane.xlu0 %3619  ;;  %v3626_v51 = vpop.xlane.xlu1 %3625 }
 0xa81   : > { %3761 = vmin.xlane.f32.xlu1 %v12762_v57  ;;  %3755 = vmin.xlane.f32.xlu0 %v12762_v57 }
 0xa84   : > { %v3624_v63 = vpop.xlane.xlu0 %3623  ;;  %v3630_v29 = vpop.xlane.xlu1 %3629 }
 0xa85   : > { %3765 = vmin.xlane.f32.xlu1 %v12762_v57  ;;  %3759 = vmin.xlane.f32.xlu0 %v12762_v57 }
 0xa88   : > { %v10168_v25 = vpop.xlane.xlu0 %3627  ;;  %v10170_v16 = vpop.xlane.xlu1 %3633 }
 0xa89   : > { %3769 = vmin.xlane.f32.xlu1 %v12762_v57  ;;  %3763 = vmin.xlane.f32.xlu0 %v12762_v57 }
 0xa8c   : > { %v10172_v47 = vpop.xlane.xlu0 %3631 }
 0xa8d   : > { %3773 = vmin.xlane.f32.xlu1 %v12762_v57  ;;  %3767 = vmin.xlane.f32.xlu0 %v12762_v57 }
 0xa90   : > { %v10175_v50 = vpop.xlane.xlu0 %3635 }
 0xa91   : > { %3777 = vmin.xlane.f32.xlu1 %v12762_v57  ;;  %3771 = vmin.xlane.f32.xlu0 %v12762_v57 }
 0xa95   : > { %3775 = vmin.xlane.f32.xlu0 %v12762_v57 }
 0xa99   : > { %3779 = vmin.xlane.f32.xlu0 %v12762_v57 }
 0xaa6   : > { %v3578_v45 = vpop.xlane.xlu1 %3577 }
 0xaa7   : > { %v3641_v35 = vmin.f32 %v3578_v45, %v3610_v56 }
 0xaa9   : > { %v10180_v60 = vsel %vm3881_vm1, %v3641_v35, %v12914_v59  ;;  %vm3657_vm4 = vcmp.eq.f32.partialorder %v9995_v2, %v3641_v35 }
 0xaaa   : > { %12915 = vst [vmem:[#allocation13_spill] sm:$0xff] %v10180_v60  ;;  %v3582_v10 = vpop.xlane.xlu1 %3581  ;;  %v3673_v27 = vsel %vm3657_vm4, %v7540_v15, 1e+09 }
 0xaab   : > { %v3643_v41 = vmin.f32 %v3582_v10, %v3614_v0  ;;  %3689 = vmin.xlane.f32.xlu1 %v3673_v27 }
 0xaad   : > { %v10187_v1 = vsel %vm3881_vm1, %v3643_v41, %v9858_v32  ;;  %vm3659_vm5 = vcmp.eq.f32.partialorder %v10005_v26, %v3643_v41 }
 0xaae   : > { %v3586_v45 = vpop.xlane.xlu1 %3585  ;;  %v3580_v56 = vpop.xlane.xlu0 %3579  ;;  %v3675_v23 = vsel %vm3659_vm5, %v7540_v15, 1e+09 }
 0xaaf   : > { %v3645_v59 = vmin.f32 %v3586_v45, %v3618_v20  ;;  %v3642_v60 = vmin.f32 %v3580_v56, %v3612_v14  ;;  %3693 = vmin.xlane.f32.xlu1 %v3675_v23 }
 0xab1   : > { %v10194_v35 = vsel %vm3881_vm1, %v3645_v59, %v9865_v3  ;;  %v10199_v27 = vsel %vm3881_vm1, %v3642_v60, %v9870_v12  ;;  %vm3661_vm6 = vcmp.eq.f32.partialorder %v10021_v52, %v3645_v59  ;;  %vm3658_vm2 = vcmp.eq.f32.partialorder %v10024_v7, %v3642_v60 }
 0xab2   : > { %v3590_v32 = vpop.xlane.xlu1 %3589  ;;  %v3584_v41 = vpop.xlane.xlu0 %3583  ;;  %v3677_v10 = vsel %vm3661_vm6, %v7540_v15, 1e+09  ;;  %v3674_v23 = vsel %vm3658_vm2, %v7540_v15, 1e+09 }
 0xab3   : > { %v3647_v0 = vmin.f32 %v3590_v32, %v3622_v8  ;;  %v3644_v14 = vmin.f32 %v3584_v41, %v3616_v36  ;;  %3697 = vmin.xlane.f32.xlu1 %v3677_v10  ;;  %3691 = vmin.xlane.f32.xlu0 %v3674_v23 }
 0xab5   : > { %v10208_v3 = vsel %vm3881_vm1, %v3647_v0, %v9879_v62  ;;  %v10213_v12 = vsel %vm3881_vm1, %v3644_v14, %v9884_v24  ;;  %vm3663_vm7 = vcmp.eq.f32.partialorder %v10041_v44, %v3647_v0  ;;  %vm3660_vm8 = vcmp.eq.f32.partialorder %v10044_v13, %v3644_v14 }
 0xab6   : > { %v3594_v60 = vpop.xlane.xlu1 %3593  ;;  %v3588_v20 = vpop.xlane.xlu0 %3587  ;;  %v3679_v36 = vsel %vm3663_vm7, %v7540_v15, 1e+09  ;;  %v3676_v8 = vsel %vm3660_vm8, %v7540_v15, 1e+09 }
 0xab7   : > { %v3649_v45 = vmin.f32 %v3594_v60, %v3626_v51  ;;  %v3646_v56 = vmin.f32 %v3588_v20, %v3620_v49  ;;  %3701 = vmin.xlane.f32.xlu1 %v3679_v36  ;;  %3695 = vmin.xlane.f32.xlu0 %v3676_v8 }
 0xab9   : > { %v10222_v62 = vsel %vm3881_vm1, %v3649_v45, %v9893_v53  ;;  %v10227_v24 = vsel %vm3881_vm1, %v3646_v56, %v9898_v28  ;;  %vm3665_vm9 = vcmp.eq.f32.partialorder %v10061_v54, %v3649_v45  ;;  %vm3662_vm10 = vcmp.eq.f32.partialorder %v10064_v48, %v3646_v56 }
 0xaba   : > { %v3598_v59 = vpop.xlane.xlu1 %3597  ;;  %v3592_v32 = vpop.xlane.xlu0 %3591  ;;  %v3681_v49 = vsel %vm3665_vm9, %v7540_v15, 1e+09  ;;  %v3678_v51 = vsel %vm3662_vm10, %v7540_v15, 1e+09 }
 0xabb   : > { %v3651_v41 = vmin.f32 %v3598_v59, %v3630_v29  ;;  %v3648_v10 = vmin.f32 %v3592_v32, %v3624_v63  ;;  %3705 = vmin.xlane.f32.xlu1 %v3681_v49  ;;  %3699 = vmin.xlane.f32.xlu0 %v3678_v51 }
 0xabd   : > { %v10236_v53 = vsel %vm3881_vm1, %v3651_v41, %v9907_v9  ;;  %v10241_v28 = vsel %vm3881_vm1, %v3648_v10, %v9912_v31  ;;  %vm3667_vm11 = vcmp.eq.f32.partialorder %v10081_v30, %v3651_v41  ;;  %vm3664_vm12 = vcmp.eq.f32.partialorder %v10084_v33, %v3648_v10 }
 0xabe   : > { %v3602_v23 = vpop.xlane.xlu1 %3601  ;;  %v3596_v0 = vpop.xlane.xlu0 %3595  ;;  %v3683_v63 = vsel %vm3667_vm11, %v7540_v15, 1e+09  ;;  %v3680_v29 = vsel %vm3664_vm12, %v7540_v15, 1e+09 }
 0xabf   : > { %v3653_v14 = vmin.f32 %v3602_v23, %v10170_v16  ;;  %v3650_v9 = vmin.f32 %v3596_v0, %v10168_v25  ;;  %3709 = vmin.xlane.f32.xlu1 %v3683_v63  ;;  %3703 = vmin.xlane.f32.xlu0 %v3680_v29 }
 0xac1   : > { %v10252_v31 = vsel %vm3881_vm1, %v3653_v14, %v9923_v5  ;;  %v10257_v60 = vsel %vm3881_vm1, %v3650_v9, %v9928_v61  ;;  %vm3669_vm13 = vcmp.eq.f32.partialorder %v10103_v34, %v3653_v14  ;;  %vm3666_vm14 = vcmp.eq.f32.partialorder %v10106_v42, %v3650_v9 }
 0xac2   : > { %v3600_v20 = vpop.xlane.xlu0 %3599  ;;  %v3685_v16 = vsel %vm3669_vm13, %v7540_v15, 1e+09  ;;  %v3682_v25 = vsel %vm3666_vm14, %v7540_v15, 1e+09 }
 0xac3   : > { %v3652_v36 = vmin.f32 %v3600_v20, %v10172_v47  ;;  %3713 = vmin.xlane.f32.xlu1 %v3685_v16  ;;  %3707 = vmin.xlane.f32.xlu0 %v3682_v25 }
 0xac5   : > { %v10267_v5 = vsel %vm3881_vm1, %v3652_v36, %v9938_v4  ;;  %vm3668_vm15 = vcmp.eq.f32.partialorder %v10118_v17, %v3652_v36 }
 0xac6   : > { %v3604_v61 = vpop.xlane.xlu0 %3603  ;;  %v3684_v8 = vsel %vm3668_vm15, %v7540_v15, 1e+09 }
 0xac7   : > { %v3654_v45 = vmin.f32 %v3604_v61, %v10175_v50  ;;  %3711 = vmin.xlane.f32.xlu0 %v3684_v8 }
 0xac9   : > { %v10275_v56 = vsel %vm3881_vm1, %v3654_v45, %v9946_v38  ;;  %vm3670_vm0 = vcmp.eq.f32.partialorder %v10129_v39, %v3654_v45 }
 0xaca   : > { %v3686_v47 = vsel %vm3670_vm0, %v7540_v15, 1e+09 }
 0xacb   : > { %3715 = vmin.xlane.f32.xlu0 %v3686_v47 }
 0xafe   : > { %v3606_v4 = vpop.xlane.xlu1 %3605 }
 0xb02   : > { %v3638_v59 = vpop.xlane.xlu1 %3637 }
 0xb03   : > { %v3655_v32 = vmin.f32 %v3606_v4, %v3638_v59 }
 0xb05   : > { %v10282_v49 = vsel %vm3881_vm1, %v3655_v32, %v9953_v19  ;;  %vm3671_vm3 = vcmp.eq.f32.partialorder %v10139_v55, %v3655_v32 }
 0xb06   : > { %v3608_v50 = vpop.xlane.xlu0 %3607  ;;  %v3687_v51 = vsel %vm3671_vm3, %v7540_v15, 1e+09  ;;  %v3754_v23 = vpop.xlane.xlu1 %3753 }
 0xb07   : > { %3717 = vmin.xlane.f32.xlu1 %v3687_v51 }
 0xb0a   : > { %v3640_v38 = vpop.xlane.xlu0 %3639  ;;  %v3758_v0 = vpop.xlane.xlu1 %3757 }
 0xb0b   : > { %v3656_v41 = vmin.f32 %v3608_v50, %v3640_v38  ;;  %3781 = vmin.xlane.f32.xlu1 %v12762_v57 }
 0xb0d   : > { %v10290_v10 = vsel %vm3881_vm1, %v3656_v41, %v9961_v43  ;;  %vm3672_vm4 = vcmp.eq.f32.partialorder %v10150_v40, %v3656_v41 }
 0xb0e   : > { %v3688_v19 = vsel %vm3672_vm4, %v7540_v15, 1e+09  ;;  %v3756_v63 = vpop.xlane.xlu0 %3755  ;;  %v3762_v43 = vpop.xlane.xlu1 %3761 }
 0xb0f   : > { %3719 = vmin.xlane.f32.xlu0 %v3688_v19  ;;  %3962 = vmin.xlane.f32.xlu1 %v12763_v46 }
 0xb12   : > { %v3760_v29 = vpop.xlane.xlu0 %3759  ;;  %v3766_v14 = vpop.xlane.xlu1 %3765 }
 0xb13   : > { %3783 = vmin.xlane.f32.xlu0 %v12762_v57  ;;  %3966 = vmin.xlane.f32.xlu1 %v12763_v46 }
 0xb16   : > { %v3764_v9 = vpop.xlane.xlu0 %3763  ;;  %v3770_v20 = vpop.xlane.xlu1 %3769 }
 0xb17   : > { %3970 = vmin.xlane.f32.xlu1 %v12763_v46  ;;  %3964 = vmin.xlane.f32.xlu0 %v12763_v46 }
 0xb1a   : > { %v3768_v16 = vpop.xlane.xlu0 %3767  ;;  %v3774_v25 = vpop.xlane.xlu1 %3773 }
 0xb1b   : > { %3974 = vmin.xlane.f32.xlu1 %v12763_v46  ;;  %3968 = vmin.xlane.f32.xlu0 %v12763_v46 }
 0xb1e   : > { %v10308_v36 = vpop.xlane.xlu0 %3771  ;;  %v10311_v61 = vpop.xlane.xlu1 %3777 }
 0xb1f   : > { %3978 = vmin.xlane.f32.xlu1 %v12763_v46  ;;  %3972 = vmin.xlane.f32.xlu0 %v12763_v46 }
 0xb22   : > { %v10313_v8 = vpop.xlane.xlu0 %3775 }
 0xb23   : > { %3982 = vmin.xlane.f32.xlu1 %v12763_v46  ;;  %3976 = vmin.xlane.f32.xlu0 %v12763_v46 }
 0xb26   : > { %v10315_v4 = vpop.xlane.xlu0 %3779 }
 0xb27   : > { %3986 = vmin.xlane.f32.xlu1 %v12763_v46  ;;  %3980 = vmin.xlane.f32.xlu0 %v12763_v46 }
 0xb2b   : > { %3984 = vmin.xlane.f32.xlu0 %v12763_v46 }
 0xb2f   : > { %3988 = vmin.xlane.f32.xlu0 %v12763_v46 }
 0xb38   : > { %v3690_v45 = vpop.xlane.xlu1 %3689 }
 0xb39   : > { %v3785_v47 = vmin.f32 %v3690_v45, %v3754_v23 }
 0xb3b   : > { %v10320_v59 = vsel %vm3881_vm1, %v3785_v47, %v9991_v21  ;;  %vm3801_vm5 = vcmp.eq.f32.partialorder %v7540_v15, %v3785_v47 }
 0xb3c   : > { %v3694_v32 = vpop.xlane.xlu1 %3693  ;;  %v10324_v50 = vsel %vm3801_vm5, 1e+30, %v9995_v2 }
 0xb3d   : > { %v3787_v51 = vmin.f32 %v3694_v32, %v3758_v0  ;;  %3930 = vmin.xlane.f32.xlu1 %v10324_v50 }
 0xb3f   : > { %v10330_v38 = vsel %vm3881_vm1, %v3787_v51, %v10001_v22  ;;  %vm3803_vm6 = vcmp.eq.f32.partialorder %v7540_v15, %v3787_v51 }
 0xb40   : > { %v3698_v41 = vpop.xlane.xlu1 %3697  ;;  %v3692_v19 = vpop.xlane.xlu0 %3691  ;;  %v10334_v21 = vsel %vm3803_vm6, 1e+30, %v10005_v26 }
 0xb41   : > { %v3789_v23 = vmin.f32 %v3698_v41, %v3762_v43  ;;  %v3786_v45 = vmin.f32 %v3692_v19, %v3756_v63  ;;  %3934 = vmin.xlane.f32.xlu1 %v10334_v21  ;;  %v12918_v19 = vld [vmem:[#allocation15_spill] sm:$0xff] }
 0xb43   : > { %v10340_v2 = vsel %vm3881_vm1, %v3789_v23, %v10011_v37  ;;  %v10345_v22 = vsel %vm3881_vm1, %v3786_v45, %v10016_v58  ;;  %vm3805_vm2 = vcmp.eq.f32.partialorder %v7540_v15, %v3789_v23  ;;  %vm3802_vm7 = vcmp.eq.f32.partialorder %v7540_v15, %v3786_v45 }
 0xb44   : > { %v3702_v26 = vpop.xlane.xlu1 %3701  ;;  %v3696_v0 = vpop.xlane.xlu0 %3695  ;;  %v10350_v63 = vsel %vm3805_vm2, 1e+30, %v10021_v52  ;;  %v10353_v43 = vsel %vm3802_vm7, 1e+30, %v10024_v7 }
 0xb45   : > { %v3791_v47 = vmin.f32 %v3702_v26, %v3766_v14  ;;  %v3788_v37 = vmin.f32 %v3696_v0, %v3760_v29  ;;  %3938 = vmin.xlane.f32.xlu1 %v10350_v63  ;;  %3932 = vmin.xlane.f32.xlu0 %v10353_v43  ;;  %v12920_v0 = vld [vmem:[#allocation5_spill] sm:$0xff] }
 0xb47   : > { %v10360_v58 = vsel %vm3881_vm1, %v3791_v47, %v10031_v11  ;;  %v10365_v32 = vsel %vm3881_vm1, %v3788_v37, %v10036_v6  ;;  %vm3807_vm8 = vcmp.eq.f32.partialorder %v7540_v15, %v3791_v47  ;;  %vm3804_vm9 = vcmp.eq.f32.partialorder %v7540_v15, %v3788_v37  ;;  %v12916_v6 = vld [vmem:[#allocation14_spill] sm:$0xff] }
 0xb48   : > { %v3706_v52 = vpop.xlane.xlu1 %3705  ;;  %v3700_v7 = vpop.xlane.xlu0 %3699  ;;  %v10370_v29 = vsel %vm3807_vm8, 1e+30, %v10041_v44  ;;  %v10373_v14 = vsel %vm3804_vm9, 1e+30, %v10044_v13  ;;  %v12922_v37 = vld [vmem:[#allocation6_spill] sm:$0xff] }
 0xb49   : > { %v3793_v51 = vmin.f32 %v3706_v52, %v3770_v20  ;;  %v3790_v11 = vmin.f32 %v3700_v7, %v3764_v9  ;;  %3942 = vmin.xlane.f32.xlu1 %v10370_v29  ;;  %3936 = vmin.xlane.f32.xlu0 %v10373_v14 }
 0xb4b   : > { %v10380_v41 = vsel %vm3881_vm1, %v3793_v51, %v12916_v6  ;;  %v10385_v23 = vsel %vm3881_vm1, %v3790_v11, %v12918_v19  ;;  %vm3809_vm10 = vcmp.eq.f32.partialorder %v7540_v15, %v3793_v51  ;;  %vm3806_vm11 = vcmp.eq.f32.partialorder %v7540_v15, %v3790_v11  ;;  %v12924_v11 = vld [vmem:[#allocation7_spill] sm:$0xff]  ;;  %v12926_v19 = vld [vmem:[#allocation8_spill] sm:$0xff] }
 0xb4c   : > { %12917 = vst [vmem:[#allocation14_spill] sm:$0xff] %v10380_v41  ;;  %12919 = vst [vmem:[#allocation15_spill] sm:$0xff] %v10385_v23  ;;  %v3710_v44 = vpop.xlane.xlu1 %3709  ;;  %v3704_v13 = vpop.xlane.xlu0 %3703  ;;  %v10390_v9 = vsel %vm3809_vm10, 1e+30, %v10061_v54  ;;  %v10393_v20 = vsel %vm3806_vm11, 1e+30, %v10064_v48 }
 0xb4d   : > { %v3795_v45 = vmin.f32 %v3710_v44, %v3774_v25  ;;  %v3792_v26 = vmin.f32 %v3704_v13, %v3768_v16  ;;  %3946 = vmin.xlane.f32.xlu1 %v10390_v9  ;;  %3940 = vmin.xlane.f32.xlu0 %v10393_v20  ;;  %v12928_v13 = vld [vmem:[#allocation9_spill] sm:$0xff] }
 0xb4f   : > { %v10400_v47 = vsel %vm3881_vm1, %v3795_v45, %v12920_v0  ;;  %v10405_v52 = vsel %vm3881_vm1, %v3792_v26, %v12922_v37  ;;  %vm3811_vm12 = vcmp.eq.f32.partialorder %v7540_v15, %v3795_v45  ;;  %vm3808_vm13 = vcmp.eq.f32.partialorder %v7540_v15, %v3792_v26 }
 0xb50   : > { %12921 = vst [vmem:[#allocation5_spill] sm:$0xff] %v10400_v47  ;;  %12923 = vst [vmem:[#allocation6_spill] sm:$0xff] %v10405_v52  ;;  %v3714_v54 = vpop.xlane.xlu1 %3713  ;;  %v3708_v48 = vpop.xlane.xlu0 %3707  ;;  %v10410_v16 = vsel %vm3811_vm12, 1e+30, %v10081_v30  ;;  %v10413_v25 = vsel %vm3808_vm13, 1e+30, %v10084_v33 }
 0xb51   : > { %v3797_v7 = vmin.f32 %v3714_v54, %v10311_v61  ;;  %v3794_v51 = vmin.f32 %v3708_v48, %v10308_v36  ;;  %3950 = vmin.xlane.f32.xlu1 %v10410_v16  ;;  %3944 = vmin.xlane.f32.xlu0 %v10413_v25 }
 0xb53   : > { %v10422_v6 = vsel %vm3881_vm1, %v3797_v7, %v12924_v11  ;;  %v10427_v30 = vsel %vm3881_vm1, %v3794_v51, %v12926_v19  ;;  %vm3813_vm14 = vcmp.eq.f32.partialorder %v7540_v15, %v3797_v7  ;;  %vm3810_vm15 = vcmp.eq.f32.partialorder %v7540_v15, %v3794_v51  ;;  %v12932_v7 = vld [vmem:[#allocation10_spill] sm:$0xff] }
 0xb54   : > { %12925 = vst [vmem:[#allocation7_spill] sm:$0xff] %v10422_v6  ;;  %12927 = vst [vmem:[#allocation8_spill] sm:$0xff] %v10427_v30  ;;  %v3712_v33 = vpop.xlane.xlu0 %3711  ;;  %v10432_v36 = vsel %vm3813_vm14, 1e+30, %v10103_v34  ;;  %v10435_v61 = vsel %vm3810_vm15, 1e+30, %v10106_v42 }
 0xb55   : > { %v3796_v44 = vmin.f32 %v3712_v33, %v10313_v8  ;;  %3954 = vmin.xlane.f32.xlu1 %v10432_v36  ;;  %3948 = vmin.xlane.f32.xlu0 %v10435_v61  ;;  %v12930_v8 = vld [vmem:[#allocation11_spill] sm:$0xff] }
 0xb57   : > { %v10443_v45 = vsel %vm3881_vm1, %v3796_v44, %v12928_v13  ;;  %vm3812_vm0 = vcmp.eq.f32.partialorder %v7540_v15, %v3796_v44  ;;  %v12934_v44 = vld [vmem:[#allocation12_spill] sm:$0xff] }
 0xb58   : > { %12929 = vst [vmem:[#allocation9_spill] sm:$0xff] %v10443_v45  ;;  %v3716_v26 = vpop.xlane.xlu0 %3715  ;;  %v10447_v34 = vsel %vm3812_vm0, 1e+30, %v10118_v17  ;;  %v12936_v45 = vld [vmem:[#allocation13_spill] sm:$0xff] }
 0xb59   : > { %v3798_v42 = vmin.f32 %v3716_v26, %v10315_v4  ;;  %3952 = vmin.xlane.f32.xlu0 %v10447_v34 }
 0xb5b   : > { %v10454_v0 = vsel %vm3881_vm1, %v3798_v42, %v12930_v8  ;;  %vm3814_vm3 = vcmp.eq.f32.partialorder %v7540_v15, %v3798_v42 }
 0xb5c   : > { %12931 = vst [vmem:[#allocation11_spill] sm:$0xff] %v10454_v0  ;;  %v10458_v37 = vsel %vm3814_vm3, 1e+30, %v10129_v39 }
 0xb5d   : > { %3956 = vmin.xlane.f32.xlu0 %v10458_v37 }
 0xb94   : > { %v3718_v54 = vpop.xlane.xlu1 %3717 }
 0xb98   : > { %v3782_v48 = vpop.xlane.xlu1 %3781 }
 0xb99   : > { %v3799_v17 = vmin.f32 %v3718_v54, %v3782_v48 }
 0xb9b   : > { %v10464_v4 = vsel %vm3881_vm1, %v3799_v17, %v12932_v7  ;;  %vm3815_vm4 = vcmp.eq.f32.partialorder %v7540_v15, %v3799_v17 }
 0xb9c   : > { %12933 = vst [vmem:[#allocation10_spill] sm:$0xff] %v10464_v4  ;;  %v3720_v51 = vpop.xlane.xlu0 %3719  ;;  %v10468_v11 = vsel %vm3815_vm4, 1e+30, %v10139_v55  ;;  %v3963_v19 = vpop.xlane.xlu1 %3962 }
 0xb9d   : > { %3958 = vmin.xlane.f32.xlu1 %v10468_v11 }
 0xba0   : > { %v3784_v39 = vpop.xlane.xlu0 %3783  ;;  %v3967_v55 = vpop.xlane.xlu1 %3966 }
 0xba1   : > { %v3800_v33 = vmin.f32 %v3720_v51, %v3784_v39  ;;  %3990 = vmin.xlane.f32.xlu1 %v12763_v46 }
 0xba3   : > { %v10475_v13 = vsel %vm3881_vm1, %v3800_v33, %v12934_v44  ;;  %vm3816_vm5 = vcmp.eq.f32.partialorder %v7540_v15, %v3800_v33  ;;  %vm4234_vm1 = vcmp.eq.s32.totalorder %v7332_v18, 9 }
 0xba4   : > { %12935 = vst [vmem:[#allocation12_spill] sm:$0xff] %v10475_v13  ;;  %v10479_v26 = vsel %vm3816_vm5, 1e+30, %v10150_v40  ;;  %v3965_v42 = vpop.xlane.xlu0 %3964  ;;  %v3971_v8 = vpop.xlane.xlu1 %3970 }
 0xba5   : > { %3960 = vmin.xlane.f32.xlu0 %v10479_v26  ;;  %4106 = vmin.xlane.f32.xlu1 %v12762_v57 }
 0xba8   : > { %v3969_v54 = vpop.xlane.xlu0 %3968  ;;  %v3975_v40 = vpop.xlane.xlu1 %3974 }
 0xba9   : > { %3992 = vmin.xlane.f32.xlu0 %v12763_v46  ;;  %4110 = vmin.xlane.f32.xlu1 %v12762_v57 }
 0xbac   : > { %v3973_v48 = vpop.xlane.xlu0 %3972  ;;  %v3979_v17 = vpop.xlane.xlu1 %3978 }
 0xbad   : > { %4114 = vmin.xlane.f32.xlu1 %v12762_v57  ;;  %4108 = vmin.xlane.f32.xlu0 %v12762_v57 }
 0xbb0   : > { %v3977_v7 = vpop.xlane.xlu0 %3976  ;;  %v3983_v51 = vpop.xlane.xlu1 %3982 }
 0xbb1   : > { %4118 = vmin.xlane.f32.xlu1 %v12762_v57  ;;  %4112 = vmin.xlane.f32.xlu0 %v12762_v57 }
 0xbb4   : > { %v10495_v39 = vpop.xlane.xlu0 %3980  ;;  %v10498_v33 = vpop.xlane.xlu1 %3986 }
 0xbb5   : > { %4122 = vmin.xlane.f32.xlu1 %v12762_v57  ;;  %4116 = vmin.xlane.f32.xlu0 %v12762_v57 }
 0xbb8   : > { %v10501_v44 = vpop.xlane.xlu0 %3984 }
 0xbb9   : > { %4126 = vmin.xlane.f32.xlu1 %v12762_v57  ;;  %4120 = vmin.xlane.f32.xlu0 %v12762_v57 }
 0xbbc   : > { %v10504_v0 = vpop.xlane.xlu0 %3988 }
 0xbbd   : > { %4130 = vmin.xlane.f32.xlu1 %v12762_v57  ;;  %4124 = vmin.xlane.f32.xlu0 %v12762_v57 }
 0xbc1   : > { %4128 = vmin.xlane.f32.xlu0 %v12762_v57 }
 0xbc5   : > { %4132 = vmin.xlane.f32.xlu0 %v12762_v57 }
 0xbca   : > { %v3931_v13 = vpop.xlane.xlu1 %3930 }
 0xbcb   : > { %v3994_v4 = vmin.f32 %v3931_v13, %v3963_v19 }
 0xbcd   : > { %v10509_v30 = vsel %vm4234_vm1, %v3994_v4, %v12936_v45  ;;  %vm4010_vm6 = vcmp.eq.f32.partialorder %v10324_v50, %v3994_v4 }
 0xbce   : > { %12937 = vst [vmem:[#allocation13_spill] sm:$0xff] %v10509_v30  ;;  %v3935_v6 = vpop.xlane.xlu1 %3934  ;;  %v4026_v52 = vsel %vm4010_vm6, %v7540_v15, 1e+09 }
 0xbcf   : > { %v3996_v47 = vmin.f32 %v3935_v6, %v3967_v55  ;;  %4042 = vmin.xlane.f32.xlu1 %v4026_v52 }
 0xbd1   : > { %v10516_v23 = vsel %vm4234_vm1, %v3996_v47, %v10187_v1  ;;  %vm4012_vm2 = vcmp.eq.f32.partialorder %v10334_v21, %v3996_v47 }
 0xbd2   : > { %v3939_v19 = vpop.xlane.xlu1 %3938  ;;  %v3933_v13 = vpop.xlane.xlu0 %3932  ;;  %v4028_v41 = vsel %vm4012_vm2, %v7540_v15, 1e+09 }
 0xbd3   : > { %v3998_v45 = vmin.f32 %v3939_v19, %v3971_v8  ;;  %v3995_v30 = vmin.f32 %v3933_v13, %v3965_v42  ;;  %4046 = vmin.xlane.f32.xlu1 %v4028_v41 }
 0xbd5   : > { %v10523_v4 = vsel %vm4234_vm1, %v3998_v45, %v10194_v35  ;;  %v10528_v52 = vsel %vm4234_vm1, %v3995_v30, %v10199_v27  ;;  %vm4014_vm7 = vcmp.eq.f32.partialorder %v10350_v63, %v3998_v45  ;;  %vm4011_vm8 = vcmp.eq.f32.partialorder %v10353_v43, %v3995_v30 }
 0xbd6   : > { %v3943_v1 = vpop.xlane.xlu1 %3942  ;;  %v3937_v47 = vpop.xlane.xlu0 %3936  ;;  %v4030_v6 = vsel %vm4014_vm7, %v7540_v15, 1e+09  ;;  %v4027_v41 = vsel %vm4011_vm8, %v7540_v15, 1e+09 }
 0xbd7   : > { %v4000_v55 = vmin.f32 %v3943_v1, %v3975_v40  ;;  %v3997_v42 = vmin.f32 %v3937_v47, %v3969_v54  ;;  %4050 = vmin.xlane.f32.xlu1 %v4030_v6  ;;  %4044 = vmin.xlane.f32.xlu0 %v4027_v41 }
 0xbd9   : > { %v10537_v35 = vsel %vm4234_vm1, %v4000_v55, %v10208_v3  ;;  %v10542_v27 = vsel %vm4234_vm1, %v3997_v42, %v10213_v12  ;;  %vm4016_vm9 = vcmp.eq.f32.partialorder %v10370_v29, %v4000_v55  ;;  %vm4013_vm10 = vcmp.eq.f32.partialorder %v10373_v14, %v3997_v42 }
 0xbda   : > { %v3947_v30 = vpop.xlane.xlu1 %3946  ;;  %v3941_v8 = vpop.xlane.xlu0 %3940  ;;  %v4032_v54 = vsel %vm4016_vm9, %v7540_v15, 1e+09  ;;  %v4029_v40 = vsel %vm4013_vm10, %v7540_v15, 1e+09 }
 0xbdb   : > { %v4002_v19 = vmin.f32 %v3947_v30, %v3979_v17  ;;  %v3999_v13 = vmin.f32 %v3941_v8, %v3973_v48  ;;  %4054 = vmin.xlane.f32.xlu1 %v4032_v54  ;;  %4048 = vmin.xlane.f32.xlu0 %v4029_v40 }
 0xbdd   : > { %v10551_v3 = vsel %vm4234_vm1, %v4002_v19, %v10222_v62  ;;  %v10556_v12 = vsel %vm4234_vm1, %v3999_v13, %v10227_v24  ;;  %vm4018_vm11 = vcmp.eq.f32.partialorder %v10390_v9, %v4002_v19  ;;  %vm4015_vm12 = vcmp.eq.f32.partialorder %v10393_v20, %v3999_v13 }
 0xbde   : > { %v3951_v45 = vpop.xlane.xlu1 %3950  ;;  %v3945_v1 = vpop.xlane.xlu0 %3944  ;;  %v4034_v48 = vsel %vm4018_vm11, %v7540_v15, 1e+09  ;;  %v4031_v17 = vsel %vm4015_vm12, %v7540_v15, 1e+09 }
 0xbdf   : > { %v4004_v47 = vmin.f32 %v3951_v45, %v3983_v51  ;;  %v4001_v6 = vmin.f32 %v3945_v1, %v3977_v7  ;;  %4058 = vmin.xlane.f32.xlu1 %v4034_v48  ;;  %4052 = vmin.xlane.f32.xlu0 %v4031_v17 }
 0xbe1   : > { %v10565_v62 = vsel %vm4234_vm1, %v4004_v47, %v10236_v53  ;;  %v10570_v24 = vsel %vm4234_vm1, %v4001_v6, %v10241_v28  ;;  %vm4020_vm13 = vcmp.eq.f32.partialorder %v10410_v16, %v4004_v47  ;;  %vm4017_vm14 = vcmp.eq.f32.partialorder %v10413_v25, %v4001_v6 }
 0xbe2   : > { %v3955_v41 = vpop.xlane.xlu1 %3954  ;;  %v3949_v55 = vpop.xlane.xlu0 %3948  ;;  %v4036_v7 = vsel %vm4020_vm13, %v7540_v15, 1e+09  ;;  %v4033_v51 = vsel %vm4017_vm14, %v7540_v15, 1e+09 }
 0xbe3   : > { %v4006_v42 = vmin.f32 %v3955_v41, %v10498_v33  ;;  %v4003_v53 = vmin.f32 %v3949_v55, %v10495_v39  ;;  %4062 = vmin.xlane.f32.xlu1 %v4036_v7  ;;  %4056 = vmin.xlane.f32.xlu0 %v4033_v51 }
 0xbe5   : > { %v10581_v28 = vsel %vm4234_vm1, %v4006_v42, %v10252_v31  ;;  %v10586_v30 = vsel %vm4234_vm1, %v4003_v53, %v10257_v60  ;;  %vm4022_vm15 = vcmp.eq.f32.partialorder %v10432_v36, %v4006_v42  ;;  %vm4019_vm0 = vcmp.eq.f32.partialorder %v10435_v61, %v4003_v53 }
 0xbe6   : > { %v3953_v8 = vpop.xlane.xlu0 %3952  ;;  %v4038_v33 = vsel %vm4022_vm15, %v7540_v15, 1e+09  ;;  %v4035_v39 = vsel %vm4019_vm0, %v7540_v15, 1e+09 }
 0xbe7   : > { %v4005_v54 = vmin.f32 %v3953_v8, %v10501_v44  ;;  %4066 = vmin.xlane.f32.xlu1 %v4038_v33  ;;  %4060 = vmin.xlane.f32.xlu0 %v4035_v39 }
 0xbe9   : > { %v10596_v31 = vsel %vm4234_vm1, %v4005_v54, %v10267_v5  ;;  %vm4021_vm3 = vcmp.eq.f32.partialorder %v10447_v34, %v4005_v54 }
 0xbea   : > { %v3957_v60 = vpop.xlane.xlu0 %3956  ;;  %v4037_v40 = vsel %vm4021_vm3, %v7540_v15, 1e+09 }
 0xbeb   : > { %v4007_v19 = vmin.f32 %v3957_v60, %v10504_v0  ;;  %4064 = vmin.xlane.f32.xlu0 %v4037_v40 }
 0xbed   : > { %v10604_v13 = vsel %vm4234_vm1, %v4007_v19, %v10275_v56  ;;  %vm4023_vm4 = vcmp.eq.f32.partialorder %v10458_v37, %v4007_v19 }
 0xbee   : > { %v4039_v44 = vsel %vm4023_vm4, %v7540_v15, 1e+09 }
 0xbef   : > { %4068 = vmin.xlane.f32.xlu0 %v4039_v44 }
 0xc2a   : > { %v3959_v5 = vpop.xlane.xlu1 %3958 }
 0xc2e   : > { %v3991_v45 = vpop.xlane.xlu1 %3990 }
 0xc2f   : > { %v4008_v1 = vmin.f32 %v3959_v5, %v3991_v45 }
 0xc31   : > { %v10611_v48 = vsel %vm4234_vm1, %v4008_v1, %v10282_v49  ;;  %vm4024_vm5 = vcmp.eq.f32.partialorder %v10468_v11, %v4008_v1 }
 0xc32   : > { %v3961_v0 = vpop.xlane.xlu0 %3960  ;;  %v4040_v17 = vsel %vm4024_vm5, %v7540_v15, 1e+09  ;;  %v4107_v56 = vpop.xlane.xlu1 %4106 }
 0xc33   : > { %4070 = vmin.xlane.f32.xlu1 %v4040_v17 }
 0xc36   : > { %v3993_v47 = vpop.xlane.xlu0 %3992  ;;  %v4111_v41 = vpop.xlane.xlu1 %4110 }
 0xc37   : > { %v4009_v6 = vmin.f32 %v3961_v0, %v3993_v47  ;;  %4134 = vmin.xlane.f32.xlu1 %v12762_v57 }
 0xc39   : > { %v10619_v55 = vsel %vm4234_vm1, %v4009_v6, %v10290_v10  ;;  %vm4025_vm6 = vcmp.eq.f32.partialorder %v10479_v26, %v4009_v6 }
 0xc3a   : > { %v4041_v49 = vsel %vm4025_vm6, %v7540_v15, 1e+09  ;;  %v4109_v7 = vpop.xlane.xlu0 %4108  ;;  %v4115_v51 = vpop.xlane.xlu1 %4114 }
 0xc3b   : > { %4072 = vmin.xlane.f32.xlu0 %v4041_v49  ;;  %4315 = vmin.xlane.f32.xlu1 %v12763_v46 }
 0xc3e   : > { %v4113_v42 = vpop.xlane.xlu0 %4112  ;;  %v4119_v10 = vpop.xlane.xlu1 %4118 }
 0xc3f   : > { %4136 = vmin.xlane.f32.xlu0 %v12762_v57  ;;  %4319 = vmin.xlane.f32.xlu1 %v12763_v46 }
 0xc42   : > { %v4117_v53 = vpop.xlane.xlu0 %4116  ;;  %v4123_v8 = vpop.xlane.xlu1 %4122 }
 0xc43   : > { %4323 = vmin.xlane.f32.xlu1 %v12763_v46  ;;  %4317 = vmin.xlane.f32.xlu0 %v12763_v46 }
 0xc46   : > { %v4121_v33 = vpop.xlane.xlu0 %4120  ;;  %v4127_v39 = vpop.xlane.xlu1 %4126 }
 0xc47   : > { %4327 = vmin.xlane.f32.xlu1 %v12763_v46  ;;  %4321 = vmin.xlane.f32.xlu0 %v12763_v46 }
 0xc4a   : > { %v10634_v54 = vpop.xlane.xlu0 %4124  ;;  %v10638_v60 = vpop.xlane.xlu1 %4130 }
 0xc4b   : > { %4331 = vmin.xlane.f32.xlu1 %v12763_v46  ;;  %4325 = vmin.xlane.f32.xlu0 %v12763_v46 }
 0xc4e   : > { %v10641_v40 = vpop.xlane.xlu0 %4128 }
 0xc4f   : > { %4335 = vmin.xlane.f32.xlu1 %v12763_v46  ;;  %4329 = vmin.xlane.f32.xlu0 %v12763_v46 }
 0xc52   : > { %v10644_v5 = vpop.xlane.xlu0 %4132 }
 0xc53   : > { %4339 = vmin.xlane.f32.xlu1 %v12763_v46  ;;  %4333 = vmin.xlane.f32.xlu0 %v12763_v46 }
 0xc57   : > { %4337 = vmin.xlane.f32.xlu0 %v12763_v46 }
 0xc5b   : > { %4341 = vmin.xlane.f32.xlu0 %v12763_v46 }
 0xc5c   : > { %v4043_v19 = vpop.xlane.xlu1 %4042 }
 0xc5d   : > { %v4138_v44 = vmin.f32 %v4043_v19, %v4107_v56 }
 0xc5f   : > { %v10649_v45 = vsel %vm4234_vm1, %v4138_v44, %v10320_v59  ;;  %vm4154_vm2 = vcmp.eq.f32.partialorder %v7540_v15, %v4138_v44 }
 0xc60   : > { %v4047_v1 = vpop.xlane.xlu1 %4046  ;;  %v10653_v0 = vsel %vm4154_vm2, 1e+30, %v10324_v50 }
 0xc61   : > { %v4140_v17 = vmin.f32 %v4047_v1, %v4111_v41  ;;  %4283 = vmin.xlane.f32.xlu1 %v10653_v0 }
 0xc63   : > { %v10659_v56 = vsel %vm4234_vm1, %v4140_v17, %v10330_v38  ;;  %vm4156_vm7 = vcmp.eq.f32.partialorder %v7540_v15, %v4140_v17 }
 0xc64   : > { %v4051_v47 = vpop.xlane.xlu1 %4050  ;;  %v4045_v6 = vpop.xlane.xlu0 %4044  ;;  %v10663_v59 = vsel %vm4156_vm7, 1e+30, %v10334_v21 }
 0xc65   : > { %v4142_v49 = vmin.f32 %v4051_v47, %v4115_v51  ;;  %v4139_v19 = vmin.f32 %v4045_v6, %v4109_v7  ;;  %4287 = vmin.xlane.f32.xlu1 %v10663_v59  ;;  %v12940_v6 = vld [vmem:[#allocation15_spill] sm:$0xff] }
 0xc67   : > { %v10669_v50 = vsel %vm4234_vm1, %v4142_v49, %v10340_v2  ;;  %v10674_v38 = vsel %vm4234_vm1, %v4139_v19, %v10345_v22  ;;  %vm4158_vm8 = vcmp.eq.f32.partialorder %v7540_v15, %v4142_v49  ;;  %vm4155_vm9 = vcmp.eq.f32.partialorder %v7540_v15, %v4139_v19 }
 0xc68   : > { %v4055_v21 = vpop.xlane.xlu1 %4054  ;;  %v4049_v41 = vpop.xlane.xlu0 %4048  ;;  %v10679_v7 = vsel %vm4158_vm8, 1e+30, %v10350_v63  ;;  %v10682_v51 = vsel %vm4155_vm9, 1e+30, %v10353_v43 }
 0xc69   : > { %v4144_v44 = vmin.f32 %v4055_v21, %v4119_v10  ;;  %v4141_v2 = vmin.f32 %v4049_v41, %v4113_v42  ;;  %4291 = vmin.xlane.f32.xlu1 %v10679_v7  ;;  %4285 = vmin.xlane.f32.xlu0 %v10682_v51  ;;  %v12942_v41 = vld [vmem:[#allocation5_spill] sm:$0xff] }
 0xc6b   : > { %v10689_v22 = vsel %vm4234_vm1, %v4144_v44, %v10360_v58  ;;  %v10694_v1 = vsel %vm4234_vm1, %v4141_v2, %v10365_v32  ;;  %vm4160_vm10 = vcmp.eq.f32.partialorder %v7540_v15, %v4144_v44  ;;  %vm4157_vm11 = vcmp.eq.f32.partialorder %v7540_v15, %v4141_v2  ;;  %v12938_v32 = vld [vmem:[#allocation14_spill] sm:$0xff] }
 0xc6c   : > { %v4059_v63 = vpop.xlane.xlu1 %4058  ;;  %v4053_v43 = vpop.xlane.xlu0 %4052  ;;  %v10699_v42 = vsel %vm4160_vm10, 1e+30, %v10370_v29  ;;  %v10702_v10 = vsel %vm4157_vm11, 1e+30, %v10373_v14  ;;  %v12944_v2 = vld [vmem:[#allocation6_spill] sm:$0xff] }
 0xc6d   : > { %v4146_v17 = vmin.f32 %v4059_v63, %v4123_v8  ;;  %v4143_v58 = vmin.f32 %v4053_v43, %v4117_v53  ;;  %4295 = vmin.xlane.f32.xlu1 %v10699_v42  ;;  %4289 = vmin.xlane.f32.xlu0 %v10702_v10 }
 0xc6f   : > { %v10709_v47 = vsel %vm4234_vm1, %v4146_v17, %v12938_v32  ;;  %v10714_v49 = vsel %vm4234_vm1, %v4143_v58, %v12940_v6  ;;  %vm4162_vm12 = vcmp.eq.f32.partialorder %v7540_v15, %v4146_v17  ;;  %vm4159_vm13 = vcmp.eq.f32.partialorder %v7540_v15, %v4143_v58  ;;  %v12946_v58 = vld [vmem:[#allocation7_spill] sm:$0xff]  ;;  %v12948_v6 = vld [vmem:[#allocation8_spill] sm:$0xff] }
 0xc70   : > { %12939 = vst [vmem:[#allocation14_spill] sm:$0xff] %v10709_v47  ;;  %12941 = vst [vmem:[#allocation15_spill] sm:$0xff] %v10714_v49  ;;  %v4063_v29 = vpop.xlane.xlu1 %4062  ;;  %v4057_v14 = vpop.xlane.xlu0 %4056  ;;  %v10719_v53 = vsel %vm4162_vm12, 1e+30, %v10390_v9  ;;  %v10722_v8 = vsel %vm4159_vm13, 1e+30, %v10393_v20 }
 0xc71   : > { %v4148_v19 = vmin.f32 %v4063_v29, %v4127_v39  ;;  %v4145_v21 = vmin.f32 %v4057_v14, %v4121_v33  ;;  %4299 = vmin.xlane.f32.xlu1 %v10719_v53  ;;  %4293 = vmin.xlane.f32.xlu0 %v10722_v8  ;;  %v12950_v14 = vld [vmem:[#allocation9_spill] sm:$0xff] }
 0xc73   : > { %v10729_v44 = vsel %vm4234_vm1, %v4148_v19, %v12942_v41  ;;  %v10734_v63 = vsel %vm4234_vm1, %v4145_v21, %v12944_v2  ;;  %vm4164_vm14 = vcmp.eq.f32.partialorder %v7540_v15, %v4148_v19  ;;  %vm4161_vm15 = vcmp.eq.f32.partialorder %v7540_v15, %v4145_v21 }
 0xc74   : > { %12943 = vst [vmem:[#allocation5_spill] sm:$0xff] %v10729_v44  ;;  %12945 = vst [vmem:[#allocation6_spill] sm:$0xff] %v10734_v63  ;;  %v4067_v9 = vpop.xlane.xlu1 %4066  ;;  %v4061_v20 = vpop.xlane.xlu0 %4060  ;;  %v10739_v33 = vsel %vm4164_vm14, 1e+30, %v10410_v16  ;;  %v10742_v39 = vsel %vm4161_vm15, 1e+30, %v10413_v25 }
 0xc75   : > { %v4150_v43 = vmin.f32 %v4067_v9, %v10638_v60  ;;  %v4147_v17 = vmin.f32 %v4061_v20, %v10634_v54  ;;  %4303 = vmin.xlane.f32.xlu1 %v10739_v33  ;;  %4297 = vmin.xlane.f32.xlu0 %v10742_v39 }
 0xc77   : > { %v10751_v32 = vsel %vm4234_vm1, %v4150_v43, %v12946_v58  ;;  %v10756_v16 = vsel %vm4234_vm1, %v4147_v17, %v12948_v6  ;;  %vm4166_vm0 = vcmp.eq.f32.partialorder %v7540_v15, %v4150_v43  ;;  %vm4163_vm3 = vcmp.eq.f32.partialorder %v7540_v15, %v4147_v17  ;;  %v12954_v43 = vld [vmem:[#allocation10_spill] sm:$0xff] }
 0xc78   : > { %12947 = vst [vmem:[#allocation7_spill] sm:$0xff] %v10751_v32  ;;  %12949 = vst [vmem:[#allocation8_spill] sm:$0xff] %v10756_v16  ;;  %v4065_v25 = vpop.xlane.xlu0 %4064  ;;  %v10761_v54 = vsel %vm4166_vm0, 1e+30, %v10432_v36  ;;  %v10764_v60 = vsel %vm4163_vm3, 1e+30, %v10435_v61 }
 0xc79   : > { %v4149_v29 = vmin.f32 %v4065_v25, %v10641_v40  ;;  %4307 = vmin.xlane.f32.xlu1 %v10761_v54  ;;  %4301 = vmin.xlane.f32.xlu0 %v10764_v60  ;;  %v12952_v40 = vld [vmem:[#allocation11_spill] sm:$0xff] }
 0xc7b   : > { %v10772_v19 = vsel %vm4234_vm1, %v4149_v29, %v12950_v14  ;;  %vm4165_vm4 = vcmp.eq.f32.partialorder %v7540_v15, %v4149_v29  ;;  %v12956_v14 = vld [vmem:[#allocation12_spill] sm:$0xff] }
 0xc7c   : > { %12951 = vst [vmem:[#allocation9_spill] sm:$0xff] %v10772_v19  ;;  %v4069_v21 = vpop.xlane.xlu0 %4068  ;;  %v10776_v36 = vsel %vm4165_vm4, 1e+30, %v10447_v34  ;;  %v12958_v19 = vld [vmem:[#allocation13_spill] sm:$0xff] }
 0xc7d   : > { %v4151_v61 = vmin.f32 %v4069_v21, %v10644_v5  ;;  %4305 = vmin.xlane.f32.xlu0 %v10776_v36 }
 0xc7f   : > { %v10783_v41 = vsel %vm4234_vm1, %v4151_v61, %v12952_v40  ;;  %vm4167_vm5 = vcmp.eq.f32.partialorder %v7540_v15, %v4151_v61 }
 0xc80   : > { %12953 = vst [vmem:[#allocation11_spill] sm:$0xff] %v10783_v41  ;;  %v10787_v2 = vsel %vm4167_vm5, 1e+30, %v10458_v37 }
 0xc81   : > { %4309 = vmin.xlane.f32.xlu0 %v10787_v2 }
 0xcc0   : > { %v4071_v9 = vpop.xlane.xlu1 %4070 }
 0xcc4   : > { %v4135_v20 = vpop.xlane.xlu1 %4134 }
 0xcc5   : > { %v4152_v34 = vmin.f32 %v4071_v9, %v4135_v20 }
 0xcc7   : > { %v10793_v5 = vsel %vm4234_vm1, %v4152_v34, %v12954_v43  ;;  %vm4168_vm6 = vcmp.eq.f32.partialorder %v7540_v15, %v4152_v34 }
 0xcc8   : > { %12955 = vst [vmem:[#allocation10_spill] sm:$0xff] %v10793_v5  ;;  %v4073_v17 = vpop.xlane.xlu0 %4072  ;;  %v10797_v58 = vsel %vm4168_vm6, 1e+30, %v10468_v11  ;;  %v4316_v6 = vpop.xlane.xlu1 %4315 }
 0xcc9   : > { %4311 = vmin.xlane.f32.xlu1 %v10797_v58 }
 0xccc   : > { %v4137_v37 = vpop.xlane.xlu0 %4136  ;;  %v4320_v25 = vpop.xlane.xlu1 %4319 }
 0xccd   : > { %v4153_v29 = vmin.f32 %v4073_v17, %v4137_v37  ;;  %4343 = vmin.xlane.f32.xlu1 %v12763_v46 }
 0xccf   : > { %v10804_v21 = vsel %vm4234_vm1, %v4153_v29, %v12956_v14  ;;  %vm4169_vm2 = vcmp.eq.f32.partialorder %v7540_v15, %v4153_v29  ;;  %vm4587_vm1 = vcmp.eq.s32.totalorder %v7332_v18, 10 }
 0xcd0   : > { %12957 = vst [vmem:[#allocation12_spill] sm:$0xff] %v10804_v21  ;;  %v10808_v61 = vsel %vm4169_vm2, 1e+30, %v10479_v26  ;;  %v4324_v11 = vpop.xlane.xlu1 %4323  ;;  %v4318_v40 = vpop.xlane.xlu0 %4317 }
 0xcd1   : > { %4313 = vmin.xlane.f32.xlu0 %v10808_v61  ;;  %4459 = vmin.xlane.f32.xlu1 %v12762_v57 }
 0xcd4   : > { %v4322_v9 = vpop.xlane.xlu0 %4321  ;;  %v4328_v20 = vpop.xlane.xlu1 %4327 }
 0xcd5   : > { %4345 = vmin.xlane.f32.xlu0 %v12763_v46  ;;  %4463 = vmin.xlane.f32.xlu1 %v12762_v57 }
 0xcd8   : > { %v4326_v34 = vpop.xlane.xlu0 %4325  ;;  %v4332_v43 = vpop.xlane.xlu1 %4331 }
 0xcd9   : > { %4467 = vmin.xlane.f32.xlu1 %v12762_v57  ;;  %4461 = vmin.xlane.f32.xlu0 %v12762_v57 }
 0xcdc   : > { %v10818_v26 = vpop.xlane.xlu0 %4329  ;;  %v4336_v17 = vpop.xlane.xlu1 %4335 }
 0xcdd   : > { %4471 = vmin.xlane.f32.xlu1 %v12762_v57  ;;  %4465 = vmin.xlane.f32.xlu0 %v12762_v57 }
 0xce0   : > { %v10822_v37 = vpop.xlane.xlu0 %4333  ;;  %v10826_v29 = vpop.xlane.xlu1 %4339 }
 0xce1   : > { %4475 = vmin.xlane.f32.xlu1 %v12762_v57  ;;  %4469 = vmin.xlane.f32.xlu0 %v12762_v57 }
 0xce4   : > { %v10830_v14 = vpop.xlane.xlu0 %4337 }
 0xce5   : > { %4479 = vmin.xlane.f32.xlu1 %v12762_v57  ;;  %4473 = vmin.xlane.f32.xlu0 %v12762_v57 }
 0xce8   : > { %v10834_v41 = vpop.xlane.xlu0 %4341 }
 0xce9   : > { %4483 = vmin.xlane.f32.xlu1 %v12762_v57  ;;  %4477 = vmin.xlane.f32.xlu0 %v12762_v57 }
 0xced   : > { %4481 = vmin.xlane.f32.xlu0 %v12762_v57 }
 0xcee   : > { %v4284_v21 = vpop.xlane.xlu1 %4283 }
 0xcef   : > { %v4347_v5 = vmin.f32 %v4284_v21, %v4316_v6 }
 0xcf1   : > { %v10839_v16 = vsel %vm4587_vm1, %v4347_v5, %v12958_v19  ;;  %vm4363_vm7 = vcmp.eq.f32.partialorder %v10653_v0, %v4347_v5  ;;  %4485 = vmin.xlane.f32.xlu0 %v12762_v57 }
 0xcf2   : > { %12959 = vst [vmem:[#allocation13_spill] sm:$0xff] %v10839_v16  ;;  %v4288_v32 = vpop.xlane.xlu1 %4287  ;;  %v4379_v63 = vsel %vm4363_vm7, %v7540_v15, 1e+09 }
 0xcf3   : > { %v4349_v44 = vmin.f32 %v4288_v32, %v4320_v25  ;;  %4395 = vmin.xlane.f32.xlu1 %v4379_v63 }
 0xcf5   : > { %v10847_v6 = vsel %vm4587_vm1, %v4349_v44, %v10516_v23  ;;  %vm4365_vm8 = vcmp.eq.f32.partialorder %v10663_v59, %v4349_v44 }
 0xcf6   : > { %v4292_v21 = vpop.xlane.xlu1 %4291  ;;  %v4286_v49 = vpop.xlane.xlu0 %4285  ;;  %v4381_v19 = vsel %vm4365_vm8, %v7540_v15, 1e+09 }
 0xcf7   : > { %v4351_v16 = vmin.f32 %v4292_v21, %v4324_v11  ;;  %v4348_v5 = vmin.f32 %v4286_v49, %v4318_v40  ;;  %4399 = vmin.xlane.f32.xlu1 %v4381_v19 }
 0xcf9   : > { %v10854_v47 = vsel %vm4587_vm1, %v4351_v16, %v10523_v4  ;;  %v10859_v63 = vsel %vm4587_vm1, %v4348_v5, %v10528_v52  ;;  %vm4367_vm9 = vcmp.eq.f32.partialorder %v10679_v7, %v4351_v16  ;;  %vm4364_vm10 = vcmp.eq.f32.partialorder %v10682_v51, %v4348_v5 }
 0xcfa   : > { %v4296_v23 = vpop.xlane.xlu1 %4295  ;;  %v4290_v44 = vpop.xlane.xlu0 %4289  ;;  %v4383_v32 = vsel %vm4367_vm9, %v7540_v15, 1e+09  ;;  %v4380_v49 = vsel %vm4364_vm10, %v7540_v15, 1e+09 }
 0xcfb   : > { %v4353_v25 = vmin.f32 %v4296_v23, %v4328_v20  ;;  %v4350_v11 = vmin.f32 %v4290_v44, %v4322_v9  ;;  %4403 = vmin.xlane.f32.xlu1 %v4383_v32  ;;  %4397 = vmin.xlane.f32.xlu0 %v4380_v49 }
 0xcfd   : > { %v10868_v4 = vsel %vm4587_vm1, %v4353_v25, %v10537_v35  ;;  %v10873_v52 = vsel %vm4587_vm1, %v4350_v11, %v10542_v27  ;;  %vm4369_vm11 = vcmp.eq.f32.partialorder %v10699_v42, %v4353_v25  ;;  %vm4366_vm12 = vcmp.eq.f32.partialorder %v10702_v10, %v4350_v11 }
 0xcfe   : > { %v4300_v16 = vpop.xlane.xlu1 %4299  ;;  %v4294_v40 = vpop.xlane.xlu0 %4293  ;;  %v4385_v9 = vsel %vm4369_vm11, %v7540_v15, 1e+09  ;;  %v4382_v20 = vsel %vm4366_vm12, %v7540_v15, 1e+09 }
 0xcff   : > { %v4355_v21 = vmin.f32 %v4300_v16, %v4332_v43  ;;  %v4352_v19 = vmin.f32 %v4294_v40, %v4326_v34  ;;  %4407 = vmin.xlane.f32.xlu1 %v4385_v9  ;;  %4401 = vmin.xlane.f32.xlu0 %v4382_v20 }
 0xd01   : > { %v10882_v35 = vsel %vm4587_vm1, %v4355_v21, %v10551_v3  ;;  %v10887_v27 = vsel %vm4587_vm1, %v4352_v19, %v10556_v12  ;;  %vm4371_vm13 = vcmp.eq.f32.partialorder %v10719_v53, %v4355_v21  ;;  %vm4368_vm14 = vcmp.eq.f32.partialorder %v10722_v8, %v4352_v19 }
 0xd02   : > { %v4304_v5 = vpop.xlane.xlu1 %4303  ;;  %v4298_v23 = vpop.xlane.xlu0 %4297  ;;  %v4387_v34 = vsel %vm4371_vm13, %v7540_v15, 1e+09  ;;  %v4384_v43 = vsel %vm4368_vm14, %v7540_v15, 1e+09 }
 0xd03   : > { %v4357_v44 = vmin.f32 %v4304_v5, %v4336_v17  ;;  %v4354_v32 = vmin.f32 %v4298_v23, %v10818_v26  ;;  %4411 = vmin.xlane.f32.xlu1 %v4387_v34  ;;  %4405 = vmin.xlane.f32.xlu0 %v4384_v43 }
 0xd05   : > { %v10897_v3 = vsel %vm4587_vm1, %v4357_v44, %v10565_v62  ;;  %v10902_v12 = vsel %vm4587_vm1, %v4354_v32, %v10570_v24  ;;  %vm4373_vm15 = vcmp.eq.f32.partialorder %v10739_v33, %v4357_v44  ;;  %vm4370_vm0 = vcmp.eq.f32.partialorder %v10742_v39, %v4354_v32 }
 0xd06   : > { %v4308_v49 = vpop.xlane.xlu1 %4307  ;;  %v4302_v17 = vpop.xlane.xlu0 %4301  ;;  %v4389_v26 = vsel %vm4373_vm15, %v7540_v15, 1e+09  ;;  %v4386_v25 = vsel %vm4370_vm0, %v7540_v15, 1e+09 }
 0xd07   : > { %v4359_v11 = vmin.f32 %v4308_v49, %v10826_v29  ;;  %v4356_v62 = vmin.f32 %v4302_v17, %v10822_v37  ;;  %4415 = vmin.xlane.f32.xlu1 %v4389_v26  ;;  %4409 = vmin.xlane.f32.xlu0 %v4386_v25 }
 0xd09   : > { %v10913_v24 = vsel %vm4587_vm1, %v4359_v11, %v10581_v28  ;;  %v10918_v16 = vsel %vm4587_vm1, %v4356_v62, %v10586_v30  ;;  %vm4375_vm3 = vcmp.eq.f32.partialorder %v10761_v54, %v4359_v11  ;;  %vm4372_vm4 = vcmp.eq.f32.partialorder %v10764_v60, %v4356_v62 }
 0xd0a   : > { %v4306_v40 = vpop.xlane.xlu0 %4305  ;;  %v4391_v29 = vsel %vm4375_vm3, %v7540_v15, 1e+09  ;;  %v4388_v37 = vsel %vm4372_vm4, %v7540_v15, 1e+09 }
 0xd0b   : > { %v4358_v9 = vmin.f32 %v4306_v40, %v10830_v14  ;;  %4419 = vmin.xlane.f32.xlu1 %v4391_v29  ;;  %4413 = vmin.xlane.f32.xlu0 %v4388_v37 }
 0xd0d   : > { %v10928_v28 = vsel %vm4587_vm1, %v4358_v9, %v10596_v31  ;;  %vm4374_vm5 = vcmp.eq.f32.partialorder %v10776_v36, %v4358_v9 }
 0xd0e   : > { %v4310_v30 = vpop.xlane.xlu0 %4309  ;;  %v4390_v20 = vsel %vm4374_vm5, %v7540_v15, 1e+09 }
 0xd0f   : > { %v4360_v21 = vmin.f32 %v4310_v30, %v10834_v41  ;;  %4417 = vmin.xlane.f32.xlu0 %v4390_v20 }
 0xd11   : > { %v10936_v19 = vsel %vm4587_vm1, %v4360_v21, %v10604_v13  ;;  %vm4376_vm6 = vcmp.eq.f32.partialorder %v10787_v2, %v4360_v21 }
 0xd12   : > { %v4392_v14 = vsel %vm4376_vm6, %v7540_v15, 1e+09 }
 0xd13   : > { %4421 = vmin.xlane.f32.xlu0 %v4392_v14 }
 0xd56   : > { %v4312_v31 = vpop.xlane.xlu1 %4311 }
 0xd5a   : > { %v4344_v5 = vpop.xlane.xlu1 %4343 }
 0xd5b   : > { %v4361_v23 = vmin.f32 %v4312_v31, %v4344_v5 }
 0xd5d   : > { %v10943_v34 = vsel %vm4587_vm1, %v4361_v23, %v10611_v48  ;;  %vm4377_vm2 = vcmp.eq.f32.partialorder %v10797_v58, %v4361_v23 }
 0xd5e   : > { %v4314_v41 = vpop.xlane.xlu0 %4313  ;;  %v4393_v43 = vsel %vm4377_vm2, %v7540_v15, 1e+09  ;;  %v4460_v13 = vpop.xlane.xlu1 %4459 }
 0xd5f   : > { %4423 = vmin.xlane.f32.xlu1 %v4393_v43 }
 0xd62   : > { %v4346_v44 = vpop.xlane.xlu0 %4345  ;;  %v4464_v32 = vpop.xlane.xlu1 %4463 }
 0xd63   : > { %v4362_v49 = vmin.f32 %v4314_v41, %v4346_v44  ;;  %4487 = vmin.xlane.f32.xlu1 %v12762_v57 }
 0xd65   : > { %v10951_v17 = vsel %vm4587_vm1, %v4362_v49, %v10619_v55  ;;  %vm4378_vm7 = vcmp.eq.f32.partialorder %v10808_v61, %v4362_v49 }
 0xd66   : > { %v4394_v48 = vsel %vm4378_vm7, %v7540_v15, 1e+09  ;;  %v4468_v26 = vpop.xlane.xlu1 %4467  ;;  %v4462_v25 = vpop.xlane.xlu0 %4461 }
 0xd67   : > { %4425 = vmin.xlane.f32.xlu0 %v4394_v48  ;;  %4668 = vmin.xlane.f32.xlu1 %v12763_v46 }
 0xd6a   : > { %v4472_v11 = vpop.xlane.xlu1 %4471  ;;  %v4466_v62 = vpop.xlane.xlu0 %4465 }
 0xd6b   : > { %4489 = vmin.xlane.f32.xlu0 %v12762_v57  ;;  %4672 = vmin.xlane.f32.xlu1 %v12763_v46 }
 0xd6e   : > { %v4476_v40 = vpop.xlane.xlu1 %4475  ;;  %v4470_v29 = vpop.xlane.xlu0 %4469 }
 0xd6f   : > { %4676 = vmin.xlane.f32.xlu1 %v12763_v46  ;;  %4670 = vmin.xlane.f32.xlu0 %v12763_v46 }
 0xd72   : > { %v10960_v55 = vpop.xlane.xlu0 %4473  ;;  %v4480_v37 = vpop.xlane.xlu1 %4479 }
 0xd73   : > { %4680 = vmin.xlane.f32.xlu1 %v12763_v46  ;;  %4674 = vmin.xlane.f32.xlu0 %v12763_v46 }
 0xd76   : > { %v10964_v9 = vpop.xlane.xlu0 %4477  ;;  %v10968_v30 = vpop.xlane.xlu1 %4483 }
 0xd77   : > { %4684 = vmin.xlane.f32.xlu1 %v12763_v46  ;;  %4678 = vmin.xlane.f32.xlu0 %v12763_v46 }
 0xd7a   : > { %v10972_v20 = vpop.xlane.xlu0 %4481 }
 0xd7b   : > { %4688 = vmin.xlane.f32.xlu1 %v12763_v46  ;;  %4682 = vmin.xlane.f32.xlu0 %v12763_v46 }
 0xd7e   : > { %v10976_v31 = vpop.xlane.xlu0 %4485 }
 0xd7f   : > { %4692 = vmin.xlane.f32.xlu1 %v12763_v46  ;;  %4686 = vmin.xlane.f32.xlu0 %v12763_v46 }
 0xd80   : > { %v4396_v21 = vpop.xlane.xlu1 %4395 }
 0xd81   : > { %v4491_v14 = vmin.f32 %v4396_v21, %v4460_v13 }
 0xd83   : > { %v10981_v5 = vsel %vm4587_vm1, %v4491_v14, %v10649_v45  ;;  %vm4507_vm8 = vcmp.eq.f32.partialorder %v7540_v15, %v4491_v14  ;;  %4690 = vmin.xlane.f32.xlu0 %v12763_v46 }
 0xd84   : > { %v4400_v23 = vpop.xlane.xlu1 %4399  ;;  %v10986_v41 = vsel %vm4507_vm8, 1e+30, %v10653_v0 }
 0xd85   : > { %v4493_v43 = vmin.f32 %v4400_v23, %v4464_v32  ;;  %4636 = vmin.xlane.f32.xlu1 %v10986_v41 }
 0xd87   : > { %v10992_v13 = vsel %vm4587_vm1, %v4493_v43, %v10659_v56  ;;  %vm4509_vm9 = vcmp.eq.f32.partialorder %v7540_v15, %v4493_v43  ;;  %4694 = vmin.xlane.f32.xlu0 %v12763_v46 }
 0xd88   : > { %v4404_v45 = vpop.xlane.xlu1 %4403  ;;  %v4398_v44 = vpop.xlane.xlu0 %4397  ;;  %v10997_v49 = vsel %vm4509_vm9, 1e+30, %v10663_v59 }
 0xd89   : > { %v4495_v48 = vmin.f32 %v4404_v45, %v4468_v26  ;;  %v4492_v0 = vmin.f32 %v4398_v44, %v4462_v25  ;;  %4640 = vmin.xlane.f32.xlu1 %v10997_v49  ;;  %v12961_v44 = vld [vmem:[#allocation15_spill] sm:$0xff] }
 0xd8b   : > { %v11003_v32 = vsel %vm4587_vm1, %v4495_v48, %v10669_v50  ;;  %v11008_v56 = vsel %vm4587_vm1, %v4492_v0, %v10674_v38  ;;  %vm4511_vm10 = vcmp.eq.f32.partialorder %v7540_v15, %v4495_v48  ;;  %vm4508_vm11 = vcmp.eq.f32.partialorder %v7540_v15, %v4492_v0 }
 0xd8c   : > { %v4408_v59 = vpop.xlane.xlu1 %4407  ;;  %v4402_v21 = vpop.xlane.xlu0 %4401  ;;  %v11013_v26 = vsel %vm4511_vm10, 1e+30, %v10679_v7  ;;  %v11016_v25 = vsel %vm4508_vm11, 1e+30, %v10682_v51 }
 0xd8d   : > { %v4497_v14 = vmin.f32 %v4408_v59, %v4472_v11  ;;  %v4494_v50 = vmin.f32 %v4402_v21, %v4466_v62  ;;  %4644 = vmin.xlane.f32.xlu1 %v11013_v26  ;;  %4638 = vmin.xlane.f32.xlu0 %v11016_v25  ;;  %v12963_v21 = vld [vmem:[#allocation5_spill] sm:$0xff] }
 0xd8f   : > { %v11023_v38 = vsel %vm4587_vm1, %v4497_v14, %v10689_v22  ;;  %v11028_v23 = vsel %vm4587_vm1, %v4494_v50, %v10694_v1  ;;  %vm4513_vm12 = vcmp.eq.f32.partialorder %v7540_v15, %v4497_v14  ;;  %vm4510_vm13 = vcmp.eq.f32.partialorder %v7540_v15, %v4494_v50  ;;  %v12960_v1 = vld [vmem:[#allocation14_spill] sm:$0xff] }
 0xd90   : > { %v4412_v7 = vpop.xlane.xlu1 %4411  ;;  %v4406_v51 = vpop.xlane.xlu0 %4405  ;;  %v11033_v11 = vsel %vm4513_vm12, 1e+30, %v10699_v42  ;;  %v11036_v62 = vsel %vm4510_vm13, 1e+30, %v10702_v10  ;;  %v12965_v50 = vld [vmem:[#allocation6_spill] sm:$0xff] }
 0xd91   : > { %v4499_v43 = vmin.f32 %v4412_v7, %v4476_v40  ;;  %v4496_v22 = vmin.f32 %v4406_v51, %v4470_v29  ;;  %4648 = vmin.xlane.f32.xlu1 %v11033_v11  ;;  %4642 = vmin.xlane.f32.xlu0 %v11036_v62 }
 0xd93   : > { %v11043_v45 = vsel %vm4587_vm1, %v4499_v43, %v12960_v1  ;;  %v11048_v48 = vsel %vm4587_vm1, %v4496_v22, %v12961_v44  ;;  %vm4515_vm14 = vcmp.eq.f32.partialorder %v7540_v15, %v4499_v43  ;;  %vm4512_vm15 = vcmp.eq.f32.partialorder %v7540_v15, %v4496_v22  ;;  %v12967_v22 = vld [vmem:[#allocation7_spill] sm:$0xff]  ;;  %v12969_v44 = vld [vmem:[#allocation8_spill] sm:$0xff] }
 0xd94   : > { %12962 = vst [vmem:[#allocation14_spill] sm:$0xff] %v11048_v48  ;;  %v4416_v42 = vpop.xlane.xlu1 %4415  ;;  %v4410_v10 = vpop.xlane.xlu0 %4409  ;;  %v11053_v40 = vsel %vm4515_vm14, 1e+30, %v10719_v53  ;;  %v11056_v29 = vsel %vm4512_vm15, 1e+30, %v10722_v8 }
 0xd95   : > { %v4501_v0 = vmin.f32 %v4416_v42, %v4480_v37  ;;  %v4498_v59 = vmin.f32 %v4410_v10, %v10960_v55  ;;  %4652 = vmin.xlane.f32.xlu1 %v11053_v40  ;;  %4646 = vmin.xlane.f32.xlu0 %v11056_v29  ;;  %v12971_v10 = vld [vmem:[#allocation9_spill] sm:$0xff] }
 0xd97   : > { %v11064_v14 = vsel %vm4587_vm1, %v4501_v0, %v12963_v21  ;;  %v11069_v53 = vsel %vm4587_vm1, %v4498_v59, %v12965_v50  ;;  %vm4517_vm0 = vcmp.eq.f32.partialorder %v7540_v15, %v4501_v0  ;;  %vm4514_vm3 = vcmp.eq.f32.partialorder %v7540_v15, %v4498_v59 }
 0xd98   : > { %12964 = vst [vmem:[#allocation15_spill] sm:$0xff] %v11064_v14  ;;  %12966 = vst [vmem:[#allocation5_spill] sm:$0xff] %v11069_v53  ;;  %v4420_v8 = vpop.xlane.xlu1 %4419  ;;  %v4414_v55 = vpop.xlane.xlu0 %4413  ;;  %v11074_v37 = vsel %vm4517_vm0, 1e+30, %v10739_v33  ;;  %v11077_v7 = vsel %vm4514_vm3, 1e+30, %v10742_v39 }
 0xd99   : > { %v4503_v51 = vmin.f32 %v4420_v8, %v10968_v30  ;;  %v4500_v43 = vmin.f32 %v4414_v55, %v10964_v9  ;;  %4656 = vmin.xlane.f32.xlu1 %v11074_v37  ;;  %4650 = vmin.xlane.f32.xlu0 %v11077_v7 }
 0xd9b   : > { %v11086_v1 = vsel %vm4587_vm1, %v4503_v51, %v12967_v22  ;;  %v11091_v33 = vsel %vm4587_vm1, %v4500_v43, %v12969_v44  ;;  %vm4519_vm4 = vcmp.eq.f32.partialorder %v7540_v15, %v4503_v51  ;;  %vm4516_vm5 = vcmp.eq.f32.partialorder %v7540_v15, %v4500_v43  ;;  %v12975_v51 = vld [vmem:[#allocation10_spill] sm:$0xff] }
 0xd9c   : > { %12968 = vst [vmem:[#allocation6_spill] sm:$0xff] %v11086_v1  ;;  %12970 = vst [vmem:[#allocation7_spill] sm:$0xff] %v11091_v33  ;;  %v4418_v39 = vpop.xlane.xlu0 %4417  ;;  %v11096_v9 = vsel %vm4519_vm4, 1e+30, %v10761_v54  ;;  %v11099_v30 = vsel %vm4516_vm5, 1e+30, %v10764_v60 }
 0xd9d   : > { %v4502_v42 = vmin.f32 %v4418_v39, %v10972_v20  ;;  %4660 = vmin.xlane.f32.xlu1 %v11096_v9  ;;  %4654 = vmin.xlane.f32.xlu0 %v11099_v30  ;;  %v12973_v20 = vld [vmem:[#allocation11_spill] sm:$0xff] }
 0xd9f   : > { %v11107_v0 = vsel %vm4587_vm1, %v4502_v42, %v12971_v10  ;;  %vm4518_vm6 = vcmp.eq.f32.partialorder %v7540_v15, %v4502_v42  ;;  %v12977_v10 = vld [vmem:[#allocation12_spill] sm:$0xff] }
 0xda0   : > { %12972 = vst [vmem:[#allocation8_spill] sm:$0xff] %v11107_v0  ;;  %v4422_v59 = vpop.xlane.xlu0 %4421  ;;  %v11111_v54 = vsel %vm4518_vm6, 1e+30, %v10776_v36  ;;  %v12979_v0 = vld [vmem:[#allocation13_spill] sm:$0xff] }
 0xda1   : > { %v4504_v60 = vmin.f32 %v4422_v59, %v10976_v31  ;;  %4658 = vmin.xlane.f32.xlu0 %v11111_v54 }
 0xda3   : > { %v11118_v21 = vsel %vm4587_vm1, %v4504_v60, %v12973_v20  ;;  %vm4520_vm2 = vcmp.eq.f32.partialorder %v7540_v15, %v4504_v60 }
 0xda4   : > { %12974 = vst [vmem:[#allocation9_spill] sm:$0xff] %v11118_v21  ;;  %v11122_v50 = vsel %vm4520_vm2, 1e+30, %v10787_v2 }
 0xda5   : > { %4662 = vmin.xlane.f32.xlu0 %v11122_v50 }
 0xdec   : > { %v4424_v8 = vpop.xlane.xlu1 %4423 }
 0xdf0   : > { %v4488_v55 = vpop.xlane.xlu1 %4487 }
 0xdf1   : > { %v4505_v36 = vmin.f32 %v4424_v8, %v4488_v55 }
 0xdf3   : > { %v11128_v31 = vsel %vm4587_vm1, %v4505_v36, %v12975_v51  ;;  %vm4521_vm7 = vcmp.eq.f32.partialorder %v7540_v15, %v4505_v36 }
 0xdf4   : > { %12976 = vst [vmem:[#allocation11_spill] sm:$0xff] %v11128_v31  ;;  %v4426_v43 = vpop.xlane.xlu0 %4425  ;;  %v11132_v22 = vsel %vm4521_vm7, 1e+30, %v10797_v58  ;;  %v4669_v44 = vpop.xlane.xlu1 %4668 }
 0xdf5   : > { %4664 = vmin.xlane.f32.xlu1 %v11132_v22 }
 0xdf8   : > { %v4490_v2 = vpop.xlane.xlu0 %4489  ;;  %v4673_v39 = vpop.xlane.xlu1 %4672 }
 0xdf9   : > { %v4506_v42 = vmin.f32 %v4426_v43, %v4490_v2  ;;  %4696 = vmin.xlane.f32.xlu1 %v12763_v46 }
 0xdfb   : > { %v11139_v59 = vsel %vm4587_vm1, %v4506_v42, %v12977_v10  ;;  %vm4522_vm8 = vcmp.eq.f32.partialorder %v7540_v15, %v4506_v42  ;;  %vm4940_vm1 = vcmp.eq.s32.totalorder %v7332_v18, 11 }
 0xdfc   : > { %12978 = vst [vmem:[#allocation10_spill] sm:$0xff] %v11139_v59  ;;  %v11143_v60 = vsel %vm4522_vm8, 1e+30, %v10808_v61  ;;  %v4677_v58 = vpop.xlane.xlu1 %4676  ;;  %v4671_v20 = vpop.xlane.xlu0 %4670 }
 0xdfd   : > { %4812 = vmin.xlane.f32.xlu1 %v12762_v57  ;;  %4666 = vmin.xlane.f32.xlu0 %v11143_v60 }
 0xe00   : > { %v4681_v8 = vpop.xlane.xlu1 %4680  ;;  %v4675_v55 = vpop.xlane.xlu0 %4674 }
 0xe01   : > { %4816 = vmin.xlane.f32.xlu1 %v12762_v57  ;;  %4698 = vmin.xlane.f32.xlu0 %v12763_v46 }
 0xe04   : > { %v4685_v36 = vpop.xlane.xlu1 %4684  ;;  %v4679_v51 = vpop.xlane.xlu0 %4678 }
 0xe05   : > { %4820 = vmin.xlane.f32.xlu1 %v12762_v57  ;;  %4814 = vmin.xlane.f32.xlu0 %v12762_v57 }
 0xe08   : > { %v11151_v61 = vpop.xlane.xlu1 %4688  ;;  %v11153_v43 = vpop.xlane.xlu0 %4682 }
 0xe09   : > { %4824 = vmin.xlane.f32.xlu1 %v12762_v57  ;;  %4818 = vmin.xlane.f32.xlu0 %v12762_v57 }
 0xe0c   : > { %v11157_v2 = vpop.xlane.xlu1 %4692  ;;  %v11159_v42 = vpop.xlane.xlu0 %4686 }
 0xe0d   : > { %4828 = vmin.xlane.f32.xlu1 %v12762_v57  ;;  %4822 = vmin.xlane.f32.xlu0 %v12762_v57 }
 0xe10   : > { %v11163_v10 = vpop.xlane.xlu0 %4690 }
 0xe11   : > { %4832 = vmin.xlane.f32.xlu1 %v12762_v57  ;;  %4826 = vmin.xlane.f32.xlu0 %v12762_v57 }
 0xe12   : > { %v4637_v59 = vpop.xlane.xlu1 %4636 }
 0xe13   : > { %v4700_v31 = vmin.f32 %v4637_v59, %v4669_v44 }
 0xe14   : > { %v11168_v21 = vpop.xlane.xlu0 %4694 }
 0xe15   : > { %v11173_v33 = vsel %vm4940_vm1, %v4700_v31, %v12979_v0  ;;  %4836 = vmin.xlane.f32.xlu1 %v12762_v57  ;;  %4830 = vmin.xlane.f32.xlu0 %v12762_v57  ;;  %vm4716_vm9 = vcmp.eq.f32.partialorder %v10986_v41, %v4700_v31 }
 0xe16   : > { %12980 = vst [vmem:[#allocation12_spill] sm:$0xff] %v11173_v33  ;;  %v4641_v1 = vpop.xlane.xlu1 %4640  ;;  %v4732_v14 = vsel %vm4716_vm9, %v7540_v15, 1e+09 }
 0xe17   : > { %v4702_v53 = vmin.f32 %v4641_v1, %v4673_v39 }
 0xe19   : > { %v11182_v44 = vsel %vm4940_vm1, %v4702_v53, %v10847_v6  ;;  %4748 = vmin.xlane.f32.xlu1 %v4732_v14  ;;  %4834 = vmin.xlane.f32.xlu0 %v12762_v57  ;;  %vm4718_vm10 = vcmp.eq.f32.partialorder %v10997_v49, %v4702_v53 }
 0xe1a   : > { %v4645_v0 = vpop.xlane.xlu1 %4644  ;;  %v4639_v59 = vpop.xlane.xlu0 %4638  ;;  %v4734_v31 = vsel %vm4718_vm10, %v7540_v15, 1e+09 }
 0xe1b   : > { %v4704_v33 = vmin.f32 %v4645_v0, %v4677_v58  ;;  %v4701_v48 = vmin.f32 %v4639_v59, %v4671_v20 }
 0xe1d   : > { %v11190_v1 = vsel %vm4940_vm1, %v4704_v33, %v10854_v47  ;;  %v11195_v6 = vsel %vm4940_vm1, %v4701_v48, %v10859_v63  ;;  %4752 = vmin.xlane.f32.xlu1 %v4734_v31  ;;  %4838 = vmin.xlane.f32.xlu0 %v12762_v57  ;;  %vm4720_vm11 = vcmp.eq.f32.partialorder %v11013_v26, %v4704_v33 }
 0xe1e   : > { %v4649_v14 = vpop.xlane.xlu1 %4648  ;;  %v4643_v53 = vpop.xlane.xlu0 %4642  ;;  %vm4717_vm12 = vcmp.eq.f32.partialorder %v11016_v25, %v4701_v48  ;;  %v4736_v20 = vsel %vm4720_vm11, %v7540_v15, 1e+09 }
 0xe1f   : > { %v4706_v39 = vmin.f32 %v4649_v14, %v4681_v8  ;;  %v4703_v58 = vmin.f32 %v4643_v53, %v4675_v55  ;;  %v4733_v47 = vsel %vm4717_vm12, %v7540_v15, 1e+09 }
 0xe21   : > { %v11205_v63 = vsel %vm4940_vm1, %v4706_v39, %v10868_v4  ;;  %v11210_v0 = vsel %vm4940_vm1, %v4703_v58, %v10873_v52  ;;  %4756 = vmin.xlane.f32.xlu1 %v4736_v20  ;;  %4750 = vmin.xlane.f32.xlu0 %v4733_v47  ;;  %vm4722_vm13 = vcmp.eq.f32.partialorder %v11033_v11, %v4706_v39 }
 0xe22   : > { %v4653_v48 = vpop.xlane.xlu1 %4652  ;;  %v4647_v33 = vpop.xlane.xlu0 %4646  ;;  %vm4719_vm14 = vcmp.eq.f32.partialorder %v11036_v62, %v4703_v58  ;;  %v4738_v59 = vsel %vm4722_vm13, %v7540_v15, 1e+09 }
 0xe23   : > { %v4708_v8 = vmin.f32 %v4653_v48, %v4685_v36  ;;  %v4705_v55 = vmin.f32 %v4647_v33, %v4679_v51  ;;  %v4735_v4 = vsel %vm4719_vm14, %v7540_v15, 1e+09 }
 0xe25   : > { %v11219_v31 = vsel %vm4940_vm1, %v4708_v8, %v10882_v35  ;;  %v11224_v52 = vsel %vm4940_vm1, %v4705_v55, %v10887_v27  ;;  %4760 = vmin.xlane.f32.xlu1 %v4738_v59  ;;  %4754 = vmin.xlane.f32.xlu0 %v4735_v4  ;;  %vm4724_vm15 = vcmp.eq.f32.partialorder %v11053_v40, %v4708_v8 }
 0xe26   : > { %v4657_v36 = vpop.xlane.xlu1 %4656  ;;  %v4651_v51 = vpop.xlane.xlu0 %4650  ;;  %vm4721_vm0 = vcmp.eq.f32.partialorder %v11056_v29, %v4705_v55  ;;  %v4740_v35 = vsel %vm4724_vm15, %v7540_v15, 1e+09 }
 0xe27   : > { %v4710_v14 = vmin.f32 %v4657_v36, %v11151_v61  ;;  %v4707_v53 = vmin.f32 %v4651_v51, %v11153_v43  ;;  %v4737_v39 = vsel %vm4721_vm0, %v7540_v15, 1e+09 }
 0xe29   : > { %v11235_v27 = vsel %vm4940_vm1, %v4710_v14, %v10897_v3  ;;  %v11240_v58 = vsel %vm4940_vm1, %v4707_v53, %v10902_v12  ;;  %4764 = vmin.xlane.f32.xlu1 %v4740_v35  ;;  %4758 = vmin.xlane.f32.xlu0 %v4737_v39  ;;  %vm4726_vm3 = vcmp.eq.f32.partialorder %v11074_v37, %v4710_v14 }
 0xe2a   : > { %v4661_v61 = vpop.xlane.xlu1 %4660  ;;  %v4655_v43 = vpop.xlane.xlu0 %4654  ;;  %vm4723_vm4 = vcmp.eq.f32.partialorder %v11077_v7, %v4707_v53  ;;  %v4742_v3 = vsel %vm4726_vm3, %v7540_v15, 1e+09 }
 0xe2b   : > { %v4712_v20 = vmin.f32 %v4661_v61, %v11157_v2  ;;  %v4709_v47 = vmin.f32 %v4655_v43, %v11159_v42  ;;  %v4739_v48 = vsel %vm4723_vm4, %v7540_v15, 1e+09 }
 0xe2d   : > { %v11251_v12 = vsel %vm4940_vm1, %v4712_v20, %v10913_v24  ;;  %v11256_v33 = vsel %vm4940_vm1, %v4709_v47, %v10918_v16  ;;  %4768 = vmin.xlane.f32.xlu1 %v4742_v3  ;;  %4762 = vmin.xlane.f32.xlu0 %v4739_v48  ;;  %vm4728_vm5 = vcmp.eq.f32.partialorder %v11096_v9, %v4712_v20 }
 0xe2e   : > { %v4659_v2 = vpop.xlane.xlu0 %4658  ;;  %vm4725_vm6 = vcmp.eq.f32.partialorder %v11099_v30, %v4709_v47  ;;  %v4744_v8 = vsel %vm4728_vm5, %v7540_v15, 1e+09 }
 0xe2f   : > { %v4711_v42 = vmin.f32 %v4659_v2, %v11163_v10  ;;  %v4741_v55 = vsel %vm4725_vm6, %v7540_v15, 1e+09 }
 0xe31   : > { %v11266_v24 = vsel %vm4940_vm1, %v4711_v42, %v10928_v28  ;;  %4772 = vmin.xlane.f32.xlu1 %v4744_v8  ;;  %4766 = vmin.xlane.f32.xlu0 %v4741_v55  ;;  %vm4727_vm2 = vcmp.eq.f32.partialorder %v11111_v54, %v4711_v42 }
 0xe32   : > { %v4663_v16 = vpop.xlane.xlu0 %4662  ;;  %v4743_v4 = vsel %vm4727_vm2, %v7540_v15, 1e+09 }
 0xe33   : > { %v4713_v59 = vmin.f32 %v4663_v16, %v11168_v21 }
 0xe35   : > { %v11274_v10 = vsel %vm4940_vm1, %v4713_v59, %v10936_v19  ;;  %4770 = vmin.xlane.f32.xlu0 %v4743_v4  ;;  %vm4729_vm7 = vcmp.eq.f32.partialorder %v11122_v50, %v4713_v59 }
 0xe36   : > { %v4745_v28 = vsel %vm4729_vm7, %v7540_v15, 1e+09 }
 0xe39   : > { %4774 = vmin.xlane.f32.xlu0 %v4745_v28 }
 0xe82   : > { %v4665_v36 = vpop.xlane.xlu1 %4664 }
 0xe86   : > { %v4697_v51 = vpop.xlane.xlu1 %4696 }
 0xe87   : > { %v4714_v14 = vmin.f32 %v4665_v36, %v4697_v51 }
 0xe89   : > { %v11281_v21 = vsel %vm4940_vm1, %v4714_v14, %v10943_v34  ;;  %vm4730_vm8 = vcmp.eq.f32.partialorder %v11132_v22, %v4714_v14 }
 0xe8a   : > { %v4813_v53 = vpop.xlane.xlu1 %4812  ;;  %v4667_v35 = vpop.xlane.xlu0 %4666  ;;  %v4746_v19 = vsel %vm4730_vm8, %v7540_v15, 1e+09 }
 0xe8b   : > { %4776 = vmin.xlane.f32.xlu1 %v4746_v19 }
 0xe8e   : > { %v4817_v39 = vpop.xlane.xlu1 %4816  ;;  %v4699_v61 = vpop.xlane.xlu0 %4698 }
 0xe8f   : > { %v4715_v43 = vmin.f32 %v4667_v35, %v4699_v61  ;;  %4840 = vmin.xlane.f32.xlu1 %v12762_v57 }
 0xe91   : > { %v11289_v20 = vsel %vm4940_vm1, %v4715_v43, %v10951_v17  ;;  %vm4731_vm9 = vcmp.eq.f32.partialorder %v11143_v60, %v4715_v43 }
 0xe92   : > { %v4821_v34 = vpop.xlane.xlu1 %4820  ;;  %v4815_v47 = vpop.xlane.xlu0 %4814  ;;  %v4747_v3 = vsel %vm4731_vm9, %v7540_v15, 1e+09 }
 0xe93   : > { %5021 = vmin.xlane.f32.xlu1 %v12763_v46  ;;  %4778 = vmin.xlane.f32.xlu0 %v4747_v3 }
 0xe96   : > { %v4825_v48 = vpop.xlane.xlu1 %4824  ;;  %v4819_v2 = vpop.xlane.xlu0 %4818 }
 0xe97   : > { %5025 = vmin.xlane.f32.xlu1 %v12763_v46  ;;  %4842 = vmin.xlane.f32.xlu0 %v12762_v57 }
 0xe9a   : > { %v4829_v42 = vpop.xlane.xlu1 %4828  ;;  %v4823_v8 = vpop.xlane.xlu0 %4822 }
 0xe9b   : > { %5029 = vmin.xlane.f32.xlu1 %v12763_v46  ;;  %5023 = vmin.xlane.f32.xlu0 %v12763_v46 }
 0xe9e   : > { %v4833_v17 = vpop.xlane.xlu1 %4832  ;;  %v4827_v55 = vpop.xlane.xlu0 %4826 }
 0xe9f   : > { %5033 = vmin.xlane.f32.xlu1 %v12763_v46  ;;  %5027 = vmin.xlane.f32.xlu0 %v12763_v46 }
 0xea2   : > { %v11300_v16 = vpop.xlane.xlu1 %4836  ;;  %v11302_v59 = vpop.xlane.xlu0 %4830 }
 0xea3   : > { %5037 = vmin.xlane.f32.xlu1 %v12763_v46  ;;  %5031 = vmin.xlane.f32.xlu0 %v12763_v46 }
 0xea6   : > { %v4749_v4 = vpop.xlane.xlu1 %4748  ;;  %v11306_v28 = vpop.xlane.xlu0 %4834 }
 0xea7   : > { %v4844_v36 = vmin.f32 %v4749_v4, %v4813_v53  ;;  %5041 = vmin.xlane.f32.xlu1 %v12763_v46  ;;  %5035 = vmin.xlane.f32.xlu0 %v12763_v46 }
 0xea9   : > { %v11313_v51 = vsel %vm4940_vm1, %v4844_v36, %v10981_v5  ;;  %vm4860_vm10 = vcmp.eq.f32.partialorder %v7540_v15, %v4844_v36 }
 0xeaa   : > { %v4753_v14 = vpop.xlane.xlu1 %4752  ;;  %v11315_v35 = vpop.xlane.xlu0 %4838  ;;  %v11326_v5 = vsel %vm4860_vm10, 1e+30, %v10986_v41 }
 0xeab   : > { %v4846_v19 = vmin.f32 %v4753_v14, %v4817_v39  ;;  %5045 = vmin.xlane.f32.xlu1 %v12763_v46  ;;  %5039 = vmin.xlane.f32.xlu0 %v12763_v46 }
 0xead   : > { %v11323_v53 = vsel %vm4940_vm1, %v4846_v19, %v10992_v13  ;;  %vm4862_vm11 = vcmp.eq.f32.partialorder %v7540_v15, %v4846_v19 }
 0xeae   : > { %v4757_v61 = vpop.xlane.xlu1 %4756  ;;  %v4751_v43 = vpop.xlane.xlu0 %4750 }
 0xeaf   : > { %v4848_v3 = vmin.f32 %v4757_v61, %v4821_v34  ;;  %v4845_v4 = vmin.f32 %v4751_v43, %v4815_v47  ;;  %4989 = vmin.xlane.f32.xlu1 %v11326_v5  ;;  %5043 = vmin.xlane.f32.xlu0 %v12763_v46  ;;  %v11342_v34 = vsel %vm4862_vm11, 1e+30, %v10997_v49 }
 0xeb1   : > { %v11334_v39 = vsel %vm4940_vm1, %v4848_v3, %v11003_v32  ;;  %v11339_v13 = vsel %vm4940_vm1, %v4845_v4, %v11008_v56  ;;  %vm4864_vm12 = vcmp.eq.f32.partialorder %v7540_v15, %v4848_v3  ;;  %vm4861_vm13 = vcmp.eq.f32.partialorder %v7540_v15, %v4845_v4 }
 0xeb2   : > { %v4761_v41 = vpop.xlane.xlu1 %4760  ;;  %v4755_v36 = vpop.xlane.xlu0 %4754 }
 0xeb3   : > { %v4850_v47 = vmin.f32 %v4761_v41, %v4825_v48  ;;  %v4847_v14 = vmin.f32 %v4755_v36, %v4819_v2  ;;  %4993 = vmin.xlane.f32.xlu1 %v11342_v34  ;;  %5047 = vmin.xlane.f32.xlu0 %v12763_v46  ;;  %v11359_v48 = vsel %vm4864_vm12, 1e+30, %v11013_v26  ;;  %v11362_v2 = vsel %vm4861_vm13, 1e+30, %v11016_v25  ;;  %v12981_v26 = vld [vmem:[#allocation14_spill] sm:$0xff] }
 0xeb5   : > { %v11351_v32 = vsel %vm4940_vm1, %v4850_v47, %v11023_v38  ;;  %v11356_v49 = vsel %vm4940_vm1, %v4847_v14, %v11028_v23  ;;  %vm4866_vm14 = vcmp.eq.f32.partialorder %v7540_v15, %v4850_v47  ;;  %vm4863_vm15 = vcmp.eq.f32.partialorder %v7540_v15, %v4847_v14 }
 0xeb6   : > { %v4765_v56 = vpop.xlane.xlu1 %4764  ;;  %v4759_v19 = vpop.xlane.xlu0 %4758 }
 0xeb7   : > { %v4852_v61 = vmin.f32 %v4765_v56, %v4829_v42  ;;  %v4849_v43 = vmin.f32 %v4759_v19, %v4823_v8  ;;  %4997 = vmin.xlane.f32.xlu1 %v11359_v48  ;;  %4991 = vmin.xlane.f32.xlu0 %v11362_v2  ;;  %v11379_v42 = vsel %vm4866_vm14, 1e+30, %v11033_v11  ;;  %v11382_v8 = vsel %vm4863_vm15, 1e+30, %v11036_v62  ;;  %v12985_v11 = vld [vmem:[#allocation5_spill] sm:$0xff] }
 0xeb9   : > { %v11371_v38 = vsel %vm4940_vm1, %v4852_v61, %v11043_v45  ;;  %v11376_v25 = vsel %vm4940_vm1, %v4849_v43, %v12981_v26  ;;  %vm4868_vm0 = vcmp.eq.f32.partialorder %v7540_v15, %v4852_v61  ;;  %vm4865_vm3 = vcmp.eq.f32.partialorder %v7540_v15, %v4849_v43  ;;  %v12983_v45 = vld [vmem:[#allocation15_spill] sm:$0xff]  ;;  %v12987_v61 = vld [vmem:[#allocation6_spill] sm:$0xff] }
 0xeba   : > { %12982 = vst [vmem:[#allocation13_spill] sm:$0xff] %v11376_v25  ;;  %v4769_v23 = vpop.xlane.xlu1 %4768  ;;  %v4763_v3 = vpop.xlane.xlu0 %4762  ;;  %v12989_v43 = vld [vmem:[#allocation7_spill] sm:$0xff] }
 0xebb   : > { %v4854_v4 = vmin.f32 %v4769_v23, %v4833_v17  ;;  %v4851_v41 = vmin.f32 %v4763_v3, %v4827_v55  ;;  %5001 = vmin.xlane.f32.xlu1 %v11379_v42  ;;  %4995 = vmin.xlane.f32.xlu0 %v11382_v8  ;;  %v11399_v17 = vsel %vm4868_vm0, 1e+30, %v11053_v40  ;;  %v11402_v55 = vsel %vm4865_vm3, 1e+30, %v11056_v29  ;;  %v12991_v3 = vld [vmem:[#allocation8_spill] sm:$0xff] }
 0xebd   : > { %v11391_v36 = vsel %vm4940_vm1, %v4854_v4, %v12983_v45  ;;  %v11396_v62 = vsel %vm4940_vm1, %v4851_v41, %v12985_v11  ;;  %vm4870_vm4 = vcmp.eq.f32.partialorder %v7540_v15, %v4854_v4  ;;  %vm4867_vm5 = vcmp.eq.f32.partialorder %v7540_v15, %v4851_v41  ;;  %v12993_v45 = vld [vmem:[#allocation9_spill] sm:$0xff] }
 0xebe   : > { %12984 = vst [vmem:[#allocation14_spill] sm:$0xff] %v11391_v36  ;;  %12986 = vst [vmem:[#allocation15_spill] sm:$0xff] %v11396_v62  ;;  %v4773_v47 = vpop.xlane.xlu1 %4772  ;;  %v4767_v14 = vpop.xlane.xlu0 %4766 }
 0xebf   : > { %v4856_v56 = vmin.f32 %v4773_v47, %v11300_v16  ;;  %v4853_v19 = vmin.f32 %v4767_v14, %v11302_v59  ;;  %5005 = vmin.xlane.f32.xlu1 %v11399_v17  ;;  %4999 = vmin.xlane.f32.xlu0 %v11402_v55  ;;  %v11421_v16 = vsel %vm4870_vm4, 1e+30, %v11074_v37  ;;  %v11424_v59 = vsel %vm4867_vm5, 1e+30, %v11077_v7 }
 0xec1   : > { %v11413_v40 = vsel %vm4940_vm1, %v4856_v56, %v12987_v61  ;;  %v11418_v29 = vsel %vm4940_vm1, %v4853_v19, %v12989_v43  ;;  %vm4872_vm6 = vcmp.eq.f32.partialorder %v7540_v15, %v4856_v56  ;;  %vm4869_vm2 = vcmp.eq.f32.partialorder %v7540_v15, %v4853_v19  ;;  %v12995_v56 = vld [vmem:[#allocation11_spill] sm:$0xff] }
 0xec2   : > { %12988 = vst [vmem:[#allocation5_spill] sm:$0xff] %v11413_v40  ;;  %12990 = vst [vmem:[#allocation6_spill] sm:$0xff] %v11418_v29  ;;  %v4771_v26 = vpop.xlane.xlu0 %4770  ;;  %v11437_v41 = vsel %vm4872_vm6, 1e+30, %v11096_v9  ;;  %v11440_v7 = vsel %vm4869_vm2, 1e+30, %v11099_v30 }
 0xec3   : > { %v4855_v23 = vmin.f32 %v4771_v26, %v11306_v28  ;;  %5009 = vmin.xlane.f32.xlu1 %v11421_v16  ;;  %5003 = vmin.xlane.f32.xlu0 %v11424_v59 }
 0xec5   : > { %v11434_v4 = vsel %vm4940_vm1, %v4855_v23, %v12991_v3  ;;  %vm4871_vm7 = vcmp.eq.f32.partialorder %v7540_v15, %v4855_v23  ;;  %v12997_v3 = vld [vmem:[#allocation10_spill] sm:$0xff] }
 0xec6   : > { %12992 = vst [vmem:[#allocation7_spill] sm:$0xff] %v11434_v4  ;;  %v4775_v37 = vpop.xlane.xlu0 %4774  ;;  %v11452_v47 = vsel %vm4871_vm7, 1e+30, %v11111_v54 }
 0xec7   : > { %v4857_v28 = vmin.f32 %v4775_v37, %v11315_v35  ;;  %5013 = vmin.xlane.f32.xlu1 %v11437_v41  ;;  %5007 = vmin.xlane.f32.xlu0 %v11440_v7 }
 0xec9   : > { %v11449_v11 = vsel %vm4940_vm1, %v4857_v28, %v12993_v45  ;;  %vm4873_vm8 = vcmp.eq.f32.partialorder %v7540_v15, %v4857_v28 }
 0xeca   : > { %12994 = vst [vmem:[#allocation8_spill] sm:$0xff] %v11449_v11  ;;  %v11457_v9 = vsel %vm4873_vm8, 1e+30, %v11122_v50  ;;  %v12999_v11 = vld [vmem:[#allocation12_spill] sm:$0xff] }
 0xecb   : > { %5011 = vmin.xlane.f32.xlu0 %v11452_v47 }
 0xecf   : > { %5015 = vmin.xlane.f32.xlu0 %v11457_v9 }
 0xf18   : > { %v4777_v30 = vpop.xlane.xlu1 %4776 }
 0xf1c   : > { %v4841_v35 = vpop.xlane.xlu1 %4840 }
 0xf1d   : > { %v4858_v14 = vmin.f32 %v4777_v30, %v4841_v35 }
 0xf1f   : > { %v11463_v19 = vsel %vm4940_vm1, %v4858_v14, %v12995_v56  ;;  %vm4874_vm9 = vcmp.eq.f32.partialorder %v7540_v15, %v4858_v14 }
 0xf20   : > { %12996 = vst [vmem:[#allocation9_spill] sm:$0xff] %v11463_v19  ;;  %v5022_v54 = vpop.xlane.xlu1 %5021  ;;  %v4779_v61 = vpop.xlane.xlu0 %4778  ;;  %v11467_v43 = vsel %vm4874_vm9, 1e+30, %v11132_v22 }
 0xf21   : > { %5017 = vmin.xlane.f32.xlu1 %v11467_v43 }
 0xf24   : > { %v5026_v50 = vpop.xlane.xlu1 %5025  ;;  %v4843_v26 = vpop.xlane.xlu0 %4842 }
 0xf25   : > { %v4859_v23 = vmin.f32 %v4779_v61, %v4843_v26  ;;  %5049 = vmin.xlane.f32.xlu1 %v12763_v46 }
 0xf27   : > { %v11474_v37 = vsel %vm4940_vm1, %v4859_v23, %v12997_v3  ;;  %vm4875_vm10 = vcmp.eq.f32.partialorder %v7540_v15, %v4859_v23  ;;  %vm5293_vm1 = vcmp.eq.s32.totalorder %v7332_v18, 12 }
 0xf28   : > { %12998 = vst [vmem:[#allocation11_spill] sm:$0xff] %v11474_v37  ;;  %v5030_v28 = vpop.xlane.xlu1 %5029  ;;  %v5024_v45 = vpop.xlane.xlu0 %5023  ;;  %v11478_v30 = vsel %vm4875_vm10, 1e+30, %v11143_v60 }
 0xf29   : > { %5165 = vmin.xlane.f32.xlu1 %v12762_v57  ;;  %5019 = vmin.xlane.f32.xlu0 %v11478_v30 }
 0xf2c   : > { %v5034_v22 = vpop.xlane.xlu1 %5033  ;;  %v5028_v35 = vpop.xlane.xlu0 %5027 }
 0xf2d   : > { %5169 = vmin.xlane.f32.xlu1 %v12762_v57  ;;  %5051 = vmin.xlane.f32.xlu0 %v12763_v46 }
 0xf30   : > { %v5038_v14 = vpop.xlane.xlu1 %5037  ;;  %v5032_v56 = vpop.xlane.xlu0 %5031 }
 0xf31   : > { %5173 = vmin.xlane.f32.xlu1 %v12762_v57  ;;  %5167 = vmin.xlane.f32.xlu0 %v12762_v57 }
 0xf34   : > { %v5042_v61 = vpop.xlane.xlu1 %5041  ;;  %v5036_v26 = vpop.xlane.xlu0 %5035 }
 0xf35   : > { %5177 = vmin.xlane.f32.xlu1 %v12762_v57  ;;  %5171 = vmin.xlane.f32.xlu0 %v12762_v57 }
 0xf38   : > { %v11488_v60 = vpop.xlane.xlu1 %5045  ;;  %v11490_v23 = vpop.xlane.xlu0 %5039 }
 0xf39   : > { %5181 = vmin.xlane.f32.xlu1 %v12762_v57  ;;  %5175 = vmin.xlane.f32.xlu0 %v12762_v57 }
 0xf3c   : > { %v4990_v3 = vpop.xlane.xlu1 %4989  ;;  %v11495_v37 = vpop.xlane.xlu0 %5043 }
 0xf3d   : > { %v5053_v19 = vmin.f32 %v4990_v3, %v5022_v54  ;;  %5185 = vmin.xlane.f32.xlu1 %v12762_v57  ;;  %5179 = vmin.xlane.f32.xlu0 %v12762_v57 }
 0xf3f   : > { %v11502_v4 = vsel %vm5293_vm1, %v5053_v19, %v12999_v11  ;;  %vm5069_vm11 = vcmp.eq.f32.partialorder %v11326_v5, %v5053_v19 }
 0xf40   : > { %13000 = vst [vmem:[#allocation10_spill] sm:$0xff] %v11502_v4  ;;  %v4994_v29 = vpop.xlane.xlu1 %4993  ;;  %v11504_v40 = vpop.xlane.xlu0 %5047  ;;  %v5085_v11 = vsel %vm5069_vm11, %v7540_v15, 1e+09 }
 0xf41   : > { %v5055_v62 = vmin.f32 %v4994_v29, %v5026_v50  ;;  %5189 = vmin.xlane.f32.xlu1 %v12762_v57  ;;  %5183 = vmin.xlane.f32.xlu0 %v12762_v57 }
 0xf43   : > { %v11512_v54 = vsel %vm5293_vm1, %v5055_v62, %v11182_v44  ;;  %vm5071_vm12 = vcmp.eq.f32.partialorder %v11342_v34, %v5055_v62 }
 0xf44   : > { %v4998_v3 = vpop.xlane.xlu1 %4997  ;;  %v4992_v36 = vpop.xlane.xlu0 %4991 }
 0xf45   : > { %v5057_v4 = vmin.f32 %v4998_v3, %v5030_v28  ;;  %v5054_v25 = vmin.f32 %v4992_v36, %v5024_v45  ;;  %5101 = vmin.xlane.f32.xlu1 %v5085_v11  ;;  %5187 = vmin.xlane.f32.xlu0 %v12762_v57  ;;  %v5087_v28 = vsel %vm5071_vm12, %v7540_v15, 1e+09 }
 0xf47   : > { %v11520_v29 = vsel %vm5293_vm1, %v5057_v4, %v11190_v1  ;;  %v11525_v44 = vsel %vm5293_vm1, %v5054_v25, %v11195_v6  ;;  %vm5073_vm13 = vcmp.eq.f32.partialorder %v11359_v48, %v5057_v4  ;;  %vm5070_vm14 = vcmp.eq.f32.partialorder %v11362_v2, %v5054_v25 }
 0xf48   : > { %v5002_v19 = vpop.xlane.xlu1 %5001  ;;  %v4996_v50 = vpop.xlane.xlu0 %4995  ;;  %v5089_v4 = vsel %vm5073_vm13, %v7540_v15, 1e+09 }
 0xf49   : > { %v5059_v36 = vmin.f32 %v5002_v19, %v5034_v22  ;;  %v5056_v45 = vmin.f32 %v4996_v50, %v5028_v35  ;;  %5105 = vmin.xlane.f32.xlu1 %v5087_v28  ;;  %5191 = vmin.xlane.f32.xlu0 %v12762_v57  ;;  %v5086_v22 = vsel %vm5070_vm14, %v7540_v15, 1e+09 }
 0xf4b   : > { %v11534_v1 = vsel %vm5293_vm1, %v5059_v36, %v11205_v63  ;;  %v11539_v6 = vsel %vm5293_vm1, %v5056_v45, %v11210_v0  ;;  %vm5075_vm15 = vcmp.eq.f32.partialorder %v11379_v42, %v5059_v36  ;;  %vm5072_vm0 = vcmp.eq.f32.partialorder %v11382_v8, %v5056_v45 }
 0xf4c   : > { %v5006_v62 = vpop.xlane.xlu1 %5005  ;;  %v5000_v3 = vpop.xlane.xlu0 %4999  ;;  %v5091_v50 = vsel %vm5075_vm15, %v7540_v15, 1e+09 }
 0xf4d   : > { %v5061_v35 = vmin.f32 %v5006_v62, %v5038_v14  ;;  %v5058_v25 = vmin.f32 %v5000_v3, %v5032_v56  ;;  %5109 = vmin.xlane.f32.xlu1 %v5089_v4  ;;  %5103 = vmin.xlane.f32.xlu0 %v5086_v22  ;;  %v5088_v14 = vsel %vm5072_vm0, %v7540_v15, 1e+09 }
 0xf4f   : > { %v11548_v63 = vsel %vm5293_vm1, %v5061_v35, %v11219_v31  ;;  %v11553_v0 = vsel %vm5293_vm1, %v5058_v25, %v11224_v52  ;;  %vm5077_vm3 = vcmp.eq.f32.partialorder %v11399_v17, %v5061_v35  ;;  %vm5074_vm4 = vcmp.eq.f32.partialorder %v11402_v55, %v5058_v25 }
 0xf50   : > { %v5010_v11 = vpop.xlane.xlu1 %5009  ;;  %v5004_v19 = vpop.xlane.xlu0 %5003  ;;  %v5093_v62 = vsel %vm5077_vm3, %v7540_v15, 1e+09 }
 0xf51   : > { %v5063_v56 = vmin.f32 %v5010_v11, %v5042_v61  ;;  %v5060_v28 = vmin.f32 %v5004_v19, %v5036_v26  ;;  %5113 = vmin.xlane.f32.xlu1 %v5091_v50  ;;  %5107 = vmin.xlane.f32.xlu0 %v5088_v14  ;;  %v5090_v61 = vsel %vm5074_vm4, %v7540_v15, 1e+09 }
 0xf53   : > { %v11562_v31 = vsel %vm5293_vm1, %v5063_v56, %v11235_v27  ;;  %v11567_v52 = vsel %vm5293_vm1, %v5060_v28, %v11240_v58  ;;  %vm5079_vm5 = vcmp.eq.f32.partialorder %v11421_v16, %v5063_v56  ;;  %vm5076_vm6 = vcmp.eq.f32.partialorder %v11424_v59, %v5060_v28 }
 0xf54   : > { %v5014_v36 = vpop.xlane.xlu1 %5013  ;;  %v5008_v45 = vpop.xlane.xlu0 %5007  ;;  %v5095_v22 = vsel %vm5079_vm5, %v7540_v15, 1e+09 }
 0xf55   : > { %v5065_v26 = vmin.f32 %v5014_v36, %v11488_v60  ;;  %v5062_v3 = vmin.f32 %v5008_v45, %v11490_v23  ;;  %5117 = vmin.xlane.f32.xlu1 %v5093_v62  ;;  %5111 = vmin.xlane.f32.xlu0 %v5090_v61  ;;  %v5092_v60 = vsel %vm5076_vm6, %v7540_v15, 1e+09 }
 0xf57   : > { %v11578_v27 = vsel %vm5293_vm1, %v5065_v26, %v11251_v12  ;;  %v11583_v58 = vsel %vm5293_vm1, %v5062_v3, %v11256_v33  ;;  %vm5081_vm2 = vcmp.eq.f32.partialorder %v11437_v41, %v5065_v26  ;;  %vm5078_vm7 = vcmp.eq.f32.partialorder %v11440_v7, %v5062_v3 }
 0xf58   : > { %v5012_v4 = vpop.xlane.xlu0 %5011  ;;  %v5097_v35 = vsel %vm5081_vm2, %v7540_v15, 1e+09  ;;  %v5094_v25 = vsel %vm5078_vm7, %v7540_v15, 1e+09 }
 0xf59   : > { %v5064_v23 = vmin.f32 %v5012_v4, %v11495_v37  ;;  %5121 = vmin.xlane.f32.xlu1 %v5095_v22  ;;  %5115 = vmin.xlane.f32.xlu0 %v5092_v60 }
 0xf5b   : > { %v11593_v12 = vsel %vm5293_vm1, %v5064_v23, %v11266_v24  ;;  %vm5080_vm8 = vcmp.eq.f32.partialorder %v11452_v47, %v5064_v23 }
 0xf5c   : > { %v5016_v33 = vpop.xlane.xlu0 %5015  ;;  %v5096_v19 = vsel %vm5080_vm8, %v7540_v15, 1e+09 }
 0xf5d   : > { %v5066_v11 = vmin.f32 %v5016_v33, %v11504_v40  ;;  %5125 = vmin.xlane.f32.xlu1 %v5097_v35  ;;  %5119 = vmin.xlane.f32.xlu0 %v5094_v25 }
 0xf5f   : > { %v11602_v37 = vsel %vm5293_vm1, %v5066_v11, %v11274_v10  ;;  %vm5082_vm9 = vcmp.eq.f32.partialorder %v11457_v9, %v5066_v11 }
 0xf60   : > { %v5098_v24 = vsel %vm5082_vm9, %v7540_v15, 1e+09 }
 0xf61   : > { %5123 = vmin.xlane.f32.xlu0 %v5096_v19 }
 0xf65   : > { %5127 = vmin.xlane.f32.xlu0 %v5098_v24 }
 0xfae   : > { %v5018_v50 = vpop.xlane.xlu1 %5017 }
 0xfb2   : > { %v5050_v14 = vpop.xlane.xlu1 %5049 }
 0xfb3   : > { %v5067_v40 = vmin.f32 %v5018_v50, %v5050_v14 }
 0xfb5   : > { %v11610_v56 = vsel %vm5293_vm1, %v5067_v40, %v11281_v21  ;;  %vm5083_vm10 = vcmp.eq.f32.partialorder %v11467_v43, %v5067_v40 }
 0xfb6   : > { %v5166_v10 = vpop.xlane.xlu1 %5165  ;;  %v5020_v28 = vpop.xlane.xlu0 %5019  ;;  %v5099_v36 = vsel %vm5083_vm10, %v7540_v15, 1e+09 }
 0xfb7   : > { %5129 = vmin.xlane.f32.xlu1 %v5099_v36 }
 0xfba   : > { %v5170_v45 = vpop.xlane.xlu1 %5169  ;;  %v5052_v62 = vpop.xlane.xlu0 %5051 }
 0xfbb   : > { %v5068_v61 = vmin.f32 %v5020_v28, %v5052_v62  ;;  %5193 = vmin.xlane.f32.xlu1 %v12762_v57 }
 0xfbd   : > { %v11618_v26 = vsel %vm5293_vm1, %v5068_v61, %v11289_v20  ;;  %vm5084_vm11 = vcmp.eq.f32.partialorder %v11478_v30, %v5068_v61 }
 0xfbe   : > { %v5174_v21 = vpop.xlane.xlu1 %5173  ;;  %v5168_v3 = vpop.xlane.xlu0 %5167  ;;  %v5100_v4 = vsel %vm5084_vm11, %v7540_v15, 1e+09 }
 0xfbf   : > { %5374 = vmin.xlane.f32.xlu1 %v12763_v46  ;;  %5131 = vmin.xlane.f32.xlu0 %v5100_v4 }
 0xfc2   : > { %v5178_v22 = vpop.xlane.xlu1 %5177  ;;  %v5172_v60 = vpop.xlane.xlu0 %5171 }
 0xfc3   : > { %5378 = vmin.xlane.f32.xlu1 %v12763_v46  ;;  %5195 = vmin.xlane.f32.xlu0 %v12762_v57 }
 0xfc6   : > { %v5182_v23 = vpop.xlane.xlu1 %5181  ;;  %v5176_v33 = vpop.xlane.xlu0 %5175 }
 0xfc7   : > { %5382 = vmin.xlane.f32.xlu1 %v12763_v46  ;;  %5376 = vmin.xlane.f32.xlu0 %v12763_v46 }
 0xfca   : > { %v5186_v20 = vpop.xlane.xlu1 %5185  ;;  %v5180_v35 = vpop.xlane.xlu0 %5179 }
 0xfcb   : > { %5386 = vmin.xlane.f32.xlu1 %v12763_v46  ;;  %5380 = vmin.xlane.f32.xlu0 %v12763_v46 }
 0xfce   : > { %v11629_v25 = vpop.xlane.xlu1 %5189  ;;  %v11631_v11 = vpop.xlane.xlu0 %5183 }
 0xfcf   : > { %5390 = vmin.xlane.f32.xlu1 %v12763_v46  ;;  %5384 = vmin.xlane.f32.xlu0 %v12763_v46 }
 0xfd2   : > { %v5102_v19 = vpop.xlane.xlu1 %5101  ;;  %v11635_v24 = vpop.xlane.xlu0 %5187 }
 0xfd3   : > { %v5197_v50 = vmin.f32 %v5102_v19, %v5166_v10  ;;  %5394 = vmin.xlane.f32.xlu1 %v12763_v46  ;;  %5388 = vmin.xlane.f32.xlu0 %v12763_v46 }
 0xfd5   : > { %v11642_v14 = vsel %vm5293_vm1, %v5197_v50, %v11313_v51  ;;  %vm5213_vm12 = vcmp.eq.f32.partialorder %v7540_v15, %v5197_v50 }
 0xfd6   : > { %v5106_v40 = vpop.xlane.xlu1 %5105  ;;  %v11644_v28 = vpop.xlane.xlu0 %5191  ;;  %v11655_v51 = vsel %vm5213_vm12, 1e+30, %v11326_v5 }
 0xfd7   : > { %v5199_v36 = vmin.f32 %v5106_v40, %v5170_v45  ;;  %5398 = vmin.xlane.f32.xlu1 %v12763_v46  ;;  %5392 = vmin.xlane.f32.xlu0 %v12763_v46 }
 0xfd9   : > { %v11652_v10 = vsel %vm5293_vm1, %v5199_v36, %v11323_v53  ;;  %vm5215_vm13 = vcmp.eq.f32.partialorder %v7540_v15, %v5199_v36 }
 0xfda   : > { %v5110_v62 = vpop.xlane.xlu1 %5109  ;;  %v5104_v61 = vpop.xlane.xlu0 %5103 }
 0xfdb   : > { %v5201_v4 = vmin.f32 %v5110_v62, %v5174_v21  ;;  %v5198_v19 = vmin.f32 %v5104_v61, %v5168_v3  ;;  %5342 = vmin.xlane.f32.xlu1 %v11655_v51  ;;  %5396 = vmin.xlane.f32.xlu0 %v12763_v46  ;;  %v11671_v21 = vsel %vm5215_vm13, 1e+30, %v11342_v34 }
 0xfdd   : > { %v11663_v45 = vsel %vm5293_vm1, %v5201_v4, %v11334_v39  ;;  %v11668_v53 = vsel %vm5293_vm1, %v5198_v19, %v11339_v13  ;;  %vm5217_vm14 = vcmp.eq.f32.partialorder %v7540_v15, %v5201_v4  ;;  %vm5214_vm15 = vcmp.eq.f32.partialorder %v7540_v15, %v5198_v19 }
 0xfde   : > { %v5114_v5 = vpop.xlane.xlu1 %5113  ;;  %v5108_v50 = vpop.xlane.xlu0 %5107 }
 0xfdf   : > { %v5203_v3 = vmin.f32 %v5114_v5, %v5178_v22  ;;  %v5200_v40 = vmin.f32 %v5108_v50, %v5172_v60  ;;  %5346 = vmin.xlane.f32.xlu1 %v11671_v21  ;;  %5400 = vmin.xlane.f32.xlu0 %v12763_v46  ;;  %v11688_v22 = vsel %vm5217_vm14, 1e+30, %v11359_v48  ;;  %v11691_v60 = vsel %vm5214_vm15, 1e+30, %v11362_v2 }
 0xfe1   : > { %v11680_v39 = vsel %vm5293_vm1, %v5203_v3, %v11351_v32  ;;  %v11685_v13 = vsel %vm5293_vm1, %v5200_v40, %v11356_v49  ;;  %vm5219_vm0 = vcmp.eq.f32.partialorder %v7540_v15, %v5203_v3  ;;  %vm5216_vm3 = vcmp.eq.f32.partialorder %v7540_v15, %v5200_v40  ;;  %v13001_v49 = vld [vmem:[#allocation13_spill] sm:$0xff] }
 0xfe2   : > { %v5118_v34 = vpop.xlane.xlu1 %5117  ;;  %v5112_v36 = vpop.xlane.xlu0 %5111 }
 0xfe3   : > { %v5205_v62 = vmin.f32 %v5118_v34, %v5182_v23  ;;  %v5202_v61 = vmin.f32 %v5112_v36, %v5176_v33  ;;  %5350 = vmin.xlane.f32.xlu1 %v11688_v22  ;;  %5344 = vmin.xlane.f32.xlu0 %v11691_v60  ;;  %v11708_v23 = vsel %vm5219_vm0, 1e+30, %v11379_v42  ;;  %v11711_v33 = vsel %vm5216_vm3, 1e+30, %v11382_v8  ;;  %v13005_v42 = vld [vmem:[#allocation15_spill] sm:$0xff] }
 0xfe5   : > { %v11700_v32 = vsel %vm5293_vm1, %v5205_v62, %v11371_v38  ;;  %v11705_v48 = vsel %vm5293_vm1, %v5202_v61, %v13001_v49  ;;  %vm5221_vm4 = vcmp.eq.f32.partialorder %v7540_v15, %v5205_v62  ;;  %vm5218_vm5 = vcmp.eq.f32.partialorder %v7540_v15, %v5202_v61  ;;  %v13003_v38 = vld [vmem:[#allocation14_spill] sm:$0xff]  ;;  %v13007_v62 = vld [vmem:[#allocation5_spill] sm:$0xff] }
 0xfe6   : > { %13002 = vst [vmem:[#allocation12_spill] sm:$0xff] %v11705_v48  ;;  %v5122_v2 = vpop.xlane.xlu1 %5121  ;;  %v5116_v4 = vpop.xlane.xlu0 %5115  ;;  %v13009_v61 = vld [vmem:[#allocation6_spill] sm:$0xff] }
 0xfe7   : > { %v5207_v19 = vmin.f32 %v5122_v2, %v5186_v20  ;;  %v5204_v5 = vmin.f32 %v5116_v4, %v5180_v35  ;;  %5354 = vmin.xlane.f32.xlu1 %v11708_v23  ;;  %5348 = vmin.xlane.f32.xlu0 %v11711_v33  ;;  %v11728_v20 = vsel %vm5221_vm4, 1e+30, %v11399_v17  ;;  %v11731_v35 = vsel %vm5218_vm5, 1e+30, %v11402_v55  ;;  %v13011_v4 = vld [vmem:[#allocation7_spill] sm:$0xff] }
 0xfe9   : > { %v11720_v50 = vsel %vm5293_vm1, %v5207_v19, %v13003_v38  ;;  %v11725_v8 = vsel %vm5293_vm1, %v5204_v5, %v13005_v42  ;;  %vm5223_vm6 = vcmp.eq.f32.partialorder %v7540_v15, %v5207_v19  ;;  %vm5220_vm2 = vcmp.eq.f32.partialorder %v7540_v15, %v5204_v5  ;;  %v13013_v38 = vld [vmem:[#allocation8_spill] sm:$0xff] }
 0xfea   : > { %13004 = vst [vmem:[#allocation13_spill] sm:$0xff] %v11720_v50  ;;  %13006 = vst [vmem:[#allocation14_spill] sm:$0xff] %v11725_v8  ;;  %v5126_v3 = vpop.xlane.xlu1 %5125  ;;  %v5120_v40 = vpop.xlane.xlu0 %5119 }
 0xfeb   : > { %v5209_v34 = vmin.f32 %v5126_v3, %v11629_v25  ;;  %v5206_v36 = vmin.f32 %v5120_v40, %v11631_v11  ;;  %5358 = vmin.xlane.f32.xlu1 %v11728_v20  ;;  %5352 = vmin.xlane.f32.xlu0 %v11731_v35  ;;  %v11750_v25 = vsel %vm5223_vm6, 1e+30, %v11421_v16  ;;  %v11753_v11 = vsel %vm5220_vm2, 1e+30, %v11424_v59 }
 0xfed   : > { %v11742_v17 = vsel %vm5293_vm1, %v5209_v34, %v13007_v62  ;;  %v11747_v55 = vsel %vm5293_vm1, %v5206_v36, %v13009_v61  ;;  %vm5225_vm7 = vcmp.eq.f32.partialorder %v7540_v15, %v5209_v34  ;;  %vm5222_vm8 = vcmp.eq.f32.partialorder %v7540_v15, %v5206_v36  ;;  %v13015_v34 = vld [vmem:[#allocation9_spill] sm:$0xff] }
 0xfee   : > { %13008 = vst [vmem:[#allocation15_spill] sm:$0xff] %v11742_v17  ;;  %13010 = vst [vmem:[#allocation5_spill] sm:$0xff] %v11747_v55  ;;  %v5124_v49 = vpop.xlane.xlu0 %5123  ;;  %v11766_v5 = vsel %vm5225_vm7, 1e+30, %v11437_v41  ;;  %v11769_v59 = vsel %vm5222_vm8, 1e+30, %v11440_v7 }
 0xfef   : > { %v5208_v2 = vmin.f32 %v5124_v49, %v11635_v24  ;;  %5362 = vmin.xlane.f32.xlu1 %v11750_v25  ;;  %5356 = vmin.xlane.f32.xlu0 %v11753_v11 }
 0xff1   : > { %v11763_v19 = vsel %vm5293_vm1, %v5208_v2, %v13011_v4  ;;  %vm5224_vm9 = vcmp.eq.f32.partialorder %v7540_v15, %v5208_v2  ;;  %v13017_v4 = vld [vmem:[#allocation11_spill] sm:$0xff] }
 0xff2   : > { %13012 = vst [vmem:[#allocation6_spill] sm:$0xff] %v11763_v19  ;;  %v5128_v16 = vpop.xlane.xlu0 %5127  ;;  %v11781_v3 = vsel %vm5224_vm9, 1e+30, %v11452_v47 }
 0xff3   : > { %v5210_v24 = vmin.f32 %v5128_v16, %v11644_v28  ;;  %5366 = vmin.xlane.f32.xlu1 %v11766_v5  ;;  %5360 = vmin.xlane.f32.xlu0 %v11769_v59 }
 0xff5   : > { %v11778_v42 = vsel %vm5293_vm1, %v5210_v24, %v13013_v38  ;;  %vm5226_vm10 = vcmp.eq.f32.partialorder %v7540_v15, %v5210_v24 }
 0xff6   : > { %13014 = vst [vmem:[#allocation7_spill] sm:$0xff] %v11778_v42  ;;  %v11786_v41 = vsel %vm5226_vm10, 1e+30, %v11457_v9  ;;  %v13019_v42 = vld [vmem:[#allocation10_spill] sm:$0xff] }
 0xff7   : > { %5364 = vmin.xlane.f32.xlu0 %v11781_v3 }
 0xffb   : > { %5368 = vmin.xlane.f32.xlu0 %v11786_v41 }
0x1044   : > { %v5130_v7 = vpop.xlane.xlu1 %5129 }
0x1048   : > { %v5194_v28 = vpop.xlane.xlu1 %5193 }
0x1049   : > { %v5211_v40 = vmin.f32 %v5130_v7, %v5194_v28 }
0x104b   : > { %v11792_v36 = vsel %vm5293_vm1, %v5211_v40, %v13015_v34  ;;  %vm5227_vm11 = vcmp.eq.f32.partialorder %v7540_v15, %v5211_v40 }
0x104c   : > { %13016 = vst [vmem:[#allocation8_spill] sm:$0xff] %v11792_v36  ;;  %v5375_v47 = vpop.xlane.xlu1 %5374  ;;  %v5132_v62 = vpop.xlane.xlu0 %5131  ;;  %v11796_v61 = vsel %vm5227_vm11, 1e+30, %v11467_v43 }
0x104d   : > { %5370 = vmin.xlane.f32.xlu1 %v11796_v61 }
0x1050   : > { %v5379_v9 = vpop.xlane.xlu1 %5378  ;;  %v5196_v49 = vpop.xlane.xlu0 %5195 }
0x1051   : > { %v5212_v2 = vmin.f32 %v5132_v62, %v5196_v49  ;;  %5402 = vmin.xlane.f32.xlu1 %v12763_v46 }
0x1053   : > { %v11803_v16 = vsel %vm5293_vm1, %v5212_v2, %v13017_v4  ;;  %vm5228_vm12 = vcmp.eq.f32.partialorder %v7540_v15, %v5212_v2  ;;  %vm5646_vm1 = vcmp.eq.s32.totalorder %v7332_v18, 13 }
0x1054   : > { %13018 = vst [vmem:[#allocation9_spill] sm:$0xff] %v11803_v16  ;;  %v5383_v24 = vpop.xlane.xlu1 %5382  ;;  %v5377_v38 = vpop.xlane.xlu0 %5376  ;;  %v11807_v7 = vsel %vm5228_vm12, 1e+30, %v11478_v30 }
0x1055   : > { %5518 = vmin.xlane.f32.xlu1 %v12762_v57  ;;  %5372 = vmin.xlane.f32.xlu0 %v11807_v7 }
0x1058   : > { %v5387_v43 = vpop.xlane.xlu1 %5386  ;;  %v5381_v28 = vpop.xlane.xlu0 %5380 }
0x1059   : > { %5522 = vmin.xlane.f32.xlu1 %v12762_v57  ;;  %5404 = vmin.xlane.f32.xlu0 %v12763_v46 }
0x105c   : > { %v5391_v40 = vpop.xlane.xlu1 %5390  ;;  %v5385_v34 = vpop.xlane.xlu0 %5384 }
0x105d   : > { %5526 = vmin.xlane.f32.xlu1 %v12762_v57  ;;  %5520 = vmin.xlane.f32.xlu0 %v12762_v57 }
0x1060   : > { %v5395_v62 = vpop.xlane.xlu1 %5394  ;;  %v5389_v49 = vpop.xlane.xlu0 %5388 }
0x1061   : > { %5530 = vmin.xlane.f32.xlu1 %v12762_v57  ;;  %5524 = vmin.xlane.f32.xlu0 %v12762_v57 }
0x1064   : > { %v11817_v30 = vpop.xlane.xlu1 %5398  ;;  %v11819_v2 = vpop.xlane.xlu0 %5392 }
0x1065   : > { %5534 = vmin.xlane.f32.xlu1 %v12762_v57  ;;  %5528 = vmin.xlane.f32.xlu0 %v12762_v57 }
0x1068   : > { %v5343_v4 = vpop.xlane.xlu1 %5342  ;;  %v11824_v16 = vpop.xlane.xlu0 %5396 }
0x1069   : > { %v5406_v36 = vmin.f32 %v5343_v4, %v5375_v47  ;;  %5538 = vmin.xlane.f32.xlu1 %v12762_v57  ;;  %5532 = vmin.xlane.f32.xlu0 %v12762_v57 }
0x106b   : > { %v11831_v19 = vsel %vm5646_vm1, %v5406_v36, %v13019_v42  ;;  %vm5422_vm13 = vcmp.eq.f32.partialorder %v11655_v51, %v5406_v36 }
0x106c   : > { %13020 = vst [vmem:[#allocation11_spill] sm:$0xff] %v11831_v19  ;;  %v5347_v55 = vpop.xlane.xlu1 %5346  ;;  %v11833_v17 = vpop.xlane.xlu0 %5400  ;;  %v5438_v42 = vsel %vm5422_vm13, %v7540_v15, 1e+09 }
0x106d   : > { %v5408_v8 = vmin.f32 %v5347_v55, %v5379_v9  ;;  %5542 = vmin.xlane.f32.xlu1 %v12762_v57  ;;  %5536 = vmin.xlane.f32.xlu0 %v12762_v57 }
0x106f   : > { %v11841_v47 = vsel %vm5646_vm1, %v5408_v8, %v11512_v54  ;;  %vm5424_vm14 = vcmp.eq.f32.partialorder %v11671_v21, %v5408_v8 }
0x1070   : > { %v5351_v4 = vpop.xlane.xlu1 %5350  ;;  %v5345_v50 = vpop.xlane.xlu0 %5344 }
0x1071   : > { %v5410_v19 = vmin.f32 %v5351_v4, %v5383_v24  ;;  %v5407_v48 = vmin.f32 %v5345_v50, %v5377_v38  ;;  %5454 = vmin.xlane.f32.xlu1 %v5438_v42  ;;  %5540 = vmin.xlane.f32.xlu0 %v12762_v57  ;;  %v5440_v24 = vsel %vm5424_vm14, %v7540_v15, 1e+09 }
0x1073   : > { %v11849_v55 = vsel %vm5646_vm1, %v5410_v19, %v11520_v29  ;;  %v11854_v54 = vsel %vm5646_vm1, %v5407_v48, %v11525_v44  ;;  %vm5426_vm15 = vcmp.eq.f32.partialorder %v11688_v22, %v5410_v19  ;;  %vm5423_vm0 = vcmp.eq.f32.partialorder %v11691_v60, %v5407_v48 }
0x1074   : > { %v5355_v36 = vpop.xlane.xlu1 %5354  ;;  %v5349_v9 = vpop.xlane.xlu0 %5348  ;;  %v5442_v19 = vsel %vm5426_vm15, %v7540_v15, 1e+09 }
0x1075   : > { %v5412_v50 = vmin.f32 %v5355_v36, %v5387_v43  ;;  %v5409_v38 = vmin.f32 %v5349_v9, %v5381_v28  ;;  %5458 = vmin.xlane.f32.xlu1 %v5440_v24  ;;  %5544 = vmin.xlane.f32.xlu0 %v12762_v57  ;;  %v5439_v43 = vsel %vm5423_vm0, %v7540_v15, 1e+09 }
0x1077   : > { %v11863_v29 = vsel %vm5646_vm1, %v5412_v50, %v11534_v1  ;;  %v11868_v44 = vsel %vm5646_vm1, %v5409_v38, %v11539_v6  ;;  %vm5428_vm3 = vcmp.eq.f32.partialorder %v11708_v23, %v5412_v50  ;;  %vm5425_vm4 = vcmp.eq.f32.partialorder %v11711_v33, %v5409_v38 }
0x1078   : > { %v5359_v8 = vpop.xlane.xlu1 %5358  ;;  %v5353_v4 = vpop.xlane.xlu0 %5352  ;;  %v5444_v9 = vsel %vm5428_vm3, %v7540_v15, 1e+09 }
0x1079   : > { %v5414_v28 = vmin.f32 %v5359_v8, %v5391_v40  ;;  %v5411_v48 = vmin.f32 %v5353_v4, %v5385_v34  ;;  %5462 = vmin.xlane.f32.xlu1 %v5442_v19  ;;  %5456 = vmin.xlane.f32.xlu0 %v5439_v43  ;;  %v5441_v40 = vsel %vm5425_vm4, %v7540_v15, 1e+09 }
0x107b   : > { %v11877_v1 = vsel %vm5646_vm1, %v5414_v28, %v11548_v63  ;;  %v11882_v6 = vsel %vm5646_vm1, %v5411_v48, %v11553_v0  ;;  %vm5430_vm5 = vcmp.eq.f32.partialorder %v11728_v20, %v5414_v28  ;;  %vm5427_vm6 = vcmp.eq.f32.partialorder %v11731_v35, %v5411_v48 }
0x107c   : > { %v5363_v42 = vpop.xlane.xlu1 %5362  ;;  %v5357_v36 = vpop.xlane.xlu0 %5356  ;;  %v5446_v8 = vsel %vm5430_vm5, %v7540_v15, 1e+09 }
0x107d   : > { %v5416_v34 = vmin.f32 %v5363_v42, %v5395_v62  ;;  %v5413_v24 = vmin.f32 %v5357_v36, %v5389_v49  ;;  %5466 = vmin.xlane.f32.xlu1 %v5444_v9  ;;  %5460 = vmin.xlane.f32.xlu0 %v5441_v40  ;;  %v5443_v62 = vsel %vm5427_vm6, %v7540_v15, 1e+09 }
0x107f   : > { %v11891_v63 = vsel %vm5646_vm1, %v5416_v34, %v11562_v31  ;;  %v11896_v0 = vsel %vm5646_vm1, %v5413_v24, %v11567_v52  ;;  %vm5432_vm2 = vcmp.eq.f32.partialorder %v11750_v25, %v5416_v34  ;;  %vm5429_vm7 = vcmp.eq.f32.partialorder %v11753_v11, %v5413_v24 }
0x1080   : > { %v5367_v50 = vpop.xlane.xlu1 %5366  ;;  %v5361_v38 = vpop.xlane.xlu0 %5360  ;;  %v5448_v43 = vsel %vm5432_vm2, %v7540_v15, 1e+09 }
0x1081   : > { %v5418_v49 = vmin.f32 %v5367_v50, %v11817_v30  ;;  %v5415_v4 = vmin.f32 %v5361_v38, %v11819_v2  ;;  %5470 = vmin.xlane.f32.xlu1 %v5446_v8  ;;  %5464 = vmin.xlane.f32.xlu0 %v5443_v62  ;;  %v5445_v30 = vsel %vm5429_vm7, %v7540_v15, 1e+09 }
0x1083   : > { %v11907_v31 = vsel %vm5646_vm1, %v5418_v49, %v11578_v27  ;;  %v11912_v52 = vsel %vm5646_vm1, %v5415_v4, %v11583_v58  ;;  %vm5434_vm8 = vcmp.eq.f32.partialorder %v11766_v5, %v5418_v49  ;;  %vm5431_vm9 = vcmp.eq.f32.partialorder %v11769_v59, %v5415_v4 }
0x1084   : > { %v5365_v19 = vpop.xlane.xlu0 %5364  ;;  %v5450_v28 = vsel %vm5434_vm8, %v7540_v15, 1e+09  ;;  %v5447_v48 = vsel %vm5431_vm9, %v7540_v15, 1e+09 }
0x1085   : > { %v5417_v2 = vmin.f32 %v5365_v19, %v11824_v16  ;;  %5474 = vmin.xlane.f32.xlu1 %v5448_v43  ;;  %5468 = vmin.xlane.f32.xlu0 %v5445_v30 }
0x1087   : > { %v11922_v27 = vsel %vm5646_vm1, %v5417_v2, %v11593_v12  ;;  %vm5433_vm10 = vcmp.eq.f32.partialorder %v11781_v3, %v5417_v2 }
0x1088   : > { %v5369_v58 = vpop.xlane.xlu0 %5368  ;;  %v5449_v36 = vsel %vm5433_vm10, %v7540_v15, 1e+09 }
0x1089   : > { %v5419_v42 = vmin.f32 %v5369_v58, %v11833_v17  ;;  %5478 = vmin.xlane.f32.xlu1 %v5450_v28  ;;  %5472 = vmin.xlane.f32.xlu0 %v5447_v48 }
0x108b   : > { %v11931_v16 = vsel %vm5646_vm1, %v5419_v42, %v11602_v37  ;;  %vm5435_vm11 = vcmp.eq.f32.partialorder %v11786_v41, %v5419_v42 }
0x108c   : > { %v5451_v12 = vsel %vm5435_vm11, %v7540_v15, 1e+09 }
0x108d   : > { %5476 = vmin.xlane.f32.xlu0 %v5449_v36 }
0x1091   : > { %5480 = vmin.xlane.f32.xlu0 %v5451_v12 }
0x10da   : > { %v5371_v9 = vpop.xlane.xlu1 %5370 }
0x10de   : > { %v5403_v40 = vpop.xlane.xlu1 %5402 }
0x10df   : > { %v5420_v17 = vmin.f32 %v5371_v9, %v5403_v40 }
0x10e1   : > { %v11939_v34 = vsel %vm5646_vm1, %v5420_v17, %v11610_v56  ;;  %vm5436_vm12 = vcmp.eq.f32.partialorder %v11796_v61, %v5420_v17 }
0x10e2   : > { %v5519_v37 = vpop.xlane.xlu1 %5518  ;;  %v5373_v24 = vpop.xlane.xlu0 %5372  ;;  %v5452_v50 = vsel %vm5436_vm12, %v7540_v15, 1e+09 }
0x10e3   : > { %5482 = vmin.xlane.f32.xlu1 %v5452_v50 }
0x10e6   : > { %v5523_v38 = vpop.xlane.xlu1 %5522  ;;  %v5405_v8 = vpop.xlane.xlu0 %5404 }
0x10e7   : > { %v5421_v62 = vmin.f32 %v5373_v24, %v5405_v8  ;;  %5546 = vmin.xlane.f32.xlu1 %v12762_v57 }
0x10e9   : > { %v11947_v49 = vsel %vm5646_vm1, %v5421_v62, %v11618_v26  ;;  %vm5437_vm13 = vcmp.eq.f32.partialorder %v11807_v7, %v5421_v62 }
0x10ea   : > { %v5527_v56 = vpop.xlane.xlu1 %5526  ;;  %v5521_v4 = vpop.xlane.xlu0 %5520  ;;  %v5453_v19 = vsel %vm5437_vm13, %v7540_v15, 1e+09 }
0x10eb   : > { %5727 = vmin.xlane.f32.xlu1 %v12763_v46  ;;  %5484 = vmin.xlane.f32.xlu0 %v5453_v19 }
0x10ee   : > { %v5531_v43 = vpop.xlane.xlu1 %5530  ;;  %v5525_v30 = vpop.xlane.xlu0 %5524 }
0x10ef   : > { %5731 = vmin.xlane.f32.xlu1 %v12763_v46  ;;  %5548 = vmin.xlane.f32.xlu0 %v12762_v57 }
0x10f2   : > { %v5535_v2 = vpop.xlane.xlu1 %5534  ;;  %v5529_v58 = vpop.xlane.xlu0 %5528 }
0x10f3   : > { %5735 = vmin.xlane.f32.xlu1 %v12763_v46  ;;  %5729 = vmin.xlane.f32.xlu0 %v12763_v46 }
0x10f6   : > { %v5539_v26 = vpop.xlane.xlu1 %5538  ;;  %v5533_v28 = vpop.xlane.xlu0 %5532 }
0x10f7   : > { %5739 = vmin.xlane.f32.xlu1 %v12763_v46  ;;  %5733 = vmin.xlane.f32.xlu0 %v12763_v46 }
0x10fa   : > { %v11958_v48 = vpop.xlane.xlu1 %5542  ;;  %v11960_v42 = vpop.xlane.xlu0 %5536 }
0x10fb   : > { %5743 = vmin.xlane.f32.xlu1 %v12763_v46  ;;  %5737 = vmin.xlane.f32.xlu0 %v12763_v46 }
0x10fe   : > { %v5455_v36 = vpop.xlane.xlu1 %5454  ;;  %v11964_v12 = vpop.xlane.xlu0 %5540 }
0x10ff   : > { %v5550_v9 = vmin.f32 %v5455_v36, %v5519_v37  ;;  %5747 = vmin.xlane.f32.xlu1 %v12763_v46  ;;  %5741 = vmin.xlane.f32.xlu0 %v12763_v46 }
0x1101   : > { %v11971_v40 = vsel %vm5646_vm1, %v5550_v9, %v11642_v14  ;;  %vm5566_vm14 = vcmp.eq.f32.partialorder %v7540_v15, %v5550_v9 }
0x1102   : > { %v5459_v17 = vpop.xlane.xlu1 %5458  ;;  %v11973_v24 = vpop.xlane.xlu0 %5544  ;;  %v11984_v14 = vsel %vm5566_vm14, 1e+30, %v11655_v51 }
0x1103   : > { %v5552_v50 = vmin.f32 %v5459_v17, %v5523_v38  ;;  %5751 = vmin.xlane.f32.xlu1 %v12763_v46  ;;  %5745 = vmin.xlane.f32.xlu0 %v12763_v46 }
0x1105   : > { %v11981_v37 = vsel %vm5646_vm1, %v5552_v50, %v11652_v10  ;;  %vm5568_vm15 = vcmp.eq.f32.partialorder %v7540_v15, %v5552_v50 }
0x1106   : > { %v5463_v8 = vpop.xlane.xlu1 %5462  ;;  %v5457_v62 = vpop.xlane.xlu0 %5456 }
0x1107   : > { %v5554_v19 = vmin.f32 %v5463_v8, %v5527_v56  ;;  %v5551_v36 = vmin.f32 %v5457_v62, %v5521_v4  ;;  %5695 = vmin.xlane.f32.xlu1 %v11984_v14  ;;  %5749 = vmin.xlane.f32.xlu0 %v12763_v46  ;;  %v12000_v56 = vsel %vm5568_vm15, 1e+30, %v11671_v21 }
0x1109   : > { %v11992_v38 = vsel %vm5646_vm1, %v5554_v19, %v11663_v45  ;;  %v11997_v10 = vsel %vm5646_vm1, %v5551_v36, %v11668_v53  ;;  %vm5570_vm0 = vcmp.eq.f32.partialorder %v7540_v15, %v5554_v19  ;;  %vm5567_vm3 = vcmp.eq.f32.partialorder %v7540_v15, %v5551_v36 }
0x110a   : > { %v5467_v51 = vpop.xlane.xlu1 %5466  ;;  %v5461_v9 = vpop.xlane.xlu0 %5460 }
0x110b   : > { %v5556_v4 = vmin.f32 %v5467_v51, %v5531_v43  ;;  %v5553_v17 = vmin.f32 %v5461_v9, %v5525_v30  ;;  %5699 = vmin.xlane.f32.xlu1 %v12000_v56  ;;  %5753 = vmin.xlane.f32.xlu0 %v12763_v46  ;;  %v12017_v43 = vsel %vm5570_vm0, 1e+30, %v11688_v22  ;;  %v12020_v30 = vsel %vm5567_vm3, 1e+30, %v11691_v60 }
0x110d   : > { %v12009_v45 = vsel %vm5646_vm1, %v5556_v4, %v11680_v39  ;;  %v12014_v53 = vsel %vm5646_vm1, %v5553_v17, %v11685_v13  ;;  %vm5572_vm4 = vcmp.eq.f32.partialorder %v7540_v15, %v5556_v4  ;;  %vm5569_vm5 = vcmp.eq.f32.partialorder %v7540_v15, %v5553_v17  ;;  %v13021_v13 = vld [vmem:[#allocation12_spill] sm:$0xff] }
0x110e   : > { %v5471_v21 = vpop.xlane.xlu1 %5470  ;;  %v5465_v50 = vpop.xlane.xlu0 %5464 }
0x110f   : > { %v5558_v8 = vmin.f32 %v5471_v21, %v5535_v2  ;;  %v5555_v62 = vmin.f32 %v5465_v50, %v5529_v58  ;;  %5703 = vmin.xlane.f32.xlu1 %v12017_v43  ;;  %5697 = vmin.xlane.f32.xlu0 %v12020_v30  ;;  %v12037_v2 = vsel %vm5572_vm4, 1e+30, %v11708_v23  ;;  %v12040_v58 = vsel %vm5569_vm5, 1e+30, %v11711_v33  ;;  %v13025_v23 = vld [vmem:[#allocation14_spill] sm:$0xff] }
0x1111   : > { %v12029_v39 = vsel %vm5646_vm1, %v5558_v8, %v11700_v32  ;;  %v12034_v22 = vsel %vm5646_vm1, %v5555_v62, %v13021_v13  ;;  %vm5574_vm6 = vcmp.eq.f32.partialorder %v7540_v15, %v5558_v8  ;;  %vm5571_vm2 = vcmp.eq.f32.partialorder %v7540_v15, %v5555_v62  ;;  %v13023_v32 = vld [vmem:[#allocation13_spill] sm:$0xff]  ;;  %v13027_v8 = vld [vmem:[#allocation15_spill] sm:$0xff] }
0x1112   : > { %13022 = vst [vmem:[#allocation10_spill] sm:$0xff] %v12034_v22  ;;  %v5475_v60 = vpop.xlane.xlu1 %5474  ;;  %v5469_v19 = vpop.xlane.xlu0 %5468  ;;  %v13029_v62 = vld [vmem:[#allocation5_spill] sm:$0xff] }
0x1113   : > { %v5560_v36 = vmin.f32 %v5475_v60, %v5539_v26  ;;  %v5557_v51 = vmin.f32 %v5469_v19, %v5533_v28  ;;  %5707 = vmin.xlane.f32.xlu1 %v12037_v2  ;;  %5701 = vmin.xlane.f32.xlu0 %v12040_v58  ;;  %v12057_v26 = vsel %vm5574_vm6, 1e+30, %v11728_v20  ;;  %v12060_v28 = vsel %vm5571_vm2, 1e+30, %v11731_v35  ;;  %v13031_v19 = vld [vmem:[#allocation6_spill] sm:$0xff] }
0x1115   : > { %v12049_v9 = vsel %vm5646_vm1, %v5560_v36, %v13023_v32  ;;  %v12054_v33 = vsel %vm5646_vm1, %v5557_v51, %v13025_v23  ;;  %vm5576_vm7 = vcmp.eq.f32.partialorder %v7540_v15, %v5560_v36  ;;  %vm5573_vm8 = vcmp.eq.f32.partialorder %v7540_v15, %v5557_v51  ;;  %v13033_v32 = vld [vmem:[#allocation7_spill] sm:$0xff] }
0x1116   : > { %13024 = vst [vmem:[#allocation12_spill] sm:$0xff] %v12049_v9  ;;  %13026 = vst [vmem:[#allocation13_spill] sm:$0xff] %v12054_v33  ;;  %v5479_v4 = vpop.xlane.xlu1 %5478  ;;  %v5473_v17 = vpop.xlane.xlu0 %5472 }
0x1117   : > { %v5562_v21 = vmin.f32 %v5479_v4, %v11958_v48  ;;  %v5559_v50 = vmin.f32 %v5473_v17, %v11960_v42  ;;  %5711 = vmin.xlane.f32.xlu1 %v12057_v26  ;;  %5705 = vmin.xlane.f32.xlu0 %v12060_v28  ;;  %v12079_v48 = vsel %vm5576_vm7, 1e+30, %v11750_v25  ;;  %v12082_v42 = vsel %vm5573_vm8, 1e+30, %v11753_v11 }
0x1119   : > { %v12071_v20 = vsel %vm5646_vm1, %v5562_v21, %v13027_v8  ;;  %v12076_v35 = vsel %vm5646_vm1, %v5559_v50, %v13029_v62  ;;  %vm5578_vm9 = vcmp.eq.f32.partialorder %v7540_v15, %v5562_v21  ;;  %vm5575_vm10 = vcmp.eq.f32.partialorder %v7540_v15, %v5559_v50  ;;  %v13035_v21 = vld [vmem:[#allocation8_spill] sm:$0xff] }
0x111a   : > { %13028 = vst [vmem:[#allocation14_spill] sm:$0xff] %v12071_v20  ;;  %13030 = vst [vmem:[#allocation15_spill] sm:$0xff] %v12076_v35  ;;  %v5477_v13 = vpop.xlane.xlu0 %5476  ;;  %v12095_v51 = vsel %vm5578_vm9, 1e+30, %v11766_v5  ;;  %v12098_v11 = vsel %vm5575_vm10, 1e+30, %v11769_v59 }
0x111b   : > { %v5561_v60 = vmin.f32 %v5477_v13, %v11964_v12  ;;  %5715 = vmin.xlane.f32.xlu1 %v12079_v48  ;;  %5709 = vmin.xlane.f32.xlu0 %v12082_v42 }
0x111d   : > { %v12092_v36 = vsel %vm5646_vm1, %v5561_v60, %v13031_v19  ;;  %vm5577_vm11 = vcmp.eq.f32.partialorder %v7540_v15, %v5561_v60  ;;  %v13037_v19 = vld [vmem:[#allocation9_spill] sm:$0xff] }
0x111e   : > { %13032 = vst [vmem:[#allocation5_spill] sm:$0xff] %v12092_v36  ;;  %v5481_v25 = vpop.xlane.xlu0 %5480  ;;  %v12110_v4 = vsel %vm5577_vm11, 1e+30, %v11781_v3 }
0x111f   : > { %v5563_v12 = vmin.f32 %v5481_v25, %v11973_v24  ;;  %5719 = vmin.xlane.f32.xlu1 %v12095_v51  ;;  %5713 = vmin.xlane.f32.xlu0 %v12098_v11 }
0x1121   : > { %v12107_v23 = vsel %vm5646_vm1, %v5563_v12, %v13033_v32  ;;  %vm5579_vm12 = vcmp.eq.f32.partialorder %v7540_v15, %v5563_v12 }
0x1122   : > { %13034 = vst [vmem:[#allocation6_spill] sm:$0xff] %v12107_v23  ;;  %v12115_v5 = vsel %vm5579_vm12, 1e+30, %v11786_v41  ;;  %v13039_v23 = vld [vmem:[#allocation11_spill] sm:$0xff] }
0x1123   : > { %5717 = vmin.xlane.f32.xlu0 %v12110_v4 }
0x1127   : > { %5721 = vmin.xlane.f32.xlu0 %v12115_v5 }
0x1170   : > { %v5483_v59 = vpop.xlane.xlu1 %5482 }
0x1174   : > { %v5547_v24 = vpop.xlane.xlu1 %5546 }
0x1175   : > { %v5564_v17 = vmin.f32 %v5483_v59, %v5547_v24 }
0x1177   : > { %v12121_v50 = vsel %vm5646_vm1, %v5564_v17, %v13035_v21  ;;  %vm5580_vm13 = vcmp.eq.f32.partialorder %v7540_v15, %v5564_v17 }
0x1178   : > { %13036 = vst [vmem:[#allocation7_spill] sm:$0xff] %v12121_v50  ;;  %v5728_v3 = vpop.xlane.xlu1 %5727  ;;  %v5485_v8 = vpop.xlane.xlu0 %5484  ;;  %v12125_v62 = vsel %vm5580_vm13, 1e+30, %v11796_v61 }
0x1179   : > { %5723 = vmin.xlane.f32.xlu1 %v12125_v62 }
0x117c   : > { %v5732_v41 = vpop.xlane.xlu1 %5731  ;;  %v5549_v13 = vpop.xlane.xlu0 %5548 }
0x117d   : > { %v5565_v60 = vmin.f32 %v5485_v8, %v5549_v13  ;;  %5755 = vmin.xlane.f32.xlu1 %v12763_v46 }
0x117f   : > { %v12132_v25 = vsel %vm5646_vm1, %v5565_v60, %v13037_v19  ;;  %vm5581_vm14 = vcmp.eq.f32.partialorder %v7540_v15, %v5565_v60  ;;  %vm5999_vm1 = vcmp.eq.s32.totalorder %v7332_v18, 14 }
0x1180   : > { %13038 = vst [vmem:[#allocation8_spill] sm:$0xff] %v12132_v25  ;;  %v5736_v12 = vpop.xlane.xlu1 %5735  ;;  %v5730_v32 = vpop.xlane.xlu0 %5729  ;;  %v12136_v59 = vsel %vm5581_vm14, 1e+30, %v11807_v7 }
0x1181   : > { %5871 = vmin.xlane.f32.xlu1 %v12762_v57  ;;  %5725 = vmin.xlane.f32.xlu0 %v12136_v59 }
0x1184   : > { %v5740_v61 = vpop.xlane.xlu1 %5739  ;;  %v5734_v24 = vpop.xlane.xlu0 %5733 }
0x1185   : > { %5875 = vmin.xlane.f32.xlu1 %v12762_v57  ;;  %5757 = vmin.xlane.f32.xlu0 %v12763_v46 }
0x1188   : > { %v5744_v17 = vpop.xlane.xlu1 %5743  ;;  %v5738_v21 = vpop.xlane.xlu0 %5737 }
0x1189   : > { %5879 = vmin.xlane.f32.xlu1 %v12762_v57  ;;  %5873 = vmin.xlane.f32.xlu0 %v12762_v57 }
0x118c   : > { %v5748_v8 = vpop.xlane.xlu1 %5747  ;;  %v5742_v13 = vpop.xlane.xlu0 %5741 }
0x118d   : > { %5883 = vmin.xlane.f32.xlu1 %v12762_v57  ;;  %5877 = vmin.xlane.f32.xlu0 %v12762_v57 }
0x1190   : > { %v12146_v7 = vpop.xlane.xlu1 %5751  ;;  %v12148_v60 = vpop.xlane.xlu0 %5745 }
0x1191   : > { %5887 = vmin.xlane.f32.xlu1 %v12762_v57  ;;  %5881 = vmin.xlane.f32.xlu0 %v12762_v57 }
0x1194   : > { %v5696_v19 = vpop.xlane.xlu1 %5695  ;;  %v12153_v25 = vpop.xlane.xlu0 %5749 }
0x1195   : > { %v5759_v50 = vmin.f32 %v5696_v19, %v5728_v3  ;;  %5891 = vmin.xlane.f32.xlu1 %v12762_v57  ;;  %5885 = vmin.xlane.f32.xlu0 %v12762_v57 }
0x1197   : > { %v12160_v36 = vsel %vm5999_vm1, %v5759_v50, %v13039_v23  ;;  %vm5775_vm15 = vcmp.eq.f32.partialorder %v11984_v14, %v5759_v50 }
0x1198   : > { %13040 = vst [vmem:[#allocation9_spill] sm:$0xff] %v12160_v36  ;;  %v5700_v35 = vpop.xlane.xlu1 %5699  ;;  %v12162_v20 = vpop.xlane.xlu0 %5753  ;;  %v5791_v23 = vsel %vm5775_vm15, %v7540_v15, 1e+09 }
0x1199   : > { %v5761_v33 = vmin.f32 %v5700_v35, %v5732_v41  ;;  %5895 = vmin.xlane.f32.xlu1 %v12762_v57  ;;  %5889 = vmin.xlane.f32.xlu0 %v12762_v57 }
0x119b   : > { %v12170_v3 = vsel %vm5999_vm1, %v5761_v33, %v11841_v47  ;;  %vm5777_vm0 = vcmp.eq.f32.partialorder %v12000_v56, %v5761_v33 }
0x119c   : > { %v5704_v19 = vpop.xlane.xlu1 %5703  ;;  %v5698_v9 = vpop.xlane.xlu0 %5697 }
0x119d   : > { %v5763_v36 = vmin.f32 %v5704_v19, %v5736_v12  ;;  %v5760_v22 = vmin.f32 %v5698_v9, %v5730_v32  ;;  %5807 = vmin.xlane.f32.xlu1 %v5791_v23  ;;  %5893 = vmin.xlane.f32.xlu0 %v12762_v57  ;;  %v5793_v12 = vsel %vm5777_vm0, %v7540_v15, 1e+09 }
0x119f   : > { %v12178_v35 = vsel %vm5999_vm1, %v5763_v36, %v11849_v55  ;;  %v12183_v47 = vsel %vm5999_vm1, %v5760_v22, %v11854_v54  ;;  %vm5779_vm3 = vcmp.eq.f32.partialorder %v12017_v43, %v5763_v36  ;;  %vm5776_vm4 = vcmp.eq.f32.partialorder %v12020_v30, %v5760_v22 }
0x11a0   : > { %v5708_v50 = vpop.xlane.xlu1 %5707  ;;  %v5702_v41 = vpop.xlane.xlu0 %5701  ;;  %v5795_v36 = vsel %vm5779_vm3, %v7540_v15, 1e+09 }
0x11a1   : > { %v5765_v9 = vmin.f32 %v5708_v50, %v5740_v61  ;;  %v5762_v32 = vmin.f32 %v5702_v41, %v5734_v24  ;;  %5811 = vmin.xlane.f32.xlu1 %v5793_v12  ;;  %5897 = vmin.xlane.f32.xlu0 %v12762_v57  ;;  %v5792_v61 = vsel %vm5776_vm4, %v7540_v15, 1e+09 }
0x11a3   : > { %v12192_v55 = vsel %vm5999_vm1, %v5765_v9, %v11863_v29  ;;  %v12197_v54 = vsel %vm5999_vm1, %v5762_v32, %v11868_v44  ;;  %vm5781_vm5 = vcmp.eq.f32.partialorder %v12037_v2, %v5765_v9  ;;  %vm5778_vm6 = vcmp.eq.f32.partialorder %v12040_v58, %v5762_v32 }
0x11a4   : > { %v5712_v33 = vpop.xlane.xlu1 %5711  ;;  %v5706_v19 = vpop.xlane.xlu0 %5705  ;;  %v5797_v41 = vsel %vm5781_vm5, %v7540_v15, 1e+09 }
0x11a5   : > { %v5767_v24 = vmin.f32 %v5712_v33, %v5744_v17  ;;  %v5764_v22 = vmin.f32 %v5706_v19, %v5738_v21  ;;  %5815 = vmin.xlane.f32.xlu1 %v5795_v36  ;;  %5809 = vmin.xlane.f32.xlu0 %v5792_v61  ;;  %v5794_v17 = vsel %vm5778_vm6, %v7540_v15, 1e+09 }
0x11a7   : > { %v12206_v29 = vsel %vm5999_vm1, %v5767_v24, %v11877_v1  ;;  %v12211_v44 = vsel %vm5999_vm1, %v5764_v22, %v11882_v6  ;;  %vm5783_vm2 = vcmp.eq.f32.partialorder %v12057_v26, %v5767_v24  ;;  %vm5780_vm7 = vcmp.eq.f32.partialorder %v12060_v28, %v5764_v22 }
0x11a8   : > { %v5716_v23 = vpop.xlane.xlu1 %5715  ;;  %v5710_v50 = vpop.xlane.xlu0 %5709  ;;  %v5799_v33 = vsel %vm5783_vm2, %v7540_v15, 1e+09 }
0x11a9   : > { %v5769_v21 = vmin.f32 %v5716_v23, %v5748_v8  ;;  %v5766_v12 = vmin.f32 %v5710_v50, %v5742_v13  ;;  %5819 = vmin.xlane.f32.xlu1 %v5797_v41  ;;  %5813 = vmin.xlane.f32.xlu0 %v5794_v17  ;;  %v5796_v8 = vsel %vm5780_vm7, %v7540_v15, 1e+09 }
0x11ab   : > { %v12220_v1 = vsel %vm5999_vm1, %v5769_v21, %v11891_v63  ;;  %v12225_v6 = vsel %vm5999_vm1, %v5766_v12, %v11896_v0  ;;  %vm5785_vm8 = vcmp.eq.f32.partialorder %v12079_v48, %v5769_v21  ;;  %vm5782_vm9 = vcmp.eq.f32.partialorder %v12082_v42, %v5766_v12 }
0x11ac   : > { %v5720_v9 = vpop.xlane.xlu1 %5719  ;;  %v5714_v32 = vpop.xlane.xlu0 %5713  ;;  %v5801_v61 = vsel %vm5785_vm8, %v7540_v15, 1e+09 }
0x11ad   : > { %v5771_v13 = vmin.f32 %v5720_v9, %v12146_v7  ;;  %v5768_v19 = vmin.f32 %v5714_v32, %v12148_v60  ;;  %5823 = vmin.xlane.f32.xlu1 %v5799_v33  ;;  %5817 = vmin.xlane.f32.xlu0 %v5796_v8  ;;  %v5798_v7 = vsel %vm5782_vm9, %v7540_v15, 1e+09 }
0x11af   : > { %v12236_v63 = vsel %vm5999_vm1, %v5771_v13, %v11907_v31  ;;  %v12241_v0 = vsel %vm5999_vm1, %v5768_v19, %v11912_v52  ;;  %vm5787_vm10 = vcmp.eq.f32.partialorder %v12095_v51, %v5771_v13  ;;  %vm5784_vm11 = vcmp.eq.f32.partialorder %v12098_v11, %v5768_v19 }
0x11b0   : > { %v5718_v36 = vpop.xlane.xlu0 %5717  ;;  %v5803_v24 = vsel %vm5787_vm10, %v7540_v15, 1e+09  ;;  %v5800_v22 = vsel %vm5784_vm11, %v7540_v15, 1e+09 }
0x11b1   : > { %v5770_v60 = vmin.f32 %v5718_v36, %v12153_v25  ;;  %5827 = vmin.xlane.f32.xlu1 %v5801_v61  ;;  %5821 = vmin.xlane.f32.xlu0 %v5798_v7 }
0x11b3   : > { %v12251_v31 = vsel %vm5999_vm1, %v5770_v60, %v11922_v27  ;;  %vm5786_vm12 = vcmp.eq.f32.partialorder %v12110_v4, %v5770_v60 }
0x11b4   : > { %v5722_v52 = vpop.xlane.xlu0 %5721  ;;  %v5802_v50 = vsel %vm5786_vm12, %v7540_v15, 1e+09 }
0x11b5   : > { %v5772_v23 = vmin.f32 %v5722_v52, %v12162_v20  ;;  %5831 = vmin.xlane.f32.xlu1 %v5803_v24  ;;  %5825 = vmin.xlane.f32.xlu0 %v5800_v22 }
0x11b7   : > { %v12260_v25 = vsel %vm5999_vm1, %v5772_v23, %v11931_v16  ;;  %vm5788_vm13 = vcmp.eq.f32.partialorder %v12115_v5, %v5772_v23 }
0x11b8   : > { %v5804_v27 = vsel %vm5788_vm13, %v7540_v15, 1e+09 }
0x11b9   : > { %5829 = vmin.xlane.f32.xlu0 %v5802_v50 }
0x11bd   : > { %5833 = vmin.xlane.f32.xlu0 %v5804_v27 }
0x1206   : > { %v5724_v41 = vpop.xlane.xlu1 %5723 }
0x120a   : > { %v5756_v17 = vpop.xlane.xlu1 %5755 }
0x120b   : > { %v5773_v20 = vmin.f32 %v5724_v41, %v5756_v17 }
0x120d   : > { %vm5789_vm14 = vcmp.eq.f32.partialorder %v12125_v62, %v5773_v20  ;;  %v12269_v21 = vsel %vm5999_vm1, %v5773_v20, %v11939_v34 }
0x120e   : > { %v5872_v16 = vpop.xlane.xlu1 %5871  ;;  %v5726_v12 = vpop.xlane.xlu0 %5725  ;;  %v5805_v9 = vsel %vm5789_vm14, %v7540_v15, 1e+09 }
0x120f   : > { %5835 = vmin.xlane.f32.xlu1 %v5805_v9 }
0x1212   : > { %v5876_v32 = vpop.xlane.xlu1 %5875  ;;  %v5758_v33 = vpop.xlane.xlu0 %5757 }
0x1213   : > { %v5774_v8 = vmin.f32 %v5726_v12, %v5758_v33  ;;  %5899 = vmin.xlane.f32.xlu1 %v12762_v57 }
0x1215   : > { %vm5790_vm15 = vcmp.eq.f32.partialorder %v12136_v59, %v5774_v8  ;;  %v12277_v13 = vsel %vm5999_vm1, %v5774_v8, %v11947_v49 }
0x1216   : > { %v5880_v19 = vpop.xlane.xlu1 %5879  ;;  %v5874_v34 = vpop.xlane.xlu0 %5873  ;;  %v5806_v36 = vsel %vm5790_vm15, %v7540_v15, 1e+09 }
0x1217   : > { %6080 = vmin.xlane.f32.xlu1 %v12763_v46  ;;  %5837 = vmin.xlane.f32.xlu0 %v5806_v36 }
0x121a   : > { %v5884_v61 = vpop.xlane.xlu1 %5883  ;;  %v5878_v7 = vpop.xlane.xlu0 %5877 }
0x121b   : > { %6084 = vmin.xlane.f32.xlu1 %v12763_v46  ;;  %5901 = vmin.xlane.f32.xlu0 %v12762_v57 }
0x121e   : > { %v5888_v60 = vpop.xlane.xlu1 %5887  ;;  %v5882_v52 = vpop.xlane.xlu0 %5881 }
0x121f   : > { %6088 = vmin.xlane.f32.xlu1 %v12763_v46  ;;  %6082 = vmin.xlane.f32.xlu0 %v12763_v46 }
0x1222   : > { %v5892_v49 = vpop.xlane.xlu1 %5891  ;;  %v5886_v24 = vpop.xlane.xlu0 %5885 }
0x1223   : > { %6092 = vmin.xlane.f32.xlu1 %v12763_v46  ;;  %6086 = vmin.xlane.f32.xlu0 %v12763_v46 }
0x1226   : > { %v12287_v22 = vpop.xlane.xlu1 %5895  ;;  %v12289_v23 = vpop.xlane.xlu0 %5889 }
0x1227   : > { %6096 = vmin.xlane.f32.xlu1 %v12763_v46  ;;  %6090 = vmin.xlane.f32.xlu0 %v12763_v46 }
0x122a   : > { %v5808_v50 = vpop.xlane.xlu1 %5807  ;;  %v12293_v27 = vpop.xlane.xlu0 %5893 }
0x122b   : > { %v5903_v41 = vmin.f32 %v5808_v50, %v5872_v16  ;;  %6100 = vmin.xlane.f32.xlu1 %v12763_v46  ;;  %6094 = vmin.xlane.f32.xlu0 %v12763_v46 }
0x122d   : > { %v12300_v17 = vsel %vm5999_vm1, %v5903_v41, %v11971_v40  ;;  %vm5919_vm0 = vcmp.eq.f32.partialorder %v7540_v15, %v5903_v41 }
0x122e   : > { %v5812_v20 = vpop.xlane.xlu1 %5811  ;;  %v12302_v12 = vpop.xlane.xlu0 %5897  ;;  %v12313_v40 = vsel %vm5919_vm0, 1e+30, %v11984_v14 }
0x122f   : > { %v5905_v9 = vmin.f32 %v5812_v20, %v5876_v32  ;;  %6104 = vmin.xlane.f32.xlu1 %v12763_v46  ;;  %6098 = vmin.xlane.f32.xlu0 %v12763_v46 }
0x1231   : > { %v12310_v16 = vsel %vm5999_vm1, %v5905_v9, %v11981_v37  ;;  %vm5921_vm3 = vcmp.eq.f32.partialorder %v7540_v15, %v5905_v9 }
0x1232   : > { %v5816_v33 = vpop.xlane.xlu1 %5815  ;;  %v5810_v8 = vpop.xlane.xlu0 %5809 }
0x1233   : > { %v5907_v36 = vmin.f32 %v5816_v33, %v5880_v19  ;;  %v5904_v50 = vmin.f32 %v5810_v8, %v5874_v34  ;;  %6048 = vmin.xlane.f32.xlu1 %v12313_v40  ;;  %6102 = vmin.xlane.f32.xlu0 %v12763_v46  ;;  %v12330_v19 = vsel %vm5921_vm3, 1e+30, %v12000_v56  ;;  %v13041_v8 = vld [vmem:[#allocation10_spill] sm:$0xff]  ;;  %vm6385_vm3 = vcmask 130048  }
0x1235   : > { %v12321_v32 = vsel %vm5999_vm1, %v5907_v36, %v11992_v38  ;;  %v12326_v37 = vsel %vm5999_vm1, %v5904_v50, %v11997_v10  ;;  %vm5923_vm4 = vcmp.eq.f32.partialorder %v7540_v15, %v5907_v36  ;;  %vm5920_vm5 = vcmp.eq.f32.partialorder %v7540_v15, %v5904_v50 }
0x1236   : > { %v5820_v14 = vpop.xlane.xlu1 %5819  ;;  %v5814_v41 = vpop.xlane.xlu0 %5813 }
0x1237   : > { %v5909_v34 = vmin.f32 %v5820_v14, %v5884_v61  ;;  %v5906_v20 = vmin.f32 %v5814_v41, %v5878_v7  ;;  %6052 = vmin.xlane.f32.xlu1 %v12330_v19  ;;  %6106 = vmin.xlane.f32.xlu0 %v12763_v46  ;;  %v12347_v61 = vsel %vm5923_vm4, 1e+30, %v12017_v43  ;;  %v12350_v7 = vsel %vm5920_vm5, 1e+30, %v12020_v30  ;;  %v13042_v14 = vld [vmem:[#allocation12_spill] sm:$0xff] }
0x1239   : > { %v12338_v38 = vsel %vm5999_vm1, %v5909_v34, %v12009_v45  ;;  %v12343_v10 = vsel %vm5999_vm1, %v5906_v20, %v12014_v53  ;;  %vm5925_vm6 = vcmp.eq.f32.partialorder %v7540_v15, %v5909_v34  ;;  %vm5922_vm2 = vcmp.eq.f32.partialorder %v7540_v15, %v5906_v20  ;;  %v13043_v34 = vld [vmem:[#allocation13_spill] sm:$0xff] }
0x123a   : > { %v5824_v56 = vpop.xlane.xlu1 %5823  ;;  %v5818_v9 = vpop.xlane.xlu0 %5817 }
0x123b   : > { %v5911_v33 = vmin.f32 %v5824_v56, %v5888_v60  ;;  %v5908_v45 = vmin.f32 %v5818_v9, %v5882_v52  ;;  %6056 = vmin.xlane.f32.xlu1 %v12347_v61  ;;  %6050 = vmin.xlane.f32.xlu0 %v12350_v7  ;;  %v12367_v60 = vsel %vm5925_vm6, 1e+30, %v12037_v2  ;;  %v12370_v52 = vsel %vm5922_vm2, 1e+30, %v12040_v58 }
0x123d   : > { %v12358_v53 = vsel %vm5999_vm1, %v5911_v33, %v12029_v39  ;;  %v12363_v43 = vsel %vm5999_vm1, %v5908_v45, %v13041_v8  ;;  %vm5927_vm7 = vcmp.eq.f32.partialorder %v7540_v15, %v5911_v33  ;;  %vm5924_vm8 = vcmp.eq.f32.partialorder %v7540_v15, %v5908_v45  ;;  %v13044_v33 = vld [vmem:[#allocation14_spill] sm:$0xff] }
0x123e   : > { %v5828_v30 = vpop.xlane.xlu1 %5827  ;;  %v5822_v36 = vpop.xlane.xlu0 %5821 }
0x123f   : > { %v5913_v50 = vmin.f32 %v5828_v30, %v5892_v49  ;;  %v5910_v39 = vmin.f32 %v5822_v36, %v5886_v24  ;;  %6060 = vmin.xlane.f32.xlu1 %v12367_v60  ;;  %6054 = vmin.xlane.f32.xlu0 %v12370_v52  ;;  %v12387_v49 = vsel %vm5927_vm7, 1e+30, %v12057_v26  ;;  %v12390_v24 = vsel %vm5924_vm8, 1e+30, %v12060_v28  ;;  %v13046_v26 = vld [vmem:[#allocation15_spill] sm:$0xff]  ;;  %v13048_v36 = vld [vmem:[#allocation5_spill] sm:$0xff] }
0x1241   : > { %v12378_v41 = vsel %vm5999_vm1, %v5913_v50, %v13042_v14  ;;  %v12383_v2 = vsel %vm5999_vm1, %v5910_v39, %v13043_v34  ;;  %vm5929_vm9 = vcmp.eq.f32.partialorder %v7540_v15, %v5913_v50  ;;  %vm5926_vm10 = vcmp.eq.f32.partialorder %v7540_v15, %v5910_v39  ;;  %v13050_v14 = vld [vmem:[#allocation6_spill] sm:$0xff] }
0x1242   : > { %v5832_v58 = vpop.xlane.xlu1 %5831  ;;  %v5826_v20 = vpop.xlane.xlu0 %5825  ;;  %v12408_v30 = vsel %vm5929_vm9, 1e+30, %v12079_v48 }
0x1243   : > { %v5915_v56 = vmin.f32 %v5832_v58, %v12287_v22  ;;  %v5912_v9 = vmin.f32 %v5826_v20, %v12289_v23  ;;  %6064 = vmin.xlane.f32.xlu1 %v12387_v49  ;;  %6058 = vmin.xlane.f32.xlu0 %v12390_v24  ;;  %v12411_v22 = vsel %vm5926_vm10, 1e+30, %v12082_v42 }
0x1245   : > { %v12400_v45 = vsel %vm5999_vm1, %v5915_v56, %v13044_v33  ;;  %v12405_v28 = vsel %vm5999_vm1, %v5912_v9, %v13046_v26  ;;  %vm5931_vm11 = vcmp.eq.f32.partialorder %v7540_v15, %v5915_v56  ;;  %vm5928_vm12 = vcmp.eq.f32.partialorder %v7540_v15, %v5912_v9  ;;  %v13052_v56 = vld [vmem:[#allocation7_spill] sm:$0xff] }
0x1246   : > { %13045 = vst [vmem:[#allocation11_spill] sm:$0xff] %v12400_v45  ;;  %13047 = vst [vmem:[#allocation10_spill] sm:$0xff] %v12405_v28  ;;  %v5830_v8 = vpop.xlane.xlu0 %5829  ;;  %v12424_v39 = vsel %vm5931_vm11, 1e+30, %v12095_v51  ;;  %v12427_v42 = vsel %vm5928_vm12, 1e+30, %v12098_v11 }
0x1247   : > { %v5914_v23 = vmin.f32 %v5830_v8, %v12293_v27  ;;  %6068 = vmin.xlane.f32.xlu1 %v12408_v30  ;;  %6062 = vmin.xlane.f32.xlu0 %v12411_v22 }
0x1249   : > { %v12421_v50 = vsel %vm5999_vm1, %v5914_v23, %v13048_v36  ;;  %vm5930_vm13 = vcmp.eq.f32.partialorder %v7540_v15, %v5914_v23  ;;  %v13054_v36 = vld [vmem:[#allocation8_spill] sm:$0xff] }
0x124a   : > { %13049 = vst [vmem:[#allocation12_spill] sm:$0xff] %v12421_v50  ;;  %v5834_v48 = vpop.xlane.xlu0 %5833  ;;  %v12439_v58 = vsel %vm5930_vm13, 1e+30, %v12110_v4 }
0x124b   : > { %v5916_v27 = vmin.f32 %v5834_v48, %v12302_v12  ;;  %6072 = vmin.xlane.f32.xlu1 %v12424_v39  ;;  %6066 = vmin.xlane.f32.xlu0 %v12427_v42 }
0x124d   : > { %v12436_v34 = vsel %vm5999_vm1, %v5916_v27, %v13050_v14  ;;  %vm5932_vm14 = vcmp.eq.f32.partialorder %v7540_v15, %v5916_v27 }
0x124e   : > { %13051 = vst [vmem:[#allocation13_spill] sm:$0xff] %v12436_v34  ;;  %v12444_v51 = vsel %vm5932_vm14, 1e+30, %v12115_v5 }
0x124f   : > { %6070 = vmin.xlane.f32.xlu0 %v12439_v58 }
0x1253   : > { %6074 = vmin.xlane.f32.xlu0 %v12444_v51 }
0x129c   : > { %v5836_v11 = vpop.xlane.xlu1 %5835 }
0x12a0   : > { %v5900_v12 = vpop.xlane.xlu1 %5899 }
0x12a1   : > { %v5917_v20 = vmin.f32 %v5836_v11, %v5900_v12 }
0x12a3   : > { %vm5933_vm15 = vcmp.eq.f32.partialorder %v7540_v15, %v5917_v20  ;;  %v12451_v9 = vsel %vm5999_vm1, %v5917_v20, %v13052_v56 }
0x12a4   : > { %13053 = vst [vmem:[#allocation14_spill] sm:$0xff] %v12451_v9  ;;  %v6081_v4 = vpop.xlane.xlu1 %6080  ;;  %v5838_v33 = vpop.xlane.xlu0 %5837  ;;  %v12454_v26 = vsel %vm5933_vm15, 1e+30, %v12125_v62  ;;  %v13056_v9 = vld [vmem:[#allocation9_spill] sm:$0xff] }
0x12a5   : > { %6076 = vmin.xlane.f32.xlu1 %v12454_v26 }
0x12a8   : > { %v6085_v5 = vpop.xlane.xlu1 %6084  ;;  %v5902_v8 = vpop.xlane.xlu0 %5901 }
0x12a9   : > { %v5918_v23 = vmin.f32 %v5838_v33, %v5902_v8  ;;  %6108 = vmin.xlane.f32.xlu1 %v12763_v46 }
0x12ab   : > { %vm5934_vm0 = vcmp.eq.f32.partialorder %v7540_v15, %v5918_v23  ;;  %v12462_v48 = vsel %vm5999_vm1, %v5918_v23, %v13054_v36  ;;  %vm6320_vm1 = vcmp.eq.s32.totalorder %v7332_v18, 15 }
0x12ac   : > { %13055 = vst [vmem:[#allocation15_spill] sm:$0xff] %v12462_v48  ;;  %v6089_v27 = vpop.xlane.xlu1 %6088  ;;  %v6083_v14 = vpop.xlane.xlu0 %6082  ;;  %v12465_v11 = vsel %vm5934_vm0, 1e+30, %v12136_v59 }
0x12ad   : > { %6224 = vmin.xlane.f32.xlu1 %v12762_v57  ;;  %6078 = vmin.xlane.f32.xlu0 %v12465_v11 }
0x12b0   : > { %v6093_v62 = vpop.xlane.xlu1 %6092  ;;  %v6087_v12 = vpop.xlane.xlu0 %6086 }
0x12b1   : > { %6228 = vmin.xlane.f32.xlu1 %v12762_v57  ;;  %6110 = vmin.xlane.f32.xlu0 %v12763_v46 }
0x12b4   : > { %v6097_v20 = vpop.xlane.xlu1 %6096  ;;  %v6091_v56 = vpop.xlane.xlu0 %6090 }
0x12b5   : > { %6232 = vmin.xlane.f32.xlu1 %v12762_v57  ;;  %6226 = vmin.xlane.f32.xlu0 %v12762_v57 }
0x12b8   : > { %v12473_v33 = vpop.xlane.xlu1 %6100  ;;  %v12475_v59 = vpop.xlane.xlu0 %6094 }
0x12b9   : > { %6236 = vmin.xlane.f32.xlu1 %v12762_v57  ;;  %6230 = vmin.xlane.f32.xlu0 %v12762_v57 }
0x12bc   : > { %v12479_v8 = vpop.xlane.xlu1 %6104  ;;  %v12481_v23 = vpop.xlane.xlu0 %6098 }
0x12bd   : > { %6240 = vmin.xlane.f32.xlu1 %v12762_v57  ;;  %6234 = vmin.xlane.f32.xlu0 %v12762_v57 }
0x12c0   : > { %v6049_v46 = vpop.xlane.xlu1 %6048  ;;  %v12486_v36 = vpop.xlane.xlu0 %6102 }
0x12c1   : > { %v6112_v48 = vmin.f32 %v6049_v46, %v6081_v4  ;;  %6244 = vmin.xlane.f32.xlu1 %v12762_v57  ;;  %6238 = vmin.xlane.f32.xlu0 %v12762_v57 }
0x12c3   : > { %v6321_v34 = vsel %vm6320_vm1, %v6112_v48, %v13056_v9  ;;  %vm6128_vm4 = vcmp.eq.f32.partialorder %v12313_v40, %v6112_v48 }
0x12c4   : > { %6386 = vst.msk [vmem:[%s12492_s26] sm:$0xff] %vm6385_vm3, %v6321_v34  ;;  %v6053_v50 = vpop.xlane.xlu1 %6052  ;;  %v12501_v28 = vpop.xlane.xlu0 %6106  ;;  %v6144_v46 = vsel %vm6128_vm4, %v7540_v15, 1e+09 }
0x12c5   : > { %v6114_v45 = vmin.f32 %v6053_v50, %v6085_v5  ;;  %6248 = vmin.xlane.f32.xlu1 %v12762_v57  ;;  %6242 = vmin.xlane.f32.xlu0 %v12762_v57 }
0x12c7   : > { %v6323_v4 = vsel %vm6320_vm1, %v6114_v45, %v12170_v3  ;;  %vm6130_vm5 = vcmp.eq.f32.partialorder %v12330_v19, %v6114_v45 }
0x12c8   : > { %6388 = vst.msk [vmem:[%s12492_s26 + $0x10] sm:$0xff] %vm6385_vm3, %v6323_v4  ;;  %v6057_v9 = vpop.xlane.xlu1 %6056  ;;  %v6051_v34 = vpop.xlane.xlu0 %6050  ;;  %v6146_v48 = vsel %vm6130_vm5, %v7540_v15, 1e+09 }
0x12c9   : > { %v6116_v40 = vmin.f32 %v6057_v9, %v6089_v27  ;;  %v6113_v50 = vmin.f32 %v6051_v34, %v6083_v14  ;;  %6160 = vmin.xlane.f32.xlu1 %v6144_v46  ;;  %6246 = vmin.xlane.f32.xlu0 %v12762_v57 }
0x12cb   : > { %v6325_v5 = vsel %vm6320_vm1, %v6116_v40, %v12178_v35  ;;  %v6322_v3 = vsel %vm6320_vm1, %v6113_v50, %v12183_v47  ;;  %vm6132_vm6 = vcmp.eq.f32.partialorder %v12347_v61, %v6116_v40  ;;  %vm6129_vm2 = vcmp.eq.f32.partialorder %v12350_v7, %v6113_v50 }
0x12cc   : > { %6390 = vst.msk [vmem:[%s12492_s26 + $0x20] sm:$0xff] %vm6385_vm3, %v6325_v5  ;;  %6387 = vst.msk [vmem:[%s12492_s26 + $0x8] sm:$0xff] %vm6385_vm3, %v6322_v3  ;;  %v6061_v19 = vpop.xlane.xlu1 %6060  ;;  %v6055_v45 = vpop.xlane.xlu0 %6054 }
0x12cd   : > { %v6118_v27 = vmin.f32 %v6061_v19, %v6093_v62  ;;  %v6115_v35 = vmin.f32 %v6055_v45, %v6087_v12  ;;  %6164 = vmin.xlane.f32.xlu1 %v6146_v48  ;;  %6250 = vmin.xlane.f32.xlu0 %v12762_v57  ;;  %v6148_v12 = vsel %vm6132_vm6, %v7540_v15, 1e+09 }
0x12cf   : > { %v6327_v47 = vsel %vm6320_vm1, %v6118_v27, %v12192_v55  ;;  %v6324_v14 = vsel %vm6320_vm1, %v6115_v35, %v12197_v54  ;;  %vm6134_vm7 = vcmp.eq.f32.partialorder %v12367_v60, %v6118_v27  ;;  %v6145_v55 = vsel %vm6129_vm2, %v7540_v15, 1e+09 }
0x12d0   : > { %6392 = vst.msk [vmem:[%s12492_s26 + $0x30] sm:$0xff] %vm6385_vm3, %v6327_v47  ;;  %6389 = vst.msk [vmem:[%s12492_s26 + $0x18] sm:$0xff] %vm6385_vm3, %v6324_v14  ;;  %v6065_v7 = vpop.xlane.xlu1 %6064  ;;  %v6059_v62 = vpop.xlane.xlu0 %6058  ;;  %vm6131_vm8 = vcmp.eq.f32.partialorder %v12370_v52, %v6115_v35 }
0x12d1   : > { %v6120_v4 = vmin.f32 %v6065_v7, %v6097_v20  ;;  %v6117_v54 = vmin.f32 %v6059_v62, %v6091_v56  ;;  %6168 = vmin.xlane.f32.xlu1 %v6148_v12  ;;  %6162 = vmin.xlane.f32.xlu0 %v6145_v55  ;;  %v6150_v20 = vsel %vm6134_vm7, %v7540_v15, 1e+09 }
0x12d3   : > { %v6329_v9 = vsel %vm6320_vm1, %v6120_v4, %v12206_v29  ;;  %v6326_v34 = vsel %vm6320_vm1, %v6117_v54, %v12211_v44  ;;  %vm6136_vm9 = vcmp.eq.f32.partialorder %v12387_v49, %v6120_v4  ;;  %v6147_v29 = vsel %vm6131_vm8, %v7540_v15, 1e+09 }
0x12d4   : > { %6394 = vst.msk [vmem:[%s12492_s26 + $0x40] sm:$0xff] %vm6385_vm3, %v6329_v9  ;;  %6391 = vst.msk [vmem:[%s12492_s26 + $0x28] sm:$0xff] %vm6385_vm3, %v6326_v34  ;;  %v6069_v61 = vpop.xlane.xlu1 %6068  ;;  %v6063_v52 = vpop.xlane.xlu0 %6062  ;;  %vm6133_vm10 = vcmp.eq.f32.partialorder %v12390_v24, %v6117_v54 }
0x12d5   : > { %v6122_v44 = vmin.f32 %v6069_v61, %v12473_v33  ;;  %v6119_v56 = vmin.f32 %v6063_v52, %v12475_v59  ;;  %6172 = vmin.xlane.f32.xlu1 %v6150_v20  ;;  %6166 = vmin.xlane.f32.xlu0 %v6147_v29  ;;  %v6152_v59 = vsel %vm6136_vm9, %v7540_v15, 1e+09 }
0x12d7   : > { %v6331_v46 = vsel %vm6320_vm1, %v6122_v44, %v12220_v1  ;;  %v6328_v60 = vsel %vm6320_vm1, %v6119_v56, %v12225_v6  ;;  %vm6138_vm11 = vcmp.eq.f32.partialorder %v12408_v30, %v6122_v44  ;;  %v6149_v1 = vsel %vm6133_vm10, %v7540_v15, 1e+09 }
0x12d8   : > { %6396 = vst.msk [vmem:[%s12492_s26 + $0x50] sm:$0xff] %vm6385_vm3, %v6331_v46  ;;  %6393 = vst.msk [vmem:[%s12492_s26 + $0x38] sm:$0xff] %vm6385_vm3, %v6328_v60  ;;  %v6073_v24 = vpop.xlane.xlu1 %6072  ;;  %v6067_v33 = vpop.xlane.xlu0 %6066  ;;  %vm6135_vm12 = vcmp.eq.f32.partialorder %v12411_v22, %v6119_v56 }
0x12d9   : > { %v6124_v40 = vmin.f32 %v6073_v24, %v12479_v8  ;;  %v6121_v6 = vmin.f32 %v6067_v33, %v12481_v23  ;;  %6176 = vmin.xlane.f32.xlu1 %v6152_v59  ;;  %6170 = vmin.xlane.f32.xlu0 %v6149_v1  ;;  %v6154_v8 = vsel %vm6138_vm11, %v7540_v15, 1e+09  ;;  %v6151_v23 = vsel %vm6135_vm12, %v7540_v15, 1e+09 }
0x12db   : > { %v6333_v50 = vsel %vm6320_vm1, %v6124_v40, %v12236_v63  ;;  %v6330_v49 = vsel %vm6320_vm1, %v6121_v6, %v12241_v0  ;;  %vm6140_vm13 = vcmp.eq.f32.partialorder %v12424_v39, %v6124_v40  ;;  %vm6137_vm14 = vcmp.eq.f32.partialorder %v12427_v42, %v6121_v6 }
0x12dc   : > { %6398 = vst.msk [vmem:[%s12492_s26 + $0x60] sm:$0xff] %vm6385_vm3, %v6333_v50  ;;  %6395 = vst.msk [vmem:[%s12492_s26 + $0x48] sm:$0xff] %vm6385_vm3, %v6330_v49  ;;  %v6071_v22 = vpop.xlane.xlu0 %6070  ;;  %v6156_v30 = vsel %vm6140_vm13, %v7540_v15, 1e+09  ;;  %v6153_v3 = vsel %vm6137_vm14, %v7540_v15, 1e+09 }
0x12dd   : > { %v6123_v63 = vmin.f32 %v6071_v22, %v12486_v36  ;;  %6180 = vmin.xlane.f32.xlu1 %v6154_v8  ;;  %6174 = vmin.xlane.f32.xlu0 %v6151_v23 }
0x12df   : > { %v6332_v0 = vsel %vm6320_vm1, %v6123_v63, %v12251_v31  ;;  %vm6139_vm15 = vcmp.eq.f32.partialorder %v12439_v58, %v6123_v63 }
0x12e0   : > { %6397 = vst.msk [vmem:[%s12492_s26 + $0x58] sm:$0xff] %vm6385_vm3, %v6332_v0  ;;  %v6075_v5 = vpop.xlane.xlu0 %6074  ;;  %v6155_v31 = vsel %vm6139_vm15, %v7540_v15, 1e+09 }
0x12e1   : > { %v6125_v39 = vmin.f32 %v6075_v5, %v12501_v28  ;;  %6184 = vmin.xlane.f32.xlu1 %v6156_v30  ;;  %6178 = vmin.xlane.f32.xlu0 %v6153_v3 }
0x12e3   : > { %v6334_v42 = vsel %vm6320_vm1, %v6125_v39, %v12260_v25  ;;  %vm6141_vm0 = vcmp.eq.f32.partialorder %v12444_v51, %v6125_v39 }
0x12e4   : > { %6399 = vst.msk [vmem:[%s12492_s26 + $0x68] sm:$0xff] %vm6385_vm3, %v6334_v42  ;;  %v6157_v36 = vsel %vm6141_vm0, %v7540_v15, 1e+09 }
0x12e5   : > { %6182 = vmin.xlane.f32.xlu0 %v6155_v31 }
0x12e9   : > { %6186 = vmin.xlane.f32.xlu0 %v6157_v36 }
0x1332   : > { %v6077_v58 = vpop.xlane.xlu1 %6076 }
0x1336   : > { %v6109_v19 = vpop.xlane.xlu1 %6108 }
0x1337   : > { %v6126_v28 = vmin.f32 %v6077_v58, %v6109_v19 }
0x1339   : > { %vm6142_vm4 = vcmp.eq.f32.partialorder %v12454_v26, %v6126_v28  ;;  %v6335_v25 = vsel %vm6320_vm1, %v6126_v28, %v12269_v21 }
0x133a   : > { %6400 = vst.msk [vmem:[%s12492_s26 + $0x70] sm:$0xff] %vm6385_vm3, %v6335_v25  ;;  %v6225_v45 = vpop.xlane.xlu1 %6224  ;;  %v6079_v48 = vpop.xlane.xlu0 %6078  ;;  %v6158_v51 = vsel %vm6142_vm4, %v7540_v15, 1e+09 }
0x133b   : > { %6188 = vmin.xlane.f32.xlu1 %v6158_v51 }
0x133e   : > { %v6229_v27 = vpop.xlane.xlu1 %6228  ;;  %v6111_v35 = vpop.xlane.xlu0 %6110 }
0x133f   : > { %v6127_v47 = vmin.f32 %v6079_v48, %v6111_v35  ;;  %6252 = vmin.xlane.f32.xlu1 %v12762_v57 }
0x1341   : > { %vm6143_vm5 = vcmp.eq.f32.partialorder %v12465_v11, %v6127_v47  ;;  %v6336_v26 = vsel %vm6320_vm1, %v6127_v47, %v12277_v13 }
0x1342   : > { %6401 = vst.msk [vmem:[%s12492_s26 + $0x78] sm:$0xff] %vm6385_vm3, %v6336_v26  ;;  %v6233_v21 = vpop.xlane.xlu1 %6232  ;;  %v6227_v14 = vpop.xlane.xlu0 %6226  ;;  %v6159_v7 = vsel %vm6143_vm5, %v7540_v15, 1e+09 }
0x1343   : > { %6190 = vmin.xlane.f32.xlu0 %v6159_v7 }
0x1346   : > { %v6237_v62 = vpop.xlane.xlu1 %6236  ;;  %v6231_v12 = vpop.xlane.xlu0 %6230 }
0x1347   : > { %6254 = vmin.xlane.f32.xlu0 %v12762_v57 }
0x134a   : > { %v6241_v55 = vpop.xlane.xlu1 %6240  ;;  %v6235_v4 = vpop.xlane.xlu0 %6234 }
0x134e   : > { %v6245_v54 = vpop.xlane.xlu1 %6244  ;;  %v6239_v11 = vpop.xlane.xlu0 %6238 }
0x1352   : > { %v12630_v9 = vpop.xlane.xlu1 %6248  ;;  %v12632_v34 = vpop.xlane.xlu0 %6242 }
0x1356   : > { %v6161_v13 = vpop.xlane.xlu1 %6160  ;;  %v12634_v61 = vpop.xlane.xlu0 %6246 }
0x1357   : > { %v6256_v52 = vmin.f32 %v6161_v13, %v6225_v45 }
0x1359   : > { %v6337_v15 = vsel %vm6320_vm1, %v6256_v52, %v12300_v17 }
0x135a   : > { %v7102_v20 = vtrunc.f32 %v6337_v15  ;;  %v6165_v29 = vpop.xlane.xlu1 %6164  ;;  %v12639_v44 = vpop.xlane.xlu0 %6250 }
0x135b   : > { %v6258_v57 = vmin.f32 %v6165_v29, %v6229_v27 }
0x135c   : > { %v7103_v56 = vcvt.f32.s32 %v7102_v20  ;;  %v13059_v20 = vld [vmem:[#allocation12_spill] sm:$0xff] }
0x135d   : > { %v6339_v46 = vsel %vm6320_vm1, %v6258_v57, %v12310_v16 }
0x135e   : > { %6418 = vst.msk [vmem:[%s12645_s29] sm:$0xff] %vm6385_vm3, %v7103_v56  ;;  %v7106_v17 = vtrunc.f32 %v6339_v46  ;;  %v6169_v60 = vpop.xlane.xlu1 %6168  ;;  %v6163_v24 = vpop.xlane.xlu0 %6162 }
0x135f   : > { %v6260_v33 = vmin.f32 %v6169_v60, %v6233_v21  ;;  %v6257_v59 = vmin.f32 %v6163_v24, %v6227_v14  ;;  %v13060_v60 = vld [vmem:[#allocation13_spill] sm:$0xff] }
0x1360   : > { %v7107_v1 = vcvt.f32.s32 %v7106_v17 }
0x1361   : > { %v6341_v40 = vsel %vm6320_vm1, %v6260_v33, %v12321_v32  ;;  %v6338_v6 = vsel %vm6320_vm1, %v6257_v59, %v12326_v37 }
0x1362   : > { %6420 = vst.msk [vmem:[%s12645_s29 + $0x10] sm:$0xff] %vm6385_vm3, %v7107_v1  ;;  %v7110_v16 = vtrunc.f32 %v6341_v40  ;;  %v7104_v50 = vtrunc.f32 %v6338_v6  ;;  %v6173_v49 = vpop.xlane.xlu1 %6172  ;;  %v6167_v22 = vpop.xlane.xlu0 %6166  ;;  %v13061_v6 = vld [vmem:[#allocation14_spill] sm:$0xff] }
0x1363   : > { %v6262_v8 = vmin.f32 %v6173_v49, %v6237_v62  ;;  %v6259_v23 = vmin.f32 %v6167_v22, %v6231_v12 }
0x1364   : > { %v7111_v63 = vcvt.f32.s32 %v7110_v16  ;;  %v7105_v0 = vcvt.f32.s32 %v7104_v50 }
0x1365   : > { %v6343_v32 = vsel %vm6320_vm1, %v6262_v8, %v12338_v38  ;;  %v6340_v37 = vsel %vm6320_vm1, %v6259_v23, %v12343_v10  ;;  %v13062_v23 = vld [vmem:[#allocation15_spill] sm:$0xff] }
0x1366   : > { %6422 = vst.msk [vmem:[%s12645_s29 + $0x20] sm:$0xff] %vm6385_vm3, %v7111_v63  ;;  %6419 = vst.msk [vmem:[%s12645_s29 + $0x8] sm:$0xff] %vm6385_vm3, %v7105_v0  ;;  %v7114_v5 = vtrunc.f32 %v6343_v32  ;;  %v7108_v30 = vtrunc.f32 %v6340_v37  ;;  %v6177_v3 = vpop.xlane.xlu1 %6176  ;;  %v6171_v39 = vpop.xlane.xlu0 %6170 }
0x1367   : > { %v6264_v42 = vmin.f32 %v6177_v3, %v6241_v55  ;;  %v6261_v31 = vmin.f32 %v6171_v39, %v6235_v4  ;;  %v13057_v55 = vld [vmem:[#allocation11_spill] sm:$0xff]  ;;  %v13058_v4 = vld [vmem:[#allocation10_spill] sm:$0xff] }
0x1368   : > { %v7115_v36 = vcvt.f32.s32 %v7114_v5  ;;  %v7109_v58 = vcvt.f32.s32 %v7108_v30 }
0x1369   : > { %v6345_v38 = vsel %vm6320_vm1, %v6264_v42, %v12358_v53  ;;  %v6342_v10 = vsel %vm6320_vm1, %v6261_v31, %v12363_v43 }
0x136a   : > { %6424 = vst.msk [vmem:[%s12645_s29 + $0x30] sm:$0xff] %vm6385_vm3, %v7115_v36  ;;  %6421 = vst.msk [vmem:[%s12645_s29 + $0x18] sm:$0xff] %vm6385_vm3, %v7109_v58  ;;  %v7118_v19 = vtrunc.f32 %v6345_v38  ;;  %v7112_v28 = vtrunc.f32 %v6342_v10  ;;  %v6181_v25 = vpop.xlane.xlu1 %6180  ;;  %v6175_v45 = vpop.xlane.xlu0 %6174 }
0x136b   : > { %v6266_v48 = vmin.f32 %v6181_v25, %v6245_v54  ;;  %v6263_v51 = vmin.f32 %v6175_v45, %v6239_v11 }
0x136c   : > { %v7119_v27 = vcvt.f32.s32 %v7118_v19  ;;  %v7113_v35 = vcvt.f32.s32 %v7112_v28 }
0x136d   : > { %v6347_v53 = vsel %vm6320_vm1, %v6266_v48, %v12378_v41  ;;  %v6344_v43 = vsel %vm6320_vm1, %v6263_v51, %v12383_v2 }
0x136e   : > { %6426 = vst.msk [vmem:[%s12645_s29 + $0x40] sm:$0xff] %vm6385_vm3, %v7119_v27  ;;  %6423 = vst.msk [vmem:[%s12645_s29 + $0x28] sm:$0xff] %vm6385_vm3, %v7113_v35  ;;  %v7122_v47 = vtrunc.f32 %v6347_v53  ;;  %v7116_v26 = vtrunc.f32 %v6344_v43  ;;  %v6185_v21 = vpop.xlane.xlu1 %6184  ;;  %v6179_v14 = vpop.xlane.xlu0 %6178 }
0x136f   : > { %v6268_v7 = vmin.f32 %v6185_v21, %v12630_v9  ;;  %v6265_v62 = vmin.f32 %v6179_v14, %v12632_v34 }
0x1370   : > { %v7123_v12 = vcvt.f32.s32 %v7122_v47  ;;  %v7117_v41 = vcvt.f32.s32 %v7116_v26 }
0x1371   : > { %v6349_v2 = vsel %vm6320_vm1, %v6268_v7, %v13057_v55  ;;  %v6346_v54 = vsel %vm6320_vm1, %v6265_v62, %v13058_v4 }
0x1372   : > { %6428 = vst.msk [vmem:[%s12645_s29 + $0x50] sm:$0xff] %vm6385_vm3, %v7123_v12  ;;  %6425 = vst.msk [vmem:[%s12645_s29 + $0x38] sm:$0xff] %vm6385_vm3, %v7117_v41  ;;  %v7126_v11 = vtrunc.f32 %v6349_v2  ;;  %v7120_v9 = vtrunc.f32 %v6346_v54  ;;  %v6183_v13 = vpop.xlane.xlu0 %6182 }
0x1373   : > { %v6267_v34 = vmin.f32 %v6183_v13, %v12634_v61 }
0x1374   : > { %v7127_v52 = vcvt.f32.s32 %v7126_v11  ;;  %v7121_v15 = vcvt.f32.s32 %v7120_v9 }
0x1375   : > { %v6348_v29 = vsel %vm6320_vm1, %v6267_v34, %v13059_v20 }
0x1376   : > { %6430 = vst.msk [vmem:[%s12645_s29 + $0x60] sm:$0xff] %vm6385_vm3, %v7127_v52  ;;  %6427 = vst.msk [vmem:[%s12645_s29 + $0x48] sm:$0xff] %vm6385_vm3, %v7121_v15  ;;  %v7124_v57 = vtrunc.f32 %v6348_v29  ;;  %v6187_v56 = vpop.xlane.xlu0 %6186 }
0x1377   : > { %v6269_v46 = vmin.f32 %v6187_v56, %v12639_v44 }
0x1378   : > { %v7125_v17 = vcvt.f32.s32 %v7124_v57 }
0x1379   : > { %v6350_v61 = vsel %vm6320_vm1, %v6269_v46, %v13060_v60 }
0x137a   : > { %6429 = vst.msk [vmem:[%s12645_s29 + $0x58] sm:$0xff] %vm6385_vm3, %v7125_v17  ;;  %v7128_v24 = vtrunc.f32 %v6350_v61 }
0x137c   : > { %v7129_v33 = vcvt.f32.s32 %v7128_v24 }
0x137e   : > { %6431 = vst.msk [vmem:[%s12645_s29 + $0x68] sm:$0xff] %vm6385_vm3, %v7129_v33 }
0x13c8   : > { %v6189_v59 = vpop.xlane.xlu1 %6188 }
0x13cc   : > { %v6253_v1 = vpop.xlane.xlu1 %6252 }
0x13cd   : > { %v6270_v40 = vmin.f32 %v6189_v59, %v6253_v1 }
0x13cf   : > { %v6351_v16 = vsel %vm6320_vm1, %v6270_v40, %v13061_v6 }
0x13d0   : > { %v7130_v44 = vtrunc.f32 %v6351_v16  ;;  %v6191_v50 = vpop.xlane.xlu0 %6190 }
0x13d2   : > { %v7131_v49 = vcvt.f32.s32 %v7130_v44 }
0x13d4   : > { %6432 = vst.msk [vmem:[%s12645_s29 + $0x70] sm:$0xff] %vm6385_vm3, %v7131_v49  ;;  %v6255_v22 = vpop.xlane.xlu0 %6254 }
0x13d5   : > { %v6271_v8 = vmin.f32 %v6191_v50, %v6255_v22 }
0x13d7   : > { %v6352_v63 = vsel %vm6320_vm1, %v6271_v8, %v13062_v23 }
0x13d8   : > { %v7132_v0 = vtrunc.f32 %v6352_v63 }
0x13da   : > { %v7133_v32 = vcvt.f32.s32 %v7132_v0 }
0x13dc   : > { %6433 = vst.msk [vmem:[%s12645_s29 + $0x78] sm:$0xff] %vm6385_vm3, %v7133_v32 }
0x13dd PF: > { %s14_s14 = sadd.s32 1, %s7191_s14   ;;  %s13063_s12 = smov %s7187_s13 }
0x13de   : > { %p11_p5 = scmp.ge.s32.totalorder %s14_s14, 4   ;;  %s13064_s13 = smov %s13066_s15 }
0x13e0   :  { %13 = sbr.rel (!%p11_p5) target bundleno = 2 (0x2), region = 77 }

</bundles_post_ra>
